<compile_context>
chip_gen: v5e
topology: v5e:2x2
jax: 0.10.0
libtpu: 0.0.40
codegen_flags: <defaults>
</compile_context>

<pallas_src>
import functools

import jax
import jax.numpy as jnp
from jax import lax
from jax.experimental import pallas as pl
from jax.experimental.pallas import tpu as pltpu

NUM_LABELS = 10      # self.num_labels
OVERSHOT = 0.02      # self.overshot
MAX_ITER = 3         # args.max_iter (small for the demo)
EPS = 1e-5           # self.eps (cifar10-style inputs)


def _round_up(x, m):
    return (x + m - 1) // m * m


# ----------------------------------------------------------------------------
# Fused DeepFool kernel: runs the full MAX_ITER loop for one batch block.
# ----------------------------------------------------------------------------
def _deepfool_kernel(x_ref, w1t_ref, b1_ref, w2_ref, b2_ref, g_ref, s_ref,
                     w2d_ref, m_ref, label_ref, noise_ref, *, d_real, km1_real):
    x = x_ref[...]                       # (Bb, Dp)  f32 original flattened images
    w1t = w1t_ref[...]                   # (Hp, Dp)  bf16  (only W1^T is resident)
    b1 = b1_ref[...]                     # (1, Hp)   f32
    w2 = w2_ref[...]                     # (Hp, C)   bf16
    b2 = b2_ref[...]                     # (1, C)    f32
    g = g_ref[...]                       # (Hp, Hp)  f32  Gram matrix W1^T W1
    s = s_ref[...]                       # (1, Hp)   f32  row sums of W1^T
    w2d_base = w2d_ref[...]              # (Bb, KP, Hp) f32 (padded classes zero)
    m_mat = m_ref[...]                   # (Bb, KP, C)  f32 selection matrix
    label = label_ref[...]               # (Bb, 1) int32 predicted label

    Bb, Dp = x.shape
    Hp = w1t.shape[0]
    Cc = w2.shape[1]
    KP = w2d_base.shape[1]

    # Hoisted iotas / constants (JAX does not CSE broadcast_in_dim in loops).
    k_iota = lax.broadcasted_iota(jnp.int32, (Bb, KP), 1)
    c_iota = lax.broadcasted_iota(jnp.int32, (Bb, Cc), 1)
    valid_k = k_iota < km1_real
    eps2_d = jnp.float32(d_real * EPS * EPS)       # analytic D*eps^2 (original D)
    BIG = jnp.float32(1e30)

    def forward(xin):
        # h = relu(x @ W1 + b1); only W1^T is stored, so contract the lane dims.
        xb = xin.astype(jnp.bfloat16)
        h = lax.dot_general(xb, w1t, (((1,), (1,)), ((), ())),
                            preferred_element_type=jnp.float32) + b1   # (Bb, Hp)
        h = jnp.maximum(h, 0.0)
        lg = jnp.dot(h.astype(jnp.bfloat16), w2,
                     preferred_element_type=jnp.float32) + b2          # (Bb, C)
        return lg, h

    def body(_, carry):
        noises, perturbed, fooled = carry

        # ---- linearize the net at the current perturbed point ----
        lg, h = forward(perturbed)                               # (Bb, C), (Bb, Hp)
        out_g = jnp.sum(lg[:, None, :] * m_mat, axis=2)          # (Bb, KP)
        mask = (h > 0.0).astype(jnp.float32)                     # relu'   (Bb, Hp)
        w2d = w2d_base * mask[:, None, :]                        # (Bb, KP, Hp)

        # ---- exact squared norms via the Gram trick (no (Bb,KP,D) tensor) ----
        # ||w3_k + eps||^2 = w2d_k G w2d_k^T + 2*eps*(w2d_k . s) + D*eps^2
        w2d_flat = w2d.reshape(Bb * KP, Hp)                      # tile-aligned collapse
        gw = jnp.dot(w2d_flat, g,
                     preferred_element_type=jnp.float32).reshape(Bb, KP, Hp)
        quad = jnp.sum(w2d * gw, axis=2)                         # (Bb, KP)
        lin = jnp.sum(w2d * s, axis=2)                           # (Bb, KP)
        norm2 = quad + (2.0 * EPS) * lin + eps2_d                # (Bb, KP)

        # ---- project_boundary_polyhedron ----
        res = jnp.abs(out_g) * lax.rsqrt(norm2)                  # (Bb, KP), EUP rsqrt
        res = jnp.where(valid_k, res, BIG)                       # ignore padded classes
        rmin = jnp.min(res, axis=1, keepdims=True)
        ii = jnp.min(jnp.where(res <= rmin, k_iota, KP),
                     axis=1, keepdims=True)                      # first argmin
        onehot = (k_iota == ii).astype(jnp.float32)              # (Bb, KP)
        res_sel = jnp.sum(res * onehot, axis=1, keepdims=True)       # (Bb, 1)
        norm2_sel = jnp.sum(norm2 * onehot, axis=1, keepdims=True)   # (Bb, 1)
        w2d_sel = jnp.sum(w2d * onehot[:, :, None], axis=1)          # (Bb, Hp)

        # Only the selected class gradient goes to D-space: one (Bb,Hp)@(Hp,Dp) dot.
        w_sel = jnp.dot(w2d_sel.astype(jnp.bfloat16), w1t,
                        preferred_element_type=jnp.float32)      # (Bb, Dp)
        step = (res_sel * lax.rsqrt(norm2_sel)) * w_sel          # (Bb, Dp)

        # freeze already-fooled samples (== the reference's early break)
        step = step * (1.0 - fooled)
        perturbed = perturbed + step
        noises = noises + step

        # ---- fooled check: argmax of net(x + (1+overshot)*noises) ----
        adv_lg, _ = forward(x + (1.0 + OVERSHOT) * noises)       # (Bb, C)
        amax = jnp.max(adv_lg, axis=1, keepdims=True)
        t_idx = jnp.min(jnp.where(adv_lg >= amax, c_iota, Cc),
                        axis=1, keepdims=True)                   # first argmax
        fooled = jnp.maximum(fooled, (t_idx != label).astype(jnp.float32))
        return noises, perturbed, fooled

    init = (jnp.zeros((Bb, Dp), jnp.float32),   # noises
            x,                                  # perturbed
            jnp.zeros((Bb, 1), jnp.float32))    # fooled
    noises, _, _ = lax.fori_loop(0, MAX_ITER, body, init, unroll=True)
    noise_ref[...] = (1.0 + OVERSHOT) * noises


# ----------------------------------------------------------------------------
# DeepFool.forward  (== forward_correct with check=False)
# ----------------------------------------------------------------------------
def deepfool_forward(x, params, *, max_block_b=128):
    w1, b1, w2, b2 = params                    # (D,H), (1,H), (H,C), (1,C)
    B = x.shape[0]
    D, H = w1.shape
    C = w2.shape[1]
    K = NUM_LABELS
    KM1 = K - 1

    # ---- zero padding: lane-dense D and H, sublane-aligned K-1 (all exact) ----
    Dp = _round_up(D, 128)
    Hp = _round_up(H, 128)
    KP = _round_up(KM1, 8)

    x_flat = x.reshape(B, D).astype(jnp.float32)
    x_flat = jnp.pad(x_flat, ((0, 0), (0, Dp - D)))

    w1_p = jnp.pad(w1.astype(jnp.float32), ((0, Dp - D), (0, Hp - H)))   # (Dp, Hp)
    b1_p = jnp.pad(b1.astype(jnp.float32), ((0, 0), (0, Hp - H)))        # (1, Hp)
    w2_p = jnp.pad(w2.astype(jnp.float32), ((0, Hp - H), (0, 0)))        # (Hp, C)
    b2_p = b2.astype(jnp.float32)                                        # (1, C)

    # ---- batch block: fill MXU rows; keep >=2 grid steps when possible (v7x 2 TCs) ----
    block_b = min(max_block_b, _round_up(B, 8))
    if block_b > 8 and _round_up(B, block_b) // block_b < 2:
        block_b = _round_up(block_b // 2, 8)
    B_pad = _round_up(B, block_b)
    if B_pad != B:
        x_flat = jnp.pad(x_flat, ((0, B_pad - B), (0, 0)))

    # ---- one-time setup (glue, runs once; iterations are fused in the kernel) ----
    h0 = jnp.maximum(x_flat @ w1_p + b1_p, 0.0)
    logits0 = h0 @ w2_p + b2_p
    # TODO(synk): reference forward() calls forward_correct with pred=None (a bug
    # upstream); we use the net's own prediction as the label, which is the
    # standard (and intended) DeepFool setup.
    label = jnp.argmax(logits0, axis=1).astype(jnp.int32)                # (B_pad,)
    output0 = logits0 - jnp.take_along_axis(logits0, label[:, None], axis=1)
    target = jnp.argsort(-output0, axis=1)[:, :K]                        # (B_pad, K)

    # W2-side gather + differencing: the full (B, D, C) Jacobian is never built.
    w2_sel = w2_p.T[target]                                              # (B_pad, K, Hp)
    w2d_base = w2_sel[:, 1:, :] - w2_sel[:, 0:1, :]                      # (B_pad, KM1, Hp)
    w2d_base = jnp.pad(w2d_base, ((0, 0), (0, KP - KM1), (0, 0)))        # (B_pad, KP, Hp)

    # selection matrix: out_g[b,k] = sum_c logits[b,c]*M[b,k,c]
    #                             = logits[b, target[b,k+1]] - logits[b, label_b]
    c_iota = jnp.arange(C)
    sel_other = (target[:, 1:, None] == c_iota[None, None, :]).astype(jnp.float32)
    sel_label = (label[:, None, None] == c_iota[None, None, :]).astype(jnp.float32)
    m_mat = sel_other - sel_label                                        # (B_pad, KM1, C)
    m_mat = jnp.pad(m_mat, ((0, 0), (0, KP - KM1), (0, 0)))              # (B_pad, KP, C)

    # Gram matrix + row sums for the exact ||w3 + eps|| trick (f32 for accuracy).
    w1t_f32 = w1_p.T                                                     # (Hp, Dp)
    gram = w1t_f32 @ w1_p                                                # (Hp, Hp)
    s_row = jnp.sum(w1t_f32, axis=1)[None, :]                            # (1, Hp)

    label2d = label[:, None]                                             # (B_pad, 1)
    w1t_bf = w1t_f32.astype(jnp.bfloat16)                                # (Hp, Dp) resident
    w2_bf = w2_p.astype(jnp.bfloat16)                                    # (Hp, C)  resident

    # ---- VMEM budget: resident weights + double-buffered streamed blocks + temps ----
    resident = 2 * (Hp * Dp * 2 + Hp * C * 2 + Hp * Hp * 4) + 4 * (Hp + C) * 4
    streamed = 2 * block_b * (2 * Dp + KP * Hp + KP * C + 1) * 4
    temps = block_b * (8 * Dp + 3 * KP * Hp + 8 * Hp) * 4
    vmem_limit = int(min(max(2 * (resident + streamed + temps), 32 << 20), 48 << 20))

    grid = (B_pad // block_b,)
    const2 = lambda i: (0, 0)
    kernel = functools.partial(_deepfool_kernel, d_real=D, km1_real=KM1)
    noise = pl.pallas_call(
        kernel,
        out_shape=jax.ShapeDtypeStruct((B_pad, Dp), jnp.float32),
        grid=grid,
        in_specs=[
            pl.BlockSpec((block_b, Dp), lambda i: (i, 0)),               # x
            pl.BlockSpec((Hp, Dp), const2),                              # W1^T (bf16, resident)
            pl.BlockSpec((1, Hp), const2),                               # b1
            pl.BlockSpec((Hp, C), const2),                               # W2   (bf16, resident)
            pl.BlockSpec((1, C), const2),                                # b2
            pl.BlockSpec((Hp, Hp), const2),                              # Gram
            pl.BlockSpec((1, Hp), const2),                               # s
            pl.BlockSpec((block_b, KP, Hp), lambda i: (i, 0, 0)),        # w2d_base
            pl.BlockSpec((block_b, KP, C), lambda i: (i, 0, 0)),         # m_mat
            pl.BlockSpec((block_b, 1), lambda i: (i, 0)),                # label
        ],
        out_specs=pl.BlockSpec((block_b, Dp), lambda i: (i, 0)),
        compiler_params=pltpu.CompilerParams(
            dimension_semantics=("parallel",),
            vmem_limit_bytes=vmem_limit),
    )(x_flat, w1t_bf, b1_p, w2_bf, b2_p, gram, s_row,
      w2d_base, m_mat, label2d)

    return noise[:B, :D]                                                 # (B, D)


if __name__ == "__main__":
    B, C_in, H_img, W_img = 2, 4, 16, 16
    D = C_in * H_img * W_img
    H_hidden = 64

    key = jax.random.PRNGKey(0)
    kx, kw1, kw2, kb2 = jax.random.split(key, 4)

    x = jax.random.normal(kx, (B, C_in, H_img, W_img), jnp.float32)

    # deterministic synthetic "trained" classifier weights (MLP arch)
    w1 = 0.05 * jax.random.normal(kw1, (D, H_hidden), jnp.float32)
    b1 = jnp.zeros((1, H_hidden), jnp.float32)
    w2 = 0.10 * jax.random.normal(kw2, (H_hidden, NUM_LABELS), jnp.float32)
    b2 = 0.01 * jax.random.normal(kb2, (1, NUM_LABELS), jnp.float32)

    noise = jax.jit(deepfool_forward)(x, (w1, b1, w2, b2))
    noise = jax.block_until_ready(noise)

    assert noise.shape == (B, D)
    assert bool(jnp.all(jnp.isfinite(noise)))
    print("KERNEL_OK")
</pallas_src>

<mosaic_0001>
module attributes {stable_mosaic.version = 11 : i64} {
  func.func @_deepfool_kernel(%arg0: i32, %arg1: memref<8x1024xf32, #tpu.memory_space<vmem>>, %arg2: memref<128x1024xbf16, #tpu.memory_space<vmem>>, %arg3: memref<1x128xf32, #tpu.memory_space<vmem>>, %arg4: memref<128x10xbf16, #tpu.memory_space<vmem>>, %arg5: memref<1x10xf32, #tpu.memory_space<vmem>>, %arg6: memref<128x128xf32, #tpu.memory_space<vmem>>, %arg7: memref<1x128xf32, #tpu.memory_space<vmem>>, %arg8: memref<8x16x128xf32, #tpu.memory_space<vmem>>, %arg9: memref<8x16x10xf32, #tpu.memory_space<vmem>>, %arg10: memref<8x1xi32, #tpu.memory_space<vmem>>, %arg11: memref<8x1024xf32, #tpu.memory_space<vmem>>) attributes {dimension_semantics = [#tpu.dimension_semantics<parallel>], iteration_bounds = array<i64: 1>, scalar_prefetch = 0 : i64, scratch_operands = 0 : i64, tpu.core_type = #tpu.core_type<tc>, window_params = [{transform_indices = @transform_0, window_bounds = array<i64: 8, 1024>}, {pipeline_mode = #tpu.pipeline_mode<synchronous>, transform_indices = @transform_1, window_bounds = array<i64: 128, 1024>}, {pipeline_mode = #tpu.pipeline_mode<synchronous>, transform_indices = @transform_2, window_bounds = array<i64: 1, 128>}, {pipeline_mode = #tpu.pipeline_mode<synchronous>, transform_indices = @transform_3, window_bounds = array<i64: 128, 10>}, {pipeline_mode = #tpu.pipeline_mode<synchronous>, transform_indices = @transform_4, window_bounds = array<i64: 1, 10>}, {pipeline_mode = #tpu.pipeline_mode<synchronous>, transform_indices = @transform_5, window_bounds = array<i64: 128, 128>}, {pipeline_mode = #tpu.pipeline_mode<synchronous>, transform_indices = @transform_6, window_bounds = array<i64: 1, 128>}, {transform_indices = @transform_7, window_bounds = array<i64: 8, 16, 128>}, {transform_indices = @transform_8, window_bounds = array<i64: 8, 16, 10>}, {transform_indices = @transform_9, window_bounds = array<i64: 8, 1>}, {transform_indices = @transform_10, window_bounds = array<i64: 8, 1024>}]} {
    %c0 = arith.constant 0 : index
    %c0_0 = arith.constant 0 : index
    %0 = vector.load %arg1[%c0, %c0_0] : memref<8x1024xf32, #tpu.memory_space<vmem>>, vector<8x1024xf32>
    %c0_1 = arith.constant 0 : index
    %c0_2 = arith.constant 0 : index
    %1 = vector.load %arg2[%c0_1, %c0_2] : memref<128x1024xbf16, #tpu.memory_space<vmem>>, vector<128x1024xbf16>
    %c0_3 = arith.constant 0 : index
    %c0_4 = arith.constant 0 : index
    %2 = vector.load %arg3[%c0_3, %c0_4] : memref<1x128xf32, #tpu.memory_space<vmem>>, vector<1x128xf32>
    %c0_5 = arith.constant 0 : index
    %c0_6 = arith.constant 0 : index
    %3 = vector.load %arg4[%c0_5, %c0_6] : memref<128x10xbf16, #tpu.memory_space<vmem>>, vector<128x10xbf16>
    %c0_7 = arith.constant 0 : index
    %c0_8 = arith.constant 0 : index
    %4 = vector.load %arg5[%c0_7, %c0_8] : memref<1x10xf32, #tpu.memory_space<vmem>>, vector<1x10xf32>
    %c0_9 = arith.constant 0 : index
    %c0_10 = arith.constant 0 : index
    %5 = vector.load %arg6[%c0_9, %c0_10] : memref<128x128xf32, #tpu.memory_space<vmem>>, vector<128x128xf32>
    %c0_11 = arith.constant 0 : index
    %c0_12 = arith.constant 0 : index
    %6 = vector.load %arg7[%c0_11, %c0_12] : memref<1x128xf32, #tpu.memory_space<vmem>>, vector<1x128xf32>
    %c0_13 = arith.constant 0 : index
    %c0_14 = arith.constant 0 : index
    %c0_15 = arith.constant 0 : index
    %7 = vector.load %arg8[%c0_13, %c0_14, %c0_15] : memref<8x16x128xf32, #tpu.memory_space<vmem>>, vector<8x16x128xf32>
    %c0_16 = arith.constant 0 : index
    %c0_17 = arith.constant 0 : index
    %c0_18 = arith.constant 0 : index
    %8 = vector.load %arg9[%c0_16, %c0_17, %c0_18] : memref<8x16x10xf32, #tpu.memory_space<vmem>>, vector<8x16x10xf32>
    %c0_19 = arith.constant 0 : index
    %c0_20 = arith.constant 0 : index
    %9 = vector.load %arg10[%c0_19, %c0_20] : memref<8x1xi32, #tpu.memory_space<vmem>>, vector<8x1xi32>
    %10 = tpu.iota {dimensions = array<i32: 1>} : vector<8x16xi32>
    %11 = tpu.iota {dimensions = array<i32: 1>} : vector<8x10xi32>
    %c9_i32 = arith.constant 9 : i32
    %12 = vector.broadcast %c9_i32 : i32 to vector<8x16xi32>
    %13 = arith.cmpi slt, %10, %12 : vector<8x16xi32>
    %cst = arith.constant 0.000000e+00 : f32
    %14 = vector.broadcast %cst : f32 to vector<8x1024xf32>
    %cst_21 = arith.constant 0.000000e+00 : f32
    %15 = vector.broadcast %cst_21 : f32 to vector<8x1xf32>
    %cst_22 = arith.constant 1.024000e-07 : f32
    %cst_23 = arith.constant 1.000000e+30 : f32
    %c0_i32 = arith.constant 0 : i32
    %16 = arith.truncf %0 : vector<8x1024xf32> to vector<8x1024xbf16>
    %cst_24 = arith.constant dense<0.000000e+00> : vector<8x128xf32>
    %17 = tpu.matmul %16, %1, %cst_24 {dimension_numbers = #tpu.dot_dimension_numbers<[1], [1], [0], [0], [0, 0, 1, 0], [], []>} : vector<8x1024xbf16>, vector<128x1024xbf16>, vector<8x128xf32> -> vector<8x128xf32>
    %18 = vector.broadcast %2 : vector<1x128xf32> to vector<8x128xf32>
    %19 = arith.addf %17, %18 : vector<8x128xf32>
    %cst_25 = arith.constant 0.000000e+00 : f32
    %20 = vector.broadcast %cst_25 : f32 to vector<8x128xf32>
    %21 = arith.maximumf %19, %20 : vector<8x128xf32>
    %22 = arith.truncf %21 : vector<8x128xf32> to vector<8x128xbf16>
    %cst_26 = arith.constant dense<0.000000e+00> : vector<8x10xf32>
    %23 = tpu.matmul %22, %3, %cst_26 {dimension_numbers = #tpu.dot_dimension_numbers<[1], [0], [0], [1], [0, 0, 1, 1], [], []>} : vector<8x128xbf16>, vector<128x10xbf16>, vector<8x10xf32> -> vector<8x10xf32>
    %24 = vector.broadcast %4 : vector<1x10xf32> to vector<8x10xf32>
    %25 = arith.addf %23, %24 : vector<8x10xf32>
    %26 = vector.shape_cast %25 : vector<8x10xf32> to vector<8x1x10xf32>
    %27 = vector.broadcast %26 : vector<8x1x10xf32> to vector<8x16x10xf32>
    %28 = arith.mulf %27, %8 : vector<8x16x10xf32>
    %cst_27 = arith.constant dense<0.000000e+00> : vector<8x16xf32>
    %29 = vector.multi_reduction <add>, %28, %cst_27 [2] : vector<8x16x10xf32> to vector<8x16xf32>
    %cst_28 = arith.constant 0.000000e+00 : f32
    %30 = vector.broadcast %cst_28 : f32 to vector<8x128xf32>
    %31 = arith.cmpf ogt, %21, %30 : vector<8x128xf32>
    %32 = arith.extui %31 : vector<8x128xi1> to vector<8x128xi32>
    %33 = arith.sitofp %32 : vector<8x128xi32> to vector<8x128xf32>
    %34 = vector.shape_cast %33 : vector<8x128xf32> to vector<8x1x128xf32>
    %35 = vector.broadcast %34 : vector<8x1x128xf32> to vector<8x16x128xf32>
    %36 = arith.mulf %7, %35 : vector<8x16x128xf32>
    %37 = vector.shape_cast %36 : vector<8x16x128xf32> to vector<128x128xf32>
    %cst_29 = arith.constant dense<0.000000e+00> : vector<128x128xf32>
    %38 = tpu.matmul %37, %5, %cst_29 {dimension_numbers = #tpu.dot_dimension_numbers<[1], [0], [0], [1], [0, 0, 1, 1], [], []>} : vector<128x128xf32>, vector<128x128xf32>, vector<128x128xf32> -> vector<128x128xf32>
    %39 = vector.shape_cast %38 : vector<128x128xf32> to vector<8x16x128xf32>
    %40 = arith.mulf %36, %39 : vector<8x16x128xf32>
    %cst_30 = arith.constant dense<0.000000e+00> : vector<8x16xf32>
    %41 = vector.multi_reduction <add>, %40, %cst_30 [2] : vector<8x16x128xf32> to vector<8x16xf32>
    %42 = vector.shape_cast %6 : vector<1x128xf32> to vector<1x1x128xf32>
    %43 = vector.broadcast %42 : vector<1x1x128xf32> to vector<8x16x128xf32>
    %44 = arith.mulf %36, %43 : vector<8x16x128xf32>
    %cst_31 = arith.constant dense<0.000000e+00> : vector<8x16xf32>
    %45 = vector.multi_reduction <add>, %44, %cst_31 [2] : vector<8x16x128xf32> to vector<8x16xf32>
    %cst_32 = arith.constant 2.000000e-05 : f32
    %46 = vector.broadcast %cst_32 : f32 to vector<8x16xf32>
    %47 = arith.mulf %46, %45 : vector<8x16xf32>
    %48 = arith.addf %41, %47 : vector<8x16xf32>
    %49 = vector.broadcast %cst_22 : f32 to vector<8x16xf32>
    %50 = arith.addf %48, %49 : vector<8x16xf32>
    %51 = math.absf %29 : vector<8x16xf32>
    %52 = math.rsqrt %50 : vector<8x16xf32>
    %53 = arith.mulf %51, %52 : vector<8x16xf32>
    %54 = vector.broadcast %cst_23 : f32 to vector<8x16xf32>
    %55 = arith.select %13, %53, %54 : vector<8x16xi1>, vector<8x16xf32>
    %cst_33 = arith.constant dense<0x7F800000> : vector<8xf32>
    %56 = vector.multi_reduction <minimumf>, %55, %cst_33 [1] : vector<8x16xf32> to vector<8xf32>
    %57 = vector.shape_cast %56 : vector<8xf32> to vector<8x1xf32>
    %58 = vector.broadcast %57 : vector<8x1xf32> to vector<8x16xf32>
    %59 = arith.cmpf ole, %55, %58 : vector<8x16xf32>
    %c16_i32 = arith.constant 16 : i32
    %60 = vector.broadcast %c16_i32 : i32 to vector<8x16xi32>
    %61 = arith.select %59, %10, %60 : vector<8x16xi1>, vector<8x16xi32>
    %cst_34 = arith.constant dense<2147483647> : vector<8xi32>
    %62 = vector.multi_reduction <minsi>, %61, %cst_34 [1] : vector<8x16xi32> to vector<8xi32>
    %63 = vector.shape_cast %62 : vector<8xi32> to vector<8x1xi32>
    %64 = vector.broadcast %63 : vector<8x1xi32> to vector<8x16xi32>
    %65 = arith.cmpi eq, %10, %64 : vector<8x16xi32>
    %66 = arith.extui %65 : vector<8x16xi1> to vector<8x16xi32>
    %67 = arith.sitofp %66 : vector<8x16xi32> to vector<8x16xf32>
    %68 = arith.mulf %55, %67 : vector<8x16xf32>
    %cst_35 = arith.constant dense<0.000000e+00> : vector<8xf32>
    %69 = vector.multi_reduction <add>, %68, %cst_35 [1] : vector<8x16xf32> to vector<8xf32>
    %70 = vector.shape_cast %69 : vector<8xf32> to vector<8x1xf32>
    %71 = arith.mulf %50, %67 : vector<8x16xf32>
    %cst_36 = arith.constant dense<0.000000e+00> : vector<8xf32>
    %72 = vector.multi_reduction <add>, %71, %cst_36 [1] : vector<8x16xf32> to vector<8xf32>
    %73 = vector.shape_cast %72 : vector<8xf32> to vector<8x1xf32>
    %74 = vector.shape_cast %67 : vector<8x16xf32> to vector<8x16x1xf32>
    %75 = vector.broadcast %74 : vector<8x16x1xf32> to vector<8x16x128xf32>
    %76 = arith.mulf %36, %75 : vector<8x16x128xf32>
    %cst_37 = arith.constant dense<0.000000e+00> : vector<8x128xf32>
    %77 = vector.multi_reduction <add>, %76, %cst_37 [1] : vector<8x16x128xf32> to vector<8x128xf32>
    %78 = arith.truncf %77 : vector<8x128xf32> to vector<8x128xbf16>
    %cst_38 = arith.constant dense<0.000000e+00> : vector<8x1024xf32>
    %79 = tpu.matmul %78, %1, %cst_38 {dimension_numbers = #tpu.dot_dimension_numbers<[1], [0], [0], [1], [0, 0, 1, 1], [], []>} : vector<8x128xbf16>, vector<128x1024xbf16>, vector<8x1024xf32> -> vector<8x1024xf32>
    %80 = math.rsqrt %73 : vector<8x1xf32>
    %81 = arith.mulf %70, %80 : vector<8x1xf32>
    %82 = vector.broadcast %81 : vector<8x1xf32> to vector<8x1024xf32>
    %83 = arith.mulf %82, %79 : vector<8x1024xf32>
    %cst_39 = arith.constant 1.000000e+00 : f32
    %84 = vector.broadcast %cst_39 : f32 to vector<8x1xf32>
    %85 = arith.subf %84, %15 : vector<8x1xf32>
    %86 = vector.broadcast %85 : vector<8x1xf32> to vector<8x1024xf32>
    %87 = arith.mulf %83, %86 : vector<8x1024xf32>
    %88 = arith.addf %0, %87 : vector<8x1024xf32>
    %89 = arith.addf %14, %87 : vector<8x1024xf32>
    %cst_40 = arith.constant 1.020000e+00 : f32
    %90 = vector.broadcast %cst_40 : f32 to vector<8x1024xf32>
    %91 = arith.mulf %90, %89 : vector<8x1024xf32>
    %92 = arith.addf %0, %91 : vector<8x1024xf32>
    %93 = arith.truncf %92 : vector<8x1024xf32> to vector<8x1024xbf16>
    %cst_41 = arith.constant dense<0.000000e+00> : vector<8x128xf32>
    %94 = tpu.matmul %93, %1, %cst_41 {dimension_numbers = #tpu.dot_dimension_numbers<[1], [1], [0], [0], [0, 0, 1, 0], [], []>} : vector<8x1024xbf16>, vector<128x1024xbf16>, vector<8x128xf32> -> vector<8x128xf32>
    %95 = vector.broadcast %2 : vector<1x128xf32> to vector<8x128xf32>
    %96 = arith.addf %94, %95 : vector<8x128xf32>
    %cst_42 = arith.constant 0.000000e+00 : f32
    %97 = vector.broadcast %cst_42 : f32 to vector<8x128xf32>
    %98 = arith.maximumf %96, %97 : vector<8x128xf32>
    %99 = arith.truncf %98 : vector<8x128xf32> to vector<8x128xbf16>
    %cst_43 = arith.constant dense<0.000000e+00> : vector<8x10xf32>
    %100 = tpu.matmul %99, %3, %cst_43 {dimension_numbers = #tpu.dot_dimension_numbers<[1], [0], [0], [1], [0, 0, 1, 1], [], []>} : vector<8x128xbf16>, vector<128x10xbf16>, vector<8x10xf32> -> vector<8x10xf32>
    %101 = vector.broadcast %4 : vector<1x10xf32> to vector<8x10xf32>
    %102 = arith.addf %100, %101 : vector<8x10xf32>
    %cst_44 = arith.constant dense<0xFF800000> : vector<8xf32>
    %103 = vector.multi_reduction <maximumf>, %102, %cst_44 [1] : vector<8x10xf32> to vector<8xf32>
    %104 = vector.shape_cast %103 : vector<8xf32> to vector<8x1xf32>
    %105 = vector.broadcast %104 : vector<8x1xf32> to vector<8x10xf32>
    %106 = arith.cmpf oge, %102, %105 : vector<8x10xf32>
    %c10_i32 = arith.constant 10 : i32
    %107 = vector.broadcast %c10_i32 : i32 to vector<8x10xi32>
    %108 = arith.select %106, %11, %107 : vector<8x10xi1>, vector<8x10xi32>
    %cst_45 = arith.constant dense<2147483647> : vector<8xi32>
    %109 = vector.multi_reduction <minsi>, %108, %cst_45 [1] : vector<8x10xi32> to vector<8xi32>
    %110 = vector.shape_cast %109 : vector<8xi32> to vector<8x1xi32>
    %111 = arith.cmpi ne, %110, %9 : vector<8x1xi32>
    %112 = arith.extui %111 : vector<8x1xi1> to vector<8x1xi32>
    %113 = arith.sitofp %112 : vector<8x1xi32> to vector<8x1xf32>
    %114 = arith.maximumf %15, %113 : vector<8x1xf32>
    %c1_i32 = arith.constant 1 : i32
    %115 = arith.truncf %88 : vector<8x1024xf32> to vector<8x1024xbf16>
    %cst_46 = arith.constant dense<0.000000e+00> : vector<8x128xf32>
    %116 = tpu.matmul %115, %1, %cst_46 {dimension_numbers = #tpu.dot_dimension_numbers<[1], [1], [0], [0], [0, 0, 1, 0], [], []>} : vector<8x1024xbf16>, vector<128x1024xbf16>, vector<8x128xf32> -> vector<8x128xf32>
    %117 = vector.broadcast %2 : vector<1x128xf32> to vector<8x128xf32>
    %118 = arith.addf %116, %117 : vector<8x128xf32>
    %cst_47 = arith.constant 0.000000e+00 : f32
    %119 = vector.broadcast %cst_47 : f32 to vector<8x128xf32>
    %120 = arith.maximumf %118, %119 : vector<8x128xf32>
    %121 = arith.truncf %120 : vector<8x128xf32> to vector<8x128xbf16>
    %cst_48 = arith.constant dense<0.000000e+00> : vector<8x10xf32>
    %122 = tpu.matmul %121, %3, %cst_48 {dimension_numbers = #tpu.dot_dimension_numbers<[1], [0], [0], [1], [0, 0, 1, 1], [], []>} : vector<8x128xbf16>, vector<128x10xbf16>, vector<8x10xf32> -> vector<8x10xf32>
    %123 = vector.broadcast %4 : vector<1x10xf32> to vector<8x10xf32>
    %124 = arith.addf %122, %123 : vector<8x10xf32>
    %125 = vector.shape_cast %124 : vector<8x10xf32> to vector<8x1x10xf32>
    %126 = vector.broadcast %125 : vector<8x1x10xf32> to vector<8x16x10xf32>
    %127 = arith.mulf %126, %8 : vector<8x16x10xf32>
    %cst_49 = arith.constant dense<0.000000e+00> : vector<8x16xf32>
    %128 = vector.multi_reduction <add>, %127, %cst_49 [2] : vector<8x16x10xf32> to vector<8x16xf32>
    %cst_50 = arith.constant 0.000000e+00 : f32
    %129 = vector.broadcast %cst_50 : f32 to vector<8x128xf32>
    %130 = arith.cmpf ogt, %120, %129 : vector<8x128xf32>
    %131 = arith.extui %130 : vector<8x128xi1> to vector<8x128xi32>
    %132 = arith.sitofp %131 : vector<8x128xi32> to vector<8x128xf32>
    %133 = vector.shape_cast %132 : vector<8x128xf32> to vector<8x1x128xf32>
    %134 = vector.broadcast %133 : vector<8x1x128xf32> to vector<8x16x128xf32>
    %135 = arith.mulf %7, %134 : vector<8x16x128xf32>
    %136 = vector.shape_cast %135 : vector<8x16x128xf32> to vector<128x128xf32>
    %cst_51 = arith.constant dense<0.000000e+00> : vector<128x128xf32>
    %137 = tpu.matmul %136, %5, %cst_51 {dimension_numbers = #tpu.dot_dimension_numbers<[1], [0], [0], [1], [0, 0, 1, 1], [], []>} : vector<128x128xf32>, vector<128x128xf32>, vector<128x128xf32> -> vector<128x128xf32>
    %138 = vector.shape_cast %137 : vector<128x128xf32> to vector<8x16x128xf32>
    %139 = arith.mulf %135, %138 : vector<8x16x128xf32>
    %cst_52 = arith.constant dense<0.000000e+00> : vector<8x16xf32>
    %140 = vector.multi_reduction <add>, %139, %cst_52 [2] : vector<8x16x128xf32> to vector<8x16xf32>
    %141 = vector.shape_cast %6 : vector<1x128xf32> to vector<1x1x128xf32>
    %142 = vector.broadcast %141 : vector<1x1x128xf32> to vector<8x16x128xf32>
    %143 = arith.mulf %135, %142 : vector<8x16x128xf32>
    %cst_53 = arith.constant dense<0.000000e+00> : vector<8x16xf32>
    %144 = vector.multi_reduction <add>, %143, %cst_53 [2] : vector<8x16x128xf32> to vector<8x16xf32>
    %cst_54 = arith.constant 2.000000e-05 : f32
    %145 = vector.broadcast %cst_54 : f32 to vector<8x16xf32>
    %146 = arith.mulf %145, %144 : vector<8x16xf32>
    %147 = arith.addf %140, %146 : vector<8x16xf32>
    %148 = vector.broadcast %cst_22 : f32 to vector<8x16xf32>
    %149 = arith.addf %147, %148 : vector<8x16xf32>
    %150 = math.absf %128 : vector<8x16xf32>
    %151 = math.rsqrt %149 : vector<8x16xf32>
    %152 = arith.mulf %150, %151 : vector<8x16xf32>
    %153 = vector.broadcast %cst_23 : f32 to vector<8x16xf32>
    %154 = arith.select %13, %152, %153 : vector<8x16xi1>, vector<8x16xf32>
    %cst_55 = arith.constant dense<0x7F800000> : vector<8xf32>
    %155 = vector.multi_reduction <minimumf>, %154, %cst_55 [1] : vector<8x16xf32> to vector<8xf32>
    %156 = vector.shape_cast %155 : vector<8xf32> to vector<8x1xf32>
    %157 = vector.broadcast %156 : vector<8x1xf32> to vector<8x16xf32>
    %158 = arith.cmpf ole, %154, %157 : vector<8x16xf32>
    %c16_i32_56 = arith.constant 16 : i32
    %159 = vector.broadcast %c16_i32_56 : i32 to vector<8x16xi32>
    %160 = arith.select %158, %10, %159 : vector<8x16xi1>, vector<8x16xi32>
    %cst_57 = arith.constant dense<2147483647> : vector<8xi32>
    %161 = vector.multi_reduction <minsi>, %160, %cst_57 [1] : vector<8x16xi32> to vector<8xi32>
    %162 = vector.shape_cast %161 : vector<8xi32> to vector<8x1xi32>
    %163 = vector.broadcast %162 : vector<8x1xi32> to vector<8x16xi32>
    %164 = arith.cmpi eq, %10, %163 : vector<8x16xi32>
    %165 = arith.extui %164 : vector<8x16xi1> to vector<8x16xi32>
    %166 = arith.sitofp %165 : vector<8x16xi32> to vector<8x16xf32>
    %167 = arith.mulf %154, %166 : vector<8x16xf32>
    %cst_58 = arith.constant dense<0.000000e+00> : vector<8xf32>
    %168 = vector.multi_reduction <add>, %167, %cst_58 [1] : vector<8x16xf32> to vector<8xf32>
    %169 = vector.shape_cast %168 : vector<8xf32> to vector<8x1xf32>
    %170 = arith.mulf %149, %166 : vector<8x16xf32>
    %cst_59 = arith.constant dense<0.000000e+00> : vector<8xf32>
    %171 = vector.multi_reduction <add>, %170, %cst_59 [1] : vector<8x16xf32> to vector<8xf32>
    %172 = vector.shape_cast %171 : vector<8xf32> to vector<8x1xf32>
    %173 = vector.shape_cast %166 : vector<8x16xf32> to vector<8x16x1xf32>
    %174 = vector.broadcast %173 : vector<8x16x1xf32> to vector<8x16x128xf32>
    %175 = arith.mulf %135, %174 : vector<8x16x128xf32>
    %cst_60 = arith.constant dense<0.000000e+00> : vector<8x128xf32>
    %176 = vector.multi_reduction <add>, %175, %cst_60 [1] : vector<8x16x128xf32> to vector<8x128xf32>
    %177 = arith.truncf %176 : vector<8x128xf32> to vector<8x128xbf16>
    %cst_61 = arith.constant dense<0.000000e+00> : vector<8x1024xf32>
    %178 = tpu.matmul %177, %1, %cst_61 {dimension_numbers = #tpu.dot_dimension_numbers<[1], [0], [0], [1], [0, 0, 1, 1], [], []>} : vector<8x128xbf16>, vector<128x1024xbf16>, vector<8x1024xf32> -> vector<8x1024xf32>
    %179 = math.rsqrt %172 : vector<8x1xf32>
    %180 = arith.mulf %169, %179 : vector<8x1xf32>
    %181 = vector.broadcast %180 : vector<8x1xf32> to vector<8x1024xf32>
    %182 = arith.mulf %181, %178 : vector<8x1024xf32>
    %cst_62 = arith.constant 1.000000e+00 : f32
    %183 = vector.broadcast %cst_62 : f32 to vector<8x1xf32>
    %184 = arith.subf %183, %114 : vector<8x1xf32>
    %185 = vector.broadcast %184 : vector<8x1xf32> to vector<8x1024xf32>
    %186 = arith.mulf %182, %185 : vector<8x1024xf32>
    %187 = arith.addf %88, %186 : vector<8x1024xf32>
    %188 = arith.addf %89, %186 : vector<8x1024xf32>
    %cst_63 = arith.constant 1.020000e+00 : f32
    %189 = vector.broadcast %cst_63 : f32 to vector<8x1024xf32>
    %190 = arith.mulf %189, %188 : vector<8x1024xf32>
    %191 = arith.addf %0, %190 : vector<8x1024xf32>
    %192 = arith.truncf %191 : vector<8x1024xf32> to vector<8x1024xbf16>
    %cst_64 = arith.constant dense<0.000000e+00> : vector<8x128xf32>
    %193 = tpu.matmul %192, %1, %cst_64 {dimension_numbers = #tpu.dot_dimension_numbers<[1], [1], [0], [0], [0, 0, 1, 0], [], []>} : vector<8x1024xbf16>, vector<128x1024xbf16>, vector<8x128xf32> -> vector<8x128xf32>
    %194 = vector.broadcast %2 : vector<1x128xf32> to vector<8x128xf32>
    %195 = arith.addf %193, %194 : vector<8x128xf32>
    %cst_65 = arith.constant 0.000000e+00 : f32
    %196 = vector.broadcast %cst_65 : f32 to vector<8x128xf32>
    %197 = arith.maximumf %195, %196 : vector<8x128xf32>
    %198 = arith.truncf %197 : vector<8x128xf32> to vector<8x128xbf16>
    %cst_66 = arith.constant dense<0.000000e+00> : vector<8x10xf32>
    %199 = tpu.matmul %198, %3, %cst_66 {dimension_numbers = #tpu.dot_dimension_numbers<[1], [0], [0], [1], [0, 0, 1, 1], [], []>} : vector<8x128xbf16>, vector<128x10xbf16>, vector<8x10xf32> -> vector<8x10xf32>
    %200 = vector.broadcast %4 : vector<1x10xf32> to vector<8x10xf32>
    %201 = arith.addf %199, %200 : vector<8x10xf32>
    %cst_67 = arith.constant dense<0xFF800000> : vector<8xf32>
    %202 = vector.multi_reduction <maximumf>, %201, %cst_67 [1] : vector<8x10xf32> to vector<8xf32>
    %203 = vector.shape_cast %202 : vector<8xf32> to vector<8x1xf32>
    %204 = vector.broadcast %203 : vector<8x1xf32> to vector<8x10xf32>
    %205 = arith.cmpf oge, %201, %204 : vector<8x10xf32>
    %c10_i32_68 = arith.constant 10 : i32
    %206 = vector.broadcast %c10_i32_68 : i32 to vector<8x10xi32>
    %207 = arith.select %205, %11, %206 : vector<8x10xi1>, vector<8x10xi32>
    %cst_69 = arith.constant dense<2147483647> : vector<8xi32>
    %208 = vector.multi_reduction <minsi>, %207, %cst_69 [1] : vector<8x10xi32> to vector<8xi32>
    %209 = vector.shape_cast %208 : vector<8xi32> to vector<8x1xi32>
    %210 = arith.cmpi ne, %209, %9 : vector<8x1xi32>
    %211 = arith.extui %210 : vector<8x1xi1> to vector<8x1xi32>
    %212 = arith.sitofp %211 : vector<8x1xi32> to vector<8x1xf32>
    %213 = arith.maximumf %114, %212 : vector<8x1xf32>
    %c2_i32 = arith.constant 2 : i32
    %214 = arith.truncf %187 : vector<8x1024xf32> to vector<8x1024xbf16>
    %cst_70 = arith.constant dense<0.000000e+00> : vector<8x128xf32>
    %215 = tpu.matmul %214, %1, %cst_70 {dimension_numbers = #tpu.dot_dimension_numbers<[1], [1], [0], [0], [0, 0, 1, 0], [], []>} : vector<8x1024xbf16>, vector<128x1024xbf16>, vector<8x128xf32> -> vector<8x128xf32>
    %216 = vector.broadcast %2 : vector<1x128xf32> to vector<8x128xf32>
    %217 = arith.addf %215, %216 : vector<8x128xf32>
    %cst_71 = arith.constant 0.000000e+00 : f32
    %218 = vector.broadcast %cst_71 : f32 to vector<8x128xf32>
    %219 = arith.maximumf %217, %218 : vector<8x128xf32>
    %220 = arith.truncf %219 : vector<8x128xf32> to vector<8x128xbf16>
    %cst_72 = arith.constant dense<0.000000e+00> : vector<8x10xf32>
    %221 = tpu.matmul %220, %3, %cst_72 {dimension_numbers = #tpu.dot_dimension_numbers<[1], [0], [0], [1], [0, 0, 1, 1], [], []>} : vector<8x128xbf16>, vector<128x10xbf16>, vector<8x10xf32> -> vector<8x10xf32>
    %222 = vector.broadcast %4 : vector<1x10xf32> to vector<8x10xf32>
    %223 = arith.addf %221, %222 : vector<8x10xf32>
    %224 = vector.shape_cast %223 : vector<8x10xf32> to vector<8x1x10xf32>
    %225 = vector.broadcast %224 : vector<8x1x10xf32> to vector<8x16x10xf32>
    %226 = arith.mulf %225, %8 : vector<8x16x10xf32>
    %cst_73 = arith.constant dense<0.000000e+00> : vector<8x16xf32>
    %227 = vector.multi_reduction <add>, %226, %cst_73 [2] : vector<8x16x10xf32> to vector<8x16xf32>
    %cst_74 = arith.constant 0.000000e+00 : f32
    %228 = vector.broadcast %cst_74 : f32 to vector<8x128xf32>
    %229 = arith.cmpf ogt, %219, %228 : vector<8x128xf32>
    %230 = arith.extui %229 : vector<8x128xi1> to vector<8x128xi32>
    %231 = arith.sitofp %230 : vector<8x128xi32> to vector<8x128xf32>
    %232 = vector.shape_cast %231 : vector<8x128xf32> to vector<8x1x128xf32>
    %233 = vector.broadcast %232 : vector<8x1x128xf32> to vector<8x16x128xf32>
    %234 = arith.mulf %7, %233 : vector<8x16x128xf32>
    %235 = vector.shape_cast %234 : vector<8x16x128xf32> to vector<128x128xf32>
    %cst_75 = arith.constant dense<0.000000e+00> : vector<128x128xf32>
    %236 = tpu.matmul %235, %5, %cst_75 {dimension_numbers = #tpu.dot_dimension_numbers<[1], [0], [0], [1], [0, 0, 1, 1], [], []>} : vector<128x128xf32>, vector<128x128xf32>, vector<128x128xf32> -> vector<128x128xf32>
    %237 = vector.shape_cast %236 : vector<128x128xf32> to vector<8x16x128xf32>
    %238 = arith.mulf %234, %237 : vector<8x16x128xf32>
    %cst_76 = arith.constant dense<0.000000e+00> : vector<8x16xf32>
    %239 = vector.multi_reduction <add>, %238, %cst_76 [2] : vector<8x16x128xf32> to vector<8x16xf32>
    %240 = vector.shape_cast %6 : vector<1x128xf32> to vector<1x1x128xf32>
    %241 = vector.broadcast %240 : vector<1x1x128xf32> to vector<8x16x128xf32>
    %242 = arith.mulf %234, %241 : vector<8x16x128xf32>
    %cst_77 = arith.constant dense<0.000000e+00> : vector<8x16xf32>
    %243 = vector.multi_reduction <add>, %242, %cst_77 [2] : vector<8x16x128xf32> to vector<8x16xf32>
    %cst_78 = arith.constant 2.000000e-05 : f32
    %244 = vector.broadcast %cst_78 : f32 to vector<8x16xf32>
    %245 = arith.mulf %244, %243 : vector<8x16xf32>
    %246 = arith.addf %239, %245 : vector<8x16xf32>
    %247 = vector.broadcast %cst_22 : f32 to vector<8x16xf32>
    %248 = arith.addf %246, %247 : vector<8x16xf32>
    %249 = math.absf %227 : vector<8x16xf32>
    %250 = math.rsqrt %248 : vector<8x16xf32>
    %251 = arith.mulf %249, %250 : vector<8x16xf32>
    %252 = vector.broadcast %cst_23 : f32 to vector<8x16xf32>
    %253 = arith.select %13, %251, %252 : vector<8x16xi1>, vector<8x16xf32>
    %cst_79 = arith.constant dense<0x7F800000> : vector<8xf32>
    %254 = vector.multi_reduction <minimumf>, %253, %cst_79 [1] : vector<8x16xf32> to vector<8xf32>
    %255 = vector.shape_cast %254 : vector<8xf32> to vector<8x1xf32>
    %256 = vector.broadcast %255 : vector<8x1xf32> to vector<8x16xf32>
    %257 = arith.cmpf ole, %253, %256 : vector<8x16xf32>
    %c16_i32_80 = arith.constant 16 : i32
    %258 = vector.broadcast %c16_i32_80 : i32 to vector<8x16xi32>
    %259 = arith.select %257, %10, %258 : vector<8x16xi1>, vector<8x16xi32>
    %cst_81 = arith.constant dense<2147483647> : vector<8xi32>
    %260 = vector.multi_reduction <minsi>, %259, %cst_81 [1] : vector<8x16xi32> to vector<8xi32>
    %261 = vector.shape_cast %260 : vector<8xi32> to vector<8x1xi32>
    %262 = vector.broadcast %261 : vector<8x1xi32> to vector<8x16xi32>
    %263 = arith.cmpi eq, %10, %262 : vector<8x16xi32>
    %264 = arith.extui %263 : vector<8x16xi1> to vector<8x16xi32>
    %265 = arith.sitofp %264 : vector<8x16xi32> to vector<8x16xf32>
    %266 = arith.mulf %253, %265 : vector<8x16xf32>
    %cst_82 = arith.constant dense<0.000000e+00> : vector<8xf32>
    %267 = vector.multi_reduction <add>, %266, %cst_82 [1] : vector<8x16xf32> to vector<8xf32>
    %268 = vector.shape_cast %267 : vector<8xf32> to vector<8x1xf32>
    %269 = arith.mulf %248, %265 : vector<8x16xf32>
    %cst_83 = arith.constant dense<0.000000e+00> : vector<8xf32>
    %270 = vector.multi_reduction <add>, %269, %cst_83 [1] : vector<8x16xf32> to vector<8xf32>
    %271 = vector.shape_cast %270 : vector<8xf32> to vector<8x1xf32>
    %272 = vector.shape_cast %265 : vector<8x16xf32> to vector<8x16x1xf32>
    %273 = vector.broadcast %272 : vector<8x16x1xf32> to vector<8x16x128xf32>
    %274 = arith.mulf %234, %273 : vector<8x16x128xf32>
    %cst_84 = arith.constant dense<0.000000e+00> : vector<8x128xf32>
    %275 = vector.multi_reduction <add>, %274, %cst_84 [1] : vector<8x16x128xf32> to vector<8x128xf32>
    %276 = arith.truncf %275 : vector<8x128xf32> to vector<8x128xbf16>
    %cst_85 = arith.constant dense<0.000000e+00> : vector<8x1024xf32>
    %277 = tpu.matmul %276, %1, %cst_85 {dimension_numbers = #tpu.dot_dimension_numbers<[1], [0], [0], [1], [0, 0, 1, 1], [], []>} : vector<8x128xbf16>, vector<128x1024xbf16>, vector<8x1024xf32> -> vector<8x1024xf32>
    %278 = math.rsqrt %271 : vector<8x1xf32>
    %279 = arith.mulf %268, %278 : vector<8x1xf32>
    %280 = vector.broadcast %279 : vector<8x1xf32> to vector<8x1024xf32>
    %281 = arith.mulf %280, %277 : vector<8x1024xf32>
    %cst_86 = arith.constant 1.000000e+00 : f32
    %282 = vector.broadcast %cst_86 : f32 to vector<8x1xf32>
    %283 = arith.subf %282, %213 : vector<8x1xf32>
    %284 = vector.broadcast %283 : vector<8x1xf32> to vector<8x1024xf32>
    %285 = arith.mulf %281, %284 : vector<8x1024xf32>
    %286 = arith.addf %187, %285 : vector<8x1024xf32>
    %287 = arith.addf %188, %285 : vector<8x1024xf32>
    %cst_87 = arith.constant 1.020000e+00 : f32
    %288 = vector.broadcast %cst_87 : f32 to vector<8x1024xf32>
    %289 = arith.mulf %288, %287 : vector<8x1024xf32>
    %290 = arith.addf %0, %289 : vector<8x1024xf32>
    %291 = arith.truncf %290 : vector<8x1024xf32> to vector<8x1024xbf16>
    %cst_88 = arith.constant dense<0.000000e+00> : vector<8x128xf32>
    %292 = tpu.matmul %291, %1, %cst_88 {dimension_numbers = #tpu.dot_dimension_numbers<[1], [1], [0], [0], [0, 0, 1, 0], [], []>} : vector<8x1024xbf16>, vector<128x1024xbf16>, vector<8x128xf32> -> vector<8x128xf32>
    %293 = vector.broadcast %2 : vector<1x128xf32> to vector<8x128xf32>
    %294 = arith.addf %292, %293 : vector<8x128xf32>
    %cst_89 = arith.constant 0.000000e+00 : f32
    %295 = vector.broadcast %cst_89 : f32 to vector<8x128xf32>
    %296 = arith.maximumf %294, %295 : vector<8x128xf32>
    %297 = arith.truncf %296 : vector<8x128xf32> to vector<8x128xbf16>
    %cst_90 = arith.constant dense<0.000000e+00> : vector<8x10xf32>
    %298 = tpu.matmul %297, %3, %cst_90 {dimension_numbers = #tpu.dot_dimension_numbers<[1], [0], [0], [1], [0, 0, 1, 1], [], []>} : vector<8x128xbf16>, vector<128x10xbf16>, vector<8x10xf32> -> vector<8x10xf32>
    %299 = vector.broadcast %4 : vector<1x10xf32> to vector<8x10xf32>
    %300 = arith.addf %298, %299 : vector<8x10xf32>
    %cst_91 = arith.constant dense<0xFF800000> : vector<8xf32>
    %301 = vector.multi_reduction <maximumf>, %300, %cst_91 [1] : vector<8x10xf32> to vector<8xf32>
    %302 = vector.shape_cast %301 : vector<8xf32> to vector<8x1xf32>
    %303 = vector.broadcast %302 : vector<8x1xf32> to vector<8x10xf32>
    %304 = arith.cmpf oge, %300, %303 : vector<8x10xf32>
    %c10_i32_92 = arith.constant 10 : i32
    %305 = vector.broadcast %c10_i32_92 : i32 to vector<8x10xi32>
    %306 = arith.select %304, %11, %305 : vector<8x10xi1>, vector<8x10xi32>
    %cst_93 = arith.constant dense<2147483647> : vector<8xi32>
    %307 = vector.multi_reduction <minsi>, %306, %cst_93 [1] : vector<8x10xi32> to vector<8xi32>
    %308 = vector.shape_cast %307 : vector<8xi32> to vector<8x1xi32>
    %309 = arith.cmpi ne, %308, %9 : vector<8x1xi32>
    %310 = arith.extui %309 : vector<8x1xi1> to vector<8x1xi32>
    %311 = arith.sitofp %310 : vector<8x1xi32> to vector<8x1xf32>
    %312 = arith.maximumf %213, %311 : vector<8x1xf32>
    %cst_94 = arith.constant 1.020000e+00 : f32
    %313 = vector.broadcast %cst_94 : f32 to vector<8x1024xf32>
    %314 = arith.mulf %313, %287 : vector<8x1024xf32>
    %c0_95 = arith.constant 0 : index
    %c0_96 = arith.constant 0 : index
    %315 = vector.load %arg11[%c0_95, %c0_96] : memref<8x1024xf32, #tpu.memory_space<vmem>>, vector<8x1024xf32>
    tpu.vector_store %arg11[%c0_95, %c0_96], %314 {strides = array<i32>} : memref<8x1024xf32, #tpu.memory_space<vmem>>, vector<8x1024xf32>,
    return
  }
  func.func @transform_0(%arg0: i32) -> (i32, i32) {
    %c0_i32 = arith.constant 0 : i32
    %c0_i32_0 = arith.constant 0 : i32
    return %arg0, %c0_i32 : i32, i32
  }
  func.func @transform_1(%arg0: i32) -> (i32, i32) {
    %c0_i32 = arith.constant 0 : i32
    %c0_i32_0 = arith.constant 0 : i32
    %c0_i32_1 = arith.constant 0 : i32
    return %c0_i32, %c0_i32_0 : i32, i32
  }
  func.func @transform_2(%arg0: i32) -> (i32, i32) {
    %c0_i32 = arith.constant 0 : i32
    %c0_i32_0 = arith.constant 0 : i32
    %c0_i32_1 = arith.constant 0 : i32
    return %c0_i32, %c0_i32_0 : i32, i32
  }
  func.func @transform_3(%arg0: i32) -> (i32, i32) {
    %c0_i32 = arith.constant 0 : i32
    %c0_i32_0 = arith.constant 0 : i32
    %c0_i32_1 = arith.constant 0 : i32
    return %c0_i32, %c0_i32_0 : i32, i32
  }
  func.func @transform_4(%arg0: i32) -> (i32, i32) {
    %c0_i32 = arith.constant 0 : i32
    %c0_i32_0 = arith.constant 0 : i32
    %c0_i32_1 = arith.constant 0 : i32
    return %c0_i32, %c0_i32_0 : i32, i32
  }
  func.func @transform_5(%arg0: i32) -> (i32, i32) {
    %c0_i32 = arith.constant 0 : i32
    %c0_i32_0 = arith.constant 0 : i32
    %c0_i32_1 = arith.constant 0 : i32
    return %c0_i32, %c0_i32_0 : i32, i32
  }
  func.func @transform_6(%arg0: i32) -> (i32, i32) {
    %c0_i32 = arith.constant 0 : i32
    %c0_i32_0 = arith.constant 0 : i32
    %c0_i32_1 = arith.constant 0 : i32
    return %c0_i32, %c0_i32_0 : i32, i32
  }
  func.func @transform_7(%arg0: i32) -> (i32, i32, i32) {
    %c0_i32 = arith.constant 0 : i32
    %c0_i32_0 = arith.constant 0 : i32
    %c0_i32_1 = arith.constant 0 : i32
    return %arg0, %c0_i32, %c0_i32_0 : i32, i32, i32
  }
  func.func @transform_8(%arg0: i32) -> (i32, i32, i32) {
    %c0_i32 = arith.constant 0 : i32
    %c0_i32_0 = arith.constant 0 : i32
    %c0_i32_1 = arith.constant 0 : i32
    return %arg0, %c0_i32, %c0_i32_0 : i32, i32, i32
  }
  func.func @transform_9(%arg0: i32) -> (i32, i32) {
    %c0_i32 = arith.constant 0 : i32
    %c0_i32_0 = arith.constant 0 : i32
    return %arg0, %c0_i32 : i32, i32
  }
  func.func @transform_10(%arg0: i32) -> (i32, i32) {
    %c0_i32 = arith.constant 0 : i32
    %c0_i32_0 = arith.constant 0 : i32
    return %arg0, %c0_i32 : i32, i32
  }
}

</mosaic_0001>

<bundles_post_ra>
// kernel: deepfool_forward.1
= control target key start
LH: loop header
LB: loop body
LE: loop exit
PB: predicated region body
PF: predicated region fallthrough
CT: control target
= control target key end

     0   :  { %vm9861_vm1 = vcmask 80896   ;;  %s9624_s1 = inlined_call_operand.vmem [shape: bf16[128,1024], index: 1, kind: input, shape index: {}]   ;;  %s9625_s2 = inlined_call_operand.vmem [shape: f32[1,128], index: 2, kind: input, shape index: {}]   ;;  %s9626_s0 = inlined_call_operand.vmem [shape: f32[8,1024], index: 0, kind: input, shape index: {}]   ;;  %s9627_s6 = inlined_call_operand.vmem [shape: f32[1,128], index: 6, kind: input, shape index: {}]   ;;  %s9628_s3 = inlined_call_operand.vmem [shape: bf16[128,10], index: 3, kind: input, shape index: {}]   ;;  %s9629_s5 = inlined_call_operand.vmem [shape: f32[128,128], index: 5, kind: input, shape index: {}]   ;;  %s9630_s7 = inlined_call_operand.vmem [shape: f32[8,16,128], index: 7, kind: input, shape index: {}]   ;;  %s9631_s4 = inlined_call_operand.vmem [shape: f32[1,10], index: 4, kind: input, shape index: {}]   ;;  %s9632_s8 = inlined_call_operand.vmem [shape: f32[8,16,10], index: 8, kind: input, shape index: {}]   ;;  %s9633_s9 = inlined_call_operand.vmem [shape: s32[8,1], index: 9, kind: input, shape index: {}]   ;;  %s9634_s10 = inlined_call_operand.vmem [shape: f32[8,1024], index: 10, kind: output, shape index: {}]  }
   0x1   :  { %v5123_v0 = vld [vmem:[%s9624_s1 + $0x1c0] sm:$0xf]  ;;  %v5249_v2 = vld [vmem:[%s9624_s1 + $0x1c4] sm:$0xf]  ;;  %v5131_v5 = vld [vmem:[%s9624_s1 + $0x1c8] sm:$0xf] }
   0x2   :  { %v5253_v1 = vld [vmem:[%s9624_s1 + $0x1dc] sm:$0xf0]  ;;  %v5125_v4 = vld [vmem:[%s9624_s1 + $0x1e0] sm:$0xf0]  ;;  %v5254_v6 = vld [vmem:[%s9624_s1 + $0x1e4] sm:$0xf0] }
   0x3   :  { %v5841_v3 = vor.u32 %v5253_v1, %v5123_v0  ;;  %v5852_v7 = vor.u32 %v5249_v2, %v5125_v4  ;;  %v5854_v8 = vor.u32 %v5254_v6, %v5131_v5  ;;  %v5250_v9 = vld [vmem:[%s9624_s1 + $0x1cc] sm:$0xf]  ;;  %v5091_v12 = vld [vmem:[%s9624_s1 + $0x180] sm:$0xf]  ;;  %v5241_v14 = vld [vmem:[%s9624_s1 + $0x184] sm:$0xf] }
   0x4   :  { %v5133_v10 = vld [vmem:[%s9624_s1 + $0x1e8] sm:$0xf0]  ;;  %v5245_v13 = vld [vmem:[%s9624_s1 + $0x19c] sm:$0xf0]  ;;  %v5093_v15 = vld [vmem:[%s9624_s1 + $0x1a0] sm:$0xf0] }
   0x5   :  { %9903 = vst [vmem:[#allocation2_spill] sm:$0xff] %v5841_v3  ;;  %509 = vmatpush.bf16.xpose.msra.mxu0 %v5841_v3  ;;  %v5863_v11 = vor.u32 %v5250_v9, %v5133_v10  ;;  %522 = vmatpush.bf16.xpose.msra.mxu1 %v5852_v7  ;;  %v5099_v16 = vld [vmem:[%s9624_s1 + $0x188] sm:$0xf]  ;;  %v5242_v18 = vld [vmem:[%s9624_s1 + $0x18c] sm:$0xf]  ;;  %v5892_v20 = vor.u32 %v5245_v13, %v5091_v12 }
   0x6   :  { %9904 = vst [vmem:[#allocation3_spill] sm:$0xff] %v5852_v7  ;;  %535 = vmatpush.bf16.xpose.msra.mxu2 %v5854_v8  ;;  %v5246_v17 = vld [vmem:[%s9624_s1 + $0x1a4] sm:$0xf0]  ;;  %v5101_v19 = vld [vmem:[%s9624_s1 + $0x1a8] sm:$0xf0]  ;;  %v5894_v21 = vor.u32 %v5241_v14, %v5093_v15 }
   0x7   :  { %9905 = vst [vmem:[#allocation4_spill] sm:$0xff] %v5854_v8  ;;  %548 = vmatpush.bf16.xpose.msra.mxu3 %v5863_v11  ;;  %v5896_v22 = vor.u32 %v5246_v17, %v5099_v16  ;;  %v5898_v23 = vor.u32 %v5242_v18, %v5101_v19  ;;  %v5059_v24 = vld [vmem:[%s9624_s1 + $0x140] sm:$0xf]  ;;  %v5233_v26 = vld [vmem:[%s9624_s1 + $0x144] sm:$0xf] }
   0x8   :  { %9906 = vst [vmem:[#allocation5_spill] sm:$0xff] %v5863_v11  ;;  %v5237_v25 = vld [vmem:[%s9624_s1 + $0x15c] sm:$0xf0]  ;;  %v5061_v27 = vld [vmem:[%s9624_s1 + $0x160] sm:$0xf0] }
   0x9   :  { %9907 = vst [vmem:[#allocation6_spill] sm:$0xff] %v5892_v20  ;;  %v5067_v28 = vld [vmem:[%s9624_s1 + $0x148] sm:$0xf]  ;;  %v5234_v30 = vld [vmem:[%s9624_s1 + $0x14c] sm:$0xf]  ;;  %v5928_v32 = vor.u32 %v5237_v25, %v5059_v24  ;;  %v5930_v33 = vor.u32 %v5233_v26, %v5061_v27 }
   0xa   :  { %9908 = vst [vmem:[#allocation7_spill] sm:$0xff] %v5894_v21  ;;  %v5238_v29 = vld [vmem:[%s9624_s1 + $0x164] sm:$0xf0]  ;;  %v5069_v31 = vld [vmem:[%s9624_s1 + $0x168] sm:$0xf0] }
   0xb   :  { %9909 = vst [vmem:[#allocation8_spill] sm:$0xff] %v5896_v22  ;;  %v5932_v34 = vor.u32 %v5238_v29, %v5067_v28  ;;  %v5934_v35 = vor.u32 %v5234_v30, %v5069_v31  ;;  %v5027_v36 = vld [vmem:[%s9624_s1 + $0x100] sm:$0xf]  ;;  %v5225_v38 = vld [vmem:[%s9624_s1 + $0x104] sm:$0xf] }
   0xc   :  { %9910 = vst [vmem:[#allocation9_spill] sm:$0xff] %v5898_v23  ;;  %v5229_v37 = vld [vmem:[%s9624_s1 + $0x11c] sm:$0xf0]  ;;  %v5029_v39 = vld [vmem:[%s9624_s1 + $0x120] sm:$0xf0] }
   0xd   :  { %510 = vmatpush.bf16.xpose.msra.mxu0 %v5892_v20  ;;  %523 = vmatpush.bf16.xpose.msra.mxu1 %v5894_v21  ;;  %9911 = vst [vmem:[#allocation10_spill] sm:$0xff] %v5928_v32  ;;  %v5035_v40 = vld [vmem:[%s9624_s1 + $0x108] sm:$0xf]  ;;  %v5226_v42 = vld [vmem:[%s9624_s1 + $0x10c] sm:$0xf]  ;;  %v5964_v44 = vor.u32 %v5229_v37, %v5027_v36  ;;  %v5966_v45 = vor.u32 %v5225_v38, %v5029_v39 }
   0xe   :  { %536 = vmatpush.bf16.xpose.msra.mxu2 %v5896_v22  ;;  %9912 = vst [vmem:[#allocation11_spill] sm:$0xff] %v5930_v33  ;;  %v5230_v41 = vld [vmem:[%s9624_s1 + $0x124] sm:$0xf0]  ;;  %v5037_v43 = vld [vmem:[%s9624_s1 + $0x128] sm:$0xf0] }
   0xf   :  { %549 = vmatpush.bf16.xpose.msra.mxu3 %v5898_v23  ;;  %9913 = vst [vmem:[#allocation12_spill] sm:$0xff] %v5932_v34  ;;  %v5968_v46 = vor.u32 %v5230_v41, %v5035_v40  ;;  %v5970_v47 = vor.u32 %v5226_v42, %v5037_v43  ;;  %v4995_v48 = vld [vmem:[%s9624_s1 + $0xc0] sm:$0xf]  ;;  %v5217_v50 = vld [vmem:[%s9624_s1 + $0xc4] sm:$0xf] }
  0x10   :  { %9914 = vst [vmem:[#allocation13_spill] sm:$0xff] %v5934_v35  ;;  %v5221_v49 = vld [vmem:[%s9624_s1 + $0xdc] sm:$0xf0]  ;;  %v4997_v51 = vld [vmem:[%s9624_s1 + $0xe0] sm:$0xf0] }
  0x11   :  { %9915 = vst [vmem:[#allocation14_spill] sm:$0xff] %v5964_v44  ;;  %v5003_v52 = vld [vmem:[%s9624_s1 + $0xc8] sm:$0xf]  ;;  %v5218_v54 = vld [vmem:[%s9624_s1 + $0xcc] sm:$0xf]  ;;  %v6000_v56 = vor.u32 %v5221_v49, %v4995_v48  ;;  %v6002_v57 = vor.u32 %v5217_v50, %v4997_v51 }
  0x12   :  { %9916 = vst [vmem:[#allocation15_spill] sm:$0xff] %v5966_v45  ;;  %v5222_v53 = vld [vmem:[%s9624_s1 + $0xe4] sm:$0xf0]  ;;  %v5005_v55 = vld [vmem:[%s9624_s1 + $0xe8] sm:$0xf0] }
  0x13   :  { %9917 = vst [vmem:[#allocation16_spill] sm:$0xff] %v5968_v46  ;;  %v6004_v58 = vor.u32 %v5222_v53, %v5003_v52  ;;  %v6006_v59 = vor.u32 %v5218_v54, %v5005_v55  ;;  %v4963_v60 = vld [vmem:[%s9624_s1 + $0x80] sm:$0xf]  ;;  %v5209_v62 = vld [vmem:[%s9624_s1 + $0x84] sm:$0xf] }
  0x14   :  { %9918 = vst [vmem:[#allocation17_spill] sm:$0xff] %v5970_v47  ;;  %v5213_v61 = vld [vmem:[%s9624_s1 + $0x9c] sm:$0xf0]  ;;  %v4965_v63 = vld [vmem:[%s9624_s1 + $0xa0] sm:$0xf0] }
  0x15   :  { %511 = vmatpush.bf16.xpose.msra.mxu0 %v5928_v32  ;;  %524 = vmatpush.bf16.xpose.msra.mxu1 %v5930_v33  ;;  %9919 = vst [vmem:[#allocation18_spill] sm:$0xff] %v6000_v56  ;;  %v4971_v0 = vld [vmem:[%s9624_s1 + $0x88] sm:$0xf]  ;;  %v5210_v2 = vld [vmem:[%s9624_s1 + $0x8c] sm:$0xf]  ;;  %v6036_v5 = vor.u32 %v5213_v61, %v4963_v60  ;;  %v6038_v6 = vor.u32 %v5209_v62, %v4965_v63 }
  0x16   :  { %537 = vmatpush.bf16.xpose.msra.mxu2 %v5932_v34  ;;  %9920 = vst [vmem:[#allocation19_spill] sm:$0xff] %v6002_v57  ;;  %v5214_v1 = vld [vmem:[%s9624_s1 + $0xa4] sm:$0xf0]  ;;  %v4973_v4 = vld [vmem:[%s9624_s1 + $0xa8] sm:$0xf0] }
  0x17   :  { %550 = vmatpush.bf16.xpose.msra.mxu3 %v5934_v35  ;;  %9921 = vst [vmem:[#allocation20_spill] sm:$0xff] %v6004_v58  ;;  %v6040_v9 = vor.u32 %v5214_v1, %v4971_v0  ;;  %v6042_v10 = vor.u32 %v5210_v2, %v4973_v4  ;;  %v4931_v12 = vld [vmem:[%s9624_s1 + $0x40] sm:$0xf]  ;;  %v5201_v14 = vld [vmem:[%s9624_s1 + $0x44] sm:$0xf] }
  0x18   :  { %9922 = vst [vmem:[#allocation21_spill] sm:$0xff] %v6006_v59  ;;  %v5205_v13 = vld [vmem:[%s9624_s1 + $0x5c] sm:$0xf0]  ;;  %v4933_v15 = vld [vmem:[%s9624_s1 + $0x60] sm:$0xf0] }
  0x19   :  { %9923 = vst [vmem:[#allocation22_spill] sm:$0xff] %v6036_v5  ;;  %v4939_v16 = vld [vmem:[%s9624_s1 + $0x48] sm:$0xf]  ;;  %v5202_v18 = vld [vmem:[%s9624_s1 + $0x4c] sm:$0xf]  ;;  %v6072_v24 = vor.u32 %v5205_v13, %v4931_v12  ;;  %v6074_v25 = vor.u32 %v5201_v14, %v4933_v15  ;;  %v37_v14 = vld [vmem:[%s9626_s0 + $0x10] sm:$0xff] }
  0x1a   :  { %9924 = vst [vmem:[#allocation23_spill] sm:$0xff] %v6038_v6  ;;  %v5206_v17 = vld [vmem:[%s9624_s1 + $0x64] sm:$0xf0]  ;;  %v4941_v19 = vld [vmem:[%s9624_s1 + $0x68] sm:$0xf0] }
  0x1b   :  { %9925 = vst [vmem:[#allocation24_spill] sm:$0xff] %v6040_v9  ;;  %v6076_v26 = vor.u32 %v5206_v17, %v4939_v16  ;;  %v6078_v27 = vor.u32 %v5202_v18, %v4941_v19  ;;  %v4899_v28 = vld [vmem:[%s9624_s1] sm:$0xf]  ;;  %v5193_v30 = vld [vmem:[%s9624_s1 + $0x4] sm:$0xf]  ;;  %v180_v17 = vpack.c.bf16 %v37_v14, %v37_v14 }
  0x1c   :  { %9926 = vst [vmem:[#allocation25_spill] sm:$0xff] %v6042_v10  ;;  %v5197_v29 = vld [vmem:[%s9624_s1 + $0x1c] sm:$0xf0]  ;;  %v4901_v31 = vld [vmem:[%s9624_s1 + $0x20] sm:$0xf0] }
  0x1d   :  { %512 = vmatpush.bf16.xpose.msra.mxu0 %v5964_v44  ;;  %525 = vmatpush.bf16.xpose.msra.mxu1 %v5966_v45  ;;  %9927 = vst [vmem:[#allocation26_spill] sm:$0xff] %v6072_v24  ;;  %v4907_v36 = vld [vmem:[%s9624_s1 + $0x8] sm:$0xf]  ;;  %v5194_v38 = vld [vmem:[%s9624_s1 + $0xc] sm:$0xf]  ;;  %v6117_v43 = vor.u32 %v5197_v29, %v4899_v28  ;;  %v6128_v51 = vor.u32 %v5193_v30, %v4901_v31 }
  0x1e   :  { %538 = vmatpush.bf16.xpose.msra.mxu2 %v5968_v46  ;;  %9928 = vst [vmem:[#allocation27_spill] sm:$0xff] %v6074_v25  ;;  %v5198_v37 = vld [vmem:[%s9624_s1 + $0x24] sm:$0xf0]  ;;  %v4909_v39 = vld [vmem:[%s9624_s1 + $0x28] sm:$0xf0] }
  0x1f   :  { %551 = vmatpush.bf16.xpose.msra.mxu3 %v5970_v47  ;;  %9929 = vst [vmem:[#allocation28_spill] sm:$0xff] %v6076_v26  ;;  %v5139_v40 = vld [vmem:[%s9624_s1 + $0x1d0] sm:$0xf]  ;;  %v5251_v42 = vld [vmem:[%s9624_s1 + $0x1d4] sm:$0xf]  ;;  %v6130_v52 = vor.u32 %v5198_v37, %v4907_v36  ;;  %v6138_v55 = vor.u32 %v5194_v38, %v4909_v39  ;;  %v35_v38 = vld [vmem:[%s9626_s0] sm:$0xff] }
  0x20   :  { %9930 = vst [vmem:[#allocation29_spill] sm:$0xff] %v6078_v27  ;;  %v5255_v41 = vld [vmem:[%s9624_s1 + $0x1ec] sm:$0xf0]  ;;  %v5141_v48 = vld [vmem:[%s9624_s1 + $0x1f0] sm:$0xf0]  ;;  %v38_v39 = vld [vmem:[%s9626_s0 + $0x18] sm:$0xff] }
  0x21   :  { %9931 = vst [vmem:[#allocation30_spill] sm:$0xff] %v6117_v43  ;;  %v5147_v49 = vld [vmem:[%s9624_s1 + $0x1d8] sm:$0xf]  ;;  %v5252_v53 = vld [vmem:[%s9624_s1 + $0x1dc] sm:$0xf]  ;;  %v6140_v60 = vor.u32 %v5255_v41, %v5139_v40  ;;  %v6142_v61 = vor.u32 %v5251_v42, %v5141_v48  ;;  %v178_v42 = vpack.c.bf16 %v35_v38, %v35_v38  ;;  %v181_v48 = vpack.c.bf16 %v38_v39, %v38_v39 }
  0x22   :  { %v5256_v50 = vld [vmem:[%s9624_s1 + $0x1f4] sm:$0xf0]  ;;  %9932 = vst [vmem:[#allocation31_spill] sm:$0xff] %v6128_v51  ;;  %v5149_v54 = vld [vmem:[%s9624_s1 + $0x1f8] sm:$0xf0] }
  0x23   :  { %9933 = vst [vmem:[#allocation32_spill] sm:$0xff] %v6130_v52  ;;  %v6144_v62 = vor.u32 %v5256_v50, %v5147_v49  ;;  %v6147_v63 = vor.u32 %v5252_v53, %v5149_v54  ;;  %v5107_v0 = vld [vmem:[%s9624_s1 + $0x190] sm:$0xf]  ;;  %v5243_v2 = vld [vmem:[%s9624_s1 + $0x194] sm:$0xf]  ;;  %v36_v49 = vld [vmem:[%s9626_s0 + $0x8] sm:$0xff] }
  0x24   :  { %9934 = vst [vmem:[#allocation33_spill] sm:$0xff] %v6138_v55  ;;  %v5247_v1 = vld [vmem:[%s9624_s1 + $0x1ac] sm:$0xf0]  ;;  %v5109_v4 = vld [vmem:[%s9624_s1 + $0x1b0] sm:$0xf0]  ;;  %v179_v54 = vpack.c.bf16 %v36_v49, %v36_v49 }
  0x25   :  { %513 = vmatpush.bf16.xpose.msra.mxu0 %v6000_v56  ;;  %526 = vmatpush.bf16.xpose.msra.mxu1 %v6002_v57  ;;  %9935 = vst [vmem:[#allocation34_spill] sm:$0xff] %v6140_v60  ;;  %v5115_v12 = vld [vmem:[%s9624_s1 + $0x198] sm:$0xf]  ;;  %v5244_v15 = vld [vmem:[%s9624_s1 + $0x19c] sm:$0xf]  ;;  %v6183_v18 = vor.u32 %v5247_v1, %v5107_v0  ;;  %v6185_v19 = vor.u32 %v5243_v2, %v5109_v4 }
  0x26   :  { %539 = vmatpush.bf16.xpose.msra.mxu2 %v6004_v58  ;;  %9936 = vst [vmem:[#allocation35_spill] sm:$0xff] %v6142_v61  ;;  %v5248_v13 = vld [vmem:[%s9624_s1 + $0x1b4] sm:$0xf0]  ;;  %v5117_v16 = vld [vmem:[%s9624_s1 + $0x1b8] sm:$0xf0] }
  0x27   :  { %552 = vmatpush.bf16.xpose.msra.mxu3 %v6006_v59  ;;  %9937 = vst [vmem:[#allocation36_spill] sm:$0xff] %v6144_v62  ;;  %v6187_v28 = vor.u32 %v5248_v13, %v5115_v12  ;;  %v6189_v29 = vor.u32 %v5244_v15, %v5117_v16  ;;  %v5075_v30 = vld [vmem:[%s9624_s1 + $0x150] sm:$0xf]  ;;  %v5235_v36 = vld [vmem:[%s9624_s1 + $0x154] sm:$0xf] }
  0x28   :  { %9938 = vst [vmem:[#allocation37_spill] sm:$0xff] %v6147_v63  ;;  %v5239_v31 = vld [vmem:[%s9624_s1 + $0x16c] sm:$0xf0]  ;;  %v5077_v37 = vld [vmem:[%s9624_s1 + $0x170] sm:$0xf0] }
  0x29   :  { %9939 = vst [vmem:[#allocation38_spill] sm:$0xff] %v6183_v18  ;;  %v5083_v40 = vld [vmem:[%s9624_s1 + $0x158] sm:$0xf]  ;;  %v5236_v50 = vld [vmem:[%s9624_s1 + $0x15c] sm:$0xf]  ;;  %v6228_v0 = vor.u32 %v5239_v31, %v5075_v30  ;;  %v6230_v1 = vor.u32 %v5235_v36, %v5077_v37 }
  0x2a   :  { %9940 = vst [vmem:[#allocation39_spill] sm:$0xff] %v6185_v19  ;;  %v5240_v41 = vld [vmem:[%s9624_s1 + $0x174] sm:$0xf0]  ;;  %v5085_v53 = vld [vmem:[%s9624_s1 + $0x178] sm:$0xf0] }
  0x2b   :  { %9941 = vst [vmem:[#allocation40_spill] sm:$0xff] %v6187_v28  ;;  %v6232_v2 = vor.u32 %v5240_v41, %v5083_v40  ;;  %v6234_v4 = vor.u32 %v5236_v50, %v5085_v53  ;;  %v5043_v12 = vld [vmem:[%s9624_s1 + $0x110] sm:$0xf]  ;;  %v5227_v14 = vld [vmem:[%s9624_s1 + $0x114] sm:$0xf] }
  0x2c   :  { %9942 = vst [vmem:[#allocation41_spill] sm:$0xff] %v6189_v29  ;;  %v5231_v13 = vld [vmem:[%s9624_s1 + $0x12c] sm:$0xf0]  ;;  %v5045_v15 = vld [vmem:[%s9624_s1 + $0x130] sm:$0xf0] }
  0x2d   :  { %514 = vmatpush.bf16.xpose.msra.mxu0 %v6036_v5  ;;  %527 = vmatpush.bf16.xpose.msra.mxu1 %v6038_v6  ;;  %9943 = vst [vmem:[#allocation42_spill] sm:$0xff] %v6228_v0  ;;  %v5051_v16 = vld [vmem:[%s9624_s1 + $0x118] sm:$0xf]  ;;  %v5228_v30 = vld [vmem:[%s9624_s1 + $0x11c] sm:$0xf]  ;;  %v6264_v36 = vor.u32 %v5231_v13, %v5043_v12  ;;  %v6266_v37 = vor.u32 %v5227_v14, %v5045_v15 }
  0x2e   :  { %540 = vmatpush.bf16.xpose.msra.mxu2 %v6040_v9  ;;  %9944 = vst [vmem:[#allocation43_spill] sm:$0xff] %v6230_v1  ;;  %v5053_v31 = vld [vmem:[%s9624_s1 + $0x138] sm:$0xf0]  ;;  %v5011_v40 = vld [vmem:[%s9624_s1 + $0xd0] sm:$0xf] }
  0x2f   :  { %553 = vmatpush.bf16.xpose.msra.mxu3 %v6042_v10  ;;  %9945 = vst [vmem:[#allocation44_spill] sm:$0xff] %v6232_v2  ;;  %v6270_v39 = vor.u32 %v5228_v30, %v5053_v31  ;;  %v5223_v41 = vld [vmem:[%s9624_s1 + $0xec] sm:$0xf0]  ;;  %v5019_v49 = vld [vmem:[%s9624_s1 + $0xd8] sm:$0xf] }
  0x30   :  { %9946 = vst [vmem:[#allocation45_spill] sm:$0xff] %v6234_v4  ;;  %v5224_v50 = vld [vmem:[%s9624_s1 + $0xf4] sm:$0xf0]  ;;  %v5220_v53 = vld [vmem:[%s9624_s1 + $0xdc] sm:$0xf]  ;;  %v6300_v12 = vor.u32 %v5223_v41, %v5011_v40 }
  0x31   :  { %9947 = vst [vmem:[#allocation46_spill] sm:$0xff] %v6264_v36  ;;  %v6304_v14 = vor.u32 %v5224_v50, %v5019_v49  ;;  %v5211_v30 = vld [vmem:[%s9624_s1 + $0x94] sm:$0xf]  ;;  %v4987_v40 = vld [vmem:[%s9624_s1 + $0x98] sm:$0xf] }
  0x32   :  { %9948 = vst [vmem:[#allocation47_spill] sm:$0xff] %v6266_v37  ;;  %v4981_v31 = vld [vmem:[%s9624_s1 + $0xb0] sm:$0xf0]  ;;  %v5216_v41 = vld [vmem:[%s9624_s1 + $0xb4] sm:$0xf0] }
  0x33   :  { %9950 = vst [vmem:[#allocation49_spill] sm:$0xff] %v6270_v39  ;;  %v6338_v50 = vor.u32 %v5211_v30, %v4981_v31  ;;  %v4949_v30 = vld [vmem:[%s9624_s1 + $0x70] sm:$0xf0]  ;;  %v4955_v31 = vld [vmem:[%s9624_s1 + $0x58] sm:$0xf] }
  0x34   :  { %9951 = vst [vmem:[#allocation50_spill] sm:$0xff] %v6300_v12 }
  0x35   :  { %515 = vmatpush.bf16.xpose.msra.mxu0 %v6072_v24  ;;  %528 = vmatpush.bf16.xpose.msra.mxu1 %v6074_v25  ;;  %9953 = vst [vmem:[#allocation52_spill] sm:$0xff] %v6304_v14 }
  0x36   :  { %541 = vmatpush.bf16.xpose.msra.mxu2 %v6076_v26  ;;  %9956 = vst [vmem:[#allocation55_spill] sm:$0xff] %v6338_v50 }
  0x37   :  { %554 = vmatpush.bf16.xpose.msra.mxu3 %v6078_v27  ;;  %v39_v27 = vld [vmem:[%s9626_s0 + $0x20] sm:$0xff] }
  0x3d   :  { %516 = vmatpush.bf16.xpose.msra.mxu0 %v6117_v43  ;;  %529 = vmatpush.bf16.xpose.msra.mxu1 %v6128_v51 }
  0x3e   :  { %542 = vmatpush.bf16.xpose.msra.mxu2 %v6130_v52 }
  0x3f   :  { %555 = vmatpush.bf16.xpose.msra.mxu3 %v6138_v55 }
  0x44   :  { %517 = vmatmul.bf16.vlgmr.msra.gmra.mxu0 %v178_v42  ;;  %530 = vmatmul.bf16.vlgmr.msra.gmra.mxu1 %v179_v54  ;;  %v5219_v42 = vld [vmem:[%s9624_s1 + $0xd4] sm:$0xf]  ;;  %v5021_v54 = vld [vmem:[%s9624_s1 + $0xf8] sm:$0xf0] }
  0x45   :  { %561 = vmatpush.bf16.xpose.msrb.mxu0 %v6140_v60  ;;  %574 = vmatpush.bf16.xpose.msrb.mxu1 %v6142_v61  ;;  %v6306_v15 = vor.u32 %v5220_v53, %v5021_v54  ;;  %v6340_v53 = vor.u32 %v5216_v41, %v4987_v40  ;;  %v5208_v40 = vld [vmem:[%s9624_s1 + $0x74] sm:$0xf0]  ;;  %v5204_v41 = vld [vmem:[%s9624_s1 + $0x5c] sm:$0xf] }
  0x46   :  { %587 = vmatpush.bf16.xpose.msrb.mxu2 %v6144_v62  ;;  %556 = vmatmul.bf16.vlgmr.msra.gmra.mxu3 %v181_v48  ;;  %v5013_v48 = vld [vmem:[%s9624_s1 + $0xf0] sm:$0xf0] }
  0x47   :  { %600 = vmatpush.bf16.xpose.msrb.mxu3 %v6147_v63  ;;  %543 = vmatmul.bf16.vlgmr.msra.gmra.mxu2 %v180_v17  ;;  %v5232_v17 = vld [vmem:[%s9624_s1 + $0x134] sm:$0xf0]  ;;  %v6302_v13 = vor.u32 %v5219_v42, %v5013_v48  ;;  %9954 = vst [vmem:[#allocation53_spill] sm:$0xff] %v6306_v15  ;;  %v5212_v42 = vld [vmem:[%s9624_s1 + $0x9c] sm:$0xf] }
  0x48   :  { %v6268_v38 = vor.u32 %v5232_v17, %v5051_v16  ;;  %v4979_v16 = vld [vmem:[%s9624_s1 + $0x90] sm:$0xf]  ;;  %v4989_v48 = vld [vmem:[%s9624_s1 + $0xb8] sm:$0xf0]  ;;  %9957 = vst [vmem:[#allocation56_spill] sm:$0xff] %v6340_v53 }
  0x49   :  { %9952 = vst [vmem:[#allocation51_spill] sm:$0xff] %v6302_v13  ;;  %v5215_v17 = vld [vmem:[%s9624_s1 + $0xac] sm:$0xf0]  ;;  %v6342_v54 = vor.u32 %v5212_v42, %v4989_v48  ;;  %v4957_v42 = vld [vmem:[%s9624_s1 + $0x78] sm:$0xf0] }
  0x4a   :  { %9949 = vst [vmem:[#allocation48_spill] sm:$0xff] %v6268_v38  ;;  %v6336_v49 = vor.u32 %v5215_v17, %v4979_v16  ;;  %v5207_v16 = vld [vmem:[%s9624_s1 + $0x6c] sm:$0xf0]  ;;  %v5203_v17 = vld [vmem:[%s9624_s1 + $0x54] sm:$0xf] }
  0x4b   :  { %9958 = vst [vmem:[#allocation57_spill] sm:$0xff] %v6342_v54 }
  0x4c   :  { %9955 = vst [vmem:[#allocation54_spill] sm:$0xff] %v6336_v49 }
  0x4d   :  { %562 = vmatpush.bf16.xpose.msrb.mxu0 %v6183_v18  ;;  %575 = vmatpush.bf16.xpose.msrb.mxu1 %v6185_v19 }
  0x4e   :  { %588 = vmatpush.bf16.xpose.msrb.mxu2 %v6187_v28  ;;  %v4915_v28 = vld [vmem:[%s9624_s1 + $0x10] sm:$0xf] }
  0x4f   :  { %601 = vmatpush.bf16.xpose.msrb.mxu3 %v6189_v29 }
  0x55   :  { %563 = vmatpush.bf16.xpose.msrb.mxu0 %v6228_v0  ;;  %576 = vmatpush.bf16.xpose.msrb.mxu1 %v6230_v1 }
  0x56   :  { %589 = vmatpush.bf16.xpose.msrb.mxu2 %v6232_v2  ;;  %v6378_v2 = vor.u32 %v5204_v41, %v4957_v42  ;;  %v4925_v41 = vld [vmem:[%s9624_s1 + $0x38] sm:$0xf0] }
  0x57   :  { %602 = vmatpush.bf16.xpose.msrb.mxu3 %v6234_v4 }
  0x58   :  { %9962 = vst [vmem:[#allocation61_spill] sm:$0xff] %v6378_v2 }
  0x5d   :  { %564 = vmatpush.bf16.xpose.msrb.mxu0 %v6264_v36  ;;  %577 = vmatpush.bf16.xpose.msrb.mxu1 %v6266_v37 }
  0x5e   :  { %590 = vmatpush.bf16.xpose.msrb.mxu2 %v6268_v38  ;;  %v6376_v38 = vor.u32 %v5208_v40, %v4955_v31  ;;  %v5200_v31 = vld [vmem:[%s9624_s1 + $0x34] sm:$0xf0]  ;;  %v5196_v40 = vld [vmem:[%s9624_s1 + $0x1c] sm:$0xf] }
  0x5f   :  { %603 = vmatpush.bf16.xpose.msrb.mxu3 %v6270_v39  ;;  %v6414_v55 = vor.u32 %v5196_v40, %v4925_v41  ;;  %v5263_v41 = vld [vmem:[%s9628_s3 + $0x30] sm:$0xff] }
  0x60   :  { %9961 = vst [vmem:[#allocation60_spill] sm:$0xff] %v6376_v38 }
  0x61   :  { %9966 = vst [vmem:[#allocation65_spill] sm:$0xff] %v6414_v55 }
  0x65   :  { %565 = vmatpush.bf16.xpose.msrb.mxu0 %v6300_v12  ;;  %578 = vmatpush.bf16.xpose.msrb.mxu1 %v6302_v13 }
  0x66   :  { %591 = vmatpush.bf16.xpose.msrb.mxu2 %v6304_v14  ;;  %v4947_v14 = vld [vmem:[%s9624_s1 + $0x50] sm:$0xf] }
  0x67   :  { %604 = vmatpush.bf16.xpose.msrb.mxu3 %v6306_v15  ;;  %v6372_v48 = vor.u32 %v5207_v16, %v4947_v14  ;;  %v5199_v14 = vld [vmem:[%s9624_s1 + $0x2c] sm:$0xf0]  ;;  %v5195_v16 = vld [vmem:[%s9624_s1 + $0x14] sm:$0xf] }
  0x68   :  { %v6408_v42 = vor.u32 %v5199_v14, %v4915_v28  ;;  %v40_v28 = vld [vmem:[%s9626_s0 + $0x28] sm:$0xff]  ;;  %v41_v14 = vld [vmem:[%s9626_s0 + $0x30] sm:$0xff] }
  0x69   :  { %9959 = vst [vmem:[#allocation58_spill] sm:$0xff] %v6372_v48 }
  0x6a   :  { %9963 = vst [vmem:[#allocation62_spill] sm:$0xff] %v6408_v42 }
  0x6d   :  { %566 = vmatpush.bf16.xpose.msrb.mxu0 %v6336_v49  ;;  %579 = vmatpush.bf16.xpose.msrb.mxu1 %v6338_v50 }
  0x6e   :  { %592 = vmatpush.bf16.xpose.msrb.mxu2 %v6340_v53  ;;  %v6374_v53 = vor.u32 %v5203_v17, %v4949_v30  ;;  %v4917_v17 = vld [vmem:[%s9624_s1 + $0x30] sm:$0xf0]  ;;  %v4923_v30 = vld [vmem:[%s9624_s1 + $0x18] sm:$0xf] }
  0x6f   :  { %605 = vmatpush.bf16.xpose.msrb.mxu3 %v6342_v54  ;;  %v6412_v62 = vor.u32 %v5200_v31, %v4923_v30  ;;  %v183_v30 = vpack.c.bf16 %v40_v28, %v40_v28  ;;  %v184_v31 = vpack.c.bf16 %v41_v14, %v41_v14  ;;  %v140_v28 = vld [vmem:[%s9629_s5 + $0x78] sm:$0xff]  ;;  %v139_v14 = vld [vmem:[%s9629_s5 + $0x70] sm:$0xff] }
  0x70   :  { %9960 = vst [vmem:[#allocation59_spill] sm:$0xff] %v6374_v53 }
  0x71   :  { %9965 = vst [vmem:[#allocation64_spill] sm:$0xff] %v6412_v62 }
  0x75   :  { %567 = vmatpush.bf16.xpose.msrb.mxu0 %v6372_v48  ;;  %580 = vmatpush.bf16.xpose.msrb.mxu1 %v6374_v53 }
  0x76   :  { %593 = vmatpush.bf16.xpose.msrb.mxu2 %v6376_v38  ;;  %v6410_v38 = vor.u32 %v5195_v16, %v4917_v17  ;;  %v42_v16 = vld [vmem:[%s9626_s0 + $0x38] sm:$0xff]  ;;  %v182_v17 = vpack.c.bf16 %v39_v27, %v39_v27 }
  0x77   :  { %606 = vmatpush.bf16.xpose.msrb.mxu3 %v6378_v2  ;;  %v185_v40 = vpack.c.bf16 %v42_v16, %v42_v16  ;;  %v5264_v27 = vld [vmem:[%s9628_s3 + $0x38] sm:$0xff]  ;;  %v5262_v16 = vld [vmem:[%s9628_s3 + $0x28] sm:$0xff] }
  0x78   :  { %9964 = vst [vmem:[#allocation63_spill] sm:$0xff] %v6410_v38 }
  0x7d   :  { %568 = vmatpush.bf16.xpose.msrb.mxu0 %v6408_v42  ;;  %581 = vmatpush.bf16.xpose.msrb.mxu1 %v6410_v38 }
  0x7e   :  { %594 = vmatpush.bf16.xpose.msrb.mxu2 %v6412_v62 }
  0x7f   :  { %607 = vmatpush.bf16.xpose.msrb.mxu3 %v6414_v55 }
  0x84   :  { %569 = vmatmul.bf16.vlgmr.msrb.gmra.mxu0 %v182_v17  ;;  %582 = vmatmul.bf16.vlgmr.msrb.gmra.mxu1 %v183_v30  ;;  %v138_v17 = vld [vmem:[%s9629_s5 + $0x68] sm:$0xff]  ;;  %v137_v30 = vld [vmem:[%s9629_s5 + $0x60] sm:$0xff] }
  0x85   :  { %595 = vmatmul.bf16.vlgmr.msrb.gmra.mxu2 %v184_v31  ;;  %666 = vmatpush.bf16.msra.mxu0 %v5264_v27  ;;  %v136_v31 = vld [vmem:[%s9629_s5 + $0x58] sm:$0xff]  ;;  %v135_v27 = vld [vmem:[%s9629_s5 + $0x50] sm:$0xff] }
  0x86   :  { %1746 = vmatpush.bf16.msra.mxu2 %v5841_v3  ;;  %608 = vmatmul.bf16.vlgmr.msrb.gmra.mxu3 %v185_v40  ;;  %v5261_v40 = vld [vmem:[%s9628_s3 + $0x20] sm:$0xff] }
  0x87   :  { %1798 = vmatpush.bf16.msra.mxu3 %v6140_v60  ;;  %811 = vmatpush.msra.mxu1 %v140_v28 }
  0x89   :  { %812 = vmatpush.msra.mxu1 %v139_v14  ;;  %667 = vmatpush.bf16.msra.mxu0 %v5263_v41 }
  0x8a   :  { %1747 = vmatpush.bf16.msra.mxu2 %v5892_v20 }
  0x8b   :  { %1799 = vmatpush.bf16.msra.mxu3 %v6183_v18  ;;  %813 = vmatpush.msra.mxu1 %v138_v17 }
  0x8d   :  { %668 = vmatpush.bf16.msra.mxu0 %v5262_v16  ;;  %814 = vmatpush.msra.mxu1 %v137_v30  ;;  %v5260_v30 = vld [vmem:[%s9628_s3 + $0x18] sm:$0xff] }
  0x8e   :  { %1748 = vmatpush.bf16.msra.mxu2 %v5928_v32 }
  0x8f   :  { %1800 = vmatpush.bf16.msra.mxu3 %v6228_v0  ;;  %815 = vmatpush.msra.mxu1 %v136_v31  ;;  %v133_v31 = vld [vmem:[%s9629_s5 + $0x40] sm:$0xff] }
  0x91   :  { %669 = vmatpush.bf16.msra.mxu0 %v5261_v40  ;;  %816 = vmatpush.msra.mxu1 %v135_v27  ;;  %v130_v40 = vld [vmem:[%s9629_s5 + $0x28] sm:$0xff]  ;;  %v129_v27 = vld [vmem:[%s9629_s5 + $0x20] sm:$0xff] }
  0x92   :  { %1749 = vmatpush.bf16.msra.mxu2 %v5964_v44 }
  0x93   :  { %1801 = vmatpush.bf16.msra.mxu3 %v6264_v36 }
  0x95   :  { %670 = vmatpush.bf16.msra.mxu0 %v5260_v30  ;;  %v128_v30 = vld [vmem:[%s9629_s5 + $0x18] sm:$0xff] }
  0x96   :  { %1750 = vmatpush.bf16.msra.mxu2 %v6000_v56 }
  0x97   :  { %1802 = vmatpush.bf16.msra.mxu3 %v6300_v12 }
  0x9a   :  { %1751 = vmatpush.bf16.msra.mxu2 %v6036_v5 }
  0x9b   :  { %1803 = vmatpush.bf16.msra.mxu3 %v6336_v49 }
  0x9e   :  { %1752 = vmatpush.bf16.msra.mxu2 %v6072_v24 }
  0x9f   :  { %1804 = vmatpush.bf16.msra.mxu3 %v6372_v48 }
  0xa2   :  { %1753 = vmatpush.bf16.msra.mxu2 %v6117_v43 }
  0xa3   :  { %1805 = vmatpush.bf16.msra.mxu3 %v6408_v42 }
  0xa6   :  { %1759 = vmatpush.bf16.msrb.mxu2 %v5852_v7 }
  0xa7   :  { %1837 = vmatpush.bf16.msrb.mxu3 %v6147_v63 }
  0xaa   :  { %1760 = vmatpush.bf16.msrb.mxu2 %v5894_v21 }
  0xab   :  { %1838 = vmatpush.bf16.msrb.mxu3 %v6189_v29 }
  0xae   :  { %1761 = vmatpush.bf16.msrb.mxu2 %v5930_v33 }
  0xaf   :  { %1839 = vmatpush.bf16.msrb.mxu3 %v6234_v4 }
  0xb2   :  { %1762 = vmatpush.bf16.msrb.mxu2 %v5966_v45 }
  0xb3   :  { %1840 = vmatpush.bf16.msrb.mxu3 %v6270_v39 }
  0xb6   :  { %1763 = vmatpush.bf16.msrb.mxu2 %v6002_v57 }
  0xb7   :  { %1841 = vmatpush.bf16.msrb.mxu3 %v6306_v15 }
  0xba   :  { %1764 = vmatpush.bf16.msrb.mxu2 %v6038_v6 }
  0xbb   :  { %1842 = vmatpush.bf16.msrb.mxu3 %v6342_v54 }
  0xbe   :  { %1765 = vmatpush.bf16.msrb.mxu2 %v6074_v25 }
  0xbf   :  { %1843 = vmatpush.bf16.msrb.mxu3 %v6378_v2  ;;  %v134_v2 = vld [vmem:[%s9629_s5 + $0x48] sm:$0xff] }
  0xc0   :  { %817 = vmatpush.msra.mxu1 %v134_v2  ;;  %v5258_v2 = vld [vmem:[%s9628_s3 + $0x8] sm:$0xff] }
  0xc1   :  { %v518_v41 = vpop.f32.mrf.mxu0  ;;  %v531_v14 = vpop.f32.mrf.mxu1 }
  0xc2   :  { %1766 = vmatpush.bf16.msrb.mxu2 %v6128_v51  ;;  %818 = vmatpush.msra.mxu1 %v133_v31  ;;  %v127_v31 = vld [vmem:[%s9629_s5 + $0x10] sm:$0xff] }
  0xc3   :  { %1844 = vmatpush.bf16.msrb.mxu3 %v6414_v55 }
  0xc9   :  { %v557_v17 = vpop.f32.mrf.mxu3  ;;  %v520_v42 = vpop.f32.mrf.mxu0 }
  0xca   :  { %v544_v28 = vpop.f32.mrf.mxu2  ;;  %v533_v48 = vpop.f32.mrf.mxu1  ;;  %v131_v42 = vld [vmem:[%s9629_s5 + $0x30] sm:$0xff] }
  0xcb   :  { %v132_v48 = vld [vmem:[%s9629_s5 + $0x38] sm:$0xff] }
  0xcc   :  { %819 = vmatpush.msra.mxu1 %v132_v48  ;;  %v126_v48 = vld [vmem:[%s9629_s5 + $0x8] sm:$0xff] }
  0xce   :  { %820 = vmatpush.msra.mxu1 %v131_v42  ;;  %v125_v42 = vld [vmem:[%s9629_s5] sm:$0xff] }
  0xd0   :  { %821 = vmatpush.msra.mxu1 %v130_v40 }
  0xd1   :  { %v559_v16 = vpop.f32.mrf.mxu3 }
  0xd2   :  { %v546_v55 = vpop.f32.mrf.mxu2  ;;  %822 = vmatpush.msra.mxu1 %v129_v27  ;;  %v5257_v16 = vld [vmem:[%s9628_s3] sm:$0xff] }
  0xd3   :  { %v5259_v55 = vld [vmem:[%s9628_s3 + $0x10] sm:$0xff] }
  0xd4   :  { %671 = vmatpush.bf16.msra.mxu0 %v5259_v55  ;;  %823 = vmatpush.msra.mxu1 %v128_v30  ;;  %v5535_v55 = vld [vmem:[%s9625_s2] ss:$0 sm:$0xff] }
  0xd6   :  { %824 = vmatpush.msra.mxu1 %v127_v31 }
  0xd8   :  { %672 = vmatpush.bf16.msra.mxu0 %v5258_v2  ;;  %825 = vmatpush.msra.mxu1 %v126_v48  ;;  %v519_v2 = vadd.f32 %v5535_v55, %v518_v41 }
  0xda   :  { %826 = vmatpush.msra.mxu1 %v125_v42  ;;  %v532_v40 = vadd.f32 %v531_v14, %v519_v2 }
  0xdc   :  { %673 = vmatpush.bf16.msra.mxu0 %v5257_v16  ;;  %1922 = vmatpush.bf16.xpose.msrb.mxu1 %v5852_v7  ;;  %v545_v27 = vadd.f32 %v544_v28, %v532_v40 }
  0xde   :  { %v558_v16 = vadd.f32 %v557_v17, %v545_v27  ;;  %v9663_v27 = vmov 0.0  }
  0xe0   :  { %1772 = vmatpush.bf16.msrb.mxu0 %v5854_v8 }
  0xe4   :  { %1773 = vmatpush.bf16.msrb.mxu0 %v5896_v22  ;;  %1923 = vmatpush.bf16.xpose.msrb.mxu1 %v5894_v21 }
  0xe8   :  { %1774 = vmatpush.bf16.msrb.mxu0 %v5932_v34 }
  0xec   :  { %1775 = vmatpush.bf16.msrb.mxu0 %v5968_v46  ;;  %1924 = vmatpush.bf16.xpose.msrb.mxu1 %v5930_v33 }
  0xf0   :  { %1776 = vmatpush.bf16.msrb.mxu0 %v6004_v58 }
  0xf4   :  { %1777 = vmatpush.bf16.msrb.mxu0 %v6040_v9  ;;  %1925 = vmatpush.bf16.xpose.msrb.mxu1 %v5966_v45  ;;  %v143_v45 = vld [vmem:[%s9630_s7 + $0x8] sm:$0xff] }
  0xf8   :  { %1778 = vmatpush.bf16.msrb.mxu0 %v6076_v26 }
  0xfc   :  { %1779 = vmatpush.bf16.msrb.mxu0 %v6130_v52  ;;  %1926 = vmatpush.bf16.xpose.msrb.mxu1 %v6002_v57 }
 0x101   :  { %v570_v30 = vpop.f32.mrf.mxu0  ;;  %v583_v31 = vpop.f32.mrf.mxu1 }
 0x102   :  { %v571_v48 = vadd.f32 %v570_v30, %v558_v16 }
 0x104   :  { %v584_v41 = vadd.f32 %v583_v31, %v571_v48  ;;  %v142_v31 = vld [vmem:[%s9630_s7] sm:$0xff]  ;;  %1927 = vmatpush.bf16.xpose.msrb.mxu1 %v6038_v6 }
 0x108   :  { %v596_v55 = vpop.f32.mrf.mxu2 }
 0x109   :  { %v597_v14 = vadd.f32 %v596_v55, %v584_v41  ;;  %v609_v42 = vpop.f32.mrf.mxu3  ;;  %v572_v2 = vpop.f32.mrf.mxu0  ;;  %v6561_v55 = vld [vmem:[%s9627_s6] ss:$0 sm:$0xff] }
 0x10a   :  { %v585_v28 = vpop.f32.mrf.mxu1  ;;  %v144_v2 = vld [vmem:[%s9630_s7 + $0x10] sm:$0xff] }
 0x10b   :  { %v610_v40 = vadd.f32 %v609_v42, %v597_v14  ;;  %v146_v42 = vld [vmem:[%s9630_s7 + $0x20] sm:$0xff] }
 0x10c   :  { %1928 = vmatpush.bf16.xpose.msrb.mxu1 %v6074_v25 }
 0x10d   :  { %v613_v21 = vmax.f32 %v610_v40, 0.0 }
 0x10f   :  { %v614_v17 = vpack.c.bf16 %v613_v21, %v613_v21  ;;  %vm768_vm0 = vcmp.gt.f32.partialorder %v613_v21, 0.0 }
 0x110   :  { %v6552_v16 = vsel %vm768_vm0, 1.0, %v9663_v27  ;;  %v598_v30 = vpop.f32.mrf.mxu2 }
 0x111   :  { %v611_v48 = vpop.f32.mrf.mxu3  ;;  %674 = vmatmul.bf16.vlgmr.msra.gmra.mxu0 %v614_v17  ;;  %v779_v41 = vperm.slane %v6552_v16, 0  ;;  %v773_v21 = vrot.slane %v6552_v16, 2  ;;  %v772_v14 = vrot.slane %v6552_v16, 1  ;;  %v774_v52 = vrot.slane %v6552_v16, 3 }
 0x112   :  { %1811 = vmatpush.bf16.msra.mxu0 %v6142_v61  ;;  %v777_v54 = vrot.slane %v6552_v16, 6 }
 0x113   :  { %v6572_v28 = vmul.f32 %v779_v41, %v142_v31  ;;  %v781_v40 = vperm.slane %v773_v21, 0  ;;  %v780_v17 = vperm.slane %v772_v14, 0  ;;  %v147_v14 = vld [vmem:[%s9630_s7 + $0x28] sm:$0xff] }
 0x114   :  { %1929 = vmatpush.bf16.xpose.msrb.mxu1 %v6128_v51 }
 0x115   :  { %827 = vmatmul.f32.vlgmr.msra.gmra.mxu1 %v6572_v28  ;;  %v927_v30 = vmul.f32 %v6561_v55, %v6572_v28  ;;  %v6577_v48 = vmul.f32 %v781_v40, %v146_v42  ;;  %v6579_v27 = vmul.f32 %v780_v17, %v144_v2  ;;  %v145_v42 = vld [vmem:[%s9630_s7 + $0x18] sm:$0xff]  ;;  %v6596_v2 = vmul.f32 %v779_v41, %v143_v45  ;;  %v151_v45 = vld [vmem:[%s9630_s7 + $0x48] sm:$0xff] }
 0x116   :  { %1812 = vmatpush.bf16.msra.mxu0 %v6185_v19  ;;  %v6600_v33 = vmul.f32 %v781_v40, %v147_v14  ;;  %v6602_v7 = vmul.f32 %v780_v17, %v145_v42  ;;  %v782_v17 = vperm.slane %v774_v52, 0  ;;  %v776_v14 = vrot.slane %v6552_v16, 5 }
 0x117   :  { %943 = vadd.xlane.f32.xlu0 %v927_v30  ;;  %v931_v31 = vmul.f32 %v6561_v55, %v6577_v48  ;;  %v929_v21 = vmul.f32 %v6561_v55, %v6579_v27  ;;  %v775_v30 = vrot.slane %v6552_v16, 4  ;;  %v928_v26 = vmul.f32 %v6561_v55, %v6596_v2 }
 0x118   :  { %v932_v41 = vmul.f32 %v6561_v55, %v6600_v33  ;;  %v930_v40 = vmul.f32 %v6561_v55, %v6602_v7  ;;  %v784_v49 = vperm.slane %v776_v14, 0  ;;  %v778_v14 = vrot.slane %v6552_v16, 7 }
 0x119   :  { %951 = vadd.xlane.f32.xlu2 %v931_v31  ;;  %947 = vadd.xlane.f32.xlu1 %v929_v21  ;;  %v783_v57 = vperm.slane %v775_v30, 0  ;;  %v149_v31 = vld [vmem:[%s9630_s7 + $0x38] sm:$0xff]  ;;  %v148_v21 = vld [vmem:[%s9630_s7 + $0x30] sm:$0xff]  ;;  %v785_v16 = vperm.slane %v777_v54, 0 }
 0x11a   :  { %1813 = vmatpush.bf16.msra.mxu0 %v6230_v1  ;;  %v6627_v42 = vmul.f32 %v782_v17, %v149_v31  ;;  %v6629_v52 = vmul.f32 %v782_v17, %v148_v21  ;;  %v150_v17 = vld [vmem:[%s9630_s7 + $0x40] sm:$0xff]  ;;  %v153_v31 = vld [vmem:[%s9630_s7 + $0x58] sm:$0xff]  ;;  %v786_v25 = vperm.slane %v778_v14, 0 }
 0x11b   :  { %v6655_v6 = vmul.f32 %v784_v49, %v153_v31 }
 0x11c   :  { %1974 = vmatpush.bf16.xpose.msra.mxu1 %v6142_v61 }
 0x11d   :  { %830 = vmatmul.f32.gmra.mxu1 %v6596_v2 }
 0x11e   :  { %1814 = vmatpush.bf16.msra.mxu0 %v6266_v37 }
 0x11f   :  { %945 = vadd.xlane.f32.xlu0 %v928_v26  ;;  %v6623_v26 = vmul.f32 %v783_v57, %v151_v45  ;;  %v934_v45 = vmul.f32 %v6561_v55, %v6627_v42 }
 0x121   :  { %953 = vadd.xlane.f32.xlu2 %v932_v41  ;;  %949 = vadd.xlane.f32.xlu1 %v930_v40  ;;  %v936_v30 = vmul.f32 %v6561_v55, %v6623_v26  ;;  %v152_v41 = vld [vmem:[%s9630_s7 + $0x50] sm:$0xff]  ;;  %v933_v40 = vmul.f32 %v6561_v55, %v6629_v52 }
 0x122   :  { %1815 = vmatpush.bf16.msra.mxu0 %v6302_v13  ;;  %v6649_v21 = vmul.f32 %v784_v49, %v152_v41  ;;  %v157_v41 = vld [vmem:[%s9630_s7 + $0x78] sm:$0xff]  ;;  %v938_v49 = vmul.f32 %v6561_v55, %v6655_v6 }
 0x124   :  { %v937_v9 = vmul.f32 %v6561_v55, %v6649_v21  ;;  %1975 = vmatpush.bf16.xpose.msra.mxu1 %v6185_v19 }
 0x125   :  { %833 = vmatmul.f32.gmra.mxu1 %v6579_v27 }
 0x126   :  { %1816 = vmatpush.bf16.msra.mxu0 %v6338_v50 }
 0x127   :  { %961 = vadd.xlane.f32.xlu0 %v936_v30  ;;  %v6653_v30 = vmul.f32 %v783_v57, %v150_v17 }
 0x129   :  { %957 = vadd.xlane.f32.xlu2 %v934_v45  ;;  %955 = vadd.xlane.f32.xlu1 %v933_v40  ;;  %v935_v57 = vmul.f32 %v6561_v55, %v6653_v30  ;;  %v155_v45 = vld [vmem:[%s9630_s7 + $0x68] sm:$0xff]  ;;  %v154_v40 = vld [vmem:[%s9630_s7 + $0x60] sm:$0xff] }
 0x12a   :  { %1817 = vmatpush.bf16.msra.mxu0 %v6374_v53  ;;  %v6679_v17 = vmul.f32 %v785_v16, %v155_v45  ;;  %v6681_v31 = vmul.f32 %v785_v16, %v154_v40  ;;  %v158_v40 = vld [vmem:[%s9632_s8] sm:$0xff] }
 0x12c   :  { %9968 = vst [vmem:[#allocation67_spill] sm:$0xff] %v6679_v17  ;;  %v940_v14 = vmul.f32 %v6561_v55, %v6679_v17  ;;  %1976 = vmatpush.bf16.xpose.msra.mxu1 %v6230_v1  ;;  %v161_v1 = vld [vmem:[%s9632_s8 + $0x18] sm:$0xff] }
 0x12d   :  { %836 = vmatmul.f32.gmra.mxu1 %v6602_v7  ;;  %9969 = vst [vmem:[#allocation68_spill] sm:$0xff] %v6681_v31 }
 0x12e   :  { %1818 = vmatpush.bf16.msra.mxu0 %v6410_v38 }
 0x12f   :  { %963 = vadd.xlane.f32.xlu0 %v937_v9  ;;  %v6676_v9 = vmul.f32 %v786_v25, %v157_v41  ;;  %v156_v41 = vld [vmem:[%s9630_s7 + $0x70] sm:$0xff] }
 0x131   :  { %959 = vadd.xlane.f32.xlu2 %v935_v57  ;;  %965 = vadd.xlane.f32.xlu1 %v938_v49  ;;  %9967 = vst [vmem:[#allocation66_spill] sm:$0xff] %v6676_v9  ;;  %v942_v54 = vmul.f32 %v6561_v55, %v6676_v9  ;;  %v939_v57 = vmul.f32 %v6561_v55, %v6681_v31 }
 0x132   :  { %v6694_v49 = vmul.f32 %v786_v25, %v156_v41  ;;  %v5537_v25 = vld [vmem:[%s9631_s4] ss:$0 sm:$0xff]  ;;  %v160_v41 = vld [vmem:[%s9632_s8 + $0x10] sm:$0xff] }
 0x134   :  { %9970 = vst [vmem:[#allocation69_spill] sm:$0xff] %v6694_v49  ;;  %v941_v16 = vmul.f32 %v6561_v55, %v6694_v49  ;;  %1977 = vmatpush.bf16.xpose.msra.mxu1 %v6266_v37 }
 0x135   :  { %839 = vmatmul.f32.gmra.mxu1 %v6577_v48 }
 0x137   :  { %973 = vadd.xlane.f32.xlu0 %v942_v54 }
 0x139   :  { %969 = vadd.xlane.f32.xlu2 %v940_v14  ;;  %967 = vadd.xlane.f32.xlu1 %v939_v57 }
 0x13c   :  { %1978 = vmatpush.bf16.xpose.msra.mxu1 %v6302_v13  ;;  %v159_v13 = vld [vmem:[%s9632_s8 + $0x8] sm:$0xff] }
 0x13d   :  { %842 = vmatmul.f32.gmra.mxu1 %v6600_v33 }
 0x141   :  { %971 = vadd.xlane.f32.xlu2 %v941_v16 }
 0x144   :  { %1979 = vmatpush.bf16.xpose.msra.mxu1 %v6338_v50 }
 0x145   :  { %845 = vmatmul.f32.gmra.mxu1 %v6629_v52 }
 0x14c   :  { %1980 = vmatpush.bf16.xpose.msra.mxu1 %v6374_v53 }
 0x14d   :  { %848 = vmatmul.f32.gmra.mxu1 %v6627_v42 }
 0x154   :  { %1981 = vmatpush.bf16.xpose.msra.mxu1 %v6410_v38 }
 0x155   :  { %851 = vmatmul.f32.gmra.mxu1 %v6653_v30 }
 0x15d   :  { %854 = vmatmul.f32.gmra.mxu1 %v6623_v26 }
 0x165   :  { %857 = vmatmul.f32.gmra.mxu1 %v6649_v21 }
 0x16d   :  { %860 = vmatmul.f32.gmra.mxu1 %v6655_v6 }
 0x175   :  { %863 = vmatmul.f32.gmra.mxu1 %v6681_v31 }
 0x17d   :  { %866 = vmatmul.f32.gmra.mxu1 %v6679_v17 }
 0x185   :  { %869 = vmatmul.f32.gmra.mxu1 %v6694_v49 }
 0x18d   :  { %872 = vmatmul.f32.gmra.mxu1 %v6676_v9 }
 0x18e   :  { %v675_v55 = vpop.f32.mrf.mxu0 }
 0x18f   :  { %v6718_v45 = vadd.f32 %v5537_v25, %v675_v55 }
 0x191   :  { %v687_v54 = vperm.slane %v6718_v45, 0  ;;  %v680_v14 = vrot.slane %v6718_v45, 1  ;;  %v681_v25 = vrot.slane %v6718_v45, 2 }
 0x192   :  { %v828_v57 = vpop.f32.mrf.mxu1 }
 0x193   :  { %v876_v16 = vmul.f32 %v828_v57, %v6572_v28  ;;  %v703_v38 = vmul.f32 %v687_v54, %v158_v40  ;;  %v688_v53 = vperm.slane %v680_v14, 0  ;;  %v689_v40 = vperm.slane %v681_v25, 0 }
 0x194   :  { %v704_v14 = vmul.f32 %v687_v54, %v159_v13 }
 0x195   :  { %892 = vadd.xlane.f32.xlu0 %v876_v16  ;;  %v720_v55 = vsel %vm9861_vm1, %v703_v38, 0.0  ;;  %v705_v50 = vmul.f32 %v688_v53, %v160_v41  ;;  %v163_v38 = vld [vmem:[%s9632_s8 + $0x28] sm:$0xff]  ;;  %v706_v41 = vmul.f32 %v688_v53, %v161_v1  ;;  %v682_v16 = vrot.slane %v6718_v45, 3  ;;  %v164_v1 = vld [vmem:[%s9632_s8 + $0x30] sm:$0xff] }
 0x196   :  { %v677_v37 = vpop.f32.mrf.mxu0  ;;  %721 = vadd.xlane.f32.xlu2 %v720_v55  ;;  %v708_v61 = vmul.f32 %v689_v40, %v163_v38 }
 0x197   :  { %v726_v57 = vsel %vm9861_vm1, %v705_v50, 0.0  ;;  %v723_v37 = vsel %vm9861_vm1, %v704_v14, 0.0  ;;  %v729_v55 = vsel %vm9861_vm1, %v706_v41, 0.0  ;;  %v162_v50 = vld [vmem:[%s9632_s8 + $0x20] sm:$0xff]  ;;  %v6747_v25 = vperm.slane %v682_v16, 0 }
 0x198   :  { %727 = vadd.xlane.f32.xlu1 %v726_v57  ;;  %v735_v13 = vsel %vm9861_vm1, %v708_v61, 0.0  ;;  %v707_v53 = vmul.f32 %v689_v40, %v162_v50 }
 0x199   :  { %v709_v54 = vmul.f32 %v6747_v25, %v164_v1 }
 0x19a   :  { %v831_v19 = vpop.f32.mrf.mxu1  ;;  %v732_v14 = vsel %vm9861_vm1, %v707_v53, 0.0 }
 0x19b   :  { %v738_v38 = vsel %vm9861_vm1, %v709_v54, 0.0  ;;  %v877_v41 = vmul.f32 %v831_v19, %v6596_v2 }
 0x19d   :  { %724 = vadd.xlane.f32.xlu0 %v723_v37 }
 0x19e   :  { %730 = vadd.xlane.f32.xlu2 %v729_v55 }
 0x1a0   :  { %736 = vadd.xlane.f32.xlu1 %v735_v13 }
 0x1a2   :  { %v834_v57 = vpop.f32.mrf.mxu1 }
 0x1a3   :  { %v878_v55 = vmul.f32 %v834_v57, %v6579_v27 }
 0x1a5   :  { %733 = vadd.xlane.f32.xlu0 %v732_v14 }
 0x1a6   :  { %739 = vadd.xlane.f32.xlu2 %v738_v38 }
 0x1a8   :  { %894 = vadd.xlane.f32.xlu1 %v877_v41 }
 0x1aa   :  { %v837_v16 = vpop.f32.mrf.mxu1 }
 0x1ab   :  { %v879_v37 = vmul.f32 %v837_v16, %v6602_v7 }
 0x1ad   :  { %898 = vadd.xlane.f32.xlu0 %v879_v37 }
 0x1ae   :  { %896 = vadd.xlane.f32.xlu2 %v878_v55 }
 0x1b2   :  { %v840_v61 = vpop.f32.mrf.mxu1 }
 0x1b3   :  { %v880_v40 = vmul.f32 %v840_v61, %v6577_v48 }
 0x1b5   :  { %900 = vadd.xlane.f32.xlu0 %v880_v40 }
 0x1ba   :  { %v843_v50 = vpop.f32.mrf.mxu1 }
 0x1bb   :  { %v881_v1 = vmul.f32 %v843_v50, %v6600_v33 }
 0x1bd   :  { %902 = vadd.xlane.f32.xlu1 %v881_v1  ;;  %v6768_v1 = vpop.xlane.xlu2 %951 }
 0x1c2   :  { %v846_v13 = vpop.f32.mrf.mxu1 }
 0x1c3   :  { %v882_v53 = vmul.f32 %v846_v13, %v6629_v52  ;;  %v683_v13 = vrot.slane %v6718_v45, 4 }
 0x1c5   :  { %904 = vadd.xlane.f32.xlu1 %v882_v53 }
 0x1ca   :  { %v849_v19 = vpop.f32.mrf.mxu1 }
 0x1cb   :  { %v883_v54 = vmul.f32 %v849_v19, %v6627_v42 }
 0x1cd   :  { %906 = vadd.xlane.f32.xlu2 %v883_v54  ;;  %v6772_v54 = vpop.xlane.xlu0 %943 }
 0x1d2   :  { %v852_v14 = vpop.f32.mrf.mxu1 }
 0x1d3   :  { %v884_v57 = vmul.f32 %v852_v14, %v6653_v30  ;;  %v691_v14 = vperm.slane %v683_v13, 0  ;;  %v170_v13 = vld [vmem:[%s9632_s8 + $0x60] sm:$0xff] }
 0x1d5   :  { %908 = vadd.xlane.f32.xlu2 %v884_v57  ;;  %v167_v57 = vld [vmem:[%s9632_s8 + $0x48] sm:$0xff] }
 0x1da   :  { %v855_v38 = vpop.f32.mrf.mxu1 }
 0x1db   :  { %v885_v41 = vmul.f32 %v855_v38, %v6623_v26  ;;  %v712_v38 = vmul.f32 %v691_v14, %v167_v57 }
 0x1dd   :  { %910 = vadd.xlane.f32.xlu0 %v885_v41  ;;  %v685_v41 = vrot.slane %v6718_v45, 6 }
 0x1e2   :  { %v858_v16 = vpop.f32.mrf.mxu1 }
 0x1e3   :  { %v886_v37 = vmul.f32 %v858_v16, %v6649_v21  ;;  %v6778_v16 = vpop.xlane.xlu2 %953 }
 0x1e4   :  { %v980_v5 = vmul.f32 2e-05, %v6778_v16 }
 0x1e5   :  { %912 = vadd.xlane.f32.xlu0 %v886_v37 }
 0x1ea   :  { %v861_v55 = vpop.f32.mrf.mxu1 }
 0x1eb   :  { %v887_v61 = vmul.f32 %v861_v55, %v6655_v6 }
 0x1ed   :  { %914 = vadd.xlane.f32.xlu1 %v887_v61  ;;  %v747_v61 = vsel %vm9861_vm1, %v712_v38, 0.0  ;;  %v686_v38 = vrot.slane %v6718_v45, 7 }
 0x1ef   :  { %v694_v36 = vperm.slane %v686_v38, 0 }
 0x1f2   :  { %v864_v40 = vpop.f32.mrf.mxu1 }
 0x1f3   :  { %v888_v50 = vmul.f32 %v864_v40, %v6681_v31  ;;  %v693_v40 = vperm.slane %v685_v41, 0 }
 0x1f5   :  { %916 = vadd.xlane.f32.xlu1 %v888_v50  ;;  %v165_v50 = vld [vmem:[%s9632_s8 + $0x38] sm:$0xff]  ;;  %v715_v51 = vmul.f32 %v693_v40, %v170_v13 }
 0x1f6   :  { %v710_v57 = vmul.f32 %v6747_v25, %v165_v50  ;;  %v168_v25 = vld [vmem:[%s9632_s8 + $0x50] sm:$0xff]  ;;  %v166_v50 = vld [vmem:[%s9632_s8 + $0x40] sm:$0xff] }
 0x1f7   :  { %v756_v15 = vsel %vm9861_vm1, %v715_v51, 0.0 }
 0x1f8   :  { %v741_v12 = vsel %vm9861_vm1, %v710_v57, 0.0 }
 0x1fa   :  { %v867_v53 = vpop.f32.mrf.mxu1 }
 0x1fb   :  { %v889_v19 = vmul.f32 %v867_v53, %v6679_v17  ;;  %v6788_v53 = vpop.xlane.xlu1 %947 }
 0x1fc   :  { %v977_v63 = vmul.f32 2e-05, %v6788_v53 }
 0x1fd   :  { %918 = vadd.xlane.f32.xlu2 %v889_v19  ;;  %v946_v19 = vpop.xlane.xlu0 %945 }
 0x1fe   :  { %v976_v22 = vmul.f32 2e-05, %v946_v19 }
 0x202   :  { %v870_v37 = vpop.f32.mrf.mxu1 }
 0x203   :  { %v890_v55 = vmul.f32 %v870_v37, %v6694_v49  ;;  %v684_v37 = vrot.slane %v6718_v45, 5  ;;  %v173_v45 = vld [vmem:[%s9632_s8 + $0x78] sm:$0xff]  ;;  %v950_v13 = vpop.xlane.xlu1 %949 }
 0x204   :  { %v978_v60 = vmul.f32 2e-05, %v950_v13 }
 0x205   :  { %920 = vadd.xlane.f32.xlu0 %v890_v55  ;;  %748 = vadd.xlane.f32.xlu2 %v747_v61  ;;  %v6794_v61 = vpop.xlane.xlu2 %957  ;;  %v692_v58 = vperm.slane %v684_v37, 0  ;;  %v6807_v57 = vpop.xlane.xlu0 %961  ;;  %v718_v37 = vmul.f32 %v694_v36, %v173_v45 }
 0x207   :  { %v713_v51 = vmul.f32 %v692_v58, %v168_v25  ;;  %v765_v38 = vsel %vm9861_vm1, %v718_v37, 0.0  ;;  %v169_v25 = vld [vmem:[%s9632_s8 + $0x58] sm:$0xff] }
 0x208   :  { %v714_v45 = vmul.f32 %v692_v58, %v169_v25 }
 0x20a   :  { %v873_v41 = vpop.f32.mrf.mxu1 }
 0x20b   :  { %v891_v55 = vmul.f32 %v873_v41, %v6676_v9 }
 0x20d   :  { %742 = vadd.xlane.f32.xlu0 %v741_v12  ;;  %757 = vadd.xlane.f32.xlu2 %v756_v15  ;;  %v711_v12 = vmul.f32 %v691_v14, %v166_v50  ;;  %v750_v15 = vsel %vm9861_vm1, %v713_v51, 0.0  ;;  %v6815_v39 = vpop.xlane.xlu2 %959  ;;  %v956_v50 = vpop.xlane.xlu1 %955 }
 0x20e   :  { %922 = vadd.xlane.f32.xlu1 %v891_v55  ;;  %v171_v55 = vld [vmem:[%s9632_s8 + $0x68] sm:$0xff]  ;;  %v6820_v51 = vpop.xlane.xlu0 %963  ;;  %v983_v10 = vmul.f32 2e-05, %v6815_v39 }
 0x20f   :  { %v744_v41 = vsel %vm9861_vm1, %v711_v12, 0.0  ;;  %v716_v14 = vmul.f32 %v693_v40, %v171_v55  ;;  %v753_v12 = vsel %vm9861_vm1, %v714_v45, 0.0 }
 0x211   :  { %v759_v37 = vsel %vm9861_vm1, %v716_v14, 0.0 }
 0x215   :  { %751 = vadd.xlane.f32.xlu0 %v750_v15  ;;  %766 = vadd.xlane.f32.xlu2 %v765_v38  ;;  %v172_v15 = vld [vmem:[%s9632_s8 + $0x70] sm:$0xff]  ;;  %v6827_v38 = vpop.xlane.xlu2 %969  ;;  %v6829_v46 = vpop.xlane.xlu1 %965 }
 0x216   :  { %745 = vadd.xlane.f32.xlu1 %v744_v41  ;;  %v717_v41 = vmul.f32 %v694_v36, %v172_v15  ;;  %v6831_v40 = vpop.xlane.xlu0 %973 }
 0x218   :  { %v762_v58 = vsel %vm9861_vm1, %v717_v41, 0.0  ;;  %v975_v41 = vmul.f32 2e-05, %v6772_v54  ;;  %v979_v54 = vmul.f32 2e-05, %v6768_v1 }
 0x219   :  { %v984_v1 = vmul.f32 2e-05, %v6807_v57 }
 0x21d   :  { %760 = vadd.xlane.f32.xlu0 %v759_v37  ;;  %v6834_v55 = vpop.xlane.xlu2 %971  ;;  %v6836_v14 = vpop.xlane.xlu1 %967 }
 0x21e   :  { %754 = vadd.xlane.f32.xlu1 %v753_v12  ;;  %v893_v25 = vpop.xlane.xlu0 %892  ;;  %v987_v39 = vmul.f32 2e-05, %v6836_v14  ;;  %v6908_v35 = vmul.f32 2e-05, %v6834_v55  ;;  %v9973_v55 = vlaneseq }
 0x225   :  { %v6838_v45 = vpop.xlane.xlu2 %721  ;;  %v6840_v37 = vpop.xlane.xlu1 %727 }
 0x226   :  { %763 = vadd.xlane.f32.xlu1 %v762_v58  ;;  %v6842_v12 = vpop.xlane.xlu0 %724  ;;  %v991_v58 = vadd.f32 %v975_v41, %v893_v25 }
 0x228   :  { %v6853_v29 = vadd.f32 1.024e-07, %v991_v58 }
 0x22a   :  { %5538 = vrsqrt.f32 %v6853_v29  ;;  %vm1045_vm2 = vweird.f32 %v6853_v29 }
 0x22d   :  { %v6844_v0 = vpop.xlane.xlu2 %730  ;;  %v6846_v36 = vpop.xlane.xlu1 %736 }
 0x22e   :  { %v6848_v15 = vpop.xlane.xlu0 %733 }
 0x230   :  { %v6865_v53 = vpop.eup %5538 }
 0x231   :  { %vm1046_vm3 = vweird.f32 %v6865_v53 }
 0x232   :  { %vm6941_vm4 = vmor %vm1045_vm2, %vm1046_vm3 }
 0x235   :  { %v6850_v4 = vpop.xlane.xlu2 %739  ;;  %v895_v34 = vpop.xlane.xlu1 %894 }
 0x236   :  { %v899_v18 = vpop.xlane.xlu0 %898  ;;  %v992_v8 = vadd.f32 %v976_v22, %v895_v34 }
 0x237   :  { %v994_v62 = vadd.f32 %v978_v60, %v899_v18 }
 0x238   :  { %v6859_v25 = vadd.f32 1.024e-07, %v992_v8 }
 0x239   :  { %v6861_v58 = vadd.f32 1.024e-07, %v994_v62 }
 0x23a   :  { %9971 = vst [vmem:[#allocation70_spill] sm:$0xff] %v6859_v25  ;;  %5540 = vrsqrt.f32 %v6859_v25  ;;  %vm1055_vm6 = vweird.f32 %v6859_v25 }
 0x23b   :  { %5542 = vrsqrt.f32 %v6861_v58  ;;  %vm1075_vm10 = vweird.f32 %v6861_v58 }
 0x23d   :  { %v897_v43 = vpop.xlane.xlu2 %896  ;;  %v903_v24 = vpop.xlane.xlu1 %902 }
 0x23e   :  { %v993_v56 = vadd.f32 %v977_v63, %v897_v43  ;;  %v901_v44 = vpop.xlane.xlu0 %900  ;;  %v996_v41 = vadd.f32 %v980_v5, %v903_v24  ;;  %v1040_v43 = vmul.f32 %v6865_v53, %v6853_v29 }
 0x23f   :  { %v995_v13 = vadd.f32 %v979_v54, %v901_v44  ;;  %v982_v54 = vmul.f32 2e-05, %v6794_v61  ;;  %v986_v61 = vmul.f32 2e-05, %v6829_v46 }
 0x240   :  { %v6863_v19 = vadd.f32 1.024e-07, %v993_v56  ;;  %v6868_v22 = vadd.f32 1.024e-07, %v996_v41  ;;  %v981_v56 = vmul.f32 2e-05, %v956_v50  ;;  %v6877_v24 = vpop.eup %5540  ;;  %v1041_v60 = vmul.f32 %v6865_v53, %v1040_v43 }
 0x241   :  { %v6874_v8 = vadd.f32 1.024e-07, %v995_v13  ;;  %v6881_v62 = vpop.eup %5542  ;;  %v1050_v50 = vmul.f32 %v6877_v24, %v6859_v25  ;;  %v985_v43 = vmul.f32 2e-05, %v6820_v51  ;;  %v988_v51 = vmul.f32 2e-05, %v6827_v38 }
 0x242   :  { %9972 = vst [vmem:[#allocation71_spill] sm:$0xff] %v6868_v22  ;;  %5544 = vrsqrt.f32 %v6863_v19  ;;  %v1042_v41 = vmul.f32 0.5, %v1041_v60  ;;  %v1070_v13 = vmul.f32 %v6881_v62, %v6861_v58  ;;  %v6903_v60 = vmul.f32 2e-05, %v6831_v40 }
 0x243   :  { %5546 = vrsqrt.f32 %v6868_v22  ;;  %v1051_v3 = vmul.f32 %v6877_v24, %v1050_v50  ;;  %vm1056_vm5 = vweird.f32 %v6877_v24  ;;  %vm1076_vm7 = vweird.f32 %v6881_v62 }
 0x244   :  { %5548 = vrsqrt.f32 %v6874_v8  ;;  %v1043_v23 = vsub.f32 1.5, %v1042_v41  ;;  %v1071_v46 = vmul.f32 %v6881_v62, %v1070_v13  ;;  %vm6977_vm9 = vmor %vm1055_vm6, %vm1056_vm5  ;;  %vm1065_vm12 = vweird.f32 %v6863_v19 }
 0x245   :  { %v907_v34 = vpop.xlane.xlu2 %906  ;;  %v905_v5 = vpop.xlane.xlu1 %904  ;;  %vm6988_vm11 = vmor %vm1075_vm10, %vm1076_vm7  ;;  %vm1095_vm0 = vweird.f32 %v6868_v22  ;;  %vm1085_vm3 = vweird.f32 %v6874_v8  ;;  %vm1234_vm5 = vcmask 130112   ;;  %vm1257_vm6 = vcmask 1041409  }
 0x246   :  { %v997_v63 = vadd.f32 %v981_v56, %v905_v5  ;;  %v998_v20 = vadd.f32 %v982_v54, %v907_v34  ;;  %v6919_v34 = vand.u32 127, %v9973_v55  ;;  %v1023_v54 = vand.u32 2147483647, %v6838_v45 }
 0x247   :  { %vm1259_vm7 = vcmask 1042434  }
 0x248   :  { %v6883_v18 = vpop.eup %5544  ;;  %v6897_v56 = vadd.f32 1.024e-07, %v997_v63  ;;  %9974 = vst [vmem:[#allocation72_spill] sm:$0xff] %v6919_v34  ;;  %v6922_v41 = vadd.f32 1.024e-07, %v998_v20 }
 0x249   :  { %v6886_v16 = vpop.eup %5546  ;;  %v1060_v5 = vmul.f32 %v6883_v18, %v6863_v19  ;;  %vm1066_vm8 = vweird.f32 %v6883_v18 }
 0x24a   :  { %v6899_v59 = vpop.eup %5548  ;;  %v1090_v63 = vmul.f32 %v6886_v16, %v6868_v22  ;;  %5550 = vrsqrt.f32 %v6897_v56  ;;  %vm1096_vm13 = vweird.f32 %v6886_v16  ;;  %vm7002_vm14 = vmor %vm1065_vm12, %vm1066_vm8  ;;  %vm1115_vm12 = vweird.f32 %v6922_v41 }
 0x24b   :  { %v1061_v47 = vmul.f32 %v6883_v18, %v1060_v5  ;;  %v1080_v38 = vmul.f32 %v6899_v59, %v6874_v8  ;;  %v1044_v5 = vmul.f32 %v6865_v53, %v1043_v23  ;;  %5552 = vrsqrt.f32 %v6922_v41  ;;  %vm7020_vm2 = vmor %vm1095_vm0, %vm1096_vm13 }
 0x24c   :  { %v1091_v50 = vmul.f32 %v6886_v16, %v1090_v63  ;;  %v6947_v23 = vadd.s32 4294967288, %v6919_v34  ;;  %vm1086_vm15 = vweird.f32 %v6899_v59 }
 0x24d   :  { %v909_v57 = vpop.xlane.xlu2 %908  ;;  %v1062_v31 = vmul.f32 0.5, %v1061_v47  ;;  %v1081_v45 = vmul.f32 %v6899_v59, %v1080_v38 }
 0x24e   :  { %v999_v11 = vadd.f32 %v983_v10, %v909_v57  ;;  %v1052_v57 = vmul.f32 0.5, %v1051_v3  ;;  %9977 = vst [vmem:[#allocation73_spill] sm:$0xff] %v6947_v23  ;;  %v1092_v47 = vmul.f32 0.5, %v1091_v50 }
 0x24f   :  { %v1063_v10 = vsub.f32 1.5, %v1062_v31  ;;  %v1082_v49 = vmul.f32 0.5, %v1081_v45 }
 0x250   :  { %v911_v44 = vpop.xlane.xlu0 %910  ;;  %v6937_v63 = vpop.eup %5550  ;;  %v1053_v38 = vsub.f32 1.5, %v1052_v57 }
 0x251   :  { %v1000_v14 = vadd.f32 %v984_v1, %v911_v44  ;;  %v6929_v44 = vadd.f32 1.024e-07, %v999_v11  ;;  %v1072_v1 = vmul.f32 0.5, %v1071_v46  ;;  %v1100_v50 = vmul.f32 %v6937_v63, %v6897_v56 }
 0x252   :  { %v1054_v31 = vmul.f32 %v6877_v24, %v1053_v38  ;;  %vm1106_vm8 = vweird.f32 %v6937_v63 }
 0x253   :  { %v6932_v20 = vadd.f32 1.024e-07, %v1000_v14  ;;  %5554 = vrsqrt.f32 %v6929_v44  ;;  %v1073_v14 = vsub.f32 1.5, %v1072_v1  ;;  %vm1125_vm0 = vweird.f32 %v6929_v44 }
 0x255   :  { %5556 = vrsqrt.f32 %v6932_v20 }
 0x258   :  { %v913_v40 = vpop.xlane.xlu0 %912 }
 0x259   :  { %v1001_v13 = vadd.f32 %v985_v43, %v913_v40 }
 0x25b   :  { %v6949_v46 = vadd.f32 1.024e-07, %v1001_v13 }
 0x25d   :  { %5558 = vrsqrt.f32 %v6949_v46 }
 0x260   :  { %v915_v32 = vpop.xlane.xlu1 %914 }
 0x261   :  { %v1002_v43 = vadd.f32 %v986_v61, %v915_v32  ;;  %v1048_v32 = vsel %vm6941_vm4, %v6865_v53, %v1044_v5  ;;  %v1093_v53 = vsub.f32 1.5, %v1092_v47  ;;  %v6965_v5 = vpop.eup %5552  ;;  %vm7040_vm4 = vmor %vm1085_vm3, %vm1086_vm15  ;;  %vm1145_vm3 = vweird.f32 %v6949_v46 }
 0x262   :  { %v6961_v3 = vmul.f32 %v1048_v32, %v1023_v54  ;;  %v1083_v54 = vsub.f32 1.5, %v1082_v49  ;;  %v6975_v1 = vpop.eup %5554  ;;  %v1110_v47 = vmul.f32 %v6965_v5, %v6922_v41 }
 0x263   :  { %v6959_v13 = vadd.f32 1.024e-07, %v1002_v43  ;;  %v1101_v43 = vmul.f32 %v6937_v63, %v1100_v50  ;;  %v1094_v49 = vmul.f32 %v6886_v16, %v1093_v53  ;;  %v1120_v50 = vmul.f32 %v6975_v1, %v6929_v44 }
 0x264   :  { %vm1126_vm13 = vweird.f32 %v6975_v1 }
 0x265   :  { %5560 = vrsqrt.f32 %v6959_v13  ;;  %v1102_v45 = vmul.f32 0.5, %v1101_v43  ;;  %v9986_v43 = vand.u32 2147483647, %v6842_v12 }
 0x267   :  { %v1103_v25 = vsub.f32 1.5, %v1102_v45 }
 0x268   :  { %v917_v40 = vpop.xlane.xlu1 %916 }
 0x269   :  { %v1003_v17 = vadd.f32 %v987_v39, %v917_v40  ;;  %v1074_v39 = vmul.f32 %v6881_v62, %v1073_v14  ;;  %v1084_v14 = vmul.f32 %v6899_v59, %v1083_v54 }
 0x26b   :  { %v1078_v38 = vsel %vm6988_vm11, %v6881_v62, %v1074_v39  ;;  %v1098_v39 = vsel %vm7020_vm2, %v6886_v16, %v1094_v49  ;;  %v9989_v16 = vand.u32 2147483647, %v6844_v0  ;;  %v1088_v12 = vsel %vm7040_vm4, %v6899_v59, %v1084_v14 }
 0x26c   :  { %v9992_v14 = vand.u32 2147483647, %v6848_v15  ;;  %vm1116_vm11 = vweird.f32 %v6965_v5  ;;  %vm1135_vm2 = vweird.f32 %v6932_v20 }
 0x26d   :  { %v1202_v49 = vmul.f32 %v1078_v38, %v9989_v16  ;;  %vm7125_vm15 = vmor %vm1115_vm12, %vm1116_vm11 }
 0x270   :  { %v919_v11 = vpop.xlane.xlu2 %918 }
 0x271   :  { %v1004_v9 = vadd.f32 %v988_v51, %v919_v11  ;;  %v1064_v51 = vmul.f32 %v6883_v18, %v1063_v10  ;;  %v6986_v11 = vpop.eup %5556 }
 0x272   :  { %v7009_v32 = vpop.eup %5558  ;;  %v1130_v61 = vmul.f32 %v6986_v11, %v6932_v20 }
 0x273   :  { %v6970_v57 = vadd.f32 1.024e-07, %v1004_v9  ;;  %v6984_v9 = vadd.f32 1.024e-07, %v1003_v17  ;;  %v1058_v17 = vsel %vm6977_vm9, %v6877_v24, %v1054_v31  ;;  %v1068_v24 = vsel %vm7002_vm14, %v6883_v18, %v1064_v51  ;;  %v7034_v54 = vpop.eup %5560 }
 0x274   :  { %v1111_v51 = vmul.f32 %v6965_v5, %v1110_v47  ;;  %v1200_v10 = vmul.f32 %v1058_v17, %v9986_v43  ;;  %v9990_v47 = vand.u32 2147483647, %v6840_v37  ;;  %v1121_v17 = vmul.f32 %v6975_v1, %v1120_v50 }
 0x275   :  { %5562 = vrsqrt.f32 %v6970_v57  ;;  %v1231_v18 = vperm.slane %v6961_v3, %v6919_v34  ;;  %v1131_v0 = vmul.f32 %v6986_v11, %v1130_v61  ;;  %v1150_v37 = vmul.f32 %v7034_v54, %v6959_v13 }
 0x276   :  { %5564 = vrsqrt.f32 %v6984_v9  ;;  %v1201_v31 = vmul.f32 %v1068_v24, %v9990_v47  ;;  %v1112_v59 = vmul.f32 0.5, %v1111_v51  ;;  %v1233_v24 = vperm.slane %v1200_v10, %v6947_v23 }
 0x277   :  { %v1203_v3 = vmul.f32 %v1088_v12, %v9992_v14  ;;  %v1237_v50 = vperm.slane %v1202_v49, %v6947_v23  ;;  %v1122_v51 = vmul.f32 0.5, %v1121_v17  ;;  %v1104_v10 = vmul.f32 %v6937_v63, %v1103_v25 }
 0x278   :  { %v921_v53 = vpop.xlane.xlu0 %920  ;;  %v1236_v61 = vperm.slane %v1201_v31, %v6919_v34  ;;  %v1132_v15 = vmul.f32 0.5, %v1131_v0  ;;  %v7081_v16 = vpop.xlane.xlu2 %748  ;;  %v1113_v47 = vsub.f32 1.5, %v1112_v59  ;;  %v1151_v12 = vmul.f32 %v7034_v54, %v1150_v37 }
 0x279   :  { %v1005_v62 = vadd.f32 %v6908_v35, %v921_v53  ;;  %v1140_v35 = vmul.f32 %v7009_v32, %v6949_v46  ;;  %v1239_v17 = vperm.slane %v1203_v3, %v6919_v34  ;;  %vm1105_vm9 = vweird.f32 %v6897_v56 }
 0x27a   :  { %v1235_v25 = vsel %vm1234_vm5, %v1233_v24, %v1231_v18  ;;  %vm7092_vm10 = vmor %vm1105_vm9, %vm1106_vm8  ;;  %v1238_v14 = vsel %vm1234_vm5, %v1237_v50, %v1236_v61  ;;  %v1114_v24 = vmul.f32 %v6965_v5, %v1113_v47  ;;  %v1152_v50 = vmul.f32 0.5, %v1151_v12 }
 0x27b   :  { %v7046_v53 = vadd.f32 1.024e-07, %v1005_v62  ;;  %v7056_v43 = vpop.eup %5562  ;;  %v9991_v62 = vand.u32 2147483647, %v6846_v36  ;;  %v1141_v36 = vmul.f32 %v7009_v32, %v1140_v35  ;;  %v1108_v3 = vsel %vm7092_vm10, %v6937_v63, %v1104_v10  ;;  %vm7139_vm8 = vmor %vm1125_vm0, %vm1126_vm13 }
 0x27c   :  { %v7066_v38 = vpop.eup %5564  ;;  %v1170_v45 = vmul.f32 %v7056_v43, %v6970_v57  ;;  %vm1136_vm14 = vweird.f32 %v6986_v11  ;;  %vm1146_vm4 = vweird.f32 %v7009_v32  ;;  %vm1155_vm10 = vweird.f32 %v6959_v13 }
 0x27d   :  { %v1204_v22 = vmul.f32 %v1098_v39, %v9991_v62  ;;  %5566 = vrsqrt.f32 %v7046_v53  ;;  %v1160_v49 = vmul.f32 %v7066_v38, %v6984_v9  ;;  %vm7148_vm9 = vmor %vm1135_vm2, %vm1136_vm14  ;;  %vm1156_vm11 = vweird.f32 %v7034_v54 }
 0x27e   :  { %v1171_v37 = vmul.f32 %v7056_v43, %v1170_v45  ;;  %v1258_v45 = vsel %vm1257_vm6, %v1238_v14, %v1235_v25  ;;  %vm1165_vm12 = vweird.f32 %v6984_v9  ;;  %vm7169_vm13 = vmor %vm1145_vm3, %vm1146_vm4  ;;  %vm1166_vm14 = vweird.f32 %v7066_v38 }
 0x27f   :  { %v1240_v40 = vperm.slane %v1204_v22, %v6947_v23  ;;  %v1142_v22 = vmul.f32 0.5, %v1141_v36  ;;  %v1161_v36 = vmul.f32 %v7066_v38, %v1160_v49  ;;  %v9995_v49 = vand.u32 2147483647, %v6850_v4  ;;  %vm1157_vm2 = vmor %vm1155_vm10, %vm1156_vm11 }
 0x280   :  { %v7076_v39 = vpop.xlane.xlu0 %742  ;;  %v1118_v4 = vsel %vm7125_vm15, %v6965_v5, %v1114_v24  ;;  %v758_v0 = vpop.xlane.xlu2 %757  ;;  %vm1176_vm15 = vweird.f32 %v7056_v43  ;;  %vm1175_vm0 = vweird.f32 %v6970_v57 }
 0x281   :  { %v923_v35 = vpop.xlane.xlu1 %922  ;;  %v1241_v18 = vsel %vm1234_vm5, %v1240_v40, %v1239_v17  ;;  %v1143_v63 = vsub.f32 1.5, %v1142_v22  ;;  %v7119_v47 = vmul.f32 %v1108_v3, %v9995_v49  ;;  %v1162_v25 = vmul.f32 0.5, %v1161_v36  ;;  %vm1177_vm4 = vmor %vm1175_vm0, %vm1176_vm15 }
 0x282   :  { %v1006_v31 = vadd.f32 %v6903_v60, %v923_v35  ;;  %v1123_v60 = vsub.f32 1.5, %v1122_v51  ;;  %v1133_v35 = vsub.f32 1.5, %v1132_v15  ;;  %v7113_v51 = vsel %vm1259_vm7, %v1241_v18, %v1258_v45 }
 0x283   :  { %v7090_v62 = vpop.eup %5566  ;;  %v1172_v15 = vmul.f32 0.5, %v1171_v37  ;;  %v1153_v22 = vsub.f32 1.5, %v1152_v50  ;;  %v1144_v14 = vmul.f32 %v7009_v32, %v1143_v63  ;;  %v1032_v45 = vand.u32 2147483647, %v7081_v16 }
 0x284   :  { %v7097_v59 = vadd.f32 1.024e-07, %v1006_v31  ;;  %v1180_v61 = vmul.f32 %v7090_v62, %v7046_v53  ;;  %v1124_v40 = vmul.f32 %v6975_v1, %v1123_v60  ;;  %v1134_v31 = vmul.f32 %v6986_v11, %v1133_v35 }
 0x285   :  { %v1030_v35 = vand.u32 2147483647, %v7076_v39  ;;  %v1173_v24 = vsub.f32 1.5, %v1172_v15  ;;  %v1163_v39 = vsub.f32 1.5, %v1162_v25  ;;  %v1148_v63 = vsel %vm7169_vm13, %v7009_v32, %v1144_v14 }
 0x286   :  { %5568 = vrsqrt.f32 %v7097_v59  ;;  %v1181_v37 = vmul.f32 %v7090_v62, %v1180_v61  ;;  %v1128_v18 = vsel %vm7139_vm8, %v6975_v1, %v1124_v40  ;;  %v1138_v36 = vsel %vm7148_vm9, %v6986_v11, %v1134_v31  ;;  %vm1167_vm8 = vmor %vm1165_vm12, %vm1166_vm14 }
 0x287   :  { %v1154_v11 = vmul.f32 %v7034_v54, %v1153_v22  ;;  %v1206_v15 = vmul.f32 %v1118_v4, %v1030_v35  ;;  %v1174_v12 = vmul.f32 %v7056_v43, %v1173_v24  ;;  %v1208_v22 = vmul.f32 %v1138_v36, %v1032_v45 }
 0x288   :  { %v752_v10 = vpop.xlane.xlu0 %751  ;;  %v1182_v40 = vmul.f32 0.5, %v1181_v37  ;;  %v1164_v4 = vmul.f32 %v7066_v38, %v1163_v39  ;;  %v1035_v37 = vand.u32 2147483647, %v758_v0  ;;  %v767_v36 = vpop.xlane.xlu2 %766  ;;  %vm1195_vm9 = vweird.f32 %v7097_v59 }
 0x289   :  { %v746_v17 = vpop.xlane.xlu1 %745  ;;  %v1033_v49 = vand.u32 2147483647, %v752_v10  ;;  %v1158_v10 = vsel %vm1157_vm2, %v7034_v54, %v1154_v11  ;;  %v1246_v39 = vperm.slane %v1208_v22, %v6947_v23  ;;  %v1242_v1 = vperm.slane %v7119_v47, %v6919_v34 }
 0x28a   :  { %v1031_v61 = vand.u32 2147483647, %v746_v17  ;;  %v1183_v35 = vsub.f32 1.5, %v1182_v40  ;;  %vm1186_vm11 = vweird.f32 %v7090_v62  ;;  %vm1261_vm12 = vcmask 1043459  }
 0x28b   :  { %v1209_v24 = vmul.f32 %v1148_v63, %v1033_v49  ;;  %v1038_v47 = vand.u32 2147483647, %v767_v36  ;;  %vm1185_vm13 = vweird.f32 %v7046_v53  ;;  %vm1263_vm14 = vcmask 1044484  }
 0x28c   :  { %v7144_v3 = vpop.eup %5568  ;;  %v1207_v25 = vmul.f32 %v1128_v18, %v1031_v61  ;;  %v1243_v18 = vperm.slane %v1206_v15, %v6947_v23  ;;  %v1184_v40 = vmul.f32 %v7090_v62, %v1183_v35  ;;  %vm1187_vm15 = vmor %vm1185_vm13, %vm1186_vm11  ;;  %vm1265_vm0 = vcmask 1045509  }
 0x28d   :  { %v1190_v50 = vmul.f32 %v7144_v3, %v7097_v59  ;;  %vm1196_vm3 = vweird.f32 %v7144_v3  ;;  %v1248_v49 = vperm.slane %v1209_v24, %v6919_v34  ;;  %vm1267_vm2 = vcmask 1046534  }
 0x28e   :  { %v1245_v0 = vperm.slane %v1207_v25, %v6919_v34  ;;  %vm1197_vm10 = vmor %vm1195_vm9, %vm1196_vm3  ;;  %v1244_v15 = vsel %vm1234_vm5, %v1243_v18, %v1242_v1  ;;  %v1188_v22 = vsel %vm1187_vm15, %v7090_v62, %v1184_v40  ;;  %vm9864_vm3 = vcmask 1047559  }
 0x28f   :  { %v1191_v16 = vmul.f32 %v7144_v3, %v1190_v50  ;;  %v1178_v50 = vsel %vm1177_vm4, %v7056_v43, %v1174_v12  ;;  %v1168_v43 = vsel %vm1167_vm8, %v7066_v38, %v1164_v4  ;;  %vm9863_vm4 = vcmp.lt.s32.totalorder %v6919_v34, 9 }
 0x290   :  { %v761_v31 = vpop.xlane.xlu0 %760  ;;  %v1211_v63 = vmul.f32 %v1168_v43, %v1035_v37  ;;  %v1247_v38 = vsel %vm1234_vm5, %v1246_v39, %v1245_v0  ;;  %vm9862_vm8 = vcmask 130048  }
 0x291   :  { %v1192_v17 = vmul.f32 0.5, %v1191_v16  ;;  %v1036_v60 = vand.u32 2147483647, %v761_v31  ;;  %v755_v32 = vpop.xlane.xlu1 %754 }
 0x292   :  { %v1034_v14 = vand.u32 2147483647, %v755_v32  ;;  %v1251_v32 = vperm.slane %v1211_v63, %v6919_v34  ;;  %v7237_v63 = vshrl.u32 %v9973_v55, 7 }
 0x293   :  { %v1193_v5 = vsub.f32 1.5, %v1192_v17  ;;  %v1212_v45 = vmul.f32 %v1178_v50, %v1036_v60  ;;  %v1262_v60 = vsel %vm1261_vm12, %v1244_v15, %v7113_v51 }
 0x294   :  { %v1210_v61 = vmul.f32 %v1158_v10, %v1034_v14  ;;  %v1264_v10 = vsel %vm1263_vm14, %v1247_v38, %v1262_v60  ;;  %10004 = vst [vmem:[#allocation74_spill] sm:$0xff] %v7237_v63  ;;  %5279 = vset.pattern.permute.xlu2 %v7237_v63  ;;  %5267 = vset.pattern.permute.xlu0 %v7237_v63 }
 0x295   :  { %v1194_v54 = vmul.f32 %v7144_v3, %v1193_v5  ;;  %v1252_v31 = vperm.slane %v1212_v45, %v6947_v23 }
 0x296   :  { %v1249_v11 = vperm.slane %v1210_v61, %v6947_v23 }
 0x297   :  { %v1198_v16 = vsel %vm1197_vm10, %v7144_v3, %v1194_v54  ;;  %v1253_v14 = vsel %vm1234_vm5, %v1252_v31, %v1251_v32  ;;  %v10006_v31 = vmov 0.0  }
 0x298   :  { %v1214_v17 = vmul.f32 %v1198_v16, %v1038_v47  ;;  %v1250_v3 = vsel %vm1234_vm5, %v1249_v11, %v1248_v49  ;;  %v7242_v16 = vadd.s32 8, %v7237_v63 }
 0x299   :  { %v764_v12 = vpop.xlane.xlu1 %763  ;;  %v1266_v37 = vsel %vm1265_vm0, %v1250_v3, %v1264_v10 }
 0x29a   :  { %v1037_v25 = vand.u32 2147483647, %v764_v12  ;;  %v1255_v5 = vperm.slane %v1214_v17, %v6947_v23  ;;  %v1268_v18 = vsel %vm1267_vm2, %v1253_v14, %v1266_v37  ;;  %10005 = vst [vmem:[#allocation75_spill] sm:$0xff] %v7242_v16  ;;  %5273 = vset.pattern.permute.xlu1 %v7242_v16 }
 0x29c   :  { %v1213_v4 = vmul.f32 %v1188_v22, %v1037_v25 }
 0x29e   :  { %v1254_v35 = vperm.slane %v1213_v4, %v6919_v34 }
 0x2a0   :  { %v1256_v51 = vsel %vm1234_vm5, %v1255_v5, %v1254_v35 }
 0x2a1   :  { %v1270_v62 = vsel %vm9864_vm3, %v1256_v51, %v1268_v18  ;;  %v9772_v18 = vmov 0  }
 0x2a2   :  { %v7229_v24 = vsel %vm9863_vm4, %v1270_v62, 1e+30 }
 0x2a3   :  { %v1274_v50 = vsel %vm9862_vm8, %v7229_v24, inf }
 0x2a4   :  { %1275 = vmin.xlane.f32.xlu0 %v1274_v50 }
 0x317   :  { %v1276_v61 = vpop.xlane.xlu0 %1275 }
 0x318   :  { %vm1277_vm9 = vcmp.le.f32.partialorder %v7229_v24, %v1276_v61 }
 0x319   :  { %v1278_v36 = vsel %vm1277_vm9, %v6919_v34, 16 }
 0x31a   :  { %v1279_v54 = vsel %vm9862_vm8, %v1278_v36, 2147483647 }
 0x31b   :  { %v1281_v0 = vshra.s32 %v1279_v54, 16  ;;  %v1280_v39 = vand.u32 65535, %v1279_v54 }
 0x31d   :  { %v1283_v45 = vcvt.s32.f32 %v1281_v0  ;;  %v1282_v43 = vcvt.s32.f32 %v1280_v39 }
 0x31f   :  { %1284 = vmin.xlane.f32.xlu1 %v1283_v45 }
 0x392   :  { %v1285_v1 = vpop.xlane.xlu1 %1284 }
 0x393   :  { %vm1286_vm10 = vcmp.eq.f32.partialorder %v1283_v45, %v1285_v1  ;;  %v1291_v40 = vcvt.f32.s32 %v1285_v1 }
 0x394   :  { %v1287_v11 = vsel %vm1286_vm10, %v1282_v43, inf }
 0x395   :  { %1288 = vmin.xlane.f32.xlu2 %v1287_v11  ;;  %v1292_v49 = vshll.u32 %v1291_v40, 16 }
 0x408   :  { %v1289_v15 = vpop.xlane.xlu2 %1288 }
 0x409   :  { %v1290_v47 = vcvt.f32.s32 %v1289_v15 }
 0x40b   :  { %v1293_v38 = vadd.s32 %v1292_v49, %v1290_v47 }
 0x40d   :  { %vm1294_vm11 = vcmp.eq.s32.totalorder %v6919_v34, %v1293_v38 }
 0x40e   :  { %v7247_v12 = vsel %vm1294_vm11, 1.0, %v10006_v31 }
 0x40f   :  { %v1328_v55 = vperm.slane %v7247_v12, 2  ;;  %v1341_v17 = vperm.slane %v7247_v12, 3  ;;  %v1302_v3 = vperm.slane %v7247_v12, 0  ;;  %v1315_v25 = vperm.slane %v7247_v12, 1 }
 0x410   :  { %v1354_v22 = vperm.slane %v7247_v12, 4  ;;  %v1367_v4 = vperm.slane %v7247_v12, 5  ;;  %v1380_v10 = vperm.slane %v7247_v12, 6  ;;  %v1393_v14 = vperm.slane %v7247_v12, 7 }
 0x411   :  { %v5280_v60 = vpack.i.bf16 %v1341_v17, %v1328_v55  ;;  %v5274_v32 = vpack.i.bf16 %v1315_v25, %v1302_v3 }
 0x412   :  { %v5292_v37 = vpack.i.bf16 %v1367_v4, %v1354_v22  ;;  %v5308_v5 = vpack.i.bf16 %v1393_v14, %v1380_v10 }
 0x413   :  { %5281 = vperm.xlu2 %5279, %v5280_v60   ;;  %5275 = vperm.xlu1 %5273, %v5274_v32  }
 0x414   :  { %5269 = vperm.xlu0 %5267, %v5274_v32  }
 0x41b   :  { %5285 = vset.pattern.permute.xlu2 %v7242_v16  ;;  %5291 = vset.pattern.permute.xlu1 %v7237_v63 }
 0x41c   :  { %5307 = vset.pattern.permute.xlu0 %v7242_v16 }
 0x423   :  { %5287 = vperm.xlu2 %5285, %v5280_v60   ;;  %5293 = vperm.xlu1 %5291, %v5292_v37  }
 0x424   :  { %5309 = vperm.xlu0 %5307, %v5308_v5  }
 0x42b   :  { %5298 = vperm.xlu2 %5285, %v5292_v37   ;;  %5303 = vperm.xlu1 %5291, %v5308_v5  }
 0x42c   :  { %5335 = vset.pattern.permute.xlu0 %v7237_v63 }
 0x433   :  { %5313 = vset.pattern.permute.xlu2 %v7237_v63  ;;  %5319 = vset.pattern.permute.xlu1 %v7242_v16 }
 0x434   :  { %5337 = vperm.xlu0 %5335, %v5292_v37  }
 0x43b   :  { %5315 = vperm.xlu2 %5313, %v5274_v32   ;;  %5321 = vperm.xlu1 %5319, %v5274_v32  }
 0x43c   :  { %5359 = vset.pattern.permute.xlu0 %v9772_v18 }
 0x443   :  { %5326 = vperm.xlu2 %5313, %v5280_v60   ;;  %5331 = vperm.xlu1 %5319, %v5280_v60  }
 0x44b   :  { %5341 = vset.pattern.permute.xlu2 %v7242_v16  ;;  %5347 = vset.pattern.permute.xlu1 %v7237_v63 }
 0x453   :  { %5343 = vperm.xlu2 %5341, %v5292_v37   ;;  %5349 = vperm.xlu1 %5347, %v5308_v5  }
 0x45b   :  { %5354 = vperm.xlu2 %5341, %v5308_v5   ;;  %5358 = vset.pattern.permute.xlu1 %v9772_v18 }
 0x463   :  { %5360 = vset.pattern.permute.xlu2 %v9772_v18 }
 0x46d   :  { %v5282_v35 = vpop.permute.xlu2 %5281 }
 0x46e   :  { %v5284_v61 = vunpack.i.h.bf16 %v5282_v35  ;;  %v5283_v36 = vunpack.i.l.bf16 %v5282_v35 }
 0x470   :  { %v1647_v15 = vmul.f32 %v5284_v61, %v6629_v52  ;;  %v1645_v49 = vmul.f32 %v5283_v36, %v6577_v48 }
 0x47d   :  { %v5288_v51 = vpop.permute.xlu2 %5287 }
 0x47e   :  { %v5290_v62 = vunpack.i.h.bf16 %v5288_v51  ;;  %v5289_v50 = vunpack.i.l.bf16 %v5288_v51 }
 0x480   :  { %v1648_v0 = vmul.f32 %v5290_v62, %v6627_v42  ;;  %v1646_v45 = vmul.f32 %v5289_v50, %v6600_v33 }
 0x482   :  { %v1671_v42 = vadd.f32 %v1646_v45, %v1645_v49  ;;  %v1678_v3 = vadd.f32 %v1648_v0, %v1647_v15 }
 0x484   :  { %v1672_v4 = vrot.slane %v1671_v42, 4  ;;  %v1679_v10 = vrot.slane %v1678_v3, 4 }
 0x485   :  { %v5276_v54 = vpop.permute.xlu1 %5275  ;;  %v5299_v60 = vpop.permute.xlu2 %5298 }
 0x486   :  { %v5270_v39 = vpop.permute.xlu0 %5269  ;;  %v5278_v1 = vunpack.i.h.bf16 %v5276_v54  ;;  %v5277_v43 = vunpack.i.l.bf16 %v5276_v54  ;;  %v1680_v5 = vadd.f32 %v1679_v10, %v1678_v3  ;;  %v5300_v35 = vunpack.i.l.bf16 %v5299_v60 }
 0x487   :  { %v5272_v11 = vunpack.i.h.bf16 %v5270_v39  ;;  %v5271_v40 = vunpack.i.l.bf16 %v5270_v39 }
 0x488   :  { %v1644_v47 = vmul.f32 %v5278_v1, %v6602_v7  ;;  %v1642_v38 = vmul.f32 %v5277_v43, %v6596_v2  ;;  %v1673_v7 = vadd.f32 %v1672_v4, %v1671_v42  ;;  %v5301_v2 = vunpack.i.h.bf16 %v5299_v60 }
 0x489   :  { %v1643_v55 = vmul.f32 %v5272_v11, %v6579_v27  ;;  %v1641_v17 = vmul.f32 %v5271_v40, %v6572_v28  ;;  %v1681_v45 = vrot.slane %v1680_v5, 2  ;;  %v1650_v1 = vmul.f32 %v5300_v35, %v6623_v26 }
 0x48a   :  { %v1674_v0 = vrot.slane %v1673_v7, 2  ;;  %v1652_v39 = vmul.f32 %v5301_v2, %v6655_v6  ;;  %v10008_v2 = vld [vmem:[#allocation67_spill] sm:$0xff] }
 0x48b   :  { %v1664_v33 = vadd.f32 %v1644_v47, %v1643_v55  ;;  %v1657_v25 = vadd.f32 %v1642_v38, %v1641_v17  ;;  %v1682_v3 = vadd.f32 %v1681_v45, %v1680_v5 }
 0x48c   :  { %v1675_v42 = vadd.f32 %v1674_v0, %v1673_v7  ;;  %v10007_v7 = vld [vmem:[#allocation66_spill] sm:$0xff] }
 0x48d   :  { %v1665_v32 = vrot.slane %v1664_v33, 4  ;;  %v1658_v22 = vrot.slane %v1657_v25, 4 }
 0x48f   :  { %v1666_v52 = vadd.f32 %v1665_v32, %v1664_v33  ;;  %v1659_v14 = vadd.f32 %v1658_v22, %v1657_v25  ;;  %v1676_v22 = vrot.slane %v1675_v42, 1 }
 0x491   :  { %v1667_v48 = vrot.slane %v1666_v52, 2  ;;  %v1660_v37 = vrot.slane %v1659_v14, 2  ;;  %v1677_v45 = vadd.f32 %v1676_v22, %v1675_v42 }
 0x493   :  { %v1668_v27 = vadd.f32 %v1667_v48, %v1666_v52  ;;  %v1661_v51 = vadd.f32 %v1660_v37, %v1659_v14  ;;  %v1683_v14 = vrot.slane %v1682_v3, 1 }
 0x495   :  { %v5316_v28 = vpop.permute.xlu2 %5315  ;;  %v5294_v62 = vpop.permute.xlu1 %5293  ;;  %v1669_v47 = vrot.slane %v1668_v27, 1  ;;  %v1662_v38 = vrot.slane %v1661_v51, 1 }
 0x496   :  { %v5318_v50 = vunpack.i.h.bf16 %v5316_v28  ;;  %v5317_v61 = vunpack.i.l.bf16 %v5316_v28  ;;  %v5296_v36 = vunpack.i.h.bf16 %v5294_v62  ;;  %v5295_v54 = vunpack.i.l.bf16 %v5294_v62  ;;  %v5310_v49 = vpop.permute.xlu0 %5309  ;;  %v10009_v28 = vld [vmem:[#allocation69_spill] sm:$0xff] }
 0x497   :  { %v5312_v26 = vunpack.i.h.bf16 %v5310_v49  ;;  %v5311_v25 = vunpack.i.l.bf16 %v5310_v49  ;;  %v1670_v60 = vadd.f32 %v1669_v47, %v1668_v27  ;;  %v1684_v49 = vadd.f32 %v1683_v14, %v1682_v3 }
 0x498   :  { %v1651_v43 = vmul.f32 %v5296_v36, %v6649_v21  ;;  %v1649_v11 = vmul.f32 %v5295_v54, %v6653_v30  ;;  %v1424_v40 = vmul.f32 %v5318_v50, %v6863_v19  ;;  %v1422_v15 = vmul.f32 %v5317_v61, %v6853_v29  ;;  %v10010_v50 = vld [vmem:[#allocation68_spill] sm:$0xff] }
 0x499   :  { %v1663_v19 = vadd.f32 %v1662_v38, %v1661_v51  ;;  %v1656_v5 = vmul.f32 %v5312_v26, %v10007_v7  ;;  %v1654_v35 = vmul.f32 %v5311_v25, %v10008_v2  ;;  %v1714_v51 = vpack.c.bf16 %v1670_v60, %v1670_v60 }
 0x49a   :  { %v1692_v55 = vadd.f32 %v1652_v39, %v1651_v43  ;;  %v1685_v17 = vadd.f32 %v1650_v1, %v1649_v11  ;;  %1461 = vperm.xlu2 %5360, %v1424_v40   ;;  %1455 = vperm.xlu1 %5358, %v1422_v15   ;;  %v1716_v60 = vpack.c.bf16 %v1684_v49, %v1684_v49 }
 0x49b   :  { %v1713_v36 = vpack.c.bf16 %v1663_v19, %v1663_v19  ;;  %v1730_v47 = vunpack.c.l.b16 %v1714_v51 }
 0x49c   :  { %v1693_v6 = vrot.slane %v1692_v55, 4  ;;  %v1686_v33 = vrot.slane %v1685_v17, 4 }
 0x49d   :  { %v7282_v21 = vpop.permute.xlu2 %5326  ;;  %v5304_v30 = vpop.permute.xlu1 %5303  ;;  %v1729_v38 = vunpack.c.l.b16 %v1713_v36 }
 0x49e   :  { %v1694_v32 = vadd.f32 %v1693_v6, %v1692_v55  ;;  %v1687_v29 = vadd.f32 %v1686_v33, %v1685_v17  ;;  %v5328_v4 = vunpack.i.l.bf16 %v7282_v21  ;;  %v5306_v10 = vunpack.i.h.bf16 %v5304_v30 }
 0x49f   :  { %v5305_v52 = vunpack.i.l.bf16 %v5304_v30  ;;  %v1715_v17 = vpack.c.bf16 %v1677_v45, %v1677_v45  ;;  %v1737_v42 = vsel %vm1257_vm6, %v1730_v47, %v1729_v38  ;;  %v10012_v38 = vld [vmem:[#allocation71_spill] sm:$0xff] }
 0x4a0   :  { %v1695_v48 = vrot.slane %v1694_v32, 2  ;;  %v1688_v37 = vrot.slane %v1687_v29, 2  ;;  %v1655_v62 = vmul.f32 %v5306_v10, %v10009_v28  ;;  %v1426_v27 = vmul.f32 %v5328_v4, %v6874_v8 }
 0x4a1   :  { %v1653_v61 = vmul.f32 %v5305_v52, %v10010_v50  ;;  %v1731_v19 = vunpack.c.l.b16 %v1715_v17  ;;  %v10011_v50 = vld [vmem:[#allocation70_spill] sm:$0xff] }
 0x4a2   :  { %v1696_v54 = vadd.f32 %v1695_v48, %v1694_v32  ;;  %v1689_v0 = vadd.f32 %v1688_v37, %v1687_v29  ;;  %v1706_v1 = vadd.f32 %v1656_v5, %v1655_v62  ;;  %1467 = vperm.xlu2 %5360, %v1426_v27   ;;  %v1732_v48 = vunpack.c.l.b16 %v1716_v60 }
 0x4a3   :  { %v1699_v39 = vadd.f32 %v1654_v35, %v1653_v61  ;;  %v1738_v4 = vsel %vm1259_vm7, %v1731_v19, %v1737_v42  ;;  %v10016_v19 = vld [vmem:[#allocation13_spill] sm:$0xff] }
 0x4a4   :  { %v1697_v43 = vrot.slane %v1696_v54, 1  ;;  %v1690_v11 = vrot.slane %v1689_v0, 1  ;;  %v1707_v15 = vrot.slane %v1706_v1, 4  ;;  %v1739_v28 = vsel %vm1261_vm12, %v1732_v48, %v1738_v4  ;;  %v10017_v4 = vld [vmem:[#allocation6_spill] sm:$0xff] }
 0x4a5   :  { %v1700_v40 = vrot.slane %v1699_v39, 4  ;;  %v10020_v48 = vld [vmem:[#allocation10_spill] sm:$0xff] }
 0x4a6   :  { %v1691_v55 = vadd.f32 %v1690_v11, %v1689_v0  ;;  %v1708_v33 = vadd.f32 %v1707_v15, %v1706_v1  ;;  %v1698_v8 = vadd.f32 %v1697_v43, %v1696_v54  ;;  %v5329_v43 = vunpack.i.h.bf16 %v7282_v21  ;;  %v5338_v17 = vpop.permute.xlu0 %5337 }
 0x4a7   :  { %v1701_v6 = vadd.f32 %v1700_v40, %v1699_v39 }
 0x4a8   :  { %v1717_v26 = vpack.c.bf16 %v1691_v55, %v1691_v55  ;;  %v1709_v30 = vrot.slane %v1708_v33, 2  ;;  %v1718_v22 = vpack.c.bf16 %v1698_v8, %v1698_v8  ;;  %v1428_v21 = vmul.f32 %v5329_v43, %v6897_v56  ;;  %v10014_v8 = vld [vmem:[#allocation2_spill] sm:$0xff] }
 0x4a9   :  { %v1702_v25 = vrot.slane %v1701_v6, 2  ;;  %v1297_v43 = vmul.f32 %v7247_v12, %v7229_v24  ;;  %v10048_v24 = vld [vmem:[#allocation46_spill] sm:$0xff]  ;;  %v10049_v12 = vld [vmem:[#allocation20_spill] sm:$0xff] }
 0x4aa   :  { %v1710_v29 = vadd.f32 %v1709_v30, %v1708_v33  ;;  %v1733_v3 = vunpack.c.l.b16 %v1717_v26  ;;  %v1734_v35 = vunpack.c.l.b16 %v1718_v22  ;;  %v5340_v33 = vunpack.i.h.bf16 %v5338_v17 }
 0x4ab   :  { %v1703_v32 = vadd.f32 %v1702_v25, %v1701_v6  ;;  %v10013_v6 = vld [vmem:[#allocation5_spill] sm:$0xff] }
 0x4ac   :  { %v1711_v52 = vrot.slane %v1710_v29, 1  ;;  %v1740_v27 = vsel %vm1263_vm14, %v1733_v3, %v1739_v28  ;;  %v10015_v25 = vld [vmem:[#allocation9_spill] sm:$0xff]  ;;  %v1432_v30 = vmul.f32 %v5340_v33, %v6949_v46  ;;  %v10026_v28 = vld [vmem:[#allocation40_spill] sm:$0xff]  ;;  %v10051_v33 = vld [vmem:[#allocation50_spill] sm:$0xff] }
 0x4ad   :  { %v1704_v10 = vrot.slane %v1703_v32, 1  ;;  %v5322_v14 = vpop.permute.xlu1 %5321  ;;  %v1741_v45 = vsel %vm1265_vm0, %v1734_v35, %v1740_v27  ;;  %v5344_v49 = vpop.permute.xlu2 %5343  ;;  %v10018_v3 = vld [vmem:[#allocation17_spill] sm:$0xff]  ;;  %v10025_v35 = vld [vmem:[#allocation36_spill] sm:$0xff] }
 0x4ae   :  { %v5324_v37 = vunpack.i.h.bf16 %v5322_v14  ;;  %v5323_v7 = vunpack.i.l.bf16 %v5322_v14  ;;  %v1712_v2 = vadd.f32 %v1711_v52, %v1710_v29  ;;  %v5345_v26 = vunpack.i.l.bf16 %v5344_v49  ;;  %v10019_v52 = vld [vmem:[#allocation21_spill] sm:$0xff]  ;;  %v10032_v27 = vld [vmem:[#allocation56_spill] sm:$0xff] }
 0x4af   :  { %v1705_v5 = vadd.f32 %v1704_v10, %v1703_v32  ;;  %v5346_v32 = vunpack.i.h.bf16 %v5344_v49  ;;  %v10042_v49 = vld [vmem:[#allocation38_spill] sm:$0xff] }
 0x4b0   :  { %v1425_v62 = vmul.f32 %v5324_v37, %v6861_v58  ;;  %v1423_v61 = vmul.f32 %v5323_v7, %v10011_v50  ;;  %v1720_v36 = vpack.c.bf16 %v1712_v2, %v1712_v2  ;;  %v1431_v56 = vmul.f32 %v5345_v26, %v6932_v20  ;;  %v10021_v37 = vld [vmem:[#allocation25_spill] sm:$0xff]  ;;  %v10030_v50 = vld [vmem:[#allocation22_spill] sm:$0xff] }
 0x4b1   :  { %v1719_v51 = vpack.c.bf16 %v1705_v5, %v1705_v5  ;;  %v1433_v10 = vmul.f32 %v5346_v32, %v6959_v13  ;;  %v10023_v5 = vld [vmem:[#allocation14_spill] sm:$0xff]  ;;  %v10024_v2 = vld [vmem:[#allocation33_spill] sm:$0xff] }
 0x4b2   :  { %1464 = vperm.xlu1 %5358, %v1425_v62   ;;  %1458 = vperm.xlu0 %5359, %v1423_v61   ;;  %v1736_v0 = vunpack.c.l.b16 %v1720_v36  ;;  %v10029_v62 = vld [vmem:[#allocation48_spill] sm:$0xff] }
 0x4b3   :  { %v1735_v54 = vunpack.c.l.b16 %v1719_v51  ;;  %v10031_v61 = vld [vmem:[#allocation52_spill] sm:$0xff]  ;;  %v10033_v51 = vld [vmem:[#allocation26_spill] sm:$0xff] }
 0x4b4   :  { %v10034_v36 = vld [vmem:[#allocation60_spill] sm:$0xff] }
 0x4b5   :  { %v1742_v39 = vsel %vm1267_vm2, %v1735_v54, %v1741_v45  ;;  %v5332_v1 = vpop.permute.xlu1 %5331  ;;  %v5355_v42 = vpop.permute.xlu2 %5354  ;;  %v10035_v54 = vld [vmem:[#allocation64_spill] sm:$0xff]  ;;  %v10037_v45 = vld [vmem:[#allocation37_spill] sm:$0xff] }
 0x4b6   :  { %v1743_v11 = vsel %vm9864_vm3, %v1736_v0, %v1742_v39  ;;  %v5334_v58 = vunpack.i.h.bf16 %v5332_v1  ;;  %v5333_v15 = vunpack.i.l.bf16 %v5332_v1  ;;  %v5356_v29 = vunpack.i.l.bf16 %v5355_v42  ;;  %v10036_v0 = vld [vmem:[#allocation4_spill] sm:$0xff]  ;;  %v10038_v39 = vld [vmem:[#allocation30_spill] sm:$0xff] }
 0x4b7   :  { %v7300_v40 = vpack.c.b16 %v1743_v11, %v1743_v11  ;;  %v10039_v1 = vld [vmem:[#allocation34_spill] sm:$0xff]  ;;  %v1298_v11 = vsel %vm9862_vm8, %v1297_v43, 0.0 }
 0x4b8   :  { %v1429_v47 = vmul.f32 %v5334_v58, %v6922_v41  ;;  %v1427_v55 = vmul.f32 %v5333_v15, %v10012_v38  ;;  %v5339_v41 = vunpack.i.l.bf16 %v5338_v17  ;;  %v1435_v20 = vmul.f32 %v5356_v29, %v6970_v57  ;;  %v10022_v57 = vld [vmem:[#allocation29_spill] sm:$0xff]  ;;  %v10040_v58 = vld [vmem:[#allocation8_spill] sm:$0xff] }
 0x4b9   :  { %1754 = vmatmul.bf16.vlgmr.msra.gmra.mxu2 %v7300_v40  ;;  %1780 = vmatmul.bf16.vlgmr.msrb.gmra.mxu0 %v7300_v40  ;;  %v10041_v15 = vld [vmem:[#allocation41_spill] sm:$0xff]  ;;  %v10055_v29 = vld [vmem:[#allocation28_spill] sm:$0xff] }
 0x4ba   :  { %1785 = vmatpush.bf16.msra.mxu2 %v10013_v6  ;;  %1806 = vmatmul.bf16.vlgmr.msra.gmra.mxu3 %v7300_v40  ;;  %v1430_v60 = vmul.f32 %v5339_v41, %v6929_v44  ;;  %v10044_v38 = vld [vmem:[#allocation45_spill] sm:$0xff] }
 0x4bb   :  { %1476 = vperm.xlu2 %5360, %v1429_v47   ;;  %1470 = vperm.xlu1 %5358, %v1427_v55   ;;  %v10043_v47 = vld [vmem:[#allocation12_spill] sm:$0xff]  ;;  %v10045_v55 = vld [vmem:[#allocation42_spill] sm:$0xff]  ;;  %v10047_v17 = vld [vmem:[#allocation49_spill] sm:$0xff] }
 0x4bc   :  { %1473 = vperm.xlu0 %5359, %v1428_v21   ;;  %1948 = vmatpush.bf16.xpose.msra.mxu3 %v10013_v6  ;;  %v10050_v21 = vld [vmem:[#allocation53_spill] sm:$0xff] }
 0x4bd   :  { %1909 = vmatpush.bf16.xpose.msrb.mxu0 %v10014_v8 }
 0x4be   :  { %1786 = vmatpush.bf16.msra.mxu2 %v10015_v25 }
 0x4c2   :  { %1787 = vmatpush.bf16.msra.mxu2 %v10016_v19 }
 0x4c3   :  { %1485 = vperm.xlu2 %5360, %v1432_v30   ;;  %1479 = vperm.xlu1 %5358, %v1430_v60   ;;  %v10052_v30 = vld [vmem:[#allocation24_spill] sm:$0xff]  ;;  %v10053_v60 = vld [vmem:[#allocation57_spill] sm:$0xff] }
 0x4c4   :  { %1482 = vperm.xlu0 %5359, %v1431_v56   ;;  %1949 = vmatpush.bf16.xpose.msra.mxu3 %v10015_v25 }
 0x4c5   :  { %v5350_v22 = vpop.permute.xlu1 %5349  ;;  %1910 = vmatpush.bf16.xpose.msrb.mxu0 %v10017_v4 }
 0x4c6   :  { %1788 = vmatpush.bf16.msra.mxu2 %v10018_v3  ;;  %v5351_v46 = vunpack.i.l.bf16 %v5350_v22  ;;  %v5352_v14 = vunpack.i.h.bf16 %v5350_v22 }
 0x4c8   :  { %v1434_v44 = vmul.f32 %v5351_v46, %v6984_v9  ;;  %v5357_v9 = vunpack.i.h.bf16 %v5355_v42  ;;  %v1436_v7 = vmul.f32 %v5352_v14, %v7046_v53  ;;  %v10027_v53 = vld [vmem:[#allocation18_spill] sm:$0xff]  ;;  %v10056_v46 = vld [vmem:[#allocation61_spill] sm:$0xff] }
 0x4c9   :  { %1767 = vmatmul.bf16.vlgmr.msrb.gmra.mxu2 %v7300_v40  ;;  %1819 = vmatmul.bf16.vlgmr.msra.gmra.mxu0 %v7300_v40  ;;  %v10054_v42 = vld [vmem:[#allocation54_spill] sm:$0xff] }
 0x4ca   :  { %1789 = vmatpush.bf16.msra.mxu2 %v10019_v52  ;;  %1845 = vmatmul.bf16.vlgmr.msrb.gmra.mxu3 %v7300_v40  ;;  %v1437_v13 = vmul.f32 %v5357_v9, %v7097_v59  ;;  %v10028_v59 = vld [vmem:[#allocation44_spill] sm:$0xff]  ;;  %v10059_v9 = vld [vmem:[#allocation65_spill] sm:$0xff] }
 0x4cb   :  { %1494 = vperm.xlu2 %5360, %v1435_v20   ;;  %1488 = vperm.xlu1 %5358, %v1433_v10   ;;  %v10058_v20 = vld [vmem:[#allocation32_spill] sm:$0xff] }
 0x4cc   :  { %1491 = vperm.xlu0 %5359, %v1434_v44   ;;  %1950 = vmatpush.bf16.xpose.msra.mxu3 %v10016_v19  ;;  %v10057_v44 = vld [vmem:[#allocation58_spill] sm:$0xff] }
 0x4cd   :  { %1911 = vmatpush.bf16.xpose.msrb.mxu0 %v10020_v48 }
 0x4ce   :  { %1790 = vmatpush.bf16.msra.mxu2 %v10021_v37 }
 0x4d2   :  { %1791 = vmatpush.bf16.msra.mxu2 %v10022_v57 }
 0x4d3   :  { %1497 = vperm.xlu1 %5358, %v1436_v7   ;;  %5361 = vset.pattern.permute.xlu2 %v7237_v63 }
 0x4d4   :  { %1500 = vperm.xlu0 %5359, %v1437_v13   ;;  %1951 = vmatpush.bf16.xpose.msra.mxu3 %v10018_v3  ;;  %v10060_v13 = vld [vmem:[#allocation62_spill] sm:$0xff] }
 0x4d5   :  { %1912 = vmatpush.bf16.xpose.msrb.mxu0 %v10023_v5 }
 0x4d6   :  { %1792 = vmatpush.bf16.msra.mxu2 %v10024_v2 }
 0x4d9   :  { %1793 = vmatmul.bf16.vlgmr.msra.gmra.mxu2 %v7300_v40 }
 0x4da   :  { %1824 = vmatpush.bf16.msrb.mxu2 %v10025_v35 }
 0x4db   :  { %5373 = vset.pattern.permute.xlu1 %v7237_v63 }
 0x4dc   :  { %1952 = vmatpush.bf16.xpose.msra.mxu3 %v10019_v52  ;;  %5367 = vset.pattern.permute.xlu0 %v7242_v16 }
 0x4dd   :  { %1913 = vmatpush.bf16.xpose.msrb.mxu0 %v10027_v53 }
 0x4de   :  { %1825 = vmatpush.bf16.msrb.mxu2 %v10026_v28 }
 0x4e2   :  { %1826 = vmatpush.bf16.msrb.mxu2 %v10028_v59 }
 0x4e4   :  { %1953 = vmatpush.bf16.xpose.msra.mxu3 %v10021_v37 }
 0x4e5   :  { %1914 = vmatpush.bf16.xpose.msrb.mxu0 %v10030_v50 }
 0x4e6   :  { %1827 = vmatpush.bf16.msrb.mxu2 %v10029_v62 }
 0x4ea   :  { %1828 = vmatpush.bf16.msrb.mxu2 %v10031_v61 }
 0x4ec   :  { %1954 = vmatpush.bf16.xpose.msra.mxu3 %v10022_v57 }
 0x4ed   :  { %1915 = vmatpush.bf16.xpose.msrb.mxu0 %v10033_v51 }
 0x4ee   :  { %1829 = vmatpush.bf16.msrb.mxu2 %v10032_v27 }
 0x4f2   :  { %1830 = vmatpush.bf16.msrb.mxu2 %v10034_v36 }
 0x4f4   :  { %1955 = vmatpush.bf16.xpose.msra.mxu3 %v10024_v2  ;;  %v1462_v41 = vpop.permute.xlu2 %1461 }
 0x4f5   :  { %1916 = vmatpush.bf16.xpose.msrb.mxu0 %v10038_v39 }
 0x4f6   :  { %1831 = vmatpush.bf16.msrb.mxu2 %v10035_v54 }
 0x4f9   :  { %1832 = vmatmul.bf16.vlgmr.msrb.gmra.mxu2 %v7300_v40  ;;  %v10046_v40 = vld [vmem:[#allocation16_spill] sm:$0xff] }
 0x4fa   :  { %1935 = vmatpush.bf16.xpose.msra.mxu2 %v10036_v0 }
 0x4fc   :  { %2000 = vmatpush.bf16.xpose.msrb.mxu3 %v10037_v45  ;;  %v1468_v22 = vpop.permute.xlu2 %1467 }
 0x4fd   :  { %1961 = vmatpush.bf16.xpose.msra.mxu0 %v10039_v1  ;;  %1299 = vadd.xlane.f32.xlu1 %v1298_v11 }
 0x502   :  { %1936 = vmatpush.bf16.xpose.msra.mxu2 %v10040_v58 }
 0x504   :  { %2001 = vmatpush.bf16.xpose.msrb.mxu3 %v10041_v15 }
 0x505   :  { %1962 = vmatpush.bf16.xpose.msra.mxu0 %v10042_v49 }
 0x50a   :  { %1937 = vmatpush.bf16.xpose.msra.mxu2 %v10043_v47 }
 0x50c   :  { %2002 = vmatpush.bf16.xpose.msrb.mxu3 %v10044_v38  ;;  %v1456_v26 = vpop.permute.xlu1 %1455 }
 0x50d   :  { %1963 = vmatpush.bf16.xpose.msra.mxu0 %v10045_v55 }
 0x512   :  { %1938 = vmatpush.bf16.xpose.msra.mxu2 %v10046_v40 }
 0x514   :  { %2003 = vmatpush.bf16.xpose.msrb.mxu3 %v10047_v17 }
 0x515   :  { %1964 = vmatpush.bf16.xpose.msra.mxu0 %v10048_v24  ;;  %v1477_v10 = vpop.permute.xlu2 %1476 }
 0x51a   :  { %1939 = vmatpush.bf16.xpose.msra.mxu2 %v10049_v12 }
 0x51c   :  { %2004 = vmatpush.bf16.xpose.msrb.mxu3 %v10050_v21  ;;  %v1508_v21 = vperm.slane %v1468_v22, %v6919_v34 }
 0x51d   :  { %1965 = vmatpush.bf16.xpose.msra.mxu0 %v10051_v33  ;;  %v1486_v63 = vpop.permute.xlu2 %1485 }
 0x522   :  { %1940 = vmatpush.bf16.xpose.msra.mxu2 %v10052_v30 }
 0x524   :  { %2005 = vmatpush.bf16.xpose.msrb.mxu3 %v10053_v60  ;;  %v1465_v56 = vpop.permute.xlu1 %1464  ;;  %v1459_v32 = vpop.permute.xlu0 %1458  ;;  %v1505_v60 = vperm.slane %v1462_v41, %v6919_v34 }
 0x525   :  { %1966 = vmatpush.bf16.xpose.msra.mxu0 %v10054_v42  ;;  %v1506_v16 = vperm.slane %v1465_v56, %v6947_v23  ;;  %v1503_v31 = vperm.slane %v1459_v32, %v6947_v23 }
 0x527   :  { %v1507_v38 = vsel %vm1234_vm5, %v1506_v16, %v1505_v60  ;;  %v1517_v60 = vperm.slane %v1486_v63, %v6919_v34 }
 0x52a   :  { %1941 = vmatpush.bf16.xpose.msra.mxu2 %v10055_v29 }
 0x52c   :  { %2006 = vmatpush.bf16.xpose.msrb.mxu3 %v10056_v46 }
 0x52d   :  { %1967 = vmatpush.bf16.xpose.msra.mxu0 %v10057_v44  ;;  %v1471_v14 = vpop.permute.xlu1 %1470  ;;  %v1512_v44 = vperm.slane %v1477_v10, %v6947_v23 }
 0x52e   :  { %v1474_v7 = vpop.permute.xlu0 %1473  ;;  %v1509_v46 = vperm.slane %v1471_v14, %v6947_v23 }
 0x52f   :  { %v1511_v45 = vperm.slane %v1474_v7, %v6919_v34 }
 0x530   :  { %v1510_v32 = vsel %vm1234_vm5, %v1509_v46, %v1508_v21 }
 0x531   :  { %v1513_v42 = vsel %vm1234_vm5, %v1512_v44, %v1511_v45 }
 0x532   :  { %1942 = vmatpush.bf16.xpose.msra.mxu2 %v10058_v20 }
 0x534   :  { %2007 = vmatpush.bf16.xpose.msrb.mxu3 %v10059_v9  ;;  %v1502_v9 = vperm.slane %v1456_v26, %v6919_v34 }
 0x535   :  { %1968 = vmatpush.bf16.xpose.msra.mxu0 %v10060_v13  ;;  %v1480_v43 = vpop.permute.xlu1 %1479 }
 0x536   :  { %v1483_v11 = vpop.permute.xlu0 %1482  ;;  %v7385_v18 = vpop.f32.mrf.mxu0  ;;  %v1504_v15 = vsel %vm1234_vm5, %v1503_v31, %v1502_v9  ;;  %v1514_v26 = vperm.slane %v1480_v43, %v6919_v34 }
 0x537   :  { %v1515_v41 = vperm.slane %v1483_v11, %v6947_v23  ;;  %v1526_v31 = vsel %vm1257_vm6, %v1507_v38, %v1504_v15  ;;  %v1495_v9 = vpop.permute.xlu2 %1494 }
 0x538   :  { %v1527_v7 = vsel %vm1259_vm7, %v1510_v32, %v1526_v31  ;;  %v1521_v11 = vperm.slane %v1495_v9, %v6947_v23 }
 0x539   :  { %v1516_v21 = vsel %vm1234_vm5, %v1515_v41, %v1514_v26  ;;  %v1528_v10 = vsel %vm1261_vm12, %v1513_v42, %v1527_v7 }
 0x53a   :  { %1987 = vmatpush.bf16.xpose.msrb.mxu2 %v10025_v35  ;;  %v1529_v63 = vsel %vm1263_vm14, %v1516_v21, %v1528_v10 }
 0x53c   :  { %v7393_v17 = vpop.f32.mrf.mxu2 }
 0x53d   :  { %v7398_v13 = vpop.f32.mrf.mxu3  ;;  %v1489_v56 = vpop.permute.xlu1 %1488 }
 0x53e   :  { %v1492_v22 = vpop.permute.xlu0 %1491  ;;  %v1783_v14 = vpop.f32.mrf.mxu0  ;;  %v1518_v16 = vperm.slane %v1489_v56, %v6947_v23 }
 0x53f   :  { %v1520_v46 = vperm.slane %v1492_v22, %v6919_v34 }
 0x540   :  { %v1519_v43 = vsel %vm1234_vm5, %v1518_v16, %v1517_v60 }
 0x541   :  { %v1522_v32 = vsel %vm1234_vm5, %v1521_v11, %v1520_v46  ;;  %v1530_v41 = vsel %vm1265_vm0, %v1519_v43, %v1529_v63 }
 0x542   :  { %1988 = vmatpush.bf16.xpose.msrb.mxu2 %v10026_v28  ;;  %v1531_v22 = vsel %vm1267_vm2, %v1522_v32, %v1530_v41 }
 0x544   :  { %v1757_v56 = vpop.f32.mrf.mxu2 }
 0x545   :  { %v1809_v14 = vpop.f32.mrf.mxu3  ;;  %v1498_v15 = vpop.permute.xlu1 %1497 }
 0x546   :  { %v1501_v38 = vpop.permute.xlu0 %1500  ;;  %v1523_v45 = vperm.slane %v1498_v15, %v6919_v34  ;;  %v7418_v44 = vpop.f32.mrf.mxu0 }
 0x547   :  { %v1524_v26 = vperm.slane %v1501_v38, %v6947_v23 }
 0x549   :  { %v1525_v42 = vsel %vm1234_vm5, %v1524_v26, %v1523_v45 }
 0x54a   :  { %1989 = vmatpush.bf16.xpose.msrb.mxu2 %v10028_v59  ;;  %v1532_v16 = vsel %vm9864_vm3, %v1525_v42, %v1531_v22 }
 0x54b   :  { %v1534_v31 = vsel %vm9862_vm8, %v1532_v16, 0.0 }
 0x54c   :  { %1535 = vadd.xlane.f32.xlu2 %v1534_v31  ;;  %v1768_v60 = vpop.f32.mrf.mxu2 }
 0x54d   :  { %v1846_v9 = vpop.f32.mrf.mxu3 }
 0x54e   :  { %v1822_v7 = vpop.f32.mrf.mxu0 }
 0x552   :  { %1990 = vmatpush.bf16.xpose.msrb.mxu2 %v10029_v62 }
 0x554   :  { %v1770_v21 = vpop.f32.mrf.mxu2 }
 0x555   :  { %v1848_v46 = vpop.f32.mrf.mxu3 }
 0x55a   :  { %1991 = vmatpush.bf16.xpose.msrb.mxu2 %v10031_v61 }
 0x55c   :  { %v1794_v43 = vpop.f32.mrf.mxu2 }
 0x562   :  { %1992 = vmatpush.bf16.xpose.msrb.mxu2 %v10032_v27 }
 0x564   :  { %v1796_v11 = vpop.f32.mrf.mxu2 }
 0x56a   :  { %1993 = vmatpush.bf16.xpose.msrb.mxu2 %v10034_v36 }
 0x570   :  { %v1300_v26 = vpop.xlane.xlu1 %1299 }
 0x572   :  { %1994 = vmatpush.bf16.xpose.msrb.mxu2 %v10035_v54 }
 0x57c   :  { %v1833_v10 = vpop.f32.mrf.mxu2 }
 0x584   :  { %v1835_v56 = vpop.f32.mrf.mxu2 }
 0x5bf   :  { %v1536_v14 = vpop.xlane.xlu2 %1535 }
 0x5c0   :  { %5570 = vrsqrt.f32 %v1536_v14  ;;  %vm1856_vm15 = vweird.f32 %v1536_v14 }
 0x5c6   :  { %v5571_v15 = vpop.eup %5570 }
 0x5c7   :  { %v1851_v63 = vmul.f32 %v5571_v15, %v1536_v14  ;;  %vm1857_vm13 = vweird.f32 %v5571_v15 }
 0x5c8   :  { %vm1858_vm9 = vmor %vm1856_vm15, %vm1857_vm13 }
 0x5c9   :  { %v1852_v38 = vmul.f32 %v5571_v15, %v1851_v63 }
 0x5cb   :  { %v1853_v45 = vmul.f32 0.5, %v1852_v38  ;;  %v7466_v38 = vld [vmem:[%s9626_s0 + $0x18] sm:$0xff] }
 0x5cc   :  { %10065 = vst [vmem:[#allocation70_spill] sm:$0xff] %v7466_v38 }
 0x5cd   :  { %v1854_v32 = vsub.f32 1.5, %v1853_v45 }
 0x5cf   :  { %v1855_v41 = vmul.f32 %v5571_v15, %v1854_v32 }
 0x5d1   :  { %v1859_v42 = vsel %vm1858_vm9, %v5571_v15, %v1855_v41  ;;  %v7460_v15 = vld [vmem:[%s9626_s0 + $0x10] sm:$0xff] }
 0x5d2   :  { %v1860_v22 = vmul.f32 %v1859_v42, %v1300_v26 }
 0x5d4   :  { %v7432_v16 = vmul.f32 %v1860_v22, %v7393_v17  ;;  %v7434_v31 = vmul.f32 %v1860_v22, %v1768_v60  ;;  %v7437_v7 = vmul.f32 %v1860_v22, %v7385_v18  ;;  %v7439_v21 = vmul.f32 %v1860_v22, %v1794_v43  ;;  %v7448_v17 = vld [vmem:[%s9626_s0] sm:$0xff]  ;;  %v7454_v18 = vld [vmem:[%s9626_s0 + $0x8] sm:$0xff] }
 0x5d6   :  { %10061 = vst [vmem:[#allocation66_spill] sm:$0xff] %v7432_v16  ;;  %v1885_v46 = vmul.f32 1.02, %v7432_v16  ;;  %v1886_v11 = vmul.f32 1.02, %v7434_v31 }
 0x5d7   :  { %10062 = vst [vmem:[#allocation67_spill] sm:$0xff] %v7434_v31  ;;  %v1887_v56 = vmul.f32 1.02, %v7437_v7  ;;  %v1888_v14 = vmul.f32 1.02, %v7439_v21 }
 0x5d8   :  { %10063 = vst [vmem:[#allocation69_spill] sm:$0xff] %v7437_v7  ;;  %v1893_v60 = vadd.f32 %v7448_v17, %v1885_v46  ;;  %v1894_v43 = vadd.f32 %v7454_v18, %v1886_v11  ;;  %v10066_v46 = vld [vmem:[#allocation3_spill] sm:$0xff]  ;;  %v7472_v11 = vmul.f32 %v1860_v22, %v7398_v13 }
 0x5d9   :  { %10064 = vst [vmem:[#allocation68_spill] sm:$0xff] %v7439_v21  ;;  %v1895_v63 = vadd.f32 %v7460_v15, %v1887_v56  ;;  %v1896_v45 = vadd.f32 %v7466_v38, %v1888_v14  ;;  %v7475_v56 = vmul.f32 %v1860_v22, %v7418_v44  ;;  %v7478_v14 = vmul.f32 %v1860_v22, %v1833_v10  ;;  %v10071_v10 = vld [vmem:[#allocation7_spill] sm:$0xff] }
 0x5da   :  { %v1901_v32 = vpack.c.bf16 %v1893_v60, %v1893_v60  ;;  %v1902_v41 = vpack.c.bf16 %v1894_v43, %v1894_v43  ;;  %10067 = vst [vmem:[#allocation71_spill] sm:$0xff] %v7472_v11  ;;  %v7480_v60 = vmul.f32 %v1860_v22, %v1846_v9  ;;  %v7485_v43 = vld [vmem:[%s9628_s3 + $0x38] sm:$0xff]  ;;  %v7495_v9 = vld [vmem:[%s9628_s3 + $0x30] sm:$0xff]  ;;  %v7503_v22 = vld [vmem:[%s9626_s0 + $0x20] sm:$0xff] }
 0x5db   :  { %v1903_v26 = vpack.c.bf16 %v1895_v63, %v1895_v63  ;;  %v1904_v42 = vpack.c.bf16 %v1896_v45, %v1896_v45  ;;  %10068 = vst [vmem:[#allocation76_spill] sm:$0xff] %v7475_v56  ;;  %v1889_v63 = vmul.f32 1.02, %v7472_v11  ;;  %v1890_v13 = vmul.f32 1.02, %v7475_v56 }
 0x5dc   :  { %1917 = vmatmul.bf16.vlgmr.msrb.gmra.mxu0 %v1901_v32  ;;  %1930 = vmatmul.bf16.vlgmr.msrb.gmra.mxu1 %v1902_v41  ;;  %10069 = vst [vmem:[#allocation77_spill] sm:$0xff] %v7478_v14  ;;  %v1891_v44 = vmul.f32 1.02, %v7478_v14  ;;  %v1892_v45 = vmul.f32 1.02, %v7480_v60  ;;  %v7509_v41 = vld [vmem:[%s9626_s0 + $0x28] sm:$0xff] }
 0x5dd   :  { %1943 = vmatmul.bf16.vlgmr.msra.gmra.mxu2 %v1903_v26  ;;  %1956 = vmatmul.bf16.vlgmr.msra.gmra.mxu3 %v1904_v42  ;;  %10070 = vst [vmem:[#allocation78_spill] sm:$0xff] %v7480_v60  ;;  %v1897_v32 = vadd.f32 %v7503_v22, %v1889_v63  ;;  %v1898_v26 = vadd.f32 %v7509_v41, %v1890_v13  ;;  %v7516_v42 = vld [vmem:[%s9626_s0 + $0x30] sm:$0xff]  ;;  %v7522_v63 = vld [vmem:[%s9626_s0 + $0x38] sm:$0xff]  ;;  %v7528_v13 = vld [vmem:[%s9628_s3 + $0x28] sm:$0xff] }
 0x5de   :  { %2060 = vmatpush.bf16.xpose.msrb.mxu1 %v10014_v8  ;;  %2073 = vmatpush.bf16.xpose.msra.mxu2 %v10066_v46  ;;  %v1899_v34 = vadd.f32 %v7516_v42, %v1891_v44  ;;  %10072 = vst [vmem:[#allocation79_spill] sm:$0xff] %v7522_v63  ;;  %v1900_v23 = vadd.f32 %v7522_v63, %v1892_v45  ;;  %v7534_v44 = vld [vmem:[%s9628_s3 + $0x20] sm:$0xff]  ;;  %v10073_v45 = vld [vmem:[#allocation11_spill] sm:$0xff] }
 0x5df   :  { %2086 = vmatpush.bf16.xpose.msra.mxu3 %v10036_v0  ;;  %2015 = vmatpush.bf16.msrb.mxu0 %v7485_v43  ;;  %v1905_v60 = vpack.c.bf16 %v1897_v32, %v1897_v32  ;;  %v1906_v38 = vpack.c.bf16 %v1898_v26, %v1898_v26  ;;  %v10076_v32 = vld [vmem:[#allocation23_spill] sm:$0xff] }
 0x5e0   :  { %v1907_v21 = vpack.c.bf16 %v1899_v34, %v1899_v34  ;;  %v7543_v34 = vld [vmem:[%s9628_s3 + $0x18] sm:$0xff]  ;;  %v10077_v26 = vld [vmem:[#allocation27_spill] sm:$0xff] }
 0x5e1   :  { %v10078_v63 = vld [vmem:[#allocation31_spill] sm:$0xff] }
 0x5e3   :  { %2016 = vmatpush.bf16.msrb.mxu0 %v7495_v9 }
 0x5e6   :  { %2061 = vmatpush.bf16.xpose.msrb.mxu1 %v10017_v4  ;;  %2074 = vmatpush.bf16.xpose.msra.mxu2 %v10071_v10  ;;  %v1908_v10 = vpack.c.bf16 %v1900_v23, %v1900_v23  ;;  %v7549_v23 = vld [vmem:[%s9628_s3 + $0x10] sm:$0xff] }
 0x5e7   :  { %2087 = vmatpush.bf16.xpose.msra.mxu3 %v10040_v58  ;;  %2017 = vmatpush.bf16.msrb.mxu0 %v7528_v13 }
 0x5eb   :  { %2018 = vmatpush.bf16.msrb.mxu0 %v7534_v44 }
 0x5ec   :  { %1969 = vmatmul.bf16.vlgmr.msra.gmra.mxu0 %v1905_v60  ;;  %1982 = vmatmul.bf16.vlgmr.msra.gmra.mxu1 %v1906_v38  ;;  %v7558_v38 = vld [vmem:[%s9628_s3 + $0x8] sm:$0xff]  ;;  %v7564_v60 = vld [vmem:[%s9628_s3] sm:$0xff] }
 0x5ed   :  { %1995 = vmatmul.bf16.vlgmr.msrb.gmra.mxu2 %v1907_v21  ;;  %2008 = vmatmul.bf16.vlgmr.msrb.gmra.mxu3 %v1908_v10  ;;  %v10074_v21 = vld [vmem:[#allocation15_spill] sm:$0xff] }
 0x5ee   :  { %2062 = vmatpush.bf16.xpose.msrb.mxu1 %v10020_v48  ;;  %2075 = vmatpush.bf16.xpose.msra.mxu2 %v10073_v45  ;;  %v10075_v10 = vld [vmem:[#allocation19_spill] sm:$0xff] }
 0x5ef   :  { %2088 = vmatpush.bf16.xpose.msra.mxu3 %v10043_v47  ;;  %2019 = vmatpush.bf16.msrb.mxu0 %v7543_v34 }
 0x5f3   :  { %2020 = vmatpush.bf16.msrb.mxu0 %v7549_v23 }
 0x5f6   :  { %2063 = vmatpush.bf16.xpose.msrb.mxu1 %v10023_v5  ;;  %2076 = vmatpush.bf16.xpose.msra.mxu2 %v10074_v21  ;;  %v7596_v21 = vadd.f32 %v7460_v15, %v7437_v7  ;;  %v10084_v15 = vld [vmem:[#allocation43_spill] sm:$0xff]  ;;  %v10091_v7 = vld [vmem:[#allocation62_spill] sm:$0xff] }
 0x5f7   :  { %2089 = vmatpush.bf16.xpose.msra.mxu3 %v10046_v40  ;;  %2021 = vmatpush.bf16.msrb.mxu0 %v7558_v38 }
 0x5f8   :  { %10082 = vst [vmem:[#allocation82_spill] sm:$0xff] %v7596_v21 }
 0x5fb   :  { %2022 = vmatpush.bf16.msrb.mxu0 %v7564_v60 }
 0x5fe   :  { %2064 = vmatpush.bf16.xpose.msrb.mxu1 %v10027_v53  ;;  %2077 = vmatpush.bf16.xpose.msra.mxu2 %v10075_v10  ;;  %v7590_v10 = vadd.f32 %v7454_v18, %v7434_v31  ;;  %v10083_v18 = vld [vmem:[#allocation39_spill] sm:$0xff] }
 0x5ff   :  { %2099 = vmatpush.bf16.xpose.msra.mxu0 %v10013_v6  ;;  %2090 = vmatpush.bf16.xpose.msra.mxu3 %v10049_v12  ;;  %v10092_v31 = vld [vmem:[#allocation63_spill] sm:$0xff] }
 0x600   :  { %10080 = vst [vmem:[#allocation81_spill] sm:$0xff] %v7590_v10 }
 0x606   :  { %2065 = vmatpush.bf16.xpose.msrb.mxu1 %v10030_v50  ;;  %2078 = vmatpush.bf16.xpose.msra.mxu2 %v10076_v32  ;;  %v7586_v32 = vadd.f32 %v7448_v17, %v7432_v16  ;;  %v2054_v17 = vpack.c.bf16 %v7596_v21, %v7596_v21  ;;  %v10088_v21 = vld [vmem:[#allocation55_spill] sm:$0xff]  ;;  %v7631_v16 = vadd.f32 %v7503_v22, %v7472_v11  ;;  %v5657_v22 = vld [vmem:[%s9629_s5 + $0x70] sm:$0xff] }
 0x607   :  { %2100 = vmatpush.bf16.xpose.msra.mxu0 %v10015_v25  ;;  %2091 = vmatpush.bf16.xpose.msra.mxu3 %v10052_v30 }
 0x608   :  { %10079 = vst [vmem:[#allocation80_spill] sm:$0xff] %v7586_v32 }
 0x609   :  { %10093 = vst [vmem:[#allocation83_spill] sm:$0xff] %v7631_v16 }
 0x60e   :  { %2066 = vmatpush.bf16.xpose.msrb.mxu1 %v10033_v51  ;;  %2079 = vmatpush.bf16.xpose.msra.mxu2 %v10077_v26  ;;  %v10081_v26 = vld [vmem:[#allocation35_spill] sm:$0xff] }
 0x60f   :  { %2101 = vmatpush.bf16.xpose.msra.mxu0 %v10016_v19  ;;  %2092 = vmatpush.bf16.xpose.msra.mxu3 %v10055_v29 }
 0x616   :  { %2067 = vmatpush.bf16.xpose.msrb.mxu1 %v10038_v39  ;;  %2080 = vmatpush.bf16.xpose.msra.mxu2 %v10078_v63  ;;  %v2052_v63 = vpack.c.bf16 %v7586_v32, %v7586_v32  ;;  %v10090_v32 = vld [vmem:[#allocation59_spill] sm:$0xff] }
 0x617   :  { %2102 = vmatpush.bf16.xpose.msra.mxu0 %v10018_v3  ;;  %2093 = vmatpush.bf16.xpose.msra.mxu3 %v10058_v20 }
 0x61d   :  { %2068 = vmatmul.bf16.vlgmr.msrb.gmra.mxu1 %v2052_v63  ;;  %v10086_v63 = vld [vmem:[#allocation51_spill] sm:$0xff] }
 0x61e   :  { %2112 = vmatpush.bf16.xpose.msra.mxu1 %v10039_v1  ;;  %2125 = vmatpush.bf16.xpose.msrb.mxu2 %v10081_v26  ;;  %v2053_v1 = vpack.c.bf16 %v7590_v10, %v7590_v10  ;;  %v10089_v10 = vld [vmem:[#allocation58_spill] sm:$0xff] }
 0x61f   :  { %2138 = vmatpush.bf16.xpose.msrb.mxu3 %v10025_v35  ;;  %2103 = vmatpush.bf16.xpose.msra.mxu0 %v10019_v52 }
 0x620   :  { %2081 = vmatmul.bf16.vlgmr.msra.gmra.mxu2 %v2053_v1  ;;  %2094 = vmatmul.bf16.vlgmr.msra.gmra.mxu3 %v2054_v17  ;;  %v10085_v1 = vld [vmem:[#allocation47_spill] sm:$0xff]  ;;  %v10087_v17 = vld [vmem:[#allocation54_spill] sm:$0xff] }
 0x626   :  { %2113 = vmatpush.bf16.xpose.msra.mxu1 %v10042_v49  ;;  %2126 = vmatpush.bf16.xpose.msrb.mxu2 %v10083_v18 }
 0x627   :  { %2139 = vmatpush.bf16.xpose.msrb.mxu3 %v10026_v28  ;;  %2104 = vmatpush.bf16.xpose.msra.mxu0 %v10021_v37 }
 0x62e   :  { %2114 = vmatpush.bf16.xpose.msra.mxu1 %v10045_v55  ;;  %2127 = vmatpush.bf16.xpose.msrb.mxu2 %v10084_v15 }
 0x62f   :  { %2140 = vmatpush.bf16.xpose.msrb.mxu3 %v10028_v59  ;;  %2105 = vmatpush.bf16.xpose.msra.mxu0 %v10022_v57 }
 0x636   :  { %2115 = vmatpush.bf16.xpose.msra.mxu1 %v10048_v24  ;;  %2128 = vmatpush.bf16.xpose.msrb.mxu2 %v10085_v1 }
 0x637   :  { %2141 = vmatpush.bf16.xpose.msrb.mxu3 %v10029_v62  ;;  %2106 = vmatpush.bf16.xpose.msra.mxu0 %v10024_v2 }
 0x63e   :  { %2116 = vmatpush.bf16.xpose.msra.mxu1 %v10051_v33  ;;  %2129 = vmatpush.bf16.xpose.msrb.mxu2 %v10086_v63 }
 0x63f   :  { %2142 = vmatpush.bf16.xpose.msrb.mxu3 %v10031_v61  ;;  %v7635_v61 = vadd.f32 %v7509_v41, %v7475_v56  ;;  %v2056_v41 = vpack.c.bf16 %v7631_v16, %v7631_v16  ;;  %v10108_v56 = vld [vmem:[#allocation27_spill] sm:$0xff] }
 0x641   :  { %10094 = vst [vmem:[#allocation84_spill] sm:$0xff] %v7635_v61 }
 0x646   :  { %2117 = vmatpush.bf16.xpose.msra.mxu1 %v10087_v17  ;;  %2130 = vmatpush.bf16.xpose.msrb.mxu2 %v10088_v21 }
 0x647   :  { %2143 = vmatpush.bf16.xpose.msrb.mxu3 %v10032_v27  ;;  %v7639_v27 = vadd.f32 %v7516_v42, %v7478_v14  ;;  %v2057_v42 = vpack.c.bf16 %v7635_v61, %v7635_v61 }
 0x649   :  { %10095 = vst [vmem:[#allocation85_spill] sm:$0xff] %v7639_v27 }
 0x64e   :  { %2118 = vmatpush.bf16.xpose.msra.mxu1 %v10089_v10  ;;  %2131 = vmatpush.bf16.xpose.msrb.mxu2 %v10090_v32 }
 0x64f   :  { %2144 = vmatpush.bf16.xpose.msrb.mxu3 %v10034_v36  ;;  %v5656_v36 = vld [vmem:[%s9629_s5 + $0x78] sm:$0xff] }
 0x656   :  { %2119 = vmatpush.bf16.xpose.msra.mxu1 %v10091_v7  ;;  %2132 = vmatpush.bf16.xpose.msrb.mxu2 %v10092_v31 }
 0x657   :  { %2145 = vmatpush.bf16.xpose.msrb.mxu3 %v10035_v54 }
 0x659   :  { %v1918_v61 = vpop.f32.mrf.mxu0  ;;  %v1931_v16 = vpop.f32.mrf.mxu1 }
 0x65d   :  { %2120 = vmatmul.bf16.vlgmr.msra.gmra.mxu1 %v2056_v41  ;;  %2133 = vmatmul.bf16.vlgmr.msrb.gmra.mxu2 %v2057_v42  ;;  %v5661_v41 = vld [vmem:[%s9629_s5 + $0x50] sm:$0xff]  ;;  %v5662_v42 = vld [vmem:[%s9629_s5 + $0x48] sm:$0xff] }
 0x65e   :  { %2166 = vmatpush.bf16.msrb.mxu1 %v7485_v43  ;;  %2310 = vmatpush.msra.mxu2 %v5656_v36  ;;  %v2058_v43 = vpack.c.bf16 %v7639_v27, %v7639_v27  ;;  %v5658_v36 = vld [vmem:[%s9629_s5 + $0x68] sm:$0xff] }
 0x65f   :  { %3232 = vmatpush.bf16.msra.mxu3 %v10014_v8 }
 0x660   :  { %2311 = vmatpush.msra.mxu2 %v5657_v22  ;;  %2146 = vmatmul.bf16.vlgmr.msrb.gmra.mxu3 %v2058_v43  ;;  %v5659_v22 = vld [vmem:[%s9629_s5 + $0x60] sm:$0xff] }
 0x662   :  { %2167 = vmatpush.bf16.msrb.mxu1 %v7495_v9  ;;  %2312 = vmatpush.msra.mxu2 %v5658_v36  ;;  %v5660_v9 = vld [vmem:[%s9629_s5 + $0x58] sm:$0xff]  ;;  %v1944_v36 = vpop.f32.mrf.mxu2 }
 0x663   :  { %3233 = vmatpush.bf16.msra.mxu3 %v10017_v4  ;;  %v5704_v4 = vld [vmem:[%s9632_s8 + $0x68] sm:$0xff] }
 0x664   :  { %2313 = vmatpush.msra.mxu2 %v5659_v22  ;;  %v1957_v22 = vpop.f32.mrf.mxu3 }
 0x666   :  { %2168 = vmatpush.bf16.msrb.mxu1 %v7528_v13  ;;  %2314 = vmatpush.msra.mxu2 %v5660_v9  ;;  %v7679_v13 = vld [vmem:[%s9625_s2] ss:$0 sm:$0xff]  ;;  %v1920_v9 = vpop.f32.mrf.mxu0 }
 0x667   :  { %3234 = vmatpush.bf16.msra.mxu3 %v10020_v48  ;;  %v1919_v43 = vadd.f32 %v7679_v13, %v1918_v61  ;;  %v5666_v61 = vld [vmem:[%s9629_s5 + $0x30] sm:$0xff] }
 0x668   :  { %2315 = vmatpush.msra.mxu2 %v5661_v41  ;;  %v1933_v41 = vpop.f32.mrf.mxu1 }
 0x669   :  { %v1932_v27 = vadd.f32 %v1931_v16, %v1919_v43  ;;  %v5668_v16 = vld [vmem:[%s9629_s5 + $0x20] sm:$0xff] }
 0x66a   :  { %2169 = vmatpush.bf16.msrb.mxu1 %v7534_v44  ;;  %2316 = vmatpush.msra.mxu2 %v5662_v42  ;;  %v5664_v44 = vld [vmem:[%s9629_s5 + $0x40] sm:$0xff]  ;;  %v5665_v42 = vld [vmem:[%s9629_s5 + $0x38] sm:$0xff] }
 0x66b   :  { %3235 = vmatpush.bf16.msra.mxu3 %v10023_v5  ;;  %v1945_v14 = vadd.f32 %v1944_v36, %v1932_v27  ;;  %v5669_v27 = vld [vmem:[%s9629_s5 + $0x18] sm:$0xff]  ;;  %v5670_v36 = vld [vmem:[%s9629_s5 + $0x10] sm:$0xff] }
 0x66c   :  { %2317 = vmatpush.msra.mxu2 %v5664_v44  ;;  %v1946_v44 = vpop.f32.mrf.mxu2  ;;  %v1959_v9 = vpop.f32.mrf.mxu3 }
 0x66d   :  { %v1958_v43 = vadd.f32 %v1957_v22, %v1945_v14  ;;  %v5671_v14 = vld [vmem:[%s9629_s5 + $0x8] sm:$0xff] }
 0x66e   :  { %2170 = vmatpush.bf16.msrb.mxu1 %v7543_v34  ;;  %2318 = vmatpush.msra.mxu2 %v5665_v42  ;;  %v5667_v34 = vld [vmem:[%s9629_s5 + $0x28] sm:$0xff]  ;;  %v1970_v41 = vpop.f32.mrf.mxu0 }
 0x66f   :  { %3236 = vmatpush.bf16.msra.mxu3 %v10027_v53 }
 0x670   :  { %2319 = vmatpush.msra.mxu2 %v5666_v61  ;;  %v1983_v42 = vpop.f32.mrf.mxu1 }
 0x672   :  { %2171 = vmatpush.bf16.msrb.mxu1 %v7549_v23  ;;  %2320 = vmatpush.msra.mxu2 %v5667_v34  ;;  %v1971_v23 = vadd.f32 %v1970_v41, %v1958_v43  ;;  %v5672_v34 = vld [vmem:[%s9629_s5] sm:$0xff] }
 0x673   :  { %3237 = vmatpush.bf16.msra.mxu3 %v10030_v50 }
 0x674   :  { %2321 = vmatpush.msra.mxu2 %v5668_v16  ;;  %v1996_v22 = vpop.f32.mrf.mxu2  ;;  %v2009_v61 = vpop.f32.mrf.mxu3 }
 0x676   :  { %2172 = vmatpush.bf16.msrb.mxu1 %v7558_v38  ;;  %2322 = vmatpush.msra.mxu2 %v5669_v27  ;;  %v1984_v38 = vadd.f32 %v1983_v42, %v1971_v23  ;;  %v1972_v44 = vpop.f32.mrf.mxu0  ;;  %v10096_v23 = vld [vmem:[#allocation7_spill] sm:$0xff] }
 0x677   :  { %3238 = vmatpush.bf16.msra.mxu3 %v10033_v51  ;;  %v10103_v44 = vld [vmem:[#allocation45_spill] sm:$0xff] }
 0x678   :  { %2323 = vmatpush.msra.mxu2 %v5670_v36  ;;  %v1985_v9 = vpop.f32.mrf.mxu1  ;;  %v10097_v36 = vld [vmem:[#allocation37_spill] sm:$0xff] }
 0x679   :  { %v10104_v9 = vld [vmem:[#allocation19_spill] sm:$0xff] }
 0x67a   :  { %2173 = vmatpush.bf16.msrb.mxu1 %v7564_v60  ;;  %2324 = vmatpush.msra.mxu2 %v5671_v14  ;;  %v1997_v60 = vadd.f32 %v1996_v22, %v1984_v38  ;;  %v10098_v14 = vld [vmem:[#allocation41_spill] sm:$0xff]  ;;  %v10099_v38 = vld [vmem:[#allocation68_spill] sm:$0xff]  ;;  %v10100_v22 = vld [vmem:[#allocation70_spill] sm:$0xff] }
 0x67b   :  { %3239 = vmatpush.bf16.msra.mxu3 %v10038_v39 }
 0x67c   :  { %2325 = vmatpush.msra.mxu2 %v5672_v34  ;;  %v2010_v16 = vadd.f32 %v2009_v61, %v1997_v60  ;;  %v1998_v42 = vpop.f32.mrf.mxu2  ;;  %v2011_v27 = vpop.f32.mrf.mxu3  ;;  %v7735_v61 = vadd.f32 %v10100_v22, %v10099_v38  ;;  %v10102_v60 = vld [vmem:[#allocation15_spill] sm:$0xff]  ;;  %v10109_v38 = vld [vmem:[#allocation57_spill] sm:$0xff] }
 0x67d   :  { %v10107_v42 = vld [vmem:[#allocation53_spill] sm:$0xff] }
 0x67e   :  { %3258 = vmatpush.bf16.msra.mxu1 %v10036_v0  ;;  %3422 = vmatpush.bf16.xpose.msrb.mxu2 %v10066_v46  ;;  %v2013_v43 = vmax.f32 %v2010_v16, 0.0  ;;  %10101 = vst [vmem:[#allocation70_spill] sm:$0xff] %v7735_v61  ;;  %v2055_v34 = vpack.c.bf16 %v7735_v61, %v7735_v61  ;;  %v10105_v16 = vld [vmem:[#allocation49_spill] sm:$0xff] }
 0x67f   :  { %3271 = vmatpush.bf16.msrb.mxu3 %v10013_v6 }
 0x680   :  { %v2014_v41 = vpack.c.bf16 %v2013_v43, %v2013_v43  ;;  %v10106_v43 = vld [vmem:[#allocation23_spill] sm:$0xff] }
 0x682   :  { %3259 = vmatpush.bf16.msra.mxu1 %v10040_v58  ;;  %2023 = vmatmul.bf16.vlgmr.msrb.gmra.mxu0 %v2014_v41 }
 0x683   :  { %3272 = vmatpush.bf16.msrb.mxu3 %v10015_v25  ;;  %2151 = vmatpush.bf16.xpose.msrb.mxu0 %v10097_v36 }
 0x686   :  { %3260 = vmatpush.bf16.msra.mxu1 %v10043_v47  ;;  %3423 = vmatpush.bf16.xpose.msrb.mxu2 %v10096_v23 }
 0x687   :  { %3273 = vmatpush.bf16.msrb.mxu3 %v10016_v19 }
 0x68a   :  { %3261 = vmatpush.bf16.msra.mxu1 %v10046_v40 }
 0x68b   :  { %3274 = vmatpush.bf16.msrb.mxu3 %v10018_v3  ;;  %2152 = vmatpush.bf16.xpose.msrb.mxu0 %v10098_v14 }
 0x68e   :  { %3262 = vmatpush.bf16.msra.mxu1 %v10049_v12  ;;  %3424 = vmatpush.bf16.xpose.msrb.mxu2 %v10073_v45 }
 0x68f   :  { %3275 = vmatpush.bf16.msrb.mxu3 %v10019_v52  ;;  %v10114_v52 = vld [vmem:[#allocation79_spill] sm:$0xff] }
 0x692   :  { %3263 = vmatpush.bf16.msra.mxu1 %v10052_v30  ;;  %2107 = vmatmul.bf16.vlgmr.msra.gmra.mxu0 %v2055_v34  ;;  %v10113_v30 = vld [vmem:[#allocation78_spill] sm:$0xff] }
 0x693   :  { %3276 = vmatpush.bf16.msrb.mxu3 %v10021_v37  ;;  %2153 = vmatpush.bf16.xpose.msrb.mxu0 %v10103_v44  ;;  %v10112_v37 = vld [vmem:[#allocation65_spill] sm:$0xff]  ;;  %v7758_v12 = vadd.f32 %v10114_v52, %v10113_v30  ;;  %v10116_v52 = vld [vmem:[#allocation34_spill] sm:$0xff] }
 0x695   :  { %10115 = vst [vmem:[#allocation79_spill] sm:$0xff] %v7758_v12 }
 0x696   :  { %3264 = vmatpush.bf16.msra.mxu1 %v10055_v29  ;;  %3425 = vmatpush.bf16.xpose.msrb.mxu2 %v10102_v60  ;;  %v10111_v29 = vld [vmem:[#allocation61_spill] sm:$0xff] }
 0x697   :  { %3277 = vmatpush.bf16.msrb.mxu3 %v10022_v57  ;;  %v10110_v57 = vld [vmem:[#allocation31_spill] sm:$0xff] }
 0x69a   :  { %3265 = vmatpush.bf16.msra.mxu1 %v10058_v20  ;;  %v2069_v41 = vpop.f32.mrf.mxu1 }
 0x69b   :  { %3278 = vmatpush.bf16.msrb.mxu3 %v10024_v2  ;;  %2154 = vmatpush.bf16.xpose.msrb.mxu0 %v10105_v16  ;;  %v2070_v27 = vadd.f32 %v7679_v13, %v2069_v41  ;;  %v2059_v13 = vpack.c.bf16 %v7758_v12, %v7758_v12 }
 0x69e   :  { %3426 = vmatpush.bf16.xpose.msrb.mxu2 %v10104_v9 }
 0x6a2   :  { %v2071_v11 = vpop.f32.mrf.mxu1 }
 0x6a3   :  { %2155 = vmatpush.bf16.xpose.msrb.mxu0 %v10107_v42  ;;  %v2082_v22 = vpop.f32.mrf.mxu2  ;;  %v2095_v61 = vpop.f32.mrf.mxu3 }
 0x6a4   :  { %v2083_v34 = vadd.f32 %v2082_v22, %v2070_v27 }
 0x6a6   :  { %3427 = vmatpush.bf16.xpose.msrb.mxu2 %v10106_v43 }
 0x6ab   :  { %2156 = vmatpush.bf16.xpose.msrb.mxu0 %v10109_v38  ;;  %v2084_v2 = vpop.f32.mrf.mxu2  ;;  %v2097_v20 = vpop.f32.mrf.mxu3 }
 0x6ae   :  { %3428 = vmatpush.bf16.xpose.msrb.mxu2 %v10108_v56 }
 0x6b3   :  { %2157 = vmatpush.bf16.xpose.msrb.mxu0 %v10111_v29 }
 0x6b6   :  { %3429 = vmatpush.bf16.xpose.msrb.mxu2 %v10110_v57 }
 0x6bb   :  { %2158 = vmatpush.bf16.xpose.msrb.mxu0 %v10112_v37 }
 0x6c2   :  { %2159 = vmatmul.bf16.vlgmr.msrb.gmra.mxu0 %v2059_v13 }
 0x6c3   :  { %3245 = vmatpush.bf16.msra.mxu0 %v10066_v46  ;;  %v10117_v46 = vmov 0.0  }
 0x6c7   :  { %3246 = vmatpush.bf16.msra.mxu0 %v10096_v23 }
 0x6cb   :  { %3247 = vmatpush.bf16.msra.mxu0 %v10073_v45 }
 0x6cf   :  { %3248 = vmatpush.bf16.msra.mxu0 %v10102_v60 }
 0x6d3   :  { %3249 = vmatpush.bf16.msra.mxu0 %v10104_v9 }
 0x6d7   :  { %3250 = vmatpush.bf16.msra.mxu0 %v10106_v43 }
 0x6da   :  { %v2121_v2 = vpop.f32.mrf.mxu1 }
 0x6db   :  { %3251 = vmatpush.bf16.msra.mxu0 %v10108_v56 }
 0x6df   :  { %3252 = vmatpush.bf16.msra.mxu0 %v10110_v57  ;;  %v2096_v57 = vadd.f32 %v2095_v61, %v2083_v34 }
 0x6e0   :  { %v2134_v20 = vpop.f32.mrf.mxu2 }
 0x6e2   :  { %v2123_v41 = vpop.f32.mrf.mxu1 }
 0x6e3   :  { %3284 = vmatpush.bf16.msrb.mxu0 %v10116_v52  ;;  %v2147_v11 = vpop.f32.mrf.mxu3 }
 0x6e7   :  { %3285 = vmatpush.bf16.msrb.mxu0 %v10042_v49 }
 0x6e8   :  { %v2136_v27 = vpop.f32.mrf.mxu2 }
 0x6eb   :  { %3286 = vmatpush.bf16.msrb.mxu0 %v10045_v55  ;;  %v2149_v22 = vpop.f32.mrf.mxu3  ;;  %v5693_v55 = vld [vmem:[%s9632_s8 + $0x10] sm:$0xff] }
 0x6ef   :  { %3287 = vmatpush.bf16.msrb.mxu0 %v10048_v24 }
 0x6f3   :  { %3288 = vmatpush.bf16.msrb.mxu0 %v10051_v33 }
 0x6f7   :  { %3289 = vmatpush.bf16.msrb.mxu0 %v10087_v17 }
 0x6fb   :  { %3290 = vmatpush.bf16.msrb.mxu0 %v10089_v10 }
 0x6ff   :  { %3291 = vmatpush.bf16.msrb.mxu0 %v10091_v7  ;;  %v7778_v13 = vpop.f32.mrf.mxu0 }
 0x707   :  { %v2026_v12 = vpop.f32.mrf.mxu0 }
 0x70f   :  { %v2108_v56 = vpop.f32.mrf.mxu0 }
 0x710   :  { %v2109_v43 = vadd.f32 %v2108_v56, %v2096_v57  ;;  %v5673_v56 = vld [vmem:[%s9630_s7] sm:$0xff] }
 0x712   :  { %v2122_v9 = vadd.f32 %v2121_v2, %v2109_v43  ;;  %v5676_v2 = vld [vmem:[%s9630_s7 + $0x10] sm:$0xff] }
 0x714   :  { %v2135_v41 = vadd.f32 %v2134_v20, %v2122_v9  ;;  %v7801_v9 = vld [vmem:[%s9627_s6] ss:$0 sm:$0xff] }
 0x716   :  { %v2148_v45 = vadd.f32 %v2147_v11, %v2135_v41  ;;  %v5677_v41 = vld [vmem:[%s9630_s7 + $0x20] sm:$0xff] }
 0x717   :  { %v2110_v60 = vpop.f32.mrf.mxu0 }
 0x73f   :  { %v2160_v23 = vpop.f32.mrf.mxu0 }
 0x740   :  { %v2161_v30 = vadd.f32 %v2160_v23, %v2148_v45  ;;  %v5674_v45 = vld [vmem:[%s9630_s7 + $0x8] sm:$0xff] }
 0x742   :  { %v2164_v27 = vmax.f32 %v2161_v30, 0.0 }
 0x744   :  { %v2165_v22 = vpack.c.bf16 %v2164_v27, %v2164_v27  ;;  %vm2267_vm10 = vcmp.gt.f32.partialorder %v2164_v27, 0.0 }
 0x745   :  { %v7781_v17 = vsel %vm2267_vm10, 1.0, %v10117_v46 }
 0x746   :  { %2174 = vmatmul.bf16.vlgmr.msrb.gmra.mxu1 %v2165_v22  ;;  %v2278_v7 = vperm.slane %v7781_v17, 0  ;;  %v2271_v12 = vrot.slane %v7781_v17, 1  ;;  %v2272_v61 = vrot.slane %v7781_v17, 2  ;;  %v5678_v22 = vld [vmem:[%s9630_s7 + $0x18] sm:$0xff] }
 0x747   :  { %v2162_v57 = vpop.f32.mrf.mxu0  ;;  %3297 = vmatpush.bf16.msrb.mxu1 %v10081_v26 }
 0x748   :  { %v7790_v30 = vmul.f32 %v5673_v56, %v2278_v7  ;;  %v7795_v23 = vmul.f32 %v5674_v45, %v2278_v7  ;;  %v2279_v60 = vperm.slane %v2271_v12, 0  ;;  %v2280_v20 = vperm.slane %v2272_v61, 0  ;;  %v5679_v56 = vld [vmem:[%s9630_s7 + $0x28] sm:$0xff] }
 0x749   :  { %v2273_v61 = vrot.slane %v7781_v17, 3  ;;  %v2274_v57 = vrot.slane %v7781_v17, 4 }
 0x74a   :  { %2326 = vmatmul.f32.vlgmr.msra.gmra.mxu2 %v7790_v30  ;;  %v2424_v43 = vmul.f32 %v7801_v9, %v7795_v23  ;;  %v2423_v34 = vmul.f32 %v7801_v9, %v7790_v30  ;;  %v7810_v7 = vmul.f32 %v5676_v2, %v2279_v60  ;;  %v7819_v27 = vmul.f32 %v5677_v41, %v2280_v20 }
 0x74b   :  { %3298 = vmatpush.bf16.msrb.mxu1 %v10083_v18  ;;  %3474 = vmatpush.bf16.xpose.msra.mxu2 %v10081_v26  ;;  %v7824_v12 = vmul.f32 %v5678_v22, %v2279_v60  ;;  %v7832_v45 = vmul.f32 %v5679_v56, %v2280_v20  ;;  %v2282_v2 = vperm.slane %v2274_v57, 0  ;;  %v5680_v20 = vld [vmem:[%s9630_s7 + $0x30] sm:$0xff]  ;;  %v5681_v22 = vld [vmem:[%s9630_s7 + $0x48] sm:$0xff]  ;;  %v2275_v57 = vrot.slane %v7781_v17, 5  ;;  %v5682_v56 = vld [vmem:[%s9630_s7 + $0x38] sm:$0xff] }
 0x74c   :  { %2441 = vadd.xlane.f32.xlu2 %v2424_v43  ;;  %2439 = vadd.xlane.f32.xlu0 %v2423_v34  ;;  %v2425_v11 = vmul.f32 %v7801_v9, %v7810_v7  ;;  %v2427_v43 = vmul.f32 %v7801_v9, %v7819_v27  ;;  %v2281_v34 = vperm.slane %v2273_v61, 0 }
 0x74d   :  { %v2426_v60 = vmul.f32 %v7801_v9, %v7824_v12  ;;  %v7851_v61 = vmul.f32 %v5681_v22, %v2282_v2 }
 0x74e   :  { %2443 = vadd.xlane.f32.xlu1 %v2425_v11  ;;  %v2428_v11 = vmul.f32 %v7801_v9, %v7832_v45  ;;  %v7846_v41 = vmul.f32 %v5680_v20, %v2281_v34  ;;  %v2283_v20 = vperm.slane %v2275_v57, 0  ;;  %v5684_v57 = vld [vmem:[%s9630_s7 + $0x50] sm:$0xff] }
 0x74f   :  { %3299 = vmatpush.bf16.msrb.mxu1 %v10084_v15 }
 0x752   :  { %2329 = vmatmul.f32.gmra.mxu2 %v7795_v23 }
 0x753   :  { %3300 = vmatpush.bf16.msrb.mxu1 %v10085_v1  ;;  %3475 = vmatpush.bf16.xpose.msra.mxu2 %v10083_v18  ;;  %v7877_v18 = vmul.f32 %v5684_v57, %v2283_v20 }
 0x754   :  { %2447 = vadd.xlane.f32.xlu0 %v2427_v43  ;;  %2445 = vadd.xlane.f32.xlu2 %v2426_v60  ;;  %v7858_v43 = vmul.f32 %v5682_v56, %v2281_v34  ;;  %v2429_v60 = vmul.f32 %v7801_v9, %v7846_v41  ;;  %v5683_v34 = vld [vmem:[%s9630_s7 + $0x58] sm:$0xff] }
 0x755   :  { %v7872_v56 = vmul.f32 %v5683_v34, %v2283_v20  ;;  %v2433_v20 = vmul.f32 %v7801_v9, %v7877_v18 }
 0x756   :  { %2449 = vadd.xlane.f32.xlu1 %v2428_v11  ;;  %v2432_v11 = vmul.f32 %v7801_v9, %v7851_v61  ;;  %v2430_v22 = vmul.f32 %v7801_v9, %v7858_v43 }
 0x757   :  { %3301 = vmatpush.bf16.msrb.mxu1 %v10086_v63  ;;  %v2434_v34 = vmul.f32 %v7801_v9, %v7872_v56 }
 0x75a   :  { %2332 = vmatmul.f32.gmra.mxu2 %v7810_v7 }
 0x75b   :  { %3302 = vmatpush.bf16.msrb.mxu1 %v10088_v21  ;;  %3476 = vmatpush.bf16.xpose.msra.mxu2 %v10084_v15 }
 0x75c   :  { %2451 = vadd.xlane.f32.xlu0 %v2429_v60  ;;  %2457 = vadd.xlane.f32.xlu2 %v2432_v11  ;;  %v2276_v60 = vrot.slane %v7781_v17, 6  ;;  %v2277_v11 = vrot.slane %v7781_v17, 7 }
 0x75e   :  { %2453 = vadd.xlane.f32.xlu1 %v2430_v22  ;;  %v5685_v22 = vld [vmem:[%s9630_s7 + $0x40] sm:$0xff]  ;;  %v2284_v57 = vperm.slane %v2276_v60, 0  ;;  %v2285_v26 = vperm.slane %v2277_v11, 0  ;;  %v5687_v60 = vld [vmem:[%s9630_s7 + $0x78] sm:$0xff] }
 0x75f   :  { %3303 = vmatpush.bf16.msrb.mxu1 %v10090_v32  ;;  %v7885_v15 = vmul.f32 %v5685_v22, %v2282_v2  ;;  %v5686_v2 = vld [vmem:[%s9630_s7 + $0x60] sm:$0xff] }
 0x760   :  { %v7899_v22 = vmul.f32 %v5686_v2, %v2284_v57  ;;  %v7904_v11 = vmul.f32 %v5687_v60, %v2285_v26 }
 0x761   :  { %v2431_v17 = vmul.f32 %v7801_v9, %v7885_v15 }
 0x762   :  { %2335 = vmatmul.f32.gmra.mxu2 %v7824_v12  ;;  %10118 = vst [vmem:[#allocation86_spill] sm:$0xff] %v7899_v22  ;;  %v2438_v2 = vmul.f32 %v7801_v9, %v7904_v11 }
 0x763   :  { %3304 = vmatpush.bf16.msrb.mxu1 %v10092_v31  ;;  %3477 = vmatpush.bf16.xpose.msra.mxu2 %v10085_v1 }
 0x764   :  { %2461 = vadd.xlane.f32.xlu0 %v2434_v34  ;;  %2459 = vadd.xlane.f32.xlu2 %v2433_v20  ;;  %v5688_v34 = vld [vmem:[%s9630_s7 + $0x68] sm:$0xff] }
 0x765   :  { %v7909_v20 = vmul.f32 %v5688_v34, %v2284_v57  ;;  %v5689_v57 = vld [vmem:[%s9630_s7 + $0x70] sm:$0xff] }
 0x766   :  { %2455 = vadd.xlane.f32.xlu1 %v2431_v17  ;;  %v2435_v17 = vmul.f32 %v7801_v9, %v7899_v22  ;;  %v7922_v34 = vmul.f32 %v5689_v57, %v2285_v26  ;;  %v5691_v57 = vld [vmem:[%s9632_s8 + $0x8] sm:$0xff] }
 0x767   :  { %10119 = vst [vmem:[#allocation87_spill] sm:$0xff] %v7909_v20  ;;  %v2436_v60 = vmul.f32 %v7801_v9, %v7909_v20 }
 0x768   :  { %10120 = vst [vmem:[#allocation88_spill] sm:$0xff] %v7922_v34  ;;  %v2437_v1 = vmul.f32 %v7801_v9, %v7922_v34 }
 0x76a   :  { %2338 = vmatmul.f32.gmra.mxu2 %v7819_v27 }
 0x76b   :  { %3478 = vmatpush.bf16.xpose.msra.mxu2 %v10086_v63 }
 0x76c   :  { %2463 = vadd.xlane.f32.xlu0 %v2435_v17  ;;  %2469 = vadd.xlane.f32.xlu2 %v2438_v2 }
 0x76e   :  { %2465 = vadd.xlane.f32.xlu1 %v2436_v60 }
 0x772   :  { %2341 = vmatmul.f32.gmra.mxu2 %v7832_v45 }
 0x773   :  { %3479 = vmatpush.bf16.xpose.msra.mxu2 %v10088_v21 }
 0x776   :  { %2467 = vadd.xlane.f32.xlu1 %v2437_v1  ;;  %v7943_v1 = vld [vmem:[%s9631_s4] ss:$0 sm:$0xff] }
 0x77a   :  { %2344 = vmatmul.f32.gmra.mxu2 %v7846_v41 }
 0x77b   :  { %3480 = vmatpush.bf16.xpose.msra.mxu2 %v10090_v32  ;;  %v5692_v32 = vld [vmem:[%s9632_s8] sm:$0xff] }
 0x782   :  { %2347 = vmatmul.f32.gmra.mxu2 %v7858_v43 }
 0x783   :  { %3481 = vmatpush.bf16.xpose.msra.mxu2 %v10092_v31 }
 0x78a   :  { %2350 = vmatmul.f32.gmra.mxu2 %v7885_v15 }
 0x792   :  { %2353 = vmatmul.f32.gmra.mxu2 %v7851_v61 }
 0x79a   :  { %2356 = vmatmul.f32.gmra.mxu2 %v7877_v18 }
 0x7a2   :  { %2359 = vmatmul.f32.gmra.mxu2 %v7872_v56 }
 0x7aa   :  { %2362 = vmatmul.f32.gmra.mxu2 %v7899_v22 }
 0x7b2   :  { %2365 = vmatmul.f32.gmra.mxu2 %v7909_v20 }
 0x7ba   :  { %2368 = vmatmul.f32.gmra.mxu2 %v7922_v34 }
 0x7c2   :  { %2371 = vmatmul.f32.gmra.mxu2 %v7904_v11 }
 0x7c3   :  { %v2175_v26 = vpop.f32.mrf.mxu1 }
 0x7c4   :  { %v7946_v9 = vadd.f32 %v7943_v1, %v2175_v26 }
 0x7c6   :  { %v2187_v17 = vperm.slane %v7946_v9, 0  ;;  %v2180_v2 = vrot.slane %v7946_v9, 1  ;;  %v2181_v60 = vrot.slane %v7946_v9, 2  ;;  %v2184_v29 = vrot.slane %v7946_v9, 5 }
 0x7c8   :  { %v2204_v31 = vmul.f32 %v5691_v57, %v2187_v17  ;;  %v2203_v21 = vmul.f32 %v5692_v32, %v2187_v17  ;;  %v2188_v63 = vperm.slane %v2180_v2, 0  ;;  %v2189_v33 = vperm.slane %v2181_v60, 0  ;;  %v5694_v32 = vld [vmem:[%s9632_s8 + $0x20] sm:$0xff] }
 0x7c9   :  { %v2192_v42 = vperm.slane %v2184_v29, 0 }
 0x7ca   :  { %v2222_v26 = vsel %vm9861_vm1, %v2204_v31, 0.0  ;;  %v2219_v10 = vsel %vm9861_vm1, %v2203_v21, 0.0  ;;  %v2205_v49 = vmul.f32 %v5693_v55, %v2188_v63  ;;  %v2207_v31 = vmul.f32 %v5694_v32, %v2189_v33  ;;  %v5696_v55 = vld [vmem:[%s9632_s8 + $0x28] sm:$0xff] }
 0x7cb   :  { %v2177_v24 = vpop.f32.mrf.mxu1  ;;  %2223 = vadd.xlane.f32.xlu2 %v2222_v26  ;;  %2220 = vadd.xlane.f32.xlu1 %v2219_v10  ;;  %v2182_v10 = vrot.slane %v7946_v9, 3  ;;  %v2208_v17 = vmul.f32 %v5696_v55, %v2189_v33 }
 0x7cc   :  { %v2225_v52 = vsel %vm9861_vm1, %v2205_v49, 0.0  ;;  %v5695_v24 = vld [vmem:[%s9632_s8 + $0x18] sm:$0xff]  ;;  %v2231_v49 = vsel %vm9861_vm1, %v2207_v31, 0.0 }
 0x7cd   :  { %v2327_v57 = vpop.f32.mrf.mxu2  ;;  %2226 = vadd.xlane.f32.xlu0 %v2225_v52  ;;  %v2206_v21 = vmul.f32 %v5695_v24, %v2188_v63  ;;  %v7975_v2 = vperm.slane %v2182_v10, 0  ;;  %v2234_v26 = vsel %vm9861_vm1, %v2208_v17, 0.0  ;;  %v5697_v63 = vld [vmem:[%s9632_s8 + $0x30] sm:$0xff] }
 0x7ce   :  { %v2375_v33 = vmul.f32 %v2327_v57, %v7790_v30 }
 0x7cf   :  { %v2228_v52 = vsel %vm9861_vm1, %v2206_v21, 0.0  ;;  %v2209_v32 = vmul.f32 %v5697_v63, %v7975_v2 }
 0x7d1   :  { %v2237_v31 = vsel %vm9861_vm1, %v2209_v32, 0.0  ;;  %v7990_v32 = vpop.xlane.xlu1 %2443 }
 0x7d3   :  { %2232 = vadd.xlane.f32.xlu2 %v2231_v49  ;;  %2229 = vadd.xlane.f32.xlu1 %v2228_v52 }
 0x7d5   :  { %v2330_v60 = vpop.f32.mrf.mxu2  ;;  %2235 = vadd.xlane.f32.xlu0 %v2234_v26 }
 0x7d6   :  { %v2376_v24 = vmul.f32 %v2330_v60, %v7795_v23 }
 0x7db   :  { %2391 = vadd.xlane.f32.xlu2 %v2375_v33  ;;  %2238 = vadd.xlane.f32.xlu1 %v2237_v31 }
 0x7dd   :  { %v2333_v21 = vpop.f32.mrf.mxu2  ;;  %2393 = vadd.xlane.f32.xlu0 %v2376_v24 }
 0x7de   :  { %v2377_v10 = vmul.f32 %v2333_v21, %v7810_v7  ;;  %v7993_v21 = vpop.xlane.xlu1 %2449 }
 0x7e3   :  { %2395 = vadd.xlane.f32.xlu1 %v2377_v10 }
 0x7e5   :  { %v2336_v55 = vpop.f32.mrf.mxu2 }
 0x7e6   :  { %v2378_v17 = vmul.f32 %v2336_v55, %v7824_v12  ;;  %v7996_v55 = vpop.xlane.xlu2 %2441 }
 0x7e7   :  { %v2472_v62 = vmul.f32 2e-05, %v7996_v55 }
 0x7e8   :  { %2397 = vadd.xlane.f32.xlu2 %v2378_v17  ;;  %v7998_v17 = vpop.xlane.xlu0 %2439 }
 0x7ed   :  { %v2339_v49 = vpop.f32.mrf.mxu2 }
 0x7ee   :  { %v2379_v52 = vmul.f32 %v2339_v49, %v7819_v27 }
 0x7f0   :  { %2399 = vadd.xlane.f32.xlu2 %v2379_v52 }
 0x7f5   :  { %v2342_v57 = vpop.f32.mrf.mxu2 }
 0x7f6   :  { %v2380_v26 = vmul.f32 %v2342_v57, %v7832_v45  ;;  %v8001_v57 = vpop.xlane.xlu1 %2453 }
 0x7f8   :  { %2401 = vadd.xlane.f32.xlu0 %v2380_v26  ;;  %v8003_v26 = vpop.xlane.xlu2 %2445 }
 0x7fd   :  { %v2345_v63 = vpop.f32.mrf.mxu2 }
 0x7fe   :  { %v2381_v60 = vmul.f32 %v2345_v63, %v7846_v41  ;;  %v8005_v63 = vpop.xlane.xlu0 %2447 }
 0x800   :  { %2403 = vadd.xlane.f32.xlu0 %v2381_v60 }
 0x805   :  { %v2348_v33 = vpop.f32.mrf.mxu2 }
 0x806   :  { %v2382_v31 = vmul.f32 %v2348_v33, %v7858_v43 }
 0x808   :  { %2405 = vadd.xlane.f32.xlu1 %v2382_v31  ;;  %v8008_v31 = vpop.xlane.xlu1 %2455 }
 0x80d   :  { %v2351_v24 = vpop.f32.mrf.mxu2 }
 0x80e   :  { %v2383_v10 = vmul.f32 %v2351_v24, %v7885_v15  ;;  %v8010_v24 = vpop.xlane.xlu2 %2457 }
 0x810   :  { %2407 = vadd.xlane.f32.xlu1 %v2383_v10  ;;  %v8012_v10 = vpop.xlane.xlu0 %2451  ;;  %v8015_v3 = vpop.xlane.xlu1 %2465 }
 0x815   :  { %v2354_v49 = vpop.f32.mrf.mxu2 }
 0x816   :  { %v2384_v52 = vmul.f32 %v2354_v49, %v7851_v61 }
 0x818   :  { %2409 = vadd.xlane.f32.xlu2 %v2384_v52  ;;  %v8017_v52 = vpop.xlane.xlu2 %2459  ;;  %v8020_v19 = vpop.xlane.xlu0 %2461 }
 0x819   :  { %v8023_v47 = vpop.xlane.xlu1 %2467 }
 0x81d   :  { %v2357_v60 = vpop.f32.mrf.mxu2 }
 0x81e   :  { %v2385_v33 = vmul.f32 %v2357_v60, %v7877_v18  ;;  %v2183_v60 = vrot.slane %v7946_v9, 4 }
 0x820   :  { %2411 = vadd.xlane.f32.xlu2 %v2385_v33  ;;  %v8026_v25 = vpop.xlane.xlu2 %2469 }
 0x825   :  { %v2360_v39 = vpop.f32.mrf.mxu2 }
 0x826   :  { %v2386_v49 = vmul.f32 %v2360_v39, %v7872_v56  ;;  %v2191_v39 = vperm.slane %v2183_v60, 0 }
 0x828   :  { %2413 = vadd.xlane.f32.xlu0 %v2386_v49  ;;  %v8028_v49 = vpop.xlane.xlu0 %2463 }
 0x82d   :  { %v2363_v40 = vpop.f32.mrf.mxu2 }
 0x82e   :  { %v2387_v51 = vmul.f32 %v2363_v40, %v7899_v22  ;;  %v5698_v40 = vld [vmem:[%s9632_s8 + $0x48] sm:$0xff] }
 0x82f   :  { %v2212_v58 = vmul.f32 %v5698_v40, %v2191_v39  ;;  %v5699_v40 = vld [vmem:[%s9632_s8 + $0x38] sm:$0xff] }
 0x830   :  { %2415 = vadd.xlane.f32.xlu0 %v2387_v51  ;;  %v2185_v51 = vrot.slane %v7946_v9, 6  ;;  %v2210_v54 = vmul.f32 %v5699_v40, %v7975_v2 }
 0x832   :  { %v2193_v60 = vperm.slane %v2185_v51, 0  ;;  %v2240_v38 = vsel %vm9861_vm1, %v2210_v54, 0.0  ;;  %v5702_v54 = vld [vmem:[%s9632_s8 + $0x78] sm:$0xff] }
 0x835   :  { %v2366_v33 = vpop.f32.mrf.mxu2 }
 0x836   :  { %v2388_v50 = vmul.f32 %v2366_v33, %v7909_v20  ;;  %v2246_v33 = vsel %vm9861_vm1, %v2212_v58, 0.0  ;;  %v2186_v58 = vrot.slane %v7946_v9, 7  ;;  %v5701_v9 = vld [vmem:[%s9632_s8 + $0x50] sm:$0xff] }
 0x838   :  { %2417 = vadd.xlane.f32.xlu1 %v2388_v50  ;;  %v2194_v2 = vperm.slane %v2186_v58, 0 }
 0x83a   :  { %v2218_v16 = vmul.f32 %v5702_v54, %v2194_v2 }
 0x83c   :  { %v2264_v58 = vsel %vm9861_vm1, %v2218_v16, 0.0 }
 0x83d   :  { %v2369_v53 = vpop.f32.mrf.mxu2 }
 0x83e   :  { %v2389_v6 = vmul.f32 %v2369_v53, %v7922_v34  ;;  %v8035_v0 = vpop.xlane.xlu1 %2220  ;;  %v8037_v37 = vpop.xlane.xlu2 %2223  ;;  %v5700_v53 = vld [vmem:[%s9632_s8 + $0x60] sm:$0xff] }
 0x83f   :  { %v2215_v5 = vmul.f32 %v5700_v53, %v2193_v60 }
 0x840   :  { %2419 = vadd.xlane.f32.xlu2 %v2389_v6  ;;  %2247 = vadd.xlane.f32.xlu1 %v2246_v33  ;;  %v8040_v50 = vpop.xlane.xlu0 %2226 }
 0x841   :  { %v2255_v48 = vsel %vm9861_vm1, %v2215_v5, 0.0  ;;  %v5703_v5 = vld [vmem:[%s9632_s8 + $0x40] sm:$0xff] }
 0x845   :  { %v2372_v51 = vpop.f32.mrf.mxu2 }
 0x846   :  { %v2390_v6 = vmul.f32 %v2372_v51, %v7904_v11  ;;  %v8052_v33 = vpop.xlane.xlu1 %2229  ;;  %v8056_v40 = vpop.xlane.xlu2 %2232  ;;  %v2213_v51 = vmul.f32 %v5701_v9, %v2192_v42 }
 0x848   :  { %2241 = vadd.xlane.f32.xlu2 %v2240_v38  ;;  %2256 = vadd.xlane.f32.xlu1 %v2255_v48  ;;  %v8058_v53 = vpop.xlane.xlu0 %2235  ;;  %v2211_v48 = vmul.f32 %v5703_v5, %v2191_v39  ;;  %v2249_v38 = vsel %vm9861_vm1, %v2213_v51, 0.0  ;;  %v2216_v39 = vmul.f32 %v5704_v4, %v2193_v60  ;;  %v5705_v51 = vld [vmem:[%s9632_s8 + $0x58] sm:$0xff]  ;;  %v2474_v60 = vmul.f32 2e-05, %v8003_v26 }
 0x849   :  { %2421 = vadd.xlane.f32.xlu0 %v2390_v6  ;;  %v2214_v16 = vmul.f32 %v5705_v51, %v2192_v42 }
 0x84a   :  { %v2243_v6 = vsel %vm9861_vm1, %v2211_v48, 0.0  ;;  %v2473_v48 = vmul.f32 2e-05, %v7990_v32  ;;  %v2258_v55 = vsel %vm9861_vm1, %v2216_v39, 0.0 }
 0x84b   :  { %v2252_v4 = vsel %vm9861_vm1, %v2214_v16, 0.0 }
 0x84e   :  { %v8069_v29 = vpop.xlane.xlu1 %2238  ;;  %v2392_v54 = vpop.xlane.xlu2 %2391 }
 0x850   :  { %2250 = vadd.xlane.f32.xlu2 %v2249_v38  ;;  %2265 = vadd.xlane.f32.xlu1 %v2264_v58  ;;  %v2394_v9 = vpop.xlane.xlu0 %2393  ;;  %v2471_v38 = vmul.f32 2e-05, %v7998_v17 }
 0x851   :  { %2244 = vadd.xlane.f32.xlu0 %v2243_v6  ;;  %v2488_v5 = vadd.f32 %v2472_v62, %v2394_v9  ;;  %v5706_v9 = vld [vmem:[%s9632_s8 + $0x70] sm:$0xff] }
 0x852   :  { %v2487_v6 = vadd.f32 %v2471_v38, %v2392_v54  ;;  %v2217_v54 = vmul.f32 %v5706_v9, %v2194_v2 }
 0x853   :  { %v8084_v59 = vadd.f32 1.024e-07, %v2488_v5  ;;  %v2475_v5 = vmul.f32 2e-05, %v8005_v63 }
 0x854   :  { %v8090_v42 = vadd.f32 1.024e-07, %v2487_v6 }
 0x855   :  { %5572 = vrsqrt.f32 %v8084_v59  ;;  %vm2551_vm10 = vweird.f32 %v8084_v59 }
 0x856   :  { %v2396_v58 = vpop.xlane.xlu1 %2395 }
 0x857   :  { %v2489_v44 = vadd.f32 %v2473_v48, %v2396_v58 }
 0x858   :  { %2259 = vadd.xlane.f32.xlu2 %v2258_v55 }
 0x859   :  { %v8087_v62 = vadd.f32 1.024e-07, %v2489_v44  ;;  %2253 = vadd.xlane.f32.xlu0 %v2252_v4  ;;  %v2261_v44 = vsel %vm9861_vm1, %v2217_v54, 0.0 }
 0x85b   :  { %v2398_v17 = vpop.xlane.xlu2 %2397  ;;  %5574 = vrsqrt.f32 %v8087_v62  ;;  %v8102_v26 = vpop.eup %5572  ;;  %vm2561_vm3 = vweird.f32 %v8087_v62 }
 0x85c   :  { %v2490_v32 = vadd.f32 %v2474_v60, %v2398_v17  ;;  %5576 = vrsqrt.f32 %v8090_v42  ;;  %v2546_v48 = vmul.f32 %v8102_v26, %v8084_v59  ;;  %vm2552_vm13 = vweird.f32 %v8102_v26 }
 0x85d   :  { %vm8141_vm4 = vmor %vm2551_vm10, %vm2552_vm13  ;;  %vm2541_vm13 = vweird.f32 %v8090_v42 }
 0x85e   :  { %v8097_v39 = vadd.f32 1.024e-07, %v2490_v32  ;;  %v2547_v60 = vmul.f32 %v8102_v26, %v2546_v48  ;;  %v2476_v32 = vmul.f32 2e-05, %v7993_v21 }
 0x860   :  { %5578 = vrsqrt.f32 %v8097_v39  ;;  %vm2571_vm9 = vweird.f32 %v8097_v39 }
 0x861   :  { %2262 = vadd.xlane.f32.xlu0 %v2261_v44  ;;  %v8105_v51 = vpop.eup %5574 }
 0x862   :  { %v8107_v2 = vpop.eup %5576  ;;  %v2556_v6 = vmul.f32 %v8105_v51, %v8087_v62  ;;  %vm2562_vm15 = vweird.f32 %v8105_v51 }
 0x863   :  { %v2400_v16 = vpop.xlane.xlu2 %2399  ;;  %v2536_v63 = vmul.f32 %v8107_v2, %v8090_v42  ;;  %vm2542_vm8 = vweird.f32 %v8107_v2 }
 0x864   :  { %v2491_v38 = vadd.f32 %v2475_v5, %v2400_v16  ;;  %v2557_v9 = vmul.f32 %v8105_v51, %v2556_v6 }
 0x865   :  { %v2537_v44 = vmul.f32 %v8107_v2, %v2536_v63 }
 0x866   :  { %v5579_v58 = vpop.eup %5578  ;;  %v8113_v55 = vadd.f32 1.024e-07, %v2491_v38  ;;  %v2548_v38 = vmul.f32 0.5, %v2547_v60  ;;  %v2558_v28 = vmul.f32 0.5, %v2557_v9  ;;  %v2522_v9 = vand.u32 2147483647, %v8052_v33 }
 0x867   :  { %v2566_v4 = vmul.f32 %v5579_v58, %v8097_v39  ;;  %v2538_v35 = vmul.f32 0.5, %v2537_v44  ;;  %vm2572_vm11 = vweird.f32 %v5579_v58 }
 0x868   :  { %5580 = vrsqrt.f32 %v8113_v55  ;;  %v2549_v48 = vsub.f32 1.5, %v2548_v38  ;;  %vm8134_vm1 = vmor %vm2571_vm9, %vm2572_vm11 }
 0x869   :  { %v2567_v17 = vmul.f32 %v5579_v58, %v2566_v4  ;;  %v2559_v4 = vsub.f32 1.5, %v2558_v28  ;;  %v2539_v34 = vsub.f32 1.5, %v2538_v35  ;;  %vm8151_vm11 = vmor %vm2561_vm3, %vm2562_vm15  ;;  %vm2581_vm3 = vweird.f32 %v8113_v55 }
 0x86a   :  { %v2550_v63 = vmul.f32 %v8102_v26, %v2549_v48  ;;  %v2519_v48 = vand.u32 2147483647, %v8035_v0 }
 0x86b   :  { %v2402_v54 = vpop.xlane.xlu0 %2401  ;;  %v2568_v5 = vmul.f32 0.5, %v2567_v17 }
 0x86c   :  { %v2492_v16 = vadd.f32 %v2476_v32, %v2402_v54  ;;  %v2560_v32 = vmul.f32 %v8105_v51, %v2559_v4  ;;  %v2554_v54 = vsel %vm8141_vm4, %v8102_v26, %v2550_v63 }
 0x86d   :  { %v2569_v22 = vsub.f32 1.5, %v2568_v5 }
 0x86e   :  { %v5581_v14 = vpop.eup %5580  ;;  %v8123_v8 = vadd.f32 1.024e-07, %v2492_v16  ;;  %v2520_v16 = vand.u32 2147483647, %v8037_v37  ;;  %v2564_v38 = vsel %vm8151_vm11, %v8105_v51, %v2560_v32  ;;  %v10128_v32 = vld [vmem:[#allocation73_spill] sm:$0xff] }
 0x86f   :  { %v2576_v36 = vmul.f32 %v5581_v14, %v8113_v55  ;;  %v2570_v20 = vmul.f32 %v5579_v58, %v2569_v22  ;;  %vm2582_vm9 = vweird.f32 %v5581_v14 }
 0x870   :  { %10121 = vst [vmem:[#allocation89_spill] sm:$0xff] %v8123_v8  ;;  %5582 = vrsqrt.f32 %v8123_v8  ;;  %v2696_v4 = vmul.f32 %v2554_v54, %v2520_v16  ;;  %vm2583_vm4 = vmor %vm2581_vm3, %vm2582_vm9 }
 0x871   :  { %v2577_v21 = vmul.f32 %v5581_v14, %v2576_v36  ;;  %v2540_v36 = vmul.f32 %v8107_v2, %v2539_v34  ;;  %v2574_v33 = vsel %vm8134_vm1, %v5579_v58, %v2570_v20  ;;  %v2521_v20 = vand.u32 2147483647, %v8040_v50  ;;  %vm2543_vm1 = vmor %vm2541_vm13, %vm2542_vm8 }
 0x872   :  { %v2698_v58 = vmul.f32 %v2574_v33, %v2522_v9  ;;  %vm2591_vm8 = vweird.f32 %v8123_v8  ;;  %v2524_v9 = vand.u32 2147483647, %v8058_v53  ;;  %v2728_v0 = vperm.slane %v2696_v4, %v10128_v32 }
 0x873   :  { %v2578_v6 = vmul.f32 0.5, %v2577_v21  ;;  %v2544_v21 = vsel %vm2543_vm1, %v8107_v2, %v2540_v36  ;;  %v2697_v37 = vmul.f32 %v2564_v38, %v2521_v20  ;;  %v10129_v2 = vld [vmem:[#allocation72_spill] sm:$0xff] }
 0x874   :  { %v2695_v51 = vmul.f32 %v2544_v21, %v2519_v48  ;;  %v2731_v50 = vperm.slane %v2698_v58, %v10128_v32  ;;  %v2477_v58 = vmul.f32 2e-05, %v8012_v10  ;;  %v2478_v48 = vmul.f32 2e-05, %v8001_v57 }
 0x875   :  { %v2579_v60 = vsub.f32 1.5, %v2578_v6  ;;  %v2730_v36 = vperm.slane %v2697_v37, %v10129_v2  ;;  %v2482_v57 = vmul.f32 2e-05, %v8020_v19 }
 0x876   :  { %v5583_v17 = vpop.eup %5582  ;;  %v2727_v33 = vperm.slane %v2695_v51, %v10129_v2 }
 0x877   :  { %v2586_v28 = vmul.f32 %v5583_v17, %v8123_v8  ;;  %v2580_v34 = vmul.f32 %v5581_v14, %v2579_v60  ;;  %vm2592_vm15 = vweird.f32 %v5583_v17  ;;  %v2523_v60 = vand.u32 2147483647, %v8056_v40 }
 0x878   :  { %vm2593_vm10 = vmor %vm2591_vm8, %vm2592_vm15  ;;  %v2732_v40 = vsel %vm1234_vm5, %v2731_v50, %v2730_v36 }
 0x879   :  { %v2587_v5 = vmul.f32 %v5583_v17, %v2586_v28  ;;  %v2584_v6 = vsel %vm2583_vm4, %v5581_v14, %v2580_v34  ;;  %v2729_v34 = vsel %vm1234_vm5, %v2728_v0, %v2727_v33  ;;  %v2484_v33 = vmul.f32 2e-05, %v8015_v3 }
 0x87a   :  { %v2699_v28 = vmul.f32 %v2584_v6, %v2523_v60  ;;  %v2479_v6 = vmul.f32 2e-05, %v8008_v31  ;;  %v2480_v60 = vmul.f32 2e-05, %v8010_v24 }
 0x87b   :  { %v2588_v26 = vmul.f32 0.5, %v2587_v5  ;;  %v2751_v5 = vsel %vm1257_vm6, %v2732_v40, %v2729_v34  ;;  %v2406_v38 = vpop.xlane.xlu1 %2405 }
 0x87c   :  { %v2733_v54 = vperm.slane %v2699_v28, %v10129_v2 }
 0x87d   :  { %v2589_v63 = vsub.f32 1.5, %v2588_v26 }
 0x87f   :  { %v2590_v35 = vmul.f32 %v5583_v17, %v2589_v63  ;;  %v2494_v63 = vadd.f32 %v2478_v48, %v2406_v38 }
 0x881   :  { %v2594_v22 = vsel %vm2593_vm10, %v5583_v17, %v2590_v35  ;;  %v2404_v17 = vpop.xlane.xlu0 %2403  ;;  %v2481_v35 = vmul.f32 2e-05, %v8017_v52  ;;  %v8188_v10 = vadd.f32 1.024e-07, %v2494_v63 }
 0x882   :  { %v2700_v14 = vmul.f32 %v2594_v22, %v2524_v9  ;;  %v2493_v26 = vadd.f32 %v2477_v58, %v2404_v17  ;;  %v2485_v58 = vmul.f32 2e-05, %v8023_v47 }
 0x883   :  { %v2408_v4 = vpop.xlane.xlu1 %2407  ;;  %10131 = vst [vmem:[#allocation91_spill] sm:$0xff] %v8188_v10  ;;  %vm2611_vm3 = vweird.f32 %v8188_v10 }
 0x884   :  { %v2734_v44 = vperm.slane %v2700_v14, %v10128_v32  ;;  %v8182_v21 = vadd.f32 1.024e-07, %v2493_v26  ;;  %v2495_v51 = vadd.f32 %v2479_v6, %v2408_v4  ;;  %v2483_v14 = vmul.f32 2e-05, %v8028_v49 }
 0x886   :  { %v2735_v53 = vsel %vm1234_vm5, %v2734_v44, %v2733_v54  ;;  %10130 = vst [vmem:[#allocation90_spill] sm:$0xff] %v8182_v21  ;;  %5584 = vrsqrt.f32 %v8182_v21  ;;  %v8191_v0 = vadd.f32 1.024e-07, %v2495_v51  ;;  %vm2601_vm9 = vweird.f32 %v8182_v21 }
 0x887   :  { %v8178_v16 = vsel %vm1259_vm7, %v2735_v53, %v2751_v5  ;;  %5586 = vrsqrt.f32 %v8188_v10 }
 0x888   :  { %5588 = vrsqrt.f32 %v8191_v0  ;;  %vm2621_vm10 = vweird.f32 %v8191_v0 }
 0x88b   :  { %v2410_v20 = vpop.xlane.xlu2 %2409 }
 0x88c   :  { %v2496_v9 = vadd.f32 %v2480_v60, %v2410_v20  ;;  %v8196_v24 = vpop.eup %5584 }
 0x88d   :  { %v2596_v40 = vmul.f32 %v8196_v24, %v8182_v21  ;;  %v8209_v53 = vpop.eup %5586  ;;  %vm2602_vm11 = vweird.f32 %v8196_v24  ;;  %v2525_v21 = vand.u32 2147483647, %v8069_v29 }
 0x88e   :  { %v8193_v36 = vadd.f32 1.024e-07, %v2496_v9  ;;  %v8213_v49 = vpop.eup %5588  ;;  %v2606_v20 = vmul.f32 %v8209_v53, %v8188_v10  ;;  %vm8264_vm13 = vmor %vm2601_vm9, %vm2602_vm11  ;;  %vm2612_vm1 = vweird.f32 %v8209_v53 }
 0x88f   :  { %v2597_v3 = vmul.f32 %v8196_v24, %v2596_v40  ;;  %v2616_v48 = vmul.f32 %v8213_v49, %v8191_v0  ;;  %vm2622_vm4 = vweird.f32 %v8213_v49  ;;  %vm8290_vm8 = vmor %vm2611_vm3, %vm2612_vm1 }
 0x890   :  { %10132 = vst [vmem:[#allocation92_spill] sm:$0xff] %v8193_v36  ;;  %5590 = vrsqrt.f32 %v8193_v36  ;;  %v2607_v60 = vmul.f32 %v8209_v53, %v2606_v20  ;;  %vm2631_vm11 = vweird.f32 %v8193_v36  ;;  %vm8304_vm1 = vmor %vm2621_vm10, %vm2622_vm4 }
 0x893   :  { %v2412_v50 = vpop.xlane.xlu2 %2411 }
 0x894   :  { %v2497_v28 = vadd.f32 %v2481_v35, %v2412_v50  ;;  %v2617_v35 = vmul.f32 %v8213_v49, %v2616_v48 }
 0x896   :  { %v8198_v22 = vadd.f32 1.024e-07, %v2497_v28  ;;  %v8219_v17 = vpop.eup %5590 }
 0x897   :  { %v2626_v6 = vmul.f32 %v8219_v17, %v8193_v36  ;;  %vm2632_vm15 = vweird.f32 %v8219_v17 }
 0x898   :  { %5592 = vrsqrt.f32 %v8198_v22  ;;  %vm2641_vm9 = vweird.f32 %v8198_v22  ;;  %vm8313_vm3 = vmor %vm2631_vm11, %vm2632_vm15 }
 0x89b   :  { %v2414_v37 = vpop.xlane.xlu0 %2413 }
 0x89c   :  { %v2498_v31 = vadd.f32 %v2482_v57, %v2414_v37  ;;  %v2598_v37 = vmul.f32 0.5, %v2597_v3  ;;  %v2627_v57 = vmul.f32 %v8219_v17, %v2626_v6 }
 0x89e   :  { %v8206_v54 = vadd.f32 1.024e-07, %v2498_v31  ;;  %v8225_v26 = vpop.eup %5592  ;;  %v2599_v28 = vsub.f32 1.5, %v2598_v37  ;;  %v2608_v31 = vmul.f32 0.5, %v2607_v60  ;;  %v2628_v20 = vmul.f32 0.5, %v2627_v57 }
 0x89f   :  { %v2636_v47 = vmul.f32 %v8225_v26, %v8198_v22 }
 0x8a0   :  { %5594 = vrsqrt.f32 %v8206_v54  ;;  %v2600_v3 = vmul.f32 %v8196_v24, %v2599_v28  ;;  %v2609_v37 = vsub.f32 1.5, %v2608_v31  ;;  %vm2651_vm4 = vweird.f32 %v8206_v54 }
 0x8a2   :  { %v2604_v31 = vsel %vm8264_vm13, %v8196_v24, %v2600_v3  ;;  %vm2642_vm13 = vweird.f32 %v8225_v26 }
 0x8a3   :  { %v2416_v52 = vpop.xlane.xlu0 %2415  ;;  %vm8334_vm10 = vmor %vm2641_vm9, %vm2642_vm13 }
 0x8a4   :  { %v2499_v44 = vadd.f32 %v2483_v14, %v2416_v52 }
 0x8a6   :  { %v8217_v38 = vadd.f32 1.024e-07, %v2499_v44  ;;  %v8233_v51 = vpop.eup %5594 }
 0x8a7   :  { %v2646_v52 = vmul.f32 %v8233_v51, %v8206_v54  ;;  %vm2652_vm15 = vweird.f32 %v8233_v51 }
 0x8ab   :  { %v2418_v19 = vpop.xlane.xlu1 %2417 }
 0x8ac   :  { %v2500_v34 = vadd.f32 %v2484_v33, %v2418_v19  ;;  %v2637_v33 = vmul.f32 %v8225_v26, %v2636_v47  ;;  %v2486_v19 = vmul.f32 2e-05, %v8026_v25  ;;  %v2647_v25 = vmul.f32 %v8233_v51, %v2646_v52 }
 0x8ad   :  { %v2610_v52 = vmul.f32 %v8209_v53, %v2609_v37 }
 0x8ae   :  { %v8211_v5 = vadd.f32 1.024e-07, %v2500_v34  ;;  %v2618_v34 = vmul.f32 0.5, %v2617_v35 }
 0x8b0   :  { %5596 = vrsqrt.f32 %v8211_v5  ;;  %v2619_v57 = vsub.f32 1.5, %v2618_v34  ;;  %vm2671_vm13 = vweird.f32 %v8211_v5 }
 0x8b1   :  { %5598 = vrsqrt.f32 %v8217_v38 }
 0x8b2   :  { %v2620_v3 = vmul.f32 %v8213_v49, %v2619_v57 }
 0x8b3   :  { %v2420_v4 = vpop.xlane.xlu2 %2419 }
 0x8b4   :  { %v2501_v63 = vadd.f32 %v2485_v58, %v2420_v4  ;;  %v8256_v58 = vpop.xlane.xlu1 %2247 }
 0x8b5   :  { %v2528_v36 = vand.u32 2147483647, %v8256_v58 }
 0x8b6   :  { %v8237_v50 = vadd.f32 1.024e-07, %v2501_v63  ;;  %v8240_v9 = vpop.eup %5596  ;;  %v2638_v63 = vmul.f32 0.5, %v2637_v33 }
 0x8b7   :  { %v8246_v14 = vpop.eup %5598  ;;  %v2666_v40 = vmul.f32 %v8240_v9, %v8211_v5  ;;  %vm2672_vm9 = vweird.f32 %v8240_v9 }
 0x8b8   :  { %5600 = vrsqrt.f32 %v8237_v50  ;;  %v2656_v4 = vmul.f32 %v8246_v14, %v8217_v38  ;;  %v2639_v34 = vsub.f32 1.5, %v2638_v63  ;;  %vm2662_vm11 = vweird.f32 %v8246_v14 }
 0x8b9   :  { %v2667_v35 = vmul.f32 %v8240_v9, %v2666_v40 }
 0x8ba   :  { %v2657_v33 = vmul.f32 %v8246_v14, %v2656_v4 }
 0x8bb   :  { %v8252_v44 = vpop.xlane.xlu2 %2241 }
 0x8bc   :  { %v2422_v48 = vpop.xlane.xlu0 %2421  ;;  %v2257_v47 = vpop.xlane.xlu1 %2256 }
 0x8bd   :  { %v2502_v6 = vadd.f32 %v2486_v19, %v2422_v48  ;;  %v2629_v19 = vsub.f32 1.5, %v2628_v20  ;;  %v2648_v48 = vmul.f32 0.5, %v2647_v25  ;;  %v8284_v20 = vmul.f32 %v2604_v31, %v2525_v21 }
 0x8be   :  { %v8262_v60 = vpop.eup %5600  ;;  %v2614_v21 = vsel %vm8290_vm8, %v8209_v53, %v2610_v52  ;;  %v2658_v25 = vmul.f32 0.5, %v2657_v33  ;;  %v2526_v52 = vand.u32 2147483647, %v8252_v44  ;;  %v2624_v33 = vsel %vm8304_vm1, %v8213_v49, %v2620_v3  ;;  %vm2653_vm1 = vmor %vm2651_vm4, %vm2652_vm15 }
 0x8bf   :  { %v8269_v28 = vadd.f32 1.024e-07, %v2502_v6  ;;  %v2676_v40 = vmul.f32 %v8262_v60, %v8237_v50  ;;  %v2668_v6 = vmul.f32 0.5, %v2667_v35  ;;  %v2630_v4 = vmul.f32 %v8219_v17, %v2629_v19 }
 0x8c0   :  { %v2649_v63 = vsub.f32 1.5, %v2648_v48  ;;  %v2640_v35 = vmul.f32 %v8225_v26, %v2639_v34  ;;  %v2659_v44 = vsub.f32 1.5, %v2658_v25  ;;  %vm2661_vm8 = vweird.f32 %v8217_v38 }
 0x8c1   :  { %5602 = vrsqrt.f32 %v8269_v28  ;;  %v2677_v31 = vmul.f32 %v8262_v60, %v2676_v40  ;;  %v2669_v48 = vsub.f32 1.5, %v2668_v6  ;;  %v2634_v40 = vsel %vm8313_vm3, %v8219_v17, %v2630_v4  ;;  %vm2663_vm4 = vmor %vm2661_vm8, %vm2662_vm11 }
 0x8c2   :  { %v2650_v17 = vmul.f32 %v8233_v51, %v2649_v63  ;;  %v2644_v6 = vsel %vm8334_vm10, %v8225_v26, %v2640_v35  ;;  %v2702_v4 = vmul.f32 %v2614_v21, %v2526_v52  ;;  %v2704_v63 = vmul.f32 %v2634_v40, %v2528_v36  ;;  %vm2673_vm10 = vmor %vm2671_vm13, %vm2672_vm9 }
 0x8c3   :  { %v2251_v24 = vpop.xlane.xlu2 %2250  ;;  %v2678_v3 = vmul.f32 0.5, %v2677_v31  ;;  %v2670_v57 = vmul.f32 %v8240_v9, %v2669_v48  ;;  %v2660_v21 = vmul.f32 %v8246_v14, %v2659_v44  ;;  %v2531_v31 = vand.u32 2147483647, %v2257_v47 }
 0x8c4   :  { %v2245_v37 = vpop.xlane.xlu0 %2244  ;;  %v2737_v48 = vperm.slane %v2702_v4, %v10128_v32  ;;  %v2266_v36 = vpop.xlane.xlu1 %2265  ;;  %vm2691_vm15 = vweird.f32 %v8269_v28  ;;  %v2740_v44 = vperm.slane %v2704_v63, %v10128_v32  ;;  %vm2682_vm8 = vweird.f32 %v8262_v60 }
 0x8c5   :  { %v2527_v29 = vand.u32 2147483647, %v2245_v37  ;;  %v2529_v37 = vand.u32 2147483647, %v2251_v24  ;;  %v2654_v24 = vsel %vm2653_vm1, %v8233_v51, %v2650_v17  ;;  %v2736_v17 = vperm.slane %v8284_v20, %v10129_v2 }
 0x8c6   :  { %vm2681_vm11 = vweird.f32 %v8237_v50  ;;  %vm10143_vm1 = vcmask 1047559  }
 0x8c7   :  { %v8309_v19 = vpop.eup %5602  ;;  %v2703_v10 = vmul.f32 %v2624_v33, %v2527_v29  ;;  %v2679_v33 = vsub.f32 1.5, %v2678_v3  ;;  %v2674_v29 = vsel %vm2673_vm10, %v8240_v9, %v2670_v57  ;;  %v2664_v9 = vsel %vm2663_vm4, %v8246_v14, %v2660_v21  ;;  %vm2683_vm13 = vmor %vm2681_vm11, %vm2682_vm8 }
 0x8c8   :  { %v2686_v34 = vmul.f32 %v8309_v19, %v8269_v28  ;;  %vm2692_vm3 = vweird.f32 %v8309_v19  ;;  %vm10145_vm10 = vcmask 130048   ;;  %vm10149_vm11 = vcmask 80896  }
 0x8c9   :  { %v2739_v47 = vperm.slane %v2703_v10, %v10129_v2  ;;  %vm2693_vm9 = vmor %vm2691_vm15, %vm2692_vm3  ;;  %v2680_v4 = vmul.f32 %v8262_v60, %v2679_v33  ;;  %vm10144_vm3 = vcmp.lt.s32.totalorder %v10129_v2, 9 }
 0x8ca   :  { %v2687_v58 = vmul.f32 %v8309_v19, %v2686_v34  ;;  %v2705_v34 = vmul.f32 %v2644_v6, %v2529_v37  ;;  %v2534_v37 = vand.u32 2147483647, %v2266_v36  ;;  %vm10146_vm15 = vmmov %vm10145_vm10 }
 0x8cb   :  { %v2260_v25 = vpop.xlane.xlu2 %2259  ;;  %v2741_v20 = vsel %vm1234_vm5, %v2740_v44, %v2739_v47  ;;  %v2684_v21 = vsel %vm2683_vm13, %v8262_v60, %v2680_v4  ;;  %vm10153_vm13 = vmmov %vm10143_vm1 }
 0x8cc   :  { %v2688_v53 = vmul.f32 0.5, %v2687_v58  ;;  %v2532_v8 = vand.u32 2147483647, %v2260_v25  ;;  %v2254_v26 = vpop.xlane.xlu0 %2253  ;;  %v2707_v58 = vmul.f32 %v2664_v9, %v2531_v31  ;;  %v2742_v10 = vperm.slane %v2705_v34, %v10129_v2 }
 0x8cd   :  { %v2530_v35 = vand.u32 2147483647, %v2254_v26 }
 0x8ce   :  { %v2689_v52 = vsub.f32 1.5, %v2688_v53  ;;  %v2708_v40 = vmul.f32 %v2674_v29, %v2532_v8  ;;  %v2738_v8 = vsel %vm1234_vm5, %v2737_v48, %v2736_v17  ;;  %v2745_v63 = vperm.slane %v2707_v58, %v10129_v2 }
 0x8cf   :  { %v2706_v49 = vmul.f32 %v2654_v24, %v2530_v35  ;;  %v2753_v26 = vsel %vm1261_vm12, %v2738_v8, %v8178_v16 }
 0x8d0   :  { %v2690_v51 = vmul.f32 %v8309_v19, %v2689_v52  ;;  %v2746_v14 = vperm.slane %v2708_v40, %v10128_v32  ;;  %v2754_v35 = vsel %vm1263_vm14, %v2741_v20, %v2753_v26 }
 0x8d1   :  { %v2743_v6 = vperm.slane %v2706_v49, %v10128_v32 }
 0x8d2   :  { %v2694_v3 = vsel %vm2693_vm9, %v8309_v19, %v2690_v51  ;;  %v2747_v31 = vsel %vm1234_vm5, %v2746_v14, %v2745_v63 }
 0x8d3   :  { %v2710_v57 = vmul.f32 %v2694_v3, %v2534_v37  ;;  %v2744_v53 = vsel %vm1234_vm5, %v2743_v6, %v2742_v10 }
 0x8d4   :  { %v2263_v25 = vpop.xlane.xlu0 %2262  ;;  %v2755_v52 = vsel %vm1265_vm0, %v2744_v53, %v2754_v35  ;;  %v10147_v35 = vmov 0  }
 0x8d5   :  { %v2533_v19 = vand.u32 2147483647, %v2263_v25  ;;  %v2749_v33 = vperm.slane %v2710_v57, %v10128_v32  ;;  %v2756_v29 = vsel %vm1267_vm2, %v2747_v31, %v2755_v52  ;;  %v10148_v31 = vld [vmem:[#allocation75_spill] sm:$0xff] }
 0x8d7   :  { %v2709_v24 = vmul.f32 %v2684_v21, %v2533_v19 }
 0x8d9   :  { %v2748_v48 = vperm.slane %v2709_v24, %v10129_v2 }
 0x8db   :  { %v2750_v34 = vsel %vm1234_vm5, %v2749_v33, %v2748_v48 }
 0x8dc   :  { %v2757_v16 = vsel %vm10143_vm1, %v2750_v34, %v2756_v29  ;;  %v8416_v34 = vadd.f32 %v7943_v1, %v7778_v13 }
 0x8dd   :  { %v8393_v60 = vsel %vm10144_vm3, %v2757_v16, 1e+30  ;;  %vm10155_vm3 = vmmov %vm10149_vm11 }
 0x8de   :  { %v2760_v49 = vsel %vm10145_vm10, %v8393_v60, inf  ;;  %v2028_v29 = vsel %vm10149_vm11, %v8416_v34, -inf }
 0x8df   :  { %2761 = vmin.xlane.f32.xlu2 %v2760_v49 }
 0x952   :  { %v2762_v36 = vpop.xlane.xlu2 %2761 }
 0x953   :  { %vm2763_vm4 = vcmp.le.f32.partialorder %v8393_v60, %v2762_v36 }
 0x954   :  { %v2764_v51 = vsel %vm2763_vm4, %v10129_v2, 16 }
 0x955   :  { %v2765_v47 = vsel %vm10146_vm15, %v2764_v51, 2147483647  ;;  %vm10208_vm15 = vmmov %vm10153_vm13 }
 0x956   :  { %v2767_v40 = vshra.s32 %v2765_v47, 16  ;;  %v2766_v17 = vand.u32 65535, %v2765_v47 }
 0x958   :  { %v2769_v44 = vcvt.s32.f32 %v2767_v40  ;;  %v2768_v6 = vcvt.s32.f32 %v2766_v17 }
 0x95a   :  { %2770 = vmin.xlane.f32.xlu0 %v2769_v44 }
 0x9cd   :  { %v2771_v9 = vpop.xlane.xlu0 %2770 }
 0x9ce   :  { %vm2772_vm9 = vcmp.eq.f32.partialorder %v2769_v44, %v2771_v9  ;;  %v2777_v3 = vcvt.f32.s32 %v2771_v9 }
 0x9cf   :  { %v2773_v58 = vsel %vm2772_vm9, %v2768_v6, inf  ;;  %vm10209_vm9 = vmmov %vm10145_vm10 }
 0x9d0   :  { %2774 = vmin.xlane.f32.xlu1 %v2773_v58  ;;  %v2778_v8 = vshll.u32 %v2777_v3, 16 }
 0xa43   :  { %v2775_v4 = vpop.xlane.xlu1 %2774 }
 0xa44   :  { %v2776_v10 = vcvt.f32.s32 %v2775_v4 }
 0xa46   :  { %v2779_v37 = vadd.s32 %v2778_v8, %v2776_v10 }
 0xa48   :  { %vm2780_vm8 = vcmp.eq.s32.totalorder %v10129_v2, %v2779_v37 }
 0xa49   :  { %v8402_v20 = vsel %vm2780_vm8, 1.0, %v10117_v46 }
 0xa4a   :  { %v2814_v14 = vperm.slane %v8402_v20, 2  ;;  %v2827_v25 = vperm.slane %v8402_v20, 3  ;;  %v2788_v57 = vperm.slane %v8402_v20, 0  ;;  %v2801_v53 = vperm.slane %v8402_v20, 1 }
 0xa4b   :  { %v2840_v63 = vperm.slane %v8402_v20, 4  ;;  %v2853_v21 = vperm.slane %v8402_v20, 5  ;;  %v2866_v52 = vperm.slane %v8402_v20, 6  ;;  %v2879_v33 = vperm.slane %v8402_v20, 7 }
 0xa4c   :  { %v5374_v19 = vpack.i.bf16 %v2827_v25, %v2814_v14  ;;  %v5368_v26 = vpack.i.bf16 %v2801_v53, %v2788_v57 }
 0xa4d   :  { %v5385_v24 = vpack.i.bf16 %v2853_v21, %v2840_v63  ;;  %v5395_v48 = vpack.i.bf16 %v2879_v33, %v2866_v52 }
 0xa4e   :  { %5375 = vperm.xlu1 %5373, %v5374_v19   ;;  %5369 = vperm.xlu0 %5367, %v5368_v26  }
 0xa4f   :  { %5363 = vperm.xlu2 %5361, %v5368_v26  }
 0xa56   :  { %5386 = vperm.xlu1 %5373, %v5385_v24   ;;  %5446 = vset.pattern.permute.xlu0 %v10147_v35 }
 0xa57   :  { %5379 = vset.pattern.permute.xlu2 %v10148_v31 }
 0xa5e   :  { %5396 = vperm.xlu1 %5373, %v5395_v48  }
 0xa5f   :  { %5381 = vperm.xlu2 %5379, %v5374_v19  }
 0xa66   :  { %5406 = vperm.xlu1 %5373, %v5368_v26  }
 0xa67   :  { %5391 = vperm.xlu2 %5379, %v5385_v24  }
 0xa6e   :  { %5416 = vperm.xlu1 %5373, %v5374_v19  }
 0xa6f   :  { %5401 = vperm.xlu2 %5379, %v5395_v48  }
 0xa76   :  { %5426 = vperm.xlu1 %5373, %v5385_v24  }
 0xa77   :  { %5411 = vperm.xlu2 %5379, %v5368_v26  }
 0xa78   :  { %2029 = vmax.xlane.f32.xlu0 %v2028_v29 }
 0xa7e   :  { %5436 = vperm.xlu1 %5373, %v5395_v48  }
 0xa7f   :  { %5421 = vperm.xlu2 %5379, %v5374_v19  }
 0xa86   :  { %5447 = vset.pattern.permute.xlu1 %v10147_v35 }
 0xa87   :  { %5431 = vperm.xlu2 %5379, %v5385_v24  }
 0xa8f   :  { %5441 = vperm.xlu2 %5379, %v5395_v48  }
 0xa97   :  { %5445 = vset.pattern.permute.xlu2 %v10147_v35 }
 0xaa9   :  { %v5364_v16 = vpop.permute.xlu2 %5363 }
 0xaaa   :  { %v5366_v36 = vunpack.i.h.bf16 %v5364_v16  ;;  %v5365_v51 = vunpack.i.l.bf16 %v5364_v16 }
 0xaac   :  { %v3129_v3 = vmul.f32 %v5366_v36, %v7810_v7  ;;  %v3127_v4 = vmul.f32 %v5365_v51, %v7790_v30 }
 0xab9   :  { %v5382_v49 = vpop.permute.xlu2 %5381 }
 0xaba   :  { %v5384_v13 = vunpack.i.h.bf16 %v5382_v49  ;;  %v5383_v1 = vunpack.i.l.bf16 %v5382_v49 }
 0xabc   :  { %v3134_v8 = vmul.f32 %v5384_v13, %v7858_v43  ;;  %v3132_v10 = vmul.f32 %v5383_v1, %v7832_v45 }
 0xac0   :  { %v5376_v47 = vpop.permute.xlu1 %5375  ;;  %v5370_v40 = vpop.permute.xlu0 %5369 }
 0xac1   :  { %v5378_v44 = vunpack.i.h.bf16 %v5376_v47  ;;  %v5377_v17 = vunpack.i.l.bf16 %v5376_v47  ;;  %v5372_v9 = vunpack.i.h.bf16 %v5370_v40  ;;  %v5371_v6 = vunpack.i.l.bf16 %v5370_v40  ;;  %v5392_v58 = vpop.permute.xlu2 %5391 }
 0xac2   :  { %v5394_v52 = vunpack.i.h.bf16 %v5392_v58  ;;  %v5393_v43 = vunpack.i.l.bf16 %v5392_v58 }
 0xac3   :  { %v3133_v37 = vmul.f32 %v5378_v44, %v7846_v41  ;;  %v3131_v14 = vmul.f32 %v5377_v17, %v7819_v27  ;;  %v3130_v25 = vmul.f32 %v5372_v9, %v7824_v12  ;;  %v3128_v57 = vmul.f32 %v5371_v6, %v7795_v23 }
 0xac4   :  { %v3138_v13 = vmul.f32 %v5394_v52, %v7872_v56  ;;  %v3136_v1 = vmul.f32 %v5393_v43, %v7851_v61 }
 0xac5   :  { %v3157_v53 = vadd.f32 %v3132_v10, %v3131_v14  ;;  %v3164_v19 = vadd.f32 %v3134_v8, %v3133_v37  ;;  %v3143_v26 = vadd.f32 %v3128_v57, %v3127_v4  ;;  %v3150_v63 = vadd.f32 %v3130_v25, %v3129_v3 }
 0xac7   :  { %v3158_v21 = vrot.slane %v3157_v53, 4  ;;  %v3165_v7 = vrot.slane %v3164_v19, 4  ;;  %v3144_v24 = vrot.slane %v3143_v26, 4  ;;  %v3151_v30 = vrot.slane %v3150_v63, 4 }
 0xac8   :  { %v5387_v33 = vpop.permute.xlu1 %5386 }
 0xac9   :  { %v3159_v45 = vadd.f32 %v3158_v21, %v3157_v53  ;;  %v3166_v48 = vadd.f32 %v3165_v7, %v3164_v19  ;;  %v3145_v41 = vadd.f32 %v3144_v24, %v3143_v26  ;;  %v3152_v29 = vadd.f32 %v3151_v30, %v3150_v63  ;;  %v5402_v12 = vpop.permute.xlu2 %5401  ;;  %v10150_v24 = vld [vmem:[#allocation87_spill] sm:$0xff] }
 0xaca   :  { %v5389_v27 = vunpack.i.h.bf16 %v5387_v33  ;;  %v5388_v16 = vunpack.i.l.bf16 %v5387_v33  ;;  %v5404_v3 = vunpack.i.h.bf16 %v5402_v12  ;;  %v5403_v4 = vunpack.i.l.bf16 %v5402_v12  ;;  %v10151_v33 = vld [vmem:[#allocation88_spill] sm:$0xff] }
 0xacb   :  { %v3160_v49 = vrot.slane %v3159_v45, 2  ;;  %v3167_v23 = vrot.slane %v3166_v48, 2  ;;  %v3146_v36 = vrot.slane %v3145_v41, 2  ;;  %v3153_v51 = vrot.slane %v3152_v29, 2 }
 0xacc   :  { %v3137_v47 = vmul.f32 %v5389_v27, %v7877_v18  ;;  %v3135_v40 = vmul.f32 %v5388_v16, %v7885_v15  ;;  %v3142_v7 = vmul.f32 %v5404_v3, %v7904_v11  ;;  %v3140_v30 = vmul.f32 %v5403_v4, %v10150_v24 }
 0xacd   :  { %v3161_v44 = vadd.f32 %v3160_v49, %v3159_v45  ;;  %v3147_v17 = vadd.f32 %v3146_v36, %v3145_v41  ;;  %v3154_v9 = vadd.f32 %v3153_v51, %v3152_v29  ;;  %v3168_v10 = vadd.f32 %v3167_v23, %v3166_v48  ;;  %v10152_v48 = vld [vmem:[#allocation86_spill] sm:$0xff] }
 0xace   :  { %v3171_v6 = vadd.f32 %v3136_v1, %v3135_v40  ;;  %v3178_v58 = vadd.f32 %v3138_v13, %v3137_v47 }
 0xacf   :  { %v3162_v8 = vrot.slane %v3161_v44, 1  ;;  %v3148_v37 = vrot.slane %v3147_v17, 1  ;;  %v3155_v14 = vrot.slane %v3154_v9, 1  ;;  %v3169_v21 = vrot.slane %v3168_v10, 1 }
 0xad0   :  { %v3172_v25 = vrot.slane %v3171_v6, 4  ;;  %v3179_v57 = vrot.slane %v3178_v58, 4  ;;  %v5397_v56 = vpop.permute.xlu1 %5396 }
 0xad1   :  { %v3149_v53 = vadd.f32 %v3148_v37, %v3147_v17  ;;  %v3156_v61 = vadd.f32 %v3155_v14, %v3154_v9  ;;  %v5399_v26 = vunpack.i.h.bf16 %v5397_v56  ;;  %v5398_v15 = vunpack.i.l.bf16 %v5397_v56  ;;  %v8438_v29 = vpop.permute.xlu2 %5411 }
 0xad2   :  { %v3173_v19 = vadd.f32 %v3172_v25, %v3171_v6  ;;  %v3180_v18 = vadd.f32 %v3179_v57, %v3178_v58  ;;  %v3163_v63 = vadd.f32 %v3162_v8, %v3161_v44  ;;  %v3170_v51 = vadd.f32 %v3169_v21, %v3168_v10 }
 0xad3   :  { %v3141_v45 = vmul.f32 %v5399_v26, %v10151_v33  ;;  %v3139_v41 = vmul.f32 %v5398_v15, %v10152_v48  ;;  %v3199_v27 = vpack.c.bf16 %v3149_v53, %v3149_v53  ;;  %v3200_v16 = vpack.c.bf16 %v3156_v61, %v3156_v61 }
 0xad4   :  { %v3174_v52 = vrot.slane %v3173_v19, 2  ;;  %v3181_v43 = vrot.slane %v3180_v18, 2  ;;  %v5413_v13 = vunpack.i.l.bf16 %v8438_v29  ;;  %v3201_v11 = vpack.c.bf16 %v3163_v63, %v3163_v63 }
 0xad5   :  { %v3185_v23 = vadd.f32 %v3140_v30, %v3139_v41  ;;  %v3192_v36 = vadd.f32 %v3142_v7, %v3141_v45  ;;  %v3215_v17 = vunpack.c.l.b16 %v3199_v27  ;;  %v3216_v9 = vunpack.c.l.b16 %v3200_v16 }
 0xad6   :  { %v3175_v12 = vadd.f32 %v3174_v52, %v3173_v19  ;;  %v3182_v49 = vadd.f32 %v3181_v43, %v3180_v18  ;;  %v2909_v58 = vmul.f32 %v5413_v13, %v8084_v59  ;;  %v3217_v25 = vunpack.c.l.b16 %v3201_v11 }
 0xad7   :  { %v3186_v40 = vrot.slane %v3185_v23, 4  ;;  %v3193_v6 = vrot.slane %v3192_v36, 4  ;;  %v3202_v56 = vpack.c.bf16 %v3170_v51, %v3170_v51  ;;  %v3223_v53 = vsel %vm1257_vm6, %v3216_v9, %v3215_v17 }
 0xad8   :  { %v3176_v1 = vrot.slane %v3175_v12, 1  ;;  %v3183_v47 = vrot.slane %v3182_v49, 1  ;;  %v5407_v44 = vpop.permute.xlu1 %5406  ;;  %2944 = vperm.xlu0 %5446, %v2909_v58   ;;  %v3224_v59 = vsel %vm1259_vm7, %v3217_v25, %v3223_v53  ;;  %v5414_v11 = vunpack.i.h.bf16 %v8438_v29  ;;  %v10154_v29 = vld [vmem:[#allocation36_spill] sm:$0xff]  ;;  %v10156_v58 = vld [vmem:[#allocation37_spill] sm:$0xff] }
 0xad9   :  { %v3187_v4 = vadd.f32 %v3186_v40, %v3185_v23  ;;  %v3194_v37 = vadd.f32 %v3193_v6, %v3192_v36  ;;  %v5408_v14 = vunpack.i.l.bf16 %v5407_v44  ;;  %v3218_v24 = vunpack.c.l.b16 %v3202_v56  ;;  %v10160_v56 = vld [vmem:[#allocation44_spill] sm:$0xff]  ;;  %v10161_v53 = vld [vmem:[#allocation45_spill] sm:$0xff] }
 0xada   :  { %v3177_v3 = vadd.f32 %v3176_v1, %v3175_v12  ;;  %v3184_v8 = vadd.f32 %v3183_v47, %v3182_v49  ;;  %v5409_v52 = vunpack.i.h.bf16 %v5407_v44  ;;  %v5422_v1 = vpop.permute.xlu2 %5421 }
 0xadb   :  { %v3188_v57 = vrot.slane %v3187_v4, 2  ;;  %v3195_v61 = vrot.slane %v3194_v37, 2  ;;  %v2908_v19 = vmul.f32 %v5408_v14, %v8090_v42  ;;  %v3225_v45 = vsel %vm1261_vm12, %v3218_v24, %v3224_v59  ;;  %v10167_v24 = vld [vmem:[#allocation53_spill] sm:$0xff] }
 0xadc   :  { %v3203_v10 = vpack.c.bf16 %v3177_v3, %v3177_v3  ;;  %v3204_v26 = vpack.c.bf16 %v3184_v8, %v3184_v8  ;;  %v2910_v16 = vmul.f32 %v5409_v52, %v8087_v62  ;;  %v2911_v62 = vmul.f32 %v5414_v11, %v8097_v39  ;;  %v10179_v11 = vld [vmem:[#allocation5_spill] sm:$0xff] }
 0xadd   :  { %v3189_v18 = vadd.f32 %v3188_v57, %v3187_v4  ;;  %v3196_v15 = vadd.f32 %v3195_v61, %v3194_v37  ;;  %2941 = vperm.xlu2 %5445, %v2908_v19   ;;  %v10158_v4 = vld [vmem:[#allocation40_spill] sm:$0xff]  ;;  %v10159_v37 = vld [vmem:[#allocation41_spill] sm:$0xff]  ;;  %v10162_v61 = vld [vmem:[#allocation6_spill] sm:$0xff] }
 0xade   :  { %v3219_v63 = vunpack.c.l.b16 %v3203_v10  ;;  %v3220_v33 = vunpack.c.l.b16 %v3204_v26  ;;  %v10163_v26 = vld [vmem:[#allocation48_spill] sm:$0xff] }
 0xadf   :  { %v3190_v21 = vrot.slane %v3189_v18, 1  ;;  %v3197_v30 = vrot.slane %v3196_v15, 1 }
 0xae0   :  { %v8445_v7 = vpop.permute.xlu1 %5416  ;;  %v3226_v42 = vsel %vm1263_vm14, %v3219_v63, %v3225_v45 }
 0xae1   :  { %v3191_v43 = vadd.f32 %v3190_v21, %v3189_v18  ;;  %v3198_v48 = vadd.f32 %v3197_v30, %v3196_v15  ;;  %v3227_v49 = vsel %vm1265_vm0, %v3220_v33, %v3226_v42  ;;  %v5418_v39 = vunpack.i.l.bf16 %v8445_v7  ;;  %v10164_v15 = vld [vmem:[#allocation49_spill] sm:$0xff]  ;;  %v10166_v21 = vld [vmem:[#allocation52_spill] sm:$0xff]  ;;  %v10168_v30 = vld [vmem:[#allocation10_spill] sm:$0xff] }
 0xae2   :  { %v5432_v14 = vpop.permute.xlu2 %5431  ;;  %v5423_v18 = vunpack.i.l.bf16 %v5422_v1  ;;  %v10170_v33 = vld [vmem:[#allocation57_spill] sm:$0xff] }
 0xae3   :  { %v3205_v41 = vpack.c.bf16 %v3191_v43, %v3191_v43  ;;  %v3206_v27 = vpack.c.bf16 %v3198_v48, %v3198_v48  ;;  %v2912_v10 = vmul.f32 %v5418_v39, %v8113_v55  ;;  %v10165_v55 = vld [vmem:[#allocation89_spill] sm:$0xff]  ;;  %v5424_v43 = vunpack.i.h.bf16 %v5422_v1  ;;  %v10171_v48 = vld [vmem:[#allocation91_spill] sm:$0xff] }
 0xae5   :  { %v3221_v12 = vunpack.c.l.b16 %v3205_v41  ;;  %v3222_v23 = vunpack.c.l.b16 %v3206_v27  ;;  %2947 = vperm.xlu2 %5445, %v2910_v16   ;;  %v2915_v42 = vmul.f32 %v5424_v43, %v10171_v48  ;;  %v10172_v41 = vld [vmem:[#allocation60_spill] sm:$0xff]  ;;  %v5419_v27 = vunpack.i.h.bf16 %v8445_v7  ;;  %v10173_v16 = vld [vmem:[#allocation61_spill] sm:$0xff]  ;;  %v10198_v48 = vld [vmem:[#allocation42_spill] sm:$0xff] }
 0xae6   :  { %v10180_v7 = vld [vmem:[#allocation92_spill] sm:$0xff] }
 0xae7   :  { %v3228_v36 = vsel %vm1267_vm2, %v3221_v12, %v3227_v49  ;;  %v10174_v12 = vld [vmem:[#allocation14_spill] sm:$0xff]  ;;  %v5433_v49 = vunpack.i.l.bf16 %v5432_v14  ;;  %v10196_v43 = vld [vmem:[#allocation24_spill] sm:$0xff] }
 0xae8   :  { %v5427_v51 = vpop.permute.xlu1 %5426  ;;  %v3229_v13 = vsel %vm10153_vm13, %v3222_v23, %v3228_v36  ;;  %v10175_v23 = vld [vmem:[#allocation64_spill] sm:$0xff]  ;;  %v10176_v36 = vld [vmem:[#allocation90_spill] sm:$0xff] }
 0xae9   :  { %v5428_v47 = vunpack.i.l.bf16 %v5427_v51  ;;  %v8454_v40 = vpack.c.b16 %v3229_v13, %v3229_v13  ;;  %v5429_v3 = vunpack.i.h.bf16 %v5427_v51  ;;  %v2914_v51 = vmul.f32 %v5419_v27, %v10176_v36  ;;  %v10177_v13 = vld [vmem:[#allocation65_spill] sm:$0xff]  ;;  %v10199_v27 = vld [vmem:[#allocation28_spill] sm:$0xff]  ;;  %v10201_v36 = vld [vmem:[#allocation46_spill] sm:$0xff] }
 0xaea   :  { %v5442_v63 = vpop.permute.xlu2 %5441  ;;  %v2917_v1 = vmul.f32 %v5433_v49, %v10180_v7  ;;  %v10200_v49 = vld [vmem:[#allocation29_spill] sm:$0xff]  ;;  %v10204_v7 = vld [vmem:[#allocation50_spill] sm:$0xff] }
 0xaeb   :  { %v2916_v44 = vmul.f32 %v5428_v47, %v8191_v0  ;;  %v2030_v17 = vpop.xlane.xlu0 %2029  ;;  %3240 = vmatmul.bf16.vlgmr.msra.gmra.mxu3 %v8454_v40  ;;  %3253 = vmatmul.bf16.vlgmr.msra.gmra.mxu0 %v8454_v40  ;;  %v2918_v25 = vmul.f32 %v5429_v3, %v8198_v22  ;;  %v2913_v22 = vmul.f32 %v5423_v18, %v10165_v55  ;;  %v5444_v52 = vunpack.i.h.bf16 %v5442_v63  ;;  %v10184_v3 = vld [vmem:[#allocation9_spill] sm:$0xff]  ;;  %v10191_v55 = vld [vmem:[#allocation30_spill] sm:$0xff] }
 0xaec   :  { %vm2031_vm1 = vcmp.ge.f32.partialorder %v8416_v34, %v2030_v17  ;;  %3266 = vmatmul.bf16.vlgmr.msra.gmra.mxu1 %v8454_v40  ;;  %3310 = vmatpush.bf16.msra.mxu3 %v10154_v29  ;;  %v10157_v34 = vld [vmem:[#allocation2_spill] sm:$0xff]  ;;  %v5443_v47 = vunpack.i.l.bf16 %v5442_v63  ;;  %v10194_v63 = vld [vmem:[#allocation21_spill] sm:$0xff] }
 0xaed   :  { %v2032_v9 = vsel %vm2031_vm1, %v10129_v2, 10  ;;  %3323 = vmatpush.bf16.msra.mxu0 %v10156_v58  ;;  %2965 = vperm.xlu0 %5446, %v2916_v44   ;;  %v2923_v45 = vmul.f32 %v5444_v52, %v8269_v28  ;;  %v10178_v28 = vld [vmem:[#allocation4_spill] sm:$0xff]  ;;  %v10181_v44 = vld [vmem:[#allocation74_spill] sm:$0xff] }
 0xaee   :  { %v8465_v6 = vsel %vm10155_vm3, %v2032_v9, 2147483647  ;;  %2950 = vperm.xlu2 %5445, %v2911_v62   ;;  %3409 = vmatpush.bf16.xpose.msra.mxu1 %v10157_v34  ;;  %v10182_v17 = vld [vmem:[#allocation18_spill] sm:$0xff]  ;;  %v5434_v62 = vunpack.i.h.bf16 %v5432_v14  ;;  %v2921_v9 = vmul.f32 %v5443_v47, %v8211_v5  ;;  %v10189_v5 = vld [vmem:[#allocation16_spill] sm:$0xff] }
 0xaef   :  { %v2035_v0 = vshra.s32 %v8465_v6, 16  ;;  %v10188_v14 = vld [vmem:[#allocation26_spill] sm:$0xff] }
 0xaf0   :  { %3311 = vmatpush.bf16.msra.mxu3 %v10158_v4  ;;  %v5437_v57 = vpop.permute.xlu1 %5436  ;;  %v2919_v39 = vmul.f32 %v5434_v62, %v8206_v54  ;;  %v10192_v54 = vld [vmem:[#allocation34_spill] sm:$0xff] }
 0xaf1   :  { %v8472_v8 = vcvt.s32.f32 %v2035_v0  ;;  %3324 = vmatpush.bf16.msra.mxu0 %v10159_v37  ;;  %v5438_v19 = vunpack.i.l.bf16 %v5437_v57  ;;  %v10183_v0 = vld [vmem:[#allocation8_spill] sm:$0xff]  ;;  %v10195_v52 = vld [vmem:[#allocation38_spill] sm:$0xff] }
 0xaf2   :  { %v10205_v47 = vld [vmem:[#allocation54_spill] sm:$0xff] }
 0xaf3   :  { %2038 = vmin.xlane.f32.xlu1 %v8472_v8  ;;  %v2920_v59 = vmul.f32 %v5438_v19, %v8217_v38  ;;  %v10169_v38 = vld [vmem:[#allocation56_spill] sm:$0xff]  ;;  %v10187_v19 = vld [vmem:[#allocation13_spill] sm:$0xff] }
 0xaf4   :  { %3312 = vmatpush.bf16.msra.mxu3 %v10160_v56 }
 0xaf5   :  { %3325 = vmatpush.bf16.msra.mxu0 %v10161_v53  ;;  %2971 = vperm.xlu0 %5446, %v2918_v25   ;;  %v10185_v25 = vld [vmem:[#allocation22_spill] sm:$0xff] }
 0xaf6   :  { %2953 = vperm.xlu2 %5445, %v2912_v10   ;;  %3410 = vmatpush.bf16.xpose.msra.mxu1 %v10162_v61  ;;  %v10186_v10 = vld [vmem:[#allocation12_spill] sm:$0xff] }
 0xaf8   :  { %3313 = vmatpush.bf16.msra.mxu3 %v10163_v26 }
 0xaf9   :  { %3326 = vmatpush.bf16.msra.mxu0 %v10164_v15 }
 0xafb   :  { %3279 = vmatmul.bf16.vlgmr.msrb.gmra.mxu3 %v8454_v40  ;;  %3292 = vmatmul.bf16.vlgmr.msrb.gmra.mxu0 %v8454_v40 }
 0xafc   :  { %3305 = vmatmul.bf16.vlgmr.msrb.gmra.mxu1 %v8454_v40  ;;  %3314 = vmatpush.bf16.msra.mxu3 %v10166_v21 }
 0xafd   :  { %3327 = vmatpush.bf16.msra.mxu0 %v10167_v24  ;;  %2977 = vperm.xlu0 %5446, %v2920_v59   ;;  %v10190_v59 = vld [vmem:[#allocation17_spill] sm:$0xff] }
 0xafe   :  { %2956 = vperm.xlu2 %5445, %v2913_v22   ;;  %3411 = vmatpush.bf16.xpose.msra.mxu1 %v10168_v30  ;;  %v2783_v22 = vmul.f32 %v8402_v20, %v8393_v60  ;;  %v10202_v20 = vld [vmem:[#allocation32_spill] sm:$0xff] }
 0xb00   :  { %3315 = vmatpush.bf16.msra.mxu3 %v10169_v38 }
 0xb01   :  { %3328 = vmatpush.bf16.msra.mxu0 %v10170_v33 }
 0xb04   :  { %3316 = vmatpush.bf16.msra.mxu3 %v10172_v41 }
 0xb05   :  { %3329 = vmatpush.bf16.msra.mxu0 %v10173_v16  ;;  %2986 = vperm.xlu0 %5446, %v2923_v45   ;;  %v10197_v45 = vld [vmem:[#allocation25_spill] sm:$0xff] }
 0xb06   :  { %2962 = vperm.xlu2 %5445, %v2915_v42   ;;  %3412 = vmatpush.bf16.xpose.msra.mxu1 %v10174_v12 }
 0xb08   :  { %3317 = vmatpush.bf16.msra.mxu3 %v10175_v23 }
 0xb09   :  { %3330 = vmatpush.bf16.msra.mxu0 %v10177_v13 }
 0xb0b   :  { %3318 = vmatmul.bf16.vlgmr.msra.gmra.mxu3 %v8454_v40 }
 0xb0c   :  { %3435 = vmatpush.bf16.xpose.msrb.mxu3 %v10178_v28  ;;  %2959 = vperm.xlu1 %5447, %v2914_v51   ;;  %v10203_v51 = vld [vmem:[#allocation33_spill] sm:$0xff] }
 0xb0d   :  { %3448 = vmatpush.bf16.xpose.msrb.mxu0 %v10179_v11  ;;  %5448 = vset.pattern.permute.xlu0 %v10181_v44 }
 0xb0e   :  { %3331 = vmatmul.bf16.vlgmr.msra.gmra.mxu0 %v8454_v40  ;;  %2968 = vperm.xlu2 %5445, %v2917_v1   ;;  %v5439_v40 = vunpack.i.h.bf16 %v5437_v57  ;;  %v10193_v57 = vld [vmem:[#allocation20_spill] sm:$0xff] }
 0xb0f   :  { %3413 = vmatpush.bf16.xpose.msra.mxu1 %v10182_v17 }
 0xb10   :  { %v2922_v18 = vmul.f32 %v5439_v40, %v8237_v50  ;;  %v2784_v50 = vsel %vm10145_vm10, %v2783_v22, 0.0  ;;  %v2034_v22 = vand.u32 65535, %v8465_v6 }
 0xb14   :  { %3436 = vmatpush.bf16.xpose.msrb.mxu3 %v10183_v0  ;;  %2980 = vperm.xlu1 %5447, %v2921_v9   ;;  %v10206_v9 = vld [vmem:[#allocation58_spill] sm:$0xff] }
 0xb15   :  { %3449 = vmatpush.bf16.xpose.msrb.mxu0 %v10184_v3 }
 0xb16   :  { %2974 = vperm.xlu2 %5445, %v2919_v39  }
 0xb17   :  { %3414 = vmatpush.bf16.xpose.msra.mxu1 %v10185_v25 }
 0xb1c   :  { %3437 = vmatpush.bf16.xpose.msrb.mxu3 %v10186_v10 }
 0xb1d   :  { %3450 = vmatpush.bf16.xpose.msrb.mxu0 %v10187_v19 }
 0xb1e   :  { %2983 = vperm.xlu2 %5445, %v2922_v18   ;;  %v10207_v18 = vld [vmem:[#allocation62_spill] sm:$0xff] }
 0xb1f   :  { %3415 = vmatpush.bf16.xpose.msra.mxu1 %v10188_v14 }
 0xb24   :  { %3438 = vmatpush.bf16.xpose.msrb.mxu3 %v10189_v5 }
 0xb25   :  { %3451 = vmatpush.bf16.xpose.msrb.mxu0 %v10190_v59 }
 0xb26   :  { %5454 = vset.pattern.permute.xlu2 %v10148_v31 }
 0xb27   :  { %3416 = vmatpush.bf16.xpose.msra.mxu1 %v10191_v55 }
 0xb2c   :  { %3439 = vmatpush.bf16.xpose.msrb.mxu3 %v10193_v57 }
 0xb2d   :  { %3452 = vmatpush.bf16.xpose.msrb.mxu0 %v10194_v63 }
 0xb2f   :  { %3461 = vmatpush.bf16.xpose.msrb.mxu1 %v10192_v54  ;;  %2785 = vadd.xlane.f32.xlu0 %v2784_v50 }
 0xb34   :  { %3440 = vmatpush.bf16.xpose.msrb.mxu3 %v10196_v43 }
 0xb35   :  { %3453 = vmatpush.bf16.xpose.msrb.mxu0 %v10197_v45 }
 0xb37   :  { %3462 = vmatpush.bf16.xpose.msrb.mxu1 %v10195_v52  ;;  %v2942_v42 = vpop.permute.xlu2 %2941 }
 0xb3c   :  { %3441 = vmatpush.bf16.xpose.msrb.mxu3 %v10199_v27 }
 0xb3d   :  { %3454 = vmatpush.bf16.xpose.msrb.mxu0 %v10200_v49 }
 0xb3f   :  { %3463 = vmatpush.bf16.xpose.msrb.mxu1 %v10198_v48  ;;  %v2948_v60 = vpop.permute.xlu2 %2947 }
 0xb44   :  { %3442 = vmatpush.bf16.xpose.msrb.mxu3 %v10202_v20 }
 0xb45   :  { %3455 = vmatpush.bf16.xpose.msrb.mxu0 %v10203_v51 }
 0xb47   :  { %3464 = vmatpush.bf16.xpose.msrb.mxu1 %v10201_v36 }
 0xb48   :  { %v2951_v1 = vpop.permute.xlu2 %2950 }
 0xb4a   :  { %v2945_v40 = vpop.permute.xlu0 %2944 }
 0xb4c   :  { %3487 = vmatpush.bf16.xpose.msra.mxu3 %v10154_v29 }
 0xb4d   :  { %3500 = vmatpush.bf16.xpose.msra.mxu0 %v10156_v58 }
 0xb4f   :  { %3465 = vmatpush.bf16.xpose.msrb.mxu1 %v10204_v7 }
 0xb50   :  { %v2954_v62 = vpop.permute.xlu2 %2953 }
 0xb54   :  { %3488 = vmatpush.bf16.xpose.msra.mxu3 %v10158_v4 }
 0xb55   :  { %3501 = vmatpush.bf16.xpose.msra.mxu0 %v10159_v37 }
 0xb57   :  { %3466 = vmatpush.bf16.xpose.msrb.mxu1 %v10205_v47 }
 0xb58   :  { %v2957_v39 = vpop.permute.xlu2 %2956 }
 0xb59   :  { %v2995_v7 = vperm.slane %v2957_v39, %v10128_v32 }
 0xb5c   :  { %3489 = vmatpush.bf16.xpose.msra.mxu3 %v10160_v56 }
 0xb5d   :  { %3502 = vmatpush.bf16.xpose.msra.mxu0 %v10161_v53  ;;  %v2036_v53 = vcvt.s32.f32 %v2034_v22 }
 0xb5f   :  { %3467 = vmatpush.bf16.xpose.msrb.mxu1 %v10206_v9  ;;  %v2966_v50 = vpop.permute.xlu0 %2965 }
 0xb60   :  { %v2963_v35 = vpop.permute.xlu2 %2962 }
 0xb61   :  { %v2998_v51 = vperm.slane %v2963_v35, %v10128_v32 }
 0xb64   :  { %3490 = vmatpush.bf16.xpose.msra.mxu3 %v10163_v26 }
 0xb65   :  { %3503 = vmatpush.bf16.xpose.msra.mxu0 %v10164_v15 }
 0xb66   :  { %v8552_v31 = vpop.xlane.xlu1 %2038 }
 0xb67   :  { %3468 = vmatpush.bf16.xpose.msrb.mxu1 %v10207_v18  ;;  %vm2040_vm4 = vcmp.eq.f32.partialorder %v8472_v8, %v8552_v31  ;;  %v2972_v6 = vpop.permute.xlu0 %2971 }
 0xb68   :  { %v2041_v37 = vsel %vm2040_vm4, %v2036_v53, inf  ;;  %v8556_v58 = vpop.f32.mrf.mxu0  ;;  %v2969_v18 = vpop.permute.xlu2 %2968 }
 0xb69   :  { %2042 = vmin.xlane.f32.xlu1 %v2041_v37  ;;  %v8558_v15 = vpop.f32.mrf.mxu1 }
 0xb6c   :  { %3491 = vmatpush.bf16.xpose.msra.mxu3 %v10166_v21  ;;  %v2992_v21 = vperm.slane %v2951_v1, %v10128_v32 }
 0xb6d   :  { %3504 = vmatpush.bf16.xpose.msra.mxu0 %v10167_v24 }
 0xb6e   :  { %v8562_v24 = vpop.f32.mrf.mxu3 }
 0xb6f   :  { %v2978_v53 = vpop.permute.xlu0 %2977 }
 0xb70   :  { %v3256_v9 = vpop.f32.mrf.mxu0  ;;  %v2975_v22 = vpop.permute.xlu2 %2974 }
 0xb71   :  { %v3269_v47 = vpop.f32.mrf.mxu1  ;;  %v2991_v9 = vperm.slane %v2948_v60, %v10129_v2  ;;  %v3001_v60 = vperm.slane %v2969_v18, %v10128_v32 }
 0xb72   :  { %v2988_v47 = vperm.slane %v2942_v42, %v10129_v2 }
 0xb74   :  { %3492 = vmatpush.bf16.xpose.msra.mxu3 %v10169_v38  ;;  %v2989_v38 = vperm.slane %v2945_v40, %v10128_v32 }
 0xb75   :  { %3505 = vmatpush.bf16.xpose.msra.mxu0 %v10170_v33 }
 0xb76   :  { %v3243_v8 = vpop.f32.mrf.mxu3  ;;  %v2990_v1 = vsel %vm1234_vm5, %v2989_v38, %v2988_v47  ;;  %v3000_v38 = vperm.slane %v2966_v50, %v10129_v2 }
 0xb77   :  { %v2994_v8 = vperm.slane %v2954_v62, %v10129_v2 }
 0xb78   :  { %v8566_v37 = vpop.f32.mrf.mxu0  ;;  %v2984_v47 = vpop.permute.xlu2 %2983 }
 0xb79   :  { %v8570_v33 = vpop.f32.mrf.mxu1  ;;  %v2996_v40 = vsel %vm1234_vm5, %v2995_v7, %v2994_v8  ;;  %v2987_v7 = vpop.permute.xlu0 %2986  ;;  %v3002_v8 = vsel %vm1234_vm5, %v3001_v60, %v3000_v38  ;;  %v3009_v18 = vperm.slane %v2984_v47, %v10129_v2 }
 0xb7c   :  { %3493 = vmatpush.bf16.xpose.msra.mxu3 %v10172_v41 }
 0xb7d   :  { %3506 = vmatpush.bf16.xpose.msra.mxu0 %v10173_v16  ;;  %v2993_v16 = vsel %vm1234_vm5, %v2992_v21, %v2991_v9 }
 0xb7e   :  { %v2960_v41 = vpop.permute.xlu1 %2959  ;;  %v3012_v42 = vsel %vm1257_vm6, %v2993_v16, %v2990_v1  ;;  %v3003_v16 = vperm.slane %v2972_v6, %v10129_v2 }
 0xb7f   :  { %v2997_v39 = vperm.slane %v2960_v41, %v10129_v2  ;;  %v3013_v21 = vsel %vm1259_vm7, %v2996_v40, %v3012_v42  ;;  %v3004_v41 = vperm.slane %v2975_v22, %v10128_v32 }
 0xb80   :  { %v3295_v62 = vpop.f32.mrf.mxu0 }
 0xb81   :  { %v3308_v9 = vpop.f32.mrf.mxu1 }
 0xb84   :  { %3494 = vmatpush.bf16.xpose.msra.mxu3 %v10175_v23  ;;  %v8583_v23 = vpop.f32.mrf.mxu3 }
 0xb85   :  { %3507 = vmatpush.bf16.xpose.msra.mxu0 %v10177_v13  ;;  %v2999_v13 = vsel %vm1234_vm5, %v2998_v51, %v2997_v39  ;;  %v3010_v51 = vperm.slane %v2987_v7, %v10128_v32  ;;  %v3006_v39 = vperm.slane %v2978_v53, %v10129_v2 }
 0xb86   :  { %v3014_v35 = vsel %vm1261_vm12, %v2999_v13, %v3013_v21  ;;  %v2981_v1 = vpop.permute.xlu1 %2980  ;;  %v3005_v13 = vsel %vm1234_vm5, %v3004_v41, %v3003_v16 }
 0xb87   :  { %v3015_v40 = vsel %vm1263_vm14, %v3002_v8, %v3014_v35  ;;  %v3007_v50 = vperm.slane %v2981_v1, %v10128_v32  ;;  %v3011_v6 = vsel %vm1234_vm5, %v3010_v51, %v3009_v18  ;;  %v2045_v35 = vcvt.f32.s32 %v8552_v31  ;;  %v174_v1 = vld [vmem:[%s9633_s9] sm:$0xff] }
 0xb88   :  { %v3016_v60 = vsel %vm1265_vm0, %v3005_v13, %v3015_v40 }
 0xb89   :  { %v3008_v22 = vsel %vm1234_vm5, %v3007_v50, %v3006_v39  ;;  %v2046_v8 = vshll.u32 %v2045_v35, 16 }
 0xb8a   :  { %v3017_v21 = vsel %vm1267_vm2, %v3008_v22, %v3016_v60 }
 0xb8b   :  { %v8602_v62 = vpop.f32.mrf.mxu0  ;;  %v3018_v9 = vsel %vm10208_vm15, %v3011_v6, %v3017_v21  ;;  %vm10277_vm15 = vmmov %vm10155_vm3 }
 0xb8c   :  { %v3282_v42 = vpop.f32.mrf.mxu3  ;;  %v3020_v38 = vsel %vm10209_vm9, %v3018_v9, 0.0  ;;  %vm10278_vm9 = vmmov %vm10155_vm3 }
 0xb8d   :  { %3021 = vadd.xlane.f32.xlu2 %v3020_v38 }
 0xb93   :  { %v3334_v47 = vpop.f32.mrf.mxu0 }
 0xb94   :  { %v3319_v53 = vpop.f32.mrf.mxu3 }
 0xb9c   :  { %v3321_v7 = vpop.f32.mrf.mxu3 }
 0xba2   :  { %v2786_v9 = vpop.xlane.xlu0 %2785 }
 0xbdc   :  { %v2043_v41 = vpop.xlane.xlu1 %2042 }
 0xbdd   :  { %v2044_v16 = vcvt.f32.s32 %v2043_v41 }
 0xbdf   :  { %v2047_v18 = vadd.s32 %v2046_v8, %v2044_v16 }
 0xbe1   :  { %vm2048_vm8 = vcmp.ne.s32.totalorder %v2047_v18, %v174_v1 }
 0xbe2   :  { %v8613_v51 = vsel %vm2048_vm8, 1.0, %v10117_v46  ;;  %vm10279_vm8 = vmmov %vm10155_vm3 }
 0xbe3   :  { %10210 = vst [vmem:[#allocation87_spill] sm:$0xff] %v8613_v51  ;;  %v9883_v40 = vmax.f32 %v8613_v51, 0.0  ;;  %v10237_v51 = vld [vmem:[#allocation35_spill] sm:$0xff] }
 0xbe5   :  { %v3355_v39 = vsub.f32 1.0, %v9883_v40 }
 0xbe7   :  { %3358 = vperm.xlu1 %5447, %v3355_v39  }
 0xbef   :  { %5460 = vset.pattern.permute.xlu1 %v10181_v44  ;;  %v10238_v44 = vld [vmem:[#allocation82_spill] sm:$0xff] }
 0xc00   :  { %v3022_v31 = vpop.xlane.xlu2 %3021 }
 0xc01   :  { %5604 = vrsqrt.f32 %v3022_v31  ;;  %vm3342_vm13 = vweird.f32 %v3022_v31 }
 0xc07   :  { %v5605_v50 = vpop.eup %5604 }
 0xc08   :  { %v3337_v42 = vmul.f32 %v5605_v50, %v3022_v31  ;;  %vm3343_vm11 = vweird.f32 %v5605_v50  ;;  %v10211_v31 = vld [vmem:[#allocation66_spill] sm:$0xff] }
 0xc09   :  { %vm3344_vm1 = vmor %vm3342_vm13, %vm3343_vm11 }
 0xc0a   :  { %v3338_v13 = vmul.f32 %v5605_v50, %v3337_v42  ;;  %v10217_v42 = vld [vmem:[#allocation68_spill] sm:$0xff]  ;;  %vm10280_vm11 = vmmov %vm10155_vm3 }
 0xc0b   :  { %vm10281_vm13 = vmmov %vm10155_vm3 }
 0xc0c   :  { %v3339_v22 = vmul.f32 0.5, %v3338_v13 }
 0xc0e   :  { %v3340_v60 = vsub.f32 1.5, %v3339_v22 }
 0xc10   :  { %v3341_v6 = vmul.f32 %v5605_v50, %v3340_v60 }
 0xc12   :  { %v3345_v21 = vsel %vm3344_vm1, %v5605_v50, %v3341_v6  ;;  %vm10282_vm1 = vmmov %vm10155_vm3 }
 0xc13   :  { %v3346_v38 = vmul.f32 %v3345_v21, %v2786_v9 }
 0xc15   :  { %v3347_v47 = vmul.f32 %v3346_v38, %v8562_v24  ;;  %v3348_v7 = vmul.f32 %v3346_v38, %v8556_v58  ;;  %v3349_v35 = vmul.f32 %v3346_v38, %v8558_v15  ;;  %v3350_v41 = vmul.f32 %v3346_v38, %v8583_v23  ;;  %v10213_v24 = vld [vmem:[#allocation67_spill] sm:$0xff]  ;;  %v10215_v15 = vld [vmem:[#allocation69_spill] sm:$0xff] }
 0xc16   :  { %v3351_v9 = vmul.f32 %v3346_v38, %v8566_v37  ;;  %v5710_v37 = vld [vmem:[%s9626_s0 + $0x18] sm:$0xff] }
 0xc59   :  { %v3359_v8 = vpop.permute.xlu1 %3358 }
 0xc5a   :  { %v8623_v16 = vmul.f32 %v3359_v8, %v3347_v47  ;;  %v8625_v1 = vmul.f32 %v3359_v8, %v3348_v7  ;;  %v8627_v18 = vmul.f32 %v3359_v8, %v3349_v35  ;;  %v8629_v39 = vmul.f32 %v3359_v8, %v3350_v41  ;;  %v5707_v47 = vld [vmem:[%s9626_s0] sm:$0xff]  ;;  %v5708_v35 = vld [vmem:[%s9626_s0 + $0x8] sm:$0xff] }
 0xc5b   :  { %v8665_v40 = vmul.f32 %v3359_v8, %v3351_v9  ;;  %v8696_v9 = vld [vmem:[%s9628_s3 + $0x38] sm:$0xff] }
 0xc5c   :  { %v8633_v50 = vadd.f32 %v8623_v16, %v10211_v31  ;;  %v8637_v58 = vadd.f32 %v8625_v1, %v10213_v24  ;;  %v8641_v23 = vadd.f32 %v8627_v18, %v10215_v15  ;;  %v8645_v13 = vadd.f32 %v8629_v39, %v10217_v42  ;;  %v5709_v31 = vld [vmem:[%s9626_s0 + $0x10] sm:$0xff] }
 0xc5d   :  { %v3352_v15 = vmul.f32 %v3346_v38, %v8570_v33  ;;  %v10219_v33 = vld [vmem:[#allocation3_spill] sm:$0xff]  ;;  %v3371_v32 = vadd.f32 %v8627_v18, %v10238_v44  ;;  %v10245_v18 = vld [vmem:[#allocation52_spill] sm:$0xff] }
 0xc5e   :  { %10212 = vst [vmem:[#allocation88_spill] sm:$0xff] %v8633_v50  ;;  %v3385_v22 = vmul.f32 1.02, %v8633_v50  ;;  %v3386_v60 = vmul.f32 1.02, %v8637_v58  ;;  %v10244_v44 = vld [vmem:[#allocation51_spill] sm:$0xff] }
 0xc5f   :  { %10214 = vst [vmem:[#allocation86_spill] sm:$0xff] %v8637_v58  ;;  %v3387_v6 = vmul.f32 1.02, %v8641_v23  ;;  %v3388_v21 = vmul.f32 1.02, %v8645_v13 }
 0xc60   :  { %10216 = vst [vmem:[#allocation2_spill] sm:$0xff] %v8641_v23  ;;  %v3393_v7 = vadd.f32 %v5707_v47, %v3385_v22  ;;  %v3394_v41 = vadd.f32 %v5708_v35, %v3386_v60  ;;  %v3353_v22 = vmul.f32 %v3346_v38, %v3319_v53  ;;  %v3354_v47 = vmul.f32 %v3346_v38, %v8602_v62  ;;  %v10220_v53 = vld [vmem:[#allocation71_spill] sm:$0xff]  ;;  %v10222_v38 = vld [vmem:[#allocation76_spill] sm:$0xff] }
 0xc61   :  { %10218 = vst [vmem:[#allocation6_spill] sm:$0xff] %v8645_v13  ;;  %v3395_v24 = vadd.f32 %v5709_v31, %v3387_v6  ;;  %v3396_v42 = vadd.f32 %v5710_v37, %v3388_v21  ;;  %v8668_v35 = vmul.f32 %v3359_v8, %v3352_v15  ;;  %v8678_v62 = vadd.f32 %v8665_v40, %v10220_v53  ;;  %v8706_v15 = vld [vmem:[%s9628_s3 + $0x30] sm:$0xff]  ;;  %v10228_v37 = vld [vmem:[#allocation7_spill] sm:$0xff] }
 0xc62   :  { %v3401_v13 = vpack.c.bf16 %v3393_v7, %v3393_v7  ;;  %v3402_v23 = vpack.c.bf16 %v3394_v41, %v3394_v41  ;;  %v8670_v50 = vmul.f32 %v3359_v8, %v3353_v22  ;;  %v8672_v6 = vmul.f32 %v3359_v8, %v3354_v47  ;;  %v10224_v8 = vld [vmem:[#allocation77_spill] sm:$0xff]  ;;  %v5714_v47 = vld [vmem:[%s9626_s0 + $0x28] sm:$0xff]  ;;  %v5715_v53 = vld [vmem:[%s9626_s0 + $0x30] sm:$0xff] }
 0xc63   :  { %v3403_v60 = vpack.c.bf16 %v3395_v24, %v3395_v24  ;;  %v3404_v58 = vpack.c.bf16 %v3396_v42, %v3396_v42  ;;  %10221 = vst [vmem:[#allocation89_spill] sm:$0xff] %v8678_v62  ;;  %v8682_v21 = vadd.f32 %v8668_v35, %v10222_v38  ;;  %v3389_v7 = vmul.f32 1.02, %v8678_v62  ;;  %v5713_v42 = vld [vmem:[%s9626_s0 + $0x20] sm:$0xff] }
 0xc64   :  { %3417 = vmatmul.bf16.vlgmr.msra.gmra.mxu1 %v3401_v13  ;;  %3430 = vmatmul.bf16.vlgmr.msrb.gmra.mxu2 %v3402_v23  ;;  %v8687_v13 = vadd.f32 %v8670_v50, %v10224_v8  ;;  %v10226_v23 = vld [vmem:[#allocation78_spill] sm:$0xff]  ;;  %v5716_v8 = vld [vmem:[%s9626_s0 + $0x38] sm:$0xff] }
 0xc65   :  { %3443 = vmatmul.bf16.vlgmr.msrb.gmra.mxu3 %v3403_v60  ;;  %3456 = vmatmul.bf16.vlgmr.msrb.gmra.mxu0 %v3404_v58  ;;  %10223 = vst [vmem:[#allocation10_spill] sm:$0xff] %v8682_v21  ;;  %v8691_v58 = vadd.f32 %v8672_v6, %v10226_v23  ;;  %v3390_v41 = vmul.f32 1.02, %v8682_v21  ;;  %v3397_v22 = vadd.f32 %v5713_v42, %v3389_v7  ;;  %v8727_v7 = vld [vmem:[%s9628_s3 + $0x28] sm:$0xff]  ;;  %v10236_v21 = vld [vmem:[#allocation81_spill] sm:$0xff] }
 0xc66   :  { %3560 = vmatpush.bf16.xpose.msrb.mxu2 %v10157_v34  ;;  %3573 = vmatpush.bf16.xpose.msrb.mxu3 %v10219_v33  ;;  %10225 = vst [vmem:[#allocation91_spill] sm:$0xff] %v8687_v13  ;;  %v3391_v31 = vmul.f32 1.02, %v8687_v13  ;;  %v3370_v62 = vadd.f32 %v8625_v1, %v10236_v21  ;;  %v10240_v1 = vld [vmem:[#allocation43_spill] sm:$0xff] }
 0xc67   :  { %3586 = vmatpush.bf16.xpose.msrb.mxu0 %v10178_v28  ;;  %10227 = vst [vmem:[#allocation14_spill] sm:$0xff] %v8691_v58  ;;  %3515 = vmatpush.bf16.msra.mxu1 %v8696_v9  ;;  %v3392_v24 = vmul.f32 1.02, %v8691_v58  ;;  %v3398_v60 = vadd.f32 %v5714_v47, %v3390_v41  ;;  %v3405_v41 = vpack.c.bf16 %v3397_v22, %v3397_v22  ;;  %v8742_v22 = vld [vmem:[%s9628_s3 + $0x18] sm:$0xff]  ;;  %v10247_v21 = vld [vmem:[#allocation55_spill] sm:$0xff] }
 0xc68   :  { %v3399_v38 = vadd.f32 %v5715_v53, %v3391_v31  ;;  %v8733_v31 = vld [vmem:[%s9628_s3 + $0x20] sm:$0xff]  ;;  %v8757_v53 = vld [vmem:[%s9628_s3 + $0x8] sm:$0xff]  ;;  %v3553_v46 = vpack.c.bf16 %v3370_v62, %v3370_v62 }
 0xc69   :  { %v3400_v23 = vadd.f32 %v5716_v8, %v3392_v24  ;;  %v3406_v42 = vpack.c.bf16 %v3398_v60, %v3398_v60  ;;  %v10229_v24 = vld [vmem:[#allocation11_spill] sm:$0xff]  ;;  %v8748_v60 = vld [vmem:[%s9628_s3 + $0x10] sm:$0xff]  ;;  %v10246_v62 = vld [vmem:[#allocation54_spill] sm:$0xff] }
 0xc6a   :  { %v3407_v47 = vpack.c.bf16 %v3399_v38, %v3399_v38  ;;  %v8763_v38 = vld [vmem:[%s9628_s3] sm:$0xff]  ;;  %v10231_v8 = vld [vmem:[#allocation19_spill] sm:$0xff] }
 0xc6b   :  { %3516 = vmatpush.bf16.msra.mxu1 %v8706_v15  ;;  %v3408_v58 = vpack.c.bf16 %v3400_v23, %v3400_v23  ;;  %v10232_v23 = vld [vmem:[#allocation23_spill] sm:$0xff] }
 0xc6e   :  { %3561 = vmatpush.bf16.xpose.msrb.mxu2 %v10162_v61  ;;  %3574 = vmatpush.bf16.xpose.msrb.mxu3 %v10228_v37 }
 0xc6f   :  { %3587 = vmatpush.bf16.xpose.msrb.mxu0 %v10183_v0  ;;  %3517 = vmatpush.bf16.msra.mxu1 %v8727_v7 }
 0xc73   :  { %3518 = vmatpush.bf16.msra.mxu1 %v8733_v31 }
 0xc74   :  { %3469 = vmatmul.bf16.vlgmr.msrb.gmra.mxu1 %v3405_v41  ;;  %3482 = vmatmul.bf16.vlgmr.msra.gmra.mxu2 %v3406_v42  ;;  %v10233_v41 = vld [vmem:[#allocation27_spill] sm:$0xff] }
 0xc75   :  { %3495 = vmatmul.bf16.vlgmr.msra.gmra.mxu3 %v3407_v47  ;;  %3508 = vmatmul.bf16.vlgmr.msra.gmra.mxu0 %v3408_v58  ;;  %v10230_v58 = vld [vmem:[#allocation15_spill] sm:$0xff]  ;;  %v10235_v47 = vld [vmem:[#allocation80_spill] sm:$0xff] }
 0xc76   :  { %3562 = vmatpush.bf16.xpose.msrb.mxu2 %v10168_v30  ;;  %3575 = vmatpush.bf16.xpose.msrb.mxu3 %v10229_v24  ;;  %v10234_v42 = vld [vmem:[#allocation31_spill] sm:$0xff]  ;;  %v3369_v13 = vadd.f32 %v8623_v16, %v10235_v47 }
 0xc77   :  { %3588 = vmatpush.bf16.xpose.msrb.mxu0 %v10186_v10  ;;  %3519 = vmatpush.bf16.msra.mxu1 %v8742_v22  ;;  %v10239_v16 = vld [vmem:[#allocation39_spill] sm:$0xff] }
 0xc78   :  { %v3552_v2 = vpack.c.bf16 %v3369_v13, %v3369_v13  ;;  %v10248_v13 = vld [vmem:[#allocation56_spill] sm:$0xff]  ;;  %v10250_v47 = vld [vmem:[#allocation59_spill] sm:$0xff] }
 0xc7b   :  { %3520 = vmatpush.bf16.msra.mxu1 %v8748_v60 }
 0xc7e   :  { %3563 = vmatpush.bf16.xpose.msrb.mxu2 %v10174_v12  ;;  %3576 = vmatpush.bf16.xpose.msrb.mxu3 %v10230_v58 }
 0xc7f   :  { %3589 = vmatpush.bf16.xpose.msrb.mxu0 %v10189_v5  ;;  %3521 = vmatpush.bf16.msra.mxu1 %v8757_v53 }
 0xc83   :  { %3522 = vmatpush.bf16.msra.mxu1 %v8763_v38 }
 0xc86   :  { %3564 = vmatpush.bf16.xpose.msrb.mxu2 %v10182_v17  ;;  %3577 = vmatpush.bf16.xpose.msrb.mxu3 %v10231_v8 }
 0xc87   :  { %3599 = vmatpush.bf16.xpose.msrb.mxu1 %v10179_v11  ;;  %3590 = vmatpush.bf16.xpose.msrb.mxu0 %v10193_v57 }
 0xc8e   :  { %3565 = vmatpush.bf16.xpose.msrb.mxu2 %v10185_v25  ;;  %3578 = vmatpush.bf16.xpose.msrb.mxu3 %v10232_v23 }
 0xc8f   :  { %3600 = vmatpush.bf16.xpose.msrb.mxu1 %v10184_v3  ;;  %3591 = vmatpush.bf16.xpose.msrb.mxu0 %v10196_v43 }
 0xc96   :  { %3566 = vmatpush.bf16.xpose.msrb.mxu2 %v10188_v14  ;;  %3579 = vmatpush.bf16.xpose.msrb.mxu3 %v10233_v41 }
 0xc97   :  { %3601 = vmatpush.bf16.xpose.msrb.mxu1 %v10187_v19  ;;  %3592 = vmatpush.bf16.xpose.msrb.mxu0 %v10199_v27 }
 0xc9e   :  { %3567 = vmatpush.bf16.xpose.msrb.mxu2 %v10191_v55  ;;  %3580 = vmatpush.bf16.xpose.msrb.mxu3 %v10234_v42  ;;  %v3554_v42 = vpack.c.bf16 %v3371_v32, %v3371_v32  ;;  %v10242_v32 = vld [vmem:[#allocation33_spill] sm:$0xff] }
 0xc9f   :  { %3602 = vmatpush.bf16.xpose.msrb.mxu1 %v10190_v59  ;;  %3593 = vmatpush.bf16.xpose.msrb.mxu0 %v10202_v20 }
 0xca5   :  { %3568 = vmatmul.bf16.vlgmr.msrb.gmra.mxu2 %v3552_v2  ;;  %3581 = vmatmul.bf16.vlgmr.msrb.gmra.mxu3 %v3553_v46  ;;  %v10241_v46 = vld [vmem:[#allocation47_spill] sm:$0xff]  ;;  %v10243_v2 = vld [vmem:[#allocation50_spill] sm:$0xff] }
 0xca6   :  { %3612 = vmatpush.bf16.xpose.msra.mxu2 %v10192_v54  ;;  %3625 = vmatpush.bf16.xpose.msra.mxu3 %v10237_v51 }
 0xca7   :  { %3638 = vmatpush.bf16.xpose.msra.mxu0 %v10154_v29  ;;  %3603 = vmatpush.bf16.xpose.msrb.mxu1 %v10194_v63  ;;  %v10254_v29 = vld [vmem:[#allocation64_spill] sm:$0xff] }
 0xca8   :  { %3594 = vmatmul.bf16.vlgmr.msrb.gmra.mxu0 %v3554_v42  ;;  %v10249_v42 = vld [vmem:[#allocation58_spill] sm:$0xff] }
 0xcae   :  { %3613 = vmatpush.bf16.xpose.msra.mxu2 %v10195_v52  ;;  %3626 = vmatpush.bf16.xpose.msra.mxu3 %v10239_v16 }
 0xcaf   :  { %3639 = vmatpush.bf16.xpose.msra.mxu0 %v10158_v4  ;;  %3604 = vmatpush.bf16.xpose.msrb.mxu1 %v10197_v45  ;;  %v10253_v4 = vld [vmem:[#allocation63_spill] sm:$0xff] }
 0xcb6   :  { %3614 = vmatpush.bf16.xpose.msra.mxu2 %v10198_v48  ;;  %3627 = vmatpush.bf16.xpose.msra.mxu3 %v10240_v1  ;;  %v10257_v1 = vld [vmem:[#allocation85_spill] sm:$0xff] }
 0xcb7   :  { %3640 = vmatpush.bf16.xpose.msra.mxu0 %v10160_v56  ;;  %3605 = vmatpush.bf16.xpose.msrb.mxu1 %v10200_v49  ;;  %v10251_v56 = vld [vmem:[#allocation60_spill] sm:$0xff] }
 0xcbe   :  { %3615 = vmatpush.bf16.xpose.msra.mxu2 %v10201_v36  ;;  %3628 = vmatpush.bf16.xpose.msra.mxu3 %v10241_v46  ;;  %v10256_v46 = vld [vmem:[#allocation84_spill] sm:$0xff] }
 0xcbf   :  { %3641 = vmatpush.bf16.xpose.msra.mxu0 %v10163_v26  ;;  %3606 = vmatpush.bf16.xpose.msrb.mxu1 %v10242_v32  ;;  %v10252_v26 = vld [vmem:[#allocation62_spill] sm:$0xff] }
 0xcc6   :  { %3616 = vmatpush.bf16.xpose.msra.mxu2 %v10243_v2  ;;  %3629 = vmatpush.bf16.xpose.msra.mxu3 %v10244_v44  ;;  %v10255_v44 = vld [vmem:[#allocation83_spill] sm:$0xff] }
 0xcc7   :  { %3642 = vmatpush.bf16.xpose.msra.mxu0 %v10245_v18  ;;  %v3373_v18 = vadd.f32 %v8665_v40, %v10255_v44 }
 0xcc9   :  { %v3556_v40 = vpack.c.bf16 %v3373_v18, %v3373_v18 }
 0xcce   :  { %3617 = vmatpush.bf16.xpose.msra.mxu2 %v10246_v62  ;;  %3630 = vmatpush.bf16.xpose.msra.mxu3 %v10247_v21  ;;  %v3374_v21 = vadd.f32 %v8668_v35, %v10256_v46 }
 0xccf   :  { %3643 = vmatpush.bf16.xpose.msra.mxu0 %v10248_v13  ;;  %v3375_v13 = vadd.f32 %v8670_v50, %v10257_v1  ;;  %v5725_v50 = vld [vmem:[%s9629_s5 + $0x68] sm:$0xff] }
 0xcd0   :  { %v3557_v44 = vpack.c.bf16 %v3374_v21, %v3374_v21 }
 0xcd1   :  { %v3558_v35 = vpack.c.bf16 %v3375_v13, %v3375_v13 }
 0xcd6   :  { %3618 = vmatpush.bf16.xpose.msra.mxu2 %v10249_v42  ;;  %3631 = vmatpush.bf16.xpose.msra.mxu3 %v10250_v47 }
 0xcd7   :  { %3644 = vmatpush.bf16.xpose.msra.mxu0 %v10251_v56  ;;  %v5723_v56 = vld [vmem:[%s9629_s5 + $0x78] sm:$0xff] }
 0xcde   :  { %3619 = vmatpush.bf16.xpose.msra.mxu2 %v10252_v26  ;;  %3632 = vmatpush.bf16.xpose.msra.mxu3 %v10253_v4 }
 0xcdf   :  { %3645 = vmatpush.bf16.xpose.msra.mxu0 %v10254_v29  ;;  %v5724_v29 = vld [vmem:[%s9629_s5 + $0x70] sm:$0xff] }
 0xce5   :  { %3620 = vmatmul.bf16.vlgmr.msra.gmra.mxu2 %v3556_v40  ;;  %3633 = vmatmul.bf16.vlgmr.msra.gmra.mxu3 %v3557_v44  ;;  %v5734_v40 = vld [vmem:[%s9629_s5 + $0x28] sm:$0xff] }
 0xce6   :  { %3666 = vmatpush.bf16.msrb.mxu2 %v8696_v9  ;;  %3810 = vmatpush.msrb.mxu3 %v5723_v56  ;;  %v3457_v56 = vpop.f32.mrf.mxu0  ;;  %v5727_v9 = vld [vmem:[%s9629_s5 + $0x58] sm:$0xff] }
 0xce7   :  { %4732 = vmatpush.bf16.msrb.mxu0 %v10157_v34  ;;  %v5726_v34 = vld [vmem:[%s9629_s5 + $0x60] sm:$0xff] }
 0xce8   :  { %3811 = vmatpush.msrb.mxu3 %v5724_v29  ;;  %3646 = vmatmul.bf16.vlgmr.msra.gmra.mxu0 %v3558_v35  ;;  %v3418_v29 = vpop.f32.mrf.mxu1  ;;  %v3444_v1 = vpop.f32.mrf.mxu3 }
 0xcea   :  { %3667 = vmatpush.bf16.msrb.mxu2 %v8706_v15  ;;  %3812 = vmatpush.msrb.mxu3 %v5725_v50  ;;  %v5729_v15 = vld [vmem:[%s9629_s5 + $0x48] sm:$0xff] }
 0xceb   :  { %4733 = vmatpush.bf16.msrb.mxu0 %v10162_v61  ;;  %v5728_v61 = vld [vmem:[%s9629_s5 + $0x50] sm:$0xff] }
 0xcec   :  { %3813 = vmatpush.msrb.mxu3 %v5726_v34 }
 0xcee   :  { %3668 = vmatpush.bf16.msrb.mxu2 %v8727_v7  ;;  %3814 = vmatpush.msrb.mxu3 %v5727_v9  ;;  %v3431_v7 = vpop.f32.mrf.mxu2  ;;  %v3459_v21 = vpop.f32.mrf.mxu0  ;;  %v5737_v9 = vld [vmem:[%s9629_s5 + $0x10] sm:$0xff] }
 0xcef   :  { %4734 = vmatpush.bf16.msrb.mxu0 %v10168_v30  ;;  %v5730_v30 = vld [vmem:[%s9629_s5 + $0x40] sm:$0xff] }
 0xcf0   :  { %3815 = vmatpush.msrb.mxu3 %v5728_v61  ;;  %v3420_v46 = vpop.f32.mrf.mxu1  ;;  %v3446_v50 = vpop.f32.mrf.mxu3 }
 0xcf2   :  { %3669 = vmatpush.bf16.msrb.mxu2 %v8733_v31  ;;  %3816 = vmatpush.msrb.mxu3 %v5729_v15  ;;  %v8858_v31 = vld [vmem:[%s9625_s2] ss:$0 sm:$0xff] }
 0xcf3   :  { %4735 = vmatpush.bf16.msrb.mxu0 %v10174_v12  ;;  %v3419_v18 = vadd.f32 %v8858_v31, %v3418_v29  ;;  %v5732_v12 = vld [vmem:[%s9629_s5 + $0x38] sm:$0xff] }
 0xcf4   :  { %3817 = vmatpush.msrb.mxu3 %v5730_v30 }
 0xcf5   :  { %v3432_v13 = vadd.f32 %v3431_v7, %v3419_v18  ;;  %v5739_v7 = vld [vmem:[%s9629_s5] sm:$0xff] }
 0xcf6   :  { %3670 = vmatpush.bf16.msrb.mxu2 %v8742_v22  ;;  %3818 = vmatpush.msrb.mxu3 %v5732_v12  ;;  %v5733_v22 = vld [vmem:[%s9629_s5 + $0x30] sm:$0xff]  ;;  %v3433_v44 = vpop.f32.mrf.mxu2  ;;  %v3509_v29 = vpop.f32.mrf.mxu0 }
 0xcf7   :  { %4736 = vmatpush.bf16.msrb.mxu0 %v10182_v17  ;;  %v3445_v35 = vadd.f32 %v3444_v1, %v3432_v13  ;;  %v5735_v17 = vld [vmem:[%s9629_s5 + $0x20] sm:$0xff]  ;;  %v10264_v13 = vld [vmem:[#allocation57_spill] sm:$0xff] }
 0xcf8   :  { %3819 = vmatpush.msrb.mxu3 %v5733_v22  ;;  %v3470_v34 = vpop.f32.mrf.mxu1  ;;  %v10266_v44 = vld [vmem:[#allocation65_spill] sm:$0xff] }
 0xcfa   :  { %3671 = vmatpush.bf16.msrb.mxu2 %v8748_v60  ;;  %3820 = vmatpush.msrb.mxu3 %v5734_v40  ;;  %v5736_v60 = vld [vmem:[%s9629_s5 + $0x18] sm:$0xff] }
 0xcfb   :  { %4737 = vmatpush.bf16.msrb.mxu0 %v10185_v25  ;;  %v3458_v25 = vadd.f32 %v3457_v56, %v3445_v35  ;;  %v3496_v56 = vpop.f32.mrf.mxu3  ;;  %v10265_v40 = vld [vmem:[#allocation61_spill] sm:$0xff] }
 0xcfc   :  { %3821 = vmatpush.msrb.mxu3 %v5735_v17 }
 0xcfd   :  { %v3471_v61 = vadd.f32 %v3470_v34, %v3458_v25 }
 0xcfe   :  { %3672 = vmatpush.bf16.msrb.mxu2 %v8757_v53  ;;  %3822 = vmatpush.msrb.mxu3 %v5736_v60  ;;  %v5738_v53 = vld [vmem:[%s9629_s5 + $0x8] sm:$0xff]  ;;  %v3483_v15 = vpop.f32.mrf.mxu2  ;;  %v3511_v30 = vpop.f32.mrf.mxu0 }
 0xcff   :  { %4738 = vmatpush.bf16.msrb.mxu0 %v10188_v14  ;;  %v3484_v14 = vadd.f32 %v3483_v15, %v3471_v61 }
 0xd00   :  { %3823 = vmatpush.msrb.mxu3 %v5737_v9  ;;  %v10269_v9 = vmov 0.0  }
 0xd01   :  { %v3497_v1 = vadd.f32 %v3496_v56, %v3484_v14 }
 0xd02   :  { %3673 = vmatpush.bf16.msrb.mxu2 %v8763_v38  ;;  %3824 = vmatpush.msrb.mxu3 %v5738_v53  ;;  %v3472_v38 = vpop.f32.mrf.mxu1 }
 0xd03   :  { %4739 = vmatpush.bf16.msrb.mxu0 %v10191_v55  ;;  %v3510_v46 = vadd.f32 %v3509_v29, %v3497_v1  ;;  %v3498_v21 = vpop.f32.mrf.mxu3  ;;  %v5742_v1 = vld [vmem:[%s9630_s7 + $0x8] sm:$0xff] }
 0xd04   :  { %3825 = vmatpush.msrb.mxu3 %v5739_v7  ;;  %v5741_v7 = vld [vmem:[%s9630_s7] sm:$0xff]  ;;  %v5744_v21 = vld [vmem:[%s9630_s7 + $0x38] sm:$0xff] }
 0xd06   :  { %4758 = vmatpush.bf16.msra.mxu2 %v10178_v28  ;;  %v3513_v28 = vmax.f32 %v3510_v46, 0.0  ;;  %v3485_v55 = vpop.f32.mrf.mxu2 }
 0xd07   :  { %4771 = vmatpush.bf16.msra.mxu0 %v10179_v11  ;;  %v10258_v11 = vld [vmem:[#allocation37_spill] sm:$0xff] }
 0xd08   :  { %v3514_v18 = vpack.c.bf16 %v3513_v28, %v3513_v28 }
 0xd0a   :  { %4759 = vmatpush.bf16.msra.mxu2 %v10183_v0  ;;  %3523 = vmatmul.bf16.vlgmr.msra.gmra.mxu1 %v3514_v18  ;;  %v10259_v0 = vld [vmem:[#allocation41_spill] sm:$0xff] }
 0xd0b   :  { %4772 = vmatpush.bf16.msra.mxu0 %v10184_v3  ;;  %3651 = vmatpush.bf16.xpose.msra.mxu1 %v10258_v11  ;;  %v10260_v3 = vld [vmem:[#allocation70_spill] sm:$0xff] }
 0xd0e   :  { %4760 = vmatpush.bf16.msra.mxu2 %v10186_v10  ;;  %v3372_v10 = vadd.f32 %v8629_v39, %v10260_v3 }
 0xd0f   :  { %4773 = vmatpush.bf16.msra.mxu0 %v10187_v19 }
 0xd10   :  { %v3555_v19 = vpack.c.bf16 %v3372_v10, %v3372_v10 }
 0xd12   :  { %4761 = vmatpush.bf16.msra.mxu2 %v10189_v5  ;;  %v10261_v5 = vld [vmem:[#allocation45_spill] sm:$0xff] }
 0xd13   :  { %4774 = vmatpush.bf16.msra.mxu0 %v10190_v59  ;;  %3652 = vmatpush.bf16.xpose.msra.mxu1 %v10259_v0  ;;  %v10262_v59 = vld [vmem:[#allocation49_spill] sm:$0xff] }
 0xd16   :  { %4762 = vmatpush.bf16.msra.mxu2 %v10193_v57 }
 0xd17   :  { %4775 = vmatpush.bf16.msra.mxu0 %v10194_v63  ;;  %v10263_v63 = vld [vmem:[#allocation53_spill] sm:$0xff] }
 0xd1a   :  { %4763 = vmatpush.bf16.msra.mxu2 %v10196_v43  ;;  %3607 = vmatmul.bf16.vlgmr.msrb.gmra.mxu1 %v3555_v19 }
 0xd1b   :  { %4776 = vmatpush.bf16.msra.mxu0 %v10197_v45  ;;  %3653 = vmatpush.bf16.xpose.msra.mxu1 %v10261_v5 }
 0xd1e   :  { %4764 = vmatpush.bf16.msra.mxu2 %v10199_v27 }
 0xd1f   :  { %4777 = vmatpush.bf16.msra.mxu0 %v10200_v49 }
 0xd22   :  { %4765 = vmatpush.bf16.msra.mxu2 %v10202_v20 }
 0xd23   :  { %4778 = vmatpush.bf16.msra.mxu0 %v10242_v32  ;;  %3654 = vmatpush.bf16.xpose.msra.mxu1 %v10262_v59  ;;  %v10267_v32 = vld [vmem:[#allocation79_spill] sm:$0xff] }
 0xd24   :  { %v3376_v35 = vadd.f32 %v8672_v6, %v10267_v32 }
 0xd25   :  { %v3595_v57 = vpop.f32.mrf.mxu0 }
 0xd26   :  { %v3559_v50 = vpack.c.bf16 %v3376_v35, %v3376_v35 }
 0xd28   :  { %v3569_v43 = vpop.f32.mrf.mxu2  ;;  %v3582_v39 = vpop.f32.mrf.mxu3 }
 0xd29   :  { %v3570_v45 = vadd.f32 %v8858_v31, %v3569_v43  ;;  %v10268_v31 = vld [vmem:[#allocation31_spill] sm:$0xff]  ;;  %v5745_v43 = vld [vmem:[%s9630_s7 + $0x18] sm:$0xff] }
 0xd2b   :  { %3655 = vmatpush.bf16.xpose.msra.mxu1 %v10263_v63  ;;  %v3583_v27 = vadd.f32 %v3582_v39, %v3570_v45  ;;  %v5746_v45 = vld [vmem:[%s9630_s7 + $0x10] sm:$0xff] }
 0xd2d   :  { %v3597_v12 = vpop.f32.mrf.mxu0  ;;  %v3596_v49 = vadd.f32 %v3595_v57, %v3583_v27 }
 0xd2e   :  { %v10270_v12 = vld [vmem:[#allocation43_spill] sm:$0xff] }
 0xd30   :  { %v3571_v22 = vpop.f32.mrf.mxu2  ;;  %v3584_v20 = vpop.f32.mrf.mxu3 }
 0xd33   :  { %3656 = vmatpush.bf16.xpose.msra.mxu1 %v10264_v13 }
 0xd3b   :  { %3657 = vmatpush.bf16.xpose.msra.mxu1 %v10265_v40 }
 0xd43   :  { %3658 = vmatpush.bf16.xpose.msra.mxu1 %v10266_v44 }
 0xd4a   :  { %3659 = vmatmul.bf16.vlgmr.msra.gmra.mxu1 %v3559_v50 }
 0xd4b   :  { %4745 = vmatpush.bf16.msrb.mxu1 %v10219_v33 }
 0xd4f   :  { %4746 = vmatpush.bf16.msrb.mxu1 %v10228_v37 }
 0xd53   :  { %4747 = vmatpush.bf16.msrb.mxu1 %v10229_v24 }
 0xd57   :  { %4748 = vmatpush.bf16.msrb.mxu1 %v10230_v58 }
 0xd5b   :  { %4749 = vmatpush.bf16.msrb.mxu1 %v10231_v8 }
 0xd5f   :  { %4750 = vmatpush.bf16.msrb.mxu1 %v10232_v23 }
 0xd63   :  { %4751 = vmatpush.bf16.msrb.mxu1 %v10233_v41 }
 0xd65   :  { %v3647_v6 = vpop.f32.mrf.mxu0 }
 0xd67   :  { %4752 = vmatpush.bf16.msrb.mxu1 %v10268_v31  ;;  %v10271_v31 = vld [vmem:[#allocation47_spill] sm:$0xff] }
 0xd68   :  { %v3621_v33 = vpop.f32.mrf.mxu2  ;;  %v3634_v37 = vpop.f32.mrf.mxu3 }
 0xd6b   :  { %4784 = vmatpush.bf16.msra.mxu1 %v10192_v54 }
 0xd6d   :  { %v3649_v24 = vpop.f32.mrf.mxu0 }
 0xd6f   :  { %4785 = vmatpush.bf16.msra.mxu1 %v10195_v52  ;;  %v8940_v52 = vld [vmem:[%s9631_s4] ss:$0 sm:$0xff] }
 0xd70   :  { %v3623_v58 = vpop.f32.mrf.mxu2  ;;  %v3636_v8 = vpop.f32.mrf.mxu3 }
 0xd71   :  { %v5749_v58 = vld [vmem:[%s9630_s7 + $0x20] sm:$0xff] }
 0xd73   :  { %4786 = vmatpush.bf16.msra.mxu1 %v10198_v48 }
 0xd77   :  { %4787 = vmatpush.bf16.msra.mxu1 %v10201_v36 }
 0xd7b   :  { %4788 = vmatpush.bf16.msra.mxu1 %v10243_v2 }
 0xd7f   :  { %4789 = vmatpush.bf16.msra.mxu1 %v10246_v62 }
 0xd83   :  { %4790 = vmatpush.bf16.msra.mxu1 %v10249_v42 }
 0xd87   :  { %4791 = vmatpush.bf16.msra.mxu1 %v10252_v26  ;;  %v3524_v54 = vpop.f32.mrf.mxu1 }
 0xd88   :  { %v8943_v48 = vadd.f32 %v8940_v52, %v3524_v54  ;;  %v10272_v54 = vld [vmem:[#allocation51_spill] sm:$0xff] }
 0xd8a   :  { %v3528_v36 = vsel %vm10155_vm3, %v8943_v48, -inf  ;;  %vm10283_vm3 = vmmov %vm10282_vm1 }
 0xd8b   :  { %3529 = vmax.xlane.f32.xlu2 %v3528_v36  ;;  %v5750_v36 = vld [vmem:[%s9630_s7 + $0x68] sm:$0xff] }
 0xd8f   :  { %v3526_v23 = vpop.f32.mrf.mxu1 }
 0xd97   :  { %v3608_v41 = vpop.f32.mrf.mxu1 }
 0xd98   :  { %v3609_v2 = vadd.f32 %v3608_v41, %v3596_v49  ;;  %v5747_v49 = vld [vmem:[%s9630_s7 + $0x40] sm:$0xff] }
 0xd9a   :  { %v3622_v62 = vadd.f32 %v3621_v33, %v3609_v2 }
 0xd9c   :  { %v3635_v42 = vadd.f32 %v3634_v37, %v3622_v62  ;;  %v5748_v37 = vld [vmem:[%s9630_s7 + $0x28] sm:$0xff] }
 0xd9e   :  { %v3648_v17 = vadd.f32 %v3647_v6, %v3635_v42  ;;  %v10273_v42 = vld [vmem:[#allocation55_spill] sm:$0xff] }
 0xd9f   :  { %v3610_v26 = vpop.f32.mrf.mxu1 }
 0xdc7   :  { %v3660_v34 = vpop.f32.mrf.mxu1 }
 0xdc8   :  { %v3661_v29 = vadd.f32 %v3660_v34, %v3648_v17  ;;  %v5751_v34 = vld [vmem:[%s9630_s7 + $0x48] sm:$0xff] }
 0xdca   :  { %v3664_v60 = vmax.f32 %v3661_v29, 0.0 }
 0xdcc   :  { %v3665_v25 = vpack.c.bf16 %v3664_v60, %v3664_v60  ;;  %vm3767_vm10 = vcmp.gt.f32.partialorder %v3664_v60, 0.0  ;;  %v5752_v60 = vld [vmem:[%s9630_s7 + $0x30] sm:$0xff] }
 0xdcd   :  { %v8948_v61 = vsel %vm3767_vm10, 1.0, %v10269_v9  ;;  %vm10284_vm10 = vmmov %vm10282_vm1 }
 0xdce   :  { %3674 = vmatmul.bf16.vlgmr.msrb.gmra.mxu2 %v3665_v25  ;;  %v3778_v53 = vperm.slane %v8948_v61, 0  ;;  %v3773_v15 = vrot.slane %v8948_v61, 3  ;;  %v3771_v14 = vrot.slane %v8948_v61, 1  ;;  %v3774_v28 = vrot.slane %v8948_v61, 4 }
 0xdcf   :  { %v3662_v56 = vpop.f32.mrf.mxu1  ;;  %4797 = vmatpush.bf16.msrb.mxu2 %v10237_v51  ;;  %v8969_v51 = vld [vmem:[%s9627_s6] ss:$0 sm:$0xff]  ;;  %v3776_v20 = vrot.slane %v8948_v61, 6  ;;  %v3777_v41 = vrot.slane %v8948_v61, 7 }
 0xdd0   :  { %v8957_v38 = vmul.f32 %v5741_v7, %v3778_v53  ;;  %v8962_v30 = vmul.f32 %v5742_v1, %v3778_v53  ;;  %v3781_v46 = vperm.slane %v3773_v15, 0  ;;  %v3779_v10 = vperm.slane %v3771_v14, 0  ;;  %v5753_v15 = vld [vmem:[%s9630_s7 + $0x70] sm:$0xff] }
 0xdd1   :  { %v3782_v57 = vperm.slane %v3774_v28, 0  ;;  %v3784_v33 = vperm.slane %v3776_v20, 0  ;;  %v3785_v26 = vperm.slane %v3777_v41, 0  ;;  %v3775_v53 = vrot.slane %v8948_v61, 5  ;;  %v5755_v28 = vld [vmem:[%s9630_s7 + $0x58] sm:$0xff] }
 0xdd2   :  { %3826 = vmatmul.f32.vlgmr.msrb.gmra.mxu3 %v8957_v38  ;;  %v3924_v55 = vmul.f32 %v8969_v51, %v8962_v30  ;;  %v3923_v18 = vmul.f32 %v8969_v51, %v8957_v38  ;;  %v8978_v3 = vmul.f32 %v5744_v21, %v3781_v46  ;;  %v8986_v39 = vmul.f32 %v5745_v43, %v3779_v10  ;;  %v5756_v21 = vld [vmem:[%s9630_s7 + $0x78] sm:$0xff] }
 0xdd3   :  { %4798 = vmatpush.bf16.msrb.mxu2 %v10239_v16  ;;  %v8991_v27 = vmul.f32 %v5746_v45, %v3779_v10  ;;  %v3772_v16 = vrot.slane %v8948_v61, 2  ;;  %v8998_v22 = vmul.f32 %v5747_v49, %v3782_v57  ;;  %v9023_v23 = vmul.f32 %v5750_v36, %v3784_v33  ;;  %v5754_v61 = vld [vmem:[%s9630_s7 + $0x50] sm:$0xff] }
 0xdd4   :  { %3941 = vadd.xlane.f32.xlu0 %v3924_v55  ;;  %3939 = vadd.xlane.f32.xlu2 %v3923_v18  ;;  %v3930_v19 = vmul.f32 %v8969_v51, %v8978_v3  ;;  %v3926_v32 = vmul.f32 %v8969_v51, %v8986_v39  ;;  %v9037_v29 = vmul.f32 %v5751_v34, %v3782_v57  ;;  %v3783_v1 = vperm.slane %v3775_v53, 0  ;;  %v5760_v53 = vld [vmem:[%s9632_s8 + $0x8] sm:$0xff] }
 0xdd5   :  { %v3925_v35 = vmul.f32 %v8969_v51, %v8991_v27  ;;  %v3780_v50 = vperm.slane %v3772_v16, 0  ;;  %v3931_v6 = vmul.f32 %v8969_v51, %v8998_v22  ;;  %v3936_v17 = vmul.f32 %v8969_v51, %v9023_v23 }
 0xdd6   :  { %3953 = vadd.xlane.f32.xlu1 %v3930_v19  ;;  %v9042_v25 = vmul.f32 %v5752_v60, %v3781_v46  ;;  %v9049_v14 = vmul.f32 %v5753_v15, %v3785_v26  ;;  %v3932_v56 = vmul.f32 %v8969_v51, %v9037_v29  ;;  %v9062_v46 = vmul.f32 %v5754_v61, %v3783_v1  ;;  %v5757_v19 = vld [vmem:[%s9630_s7 + $0x60] sm:$0xff] }
 0xdd7   :  { %4799 = vmatpush.bf16.msrb.mxu2 %v10270_v12  ;;  %v9012_v24 = vmul.f32 %v5748_v37, %v3780_v50  ;;  %v9017_v8 = vmul.f32 %v5749_v58, %v3780_v50  ;;  %v9067_v55 = vmul.f32 %v5755_v28, %v3783_v1  ;;  %v9077_v10 = vmul.f32 %v5756_v21, %v3785_v26  ;;  %v10276_v12 = vld [vmem:[#allocation72_spill] sm:$0xff]  ;;  %v5762_v61 = vld [vmem:[%s9632_s8 + $0x20] sm:$0xff] }
 0xdd8   :  { %v3929_v7 = vmul.f32 %v8969_v51, %v9042_v25  ;;  %10274 = vst [vmem:[#allocation90_spill] sm:$0xff] %v9062_v46  ;;  %v9082_v57 = vmul.f32 %v5757_v19, %v3784_v33 }
 0xdd9   :  { %v3928_v2 = vmul.f32 %v8969_v51, %v9012_v24  ;;  %v3927_v62 = vmul.f32 %v8969_v51, %v9017_v8  ;;  %10275 = vst [vmem:[#allocation4_spill] sm:$0xff] %v9067_v55  ;;  %v3934_v18 = vmul.f32 %v8969_v51, %v9067_v55  ;;  %v3938_v43 = vmul.f32 %v8969_v51, %v9077_v10 }
 0xdda   :  { %3829 = vmatmul.f32.gmra.mxu3 %v8962_v30  ;;  %v3935_v45 = vmul.f32 %v8969_v51, %v9082_v57 }
 0xddb   :  { %4800 = vmatpush.bf16.msrb.mxu2 %v10271_v31 }
 0xddc   :  { %3945 = vadd.xlane.f32.xlu0 %v3926_v32  ;;  %3943 = vadd.xlane.f32.xlu2 %v3925_v35 }
 0xdde   :  { %3955 = vadd.xlane.f32.xlu1 %v3931_v6 }
 0xddf   :  { %4801 = vmatpush.bf16.msrb.mxu2 %v10272_v54  ;;  %v5758_v54 = vld [vmem:[%s9632_s8] sm:$0xff] }
 0xde2   :  { %3832 = vmatmul.f32.gmra.mxu3 %v8991_v27 }
 0xde3   :  { %4802 = vmatpush.bf16.msrb.mxu2 %v10273_v42  ;;  %v5759_v42 = vld [vmem:[%s9632_s8 + $0x18] sm:$0xff] }
 0xde4   :  { %3949 = vadd.xlane.f32.xlu0 %v3928_v2  ;;  %3947 = vadd.xlane.f32.xlu2 %v3927_v62 }
 0xde6   :  { %3965 = vadd.xlane.f32.xlu1 %v3936_v17 }
 0xde7   :  { %4803 = vmatpush.bf16.msrb.mxu2 %v10250_v47  ;;  %v3937_v47 = vmul.f32 %v8969_v51, %v9049_v14 }
 0xdea   :  { %3835 = vmatmul.f32.gmra.mxu3 %v8986_v39 }
 0xdeb   :  { %4804 = vmatpush.bf16.msrb.mxu2 %v10253_v4  ;;  %v3933_v4 = vmul.f32 %v8969_v51, %v9062_v46 }
 0xdec   :  { %3957 = vadd.xlane.f32.xlu0 %v3932_v56  ;;  %3951 = vadd.xlane.f32.xlu2 %v3929_v7  ;;  %v5761_v7 = vld [vmem:[%s9632_s8 + $0x10] sm:$0xff] }
 0xdee   :  { %3967 = vadd.xlane.f32.xlu1 %v3937_v47 }
 0xdf2   :  { %3838 = vmatmul.f32.gmra.mxu3 %v9017_v8 }
 0xdf4   :  { %3959 = vadd.xlane.f32.xlu0 %v3933_v4  ;;  %3961 = vadd.xlane.f32.xlu2 %v3934_v18 }
 0xdfa   :  { %3841 = vmatmul.f32.gmra.mxu3 %v9012_v24 }
 0xdfc   :  { %3969 = vadd.xlane.f32.xlu0 %v3938_v43  ;;  %3963 = vadd.xlane.f32.xlu2 %v3935_v45  ;;  %v5763_v45 = vld [vmem:[%s9632_s8 + $0x30] sm:$0xff] }
 0xdfe   :  { %v3530_v16 = vpop.xlane.xlu2 %3529 }
 0xdff   :  { %vm3531_vm4 = vcmp.ge.f32.partialorder %v8943_v48, %v3530_v16 }
 0xe00   :  { %v3532_v49 = vsel %vm3531_vm4, %v10276_v12, 10 }
 0xe01   :  { %v9092_v20 = vsel %vm10277_vm15, %v3532_v49, 2147483647  ;;  %v5764_v49 = vld [vmem:[%s9632_s8 + $0x28] sm:$0xff]  ;;  %vm10285_vm15 = vmmov %vm10282_vm1 }
 0xe02   :  { %v3535_v32 = vshra.s32 %v9092_v20, 16  ;;  %3844 = vmatmul.f32.gmra.mxu3 %v9042_v25 }
 0xe04   :  { %v9096_v35 = vcvt.s32.f32 %v3535_v32 }
 0xe06   :  { %3538 = vmin.xlane.f32.xlu0 %v9096_v35 }
 0xe0a   :  { %3847 = vmatmul.f32.gmra.mxu3 %v8978_v3 }
 0xe12   :  { %3850 = vmatmul.f32.gmra.mxu3 %v8998_v22 }
 0xe1a   :  { %3853 = vmatmul.f32.gmra.mxu3 %v9037_v29 }
 0xe22   :  { %3856 = vmatmul.f32.gmra.mxu3 %v9062_v46 }
 0xe2a   :  { %3859 = vmatmul.f32.gmra.mxu3 %v9067_v55 }
 0xe32   :  { %3862 = vmatmul.f32.gmra.mxu3 %v9082_v57 }
 0xe3a   :  { %3865 = vmatmul.f32.gmra.mxu3 %v9023_v23 }
 0xe42   :  { %3868 = vmatmul.f32.gmra.mxu3 %v9049_v14 }
 0xe47   :  { %v9107_v48 = vpop.xlane.xlu0 %3941 }
 0xe4a   :  { %3871 = vmatmul.f32.gmra.mxu3 %v9077_v10 }
 0xe4f   :  { %v9110_v51 = vpop.xlane.xlu0 %3945 }
 0xe51   :  { %v3675_v50 = vpop.f32.mrf.mxu2 }
 0xe52   :  { %v9113_v31 = vadd.f32 %v8940_v52, %v3675_v50 }
 0xe54   :  { %v3687_v6 = vperm.slane %v9113_v31, 0  ;;  %v3680_v33 = vrot.slane %v9113_v31, 1  ;;  %v3681_v2 = vrot.slane %v9113_v31, 2  ;;  %v3682_v56 = vrot.slane %v9113_v31, 3 }
 0xe55   :  { %v3827_v37 = vpop.f32.mrf.mxu3 }
 0xe56   :  { %v3875_v58 = vmul.f32 %v3827_v37, %v8957_v38  ;;  %v3703_v36 = vmul.f32 %v5758_v54, %v3687_v6  ;;  %v3688_v41 = vperm.slane %v3680_v33, 0  ;;  %v3689_v60 = vperm.slane %v3681_v2, 0 }
 0xe57   :  { %v9122_v62 = vpop.xlane.xlu0 %3949  ;;  %v3704_v15 = vmul.f32 %v5760_v53, %v3687_v6  ;;  %v9142_v21 = vperm.slane %v3682_v56, 0  ;;  %v3534_v2 = vand.u32 65535, %v9092_v20 }
 0xe58   :  { %3891 = vadd.xlane.f32.xlu2 %v3875_v58  ;;  %v3719_v52 = vsel %vm10278_vm9, %v3703_v36, 0.0  ;;  %v3706_v17 = vmul.f32 %v5759_v42, %v3688_v41  ;;  %v3705_v1 = vmul.f32 %v5761_v7, %v3688_v41  ;;  %v3707_v28 = vmul.f32 %v5762_v61, %v3689_v60  ;;  %vm10286_vm9 = vmmov %vm10282_vm1 }
 0xe59   :  { %v3677_v26 = vpop.f32.mrf.mxu2  ;;  %3720 = vadd.xlane.f32.xlu0 %v3719_v52  ;;  %v3722_v18 = vsel %vm10280_vm11, %v3704_v15, 0.0  ;;  %v3709_v16 = vmul.f32 %v5763_v45, %v9142_v21  ;;  %v3708_v32 = vmul.f32 %v5764_v49, %v3689_v60  ;;  %vm10288_vm11 = vmmov %vm10282_vm1 }
 0xe5a   :  { %v3728_v34 = vsel %vm10279_vm8, %v3706_v17, 0.0  ;;  %v3725_v19 = vsel %vm10281_vm13, %v3705_v1, 0.0  ;;  %v3731_v43 = vsel %vm10282_vm1, %v3707_v28, 0.0  ;;  %v3536_v26 = vcvt.s32.f32 %v3534_v2  ;;  %vm10287_vm8 = vmmov %vm10282_vm1 }
 0xe5b   :  { %3729 = vadd.xlane.f32.xlu1 %v3728_v34  ;;  %v3737_v33 = vsel %vm10283_vm3, %v3709_v16, 0.0  ;;  %v3734_v37 = vsel %vm10284_vm10, %v3708_v32, 0.0  ;;  %vm10289_vm13 = vmmov %vm10282_vm1 }
 0xe5c   :  { %vm10290_vm3 = vmmov %vm10282_vm1 }
 0xe5d   :  { %v3830_v47 = vpop.f32.mrf.mxu3  ;;  %vm10291_vm10 = vmmov %vm10282_vm1 }
 0xe5e   :  { %v3876_v36 = vmul.f32 %v3830_v47, %v8962_v30  ;;  %v3940_v47 = vpop.xlane.xlu2 %3939 }
 0xe5f   :  { %v9139_v4 = vpop.xlane.xlu0 %3957 }
 0xe60   :  { %3723 = vadd.xlane.f32.xlu2 %v3722_v18 }
 0xe61   :  { %3726 = vadd.xlane.f32.xlu0 %v3725_v19 }
 0xe63   :  { %3732 = vadd.xlane.f32.xlu1 %v3731_v43 }
 0xe65   :  { %v3833_v50 = vpop.f32.mrf.mxu3 }
 0xe66   :  { %v3877_v54 = vmul.f32 %v3833_v50, %v8991_v27  ;;  %v9172_v28 = vpop.xlane.xlu2 %3943 }
 0xe67   :  { %v9153_v6 = vpop.xlane.xlu0 %3959 }
 0xe68   :  { %3738 = vadd.xlane.f32.xlu2 %v3737_v33 }
 0xe69   :  { %3735 = vadd.xlane.f32.xlu0 %v3734_v37 }
 0xe6d   :  { %v3836_v58 = vpop.f32.mrf.mxu3 }
 0xe6e   :  { %v3878_v42 = vmul.f32 %v3836_v58, %v8986_v39  ;;  %v9175_v43 = vpop.xlane.xlu2 %3947 }
 0xe6f   :  { %v9159_v41 = vpop.xlane.xlu0 %3969 }
 0xe70   :  { %3895 = vadd.xlane.f32.xlu2 %v3877_v54 }
 0xe71   :  { %3893 = vadd.xlane.f32.xlu0 %v3876_v36 }
 0xe75   :  { %v3839_v52 = vpop.f32.mrf.mxu3 }
 0xe76   :  { %v3879_v53 = vmul.f32 %v3839_v52, %v9017_v8  ;;  %v9179_v50 = vpop.xlane.xlu2 %3951  ;;  %v5765_v52 = vld [vmem:[%s9632_s8 + $0x38] sm:$0xff] }
 0xe79   :  { %3897 = vadd.xlane.f32.xlu0 %v3878_v42  ;;  %v9163_v17 = vpop.xlane.xlu0 %3538  ;;  %v3710_v42 = vmul.f32 %v5765_v52, %v9142_v21 }
 0xe7a   :  { %vm3540_vm4 = vcmp.eq.f32.partialorder %v9096_v35, %v9163_v17 }
 0xe7b   :  { %v3541_v34 = vsel %vm3540_vm4, %v3536_v26, inf  ;;  %v3684_v26 = vrot.slane %v9113_v31, 5  ;;  %vm10292_vm4 = vmmov %vm10282_vm1 }
 0xe7c   :  { %3542 = vmin.xlane.f32.xlu2 %v3541_v34  ;;  %v3683_v34 = vrot.slane %v9113_v31, 4 }
 0xe7d   :  { %v3842_v60 = vpop.f32.mrf.mxu3 }
 0xe7e   :  { %v3880_v15 = vmul.f32 %v3842_v60, %v9012_v24  ;;  %v9182_v58 = vpop.xlane.xlu2 %3961 }
 0xe81   :  { %3899 = vadd.xlane.f32.xlu0 %v3879_v53 }
 0xe84   :  { %3901 = vadd.xlane.f32.xlu2 %v3880_v15  ;;  %v3740_v15 = vsel %vm10285_vm15, %v3710_v42, 0.0  ;;  %v5769_v42 = vld [vmem:[%s9632_s8 + $0x68] sm:$0xff] }
 0xe85   :  { %v3845_v20 = vpop.f32.mrf.mxu3 }
 0xe86   :  { %v3881_v56 = vmul.f32 %v3845_v20, %v9042_v25  ;;  %v9185_v2 = vpop.xlane.xlu2 %3963  ;;  %v3692_v20 = vperm.slane %v3684_v26, 0 }
 0xe8c   :  { %3903 = vadd.xlane.f32.xlu2 %v3881_v56  ;;  %v3691_v56 = vperm.slane %v3683_v34, 0 }
 0xe8d   :  { %v3848_v7 = vpop.f32.mrf.mxu3 }
 0xe8e   :  { %v3882_v1 = vmul.f32 %v3848_v7, %v8978_v3  ;;  %v3971_v7 = vmul.f32 2e-05, %v3940_v47 }
 0xe90   :  { %3905 = vadd.xlane.f32.xlu1 %v3882_v1 }
 0xe95   :  { %v3851_v61 = vpop.f32.mrf.mxu3 }
 0xe96   :  { %v3883_v35 = vmul.f32 %v3851_v61, %v8998_v22  ;;  %v5766_v61 = vld [vmem:[%s9632_s8 + $0x50] sm:$0xff] }
 0xe97   :  { %v3713_v21 = vmul.f32 %v5766_v61, %v3692_v20  ;;  %v9225_v61 = vpop.xlane.xlu1 %3953 }
 0xe98   :  { %3907 = vadd.xlane.f32.xlu1 %v3883_v35  ;;  %v3685_v35 = vrot.slane %v9113_v31, 6 }
 0xe99   :  { %v3749_v47 = vsel %vm10286_vm9, %v3713_v21, 0.0 }
 0xe9d   :  { %v3854_v18 = vpop.f32.mrf.mxu3 }
 0xe9e   :  { %v3884_v19 = vmul.f32 %v3854_v18, %v9037_v29 }
 0xea0   :  { %3909 = vadd.xlane.f32.xlu0 %v3884_v19 }
 0xea5   :  { %v3857_v45 = vpop.f32.mrf.mxu3 }
 0xea6   :  { %v3885_v16 = vmul.f32 %v3857_v45, %v9062_v46  ;;  %v5767_v45 = vld [vmem:[%s9632_s8 + $0x40] sm:$0xff] }
 0xea8   :  { %3911 = vadd.xlane.f32.xlu0 %v3885_v16  ;;  %v3711_v16 = vmul.f32 %v5767_v45, %v3691_v56 }
 0xead   :  { %v3860_v49 = vpop.f32.mrf.mxu3 }
 0xeae   :  { %v3886_v32 = vmul.f32 %v3860_v49, %v9067_v55 }
 0xeb0   :  { %3913 = vadd.xlane.f32.xlu2 %v3886_v32 }
 0xeb5   :  { %v3863_v33 = vpop.f32.mrf.mxu3 }
 0xeb6   :  { %v3887_v37 = vmul.f32 %v3863_v33, %v9082_v57  ;;  %v3693_v33 = vperm.slane %v3685_v35, 0 }
 0xeb8   :  { %3915 = vadd.xlane.f32.xlu2 %v3887_v37  ;;  %v3743_v37 = vsel %vm10287_vm8, %v3711_v16, 0.0  ;;  %v3716_v26 = vmul.f32 %v5769_v42, %v3693_v33  ;;  %v5772_v16 = vld [vmem:[%s9632_s8 + $0x70] sm:$0xff]  ;;  %v3972_v42 = vmul.f32 2e-05, %v9107_v48 }
 0xebd   :  { %v3866_v54 = vpop.f32.mrf.mxu3 }
 0xebe   :  { %v3888_v36 = vmul.f32 %v3866_v54, %v9023_v23 }
 0xec0   :  { %3917 = vadd.xlane.f32.xlu1 %v3888_v36  ;;  %v5768_v36 = vld [vmem:[%s9632_s8 + $0x48] sm:$0xff] }
 0xec1   :  { %v3712_v52 = vmul.f32 %v5768_v36, %v3691_v56  ;;  %v3758_v56 = vsel %vm10289_vm13, %v3716_v26, 0.0  ;;  %v3973_v36 = vmul.f32 2e-05, %v9172_v28 }
 0xec5   :  { %v3869_v60 = vpop.f32.mrf.mxu3 }
 0xec6   :  { %v3889_v53 = vmul.f32 %v3869_v60, %v9049_v14  ;;  %v5770_v60 = vld [vmem:[%s9632_s8 + $0x58] sm:$0xff] }
 0xec8   :  { %3741 = vadd.xlane.f32.xlu1 %v3740_v15  ;;  %3919 = vadd.xlane.f32.xlu0 %v3889_v53  ;;  %v3714_v53 = vmul.f32 %v5770_v60, %v3692_v20  ;;  %v3686_v15 = vrot.slane %v9113_v31, 7  ;;  %v5771_v31 = vld [vmem:[%s9632_s8 + $0x60] sm:$0xff]  ;;  %v5773_v60 = vld [vmem:[%s9632_s8 + $0x78] sm:$0xff] }
 0xec9   :  { %v3715_v20 = vmul.f32 %v5771_v31, %v3693_v33 }
 0xeca   :  { %v3752_v21 = vsel %vm10282_vm1, %v3714_v53, 0.0  ;;  %v3694_v35 = vperm.slane %v3686_v15, 0 }
 0xecb   :  { %v3892_v1 = vpop.xlane.xlu2 %3891 }
 0xecc   :  { %v3987_v18 = vadd.f32 %v3971_v7, %v3892_v1  ;;  %v9199_v19 = vpop.xlane.xlu0 %3720  ;;  %v3746_v1 = vsel %vm10288_vm11, %v3712_v52, 0.0  ;;  %v9242_v52 = vpop.xlane.xlu1 %3955  ;;  %v3718_v53 = vmul.f32 %v5773_v60, %v3694_v35 }
 0xecd   :  { %v3872_v49 = vpop.f32.mrf.mxu3 }
 0xece   :  { %v3890_v32 = vmul.f32 %v3872_v49, %v9077_v10  ;;  %v9221_v7 = vadd.f32 1.024e-07, %v3987_v18  ;;  %v3717_v49 = vmul.f32 %v5772_v16, %v3694_v35  ;;  %v3764_v28 = vsel %vm10292_vm4, %v3718_v53, 0.0 }
 0xecf   :  { %v3974_v16 = vmul.f32 2e-05, %v9110_v51 }
 0xed0   :  { %3921 = vadd.xlane.f32.xlu2 %v3890_v32  ;;  %3750 = vadd.xlane.f32.xlu1 %v3749_v47  ;;  %5606 = vrsqrt.f32 %v9221_v7  ;;  %v3755_v47 = vsel %vm10290_vm3, %v3715_v20, 0.0  ;;  %vm4041_vm9 = vweird.f32 %v9221_v7 }
 0xed1   :  { %3744 = vadd.xlane.f32.xlu0 %v3743_v37  ;;  %v3761_v37 = vsel %vm10291_vm10, %v3717_v49, 0.0 }
 0xed3   :  { %v9207_v54 = vpop.xlane.xlu2 %3723 }
 0xed4   :  { %v9215_v34 = vpop.xlane.xlu0 %3726  ;;  %v9257_v49 = vpop.xlane.xlu1 %3965 }
 0xed6   :  { %v5607_v32 = vpop.eup %5606 }
 0xed7   :  { %v4036_v33 = vmul.f32 %v5607_v32, %v9221_v7  ;;  %vm4042_vm15 = vweird.f32 %v5607_v32 }
 0xed8   :  { %3747 = vadd.xlane.f32.xlu2 %v3746_v1  ;;  %3759 = vadd.xlane.f32.xlu1 %v3758_v56  ;;  %vm4043_vm8 = vmor %vm4041_vm9, %vm4042_vm15 }
 0xed9   :  { %3753 = vadd.xlane.f32.xlu0 %v3752_v21  ;;  %v4037_v21 = vmul.f32 %v5607_v32, %v4036_v33 }
 0xedb   :  { %v9229_v45 = vpop.xlane.xlu2 %3738  ;;  %v4038_v48 = vmul.f32 0.5, %v4037_v21 }
 0xedc   :  { %v9234_v18 = vpop.xlane.xlu0 %3735 }
 0xee0   :  { %3756 = vadd.xlane.f32.xlu2 %v3755_v47 }
 0xee1   :  { %3762 = vadd.xlane.f32.xlu0 %v3761_v37 }
 0xee3   :  { %v3896_v26 = vpop.xlane.xlu2 %3895 }
 0xee4   :  { %v3989_v15 = vadd.f32 %v3973_v36, %v3896_v26  ;;  %v3894_v1 = vpop.xlane.xlu0 %3893  ;;  %v4039_v36 = vsub.f32 1.5, %v4038_v48 }
 0xee5   :  { %v3988_v56 = vadd.f32 %v3972_v42, %v3894_v1 }
 0xee6   :  { %v9249_v31 = vadd.f32 1.024e-07, %v3989_v15  ;;  %v4040_v1 = vmul.f32 %v5607_v32, %v4039_v36  ;;  %v3976_v36 = vmul.f32 2e-05, %v9122_v62 }
 0xee7   :  { %v9251_v20 = vadd.f32 1.024e-07, %v3988_v56  ;;  %v3975_v56 = vmul.f32 2e-05, %v9175_v43 }
 0xee8   :  { %5608 = vrsqrt.f32 %v9249_v31  ;;  %3765 = vadd.xlane.f32.xlu2 %v3764_v28  ;;  %vm4061_vm10 = vweird.f32 %v9249_v31 }
 0xee9   :  { %5610 = vrsqrt.f32 %v9251_v20  ;;  %vm4051_vm13 = vweird.f32 %v9251_v20 }
 0xeec   :  { %v3898_v35 = vpop.xlane.xlu0 %3897 }
 0xeed   :  { %v3990_v47 = vadd.f32 %v3974_v16, %v3898_v35  ;;  %v9268_v35 = vpop.xlane.xlu1 %3967 }
 0xeee   :  { %v5609_v37 = vpop.eup %5608 }
 0xeef   :  { %v5611_v33 = vpop.eup %5610  ;;  %v4056_v42 = vmul.f32 %v5609_v37, %v9249_v31  ;;  %v9260_v26 = vadd.f32 1.024e-07, %v3990_v47  ;;  %v9262_v60 = vpop.xlane.xlu2 %3542  ;;  %v4044_v47 = vsel %vm4043_vm8, %v5607_v32, %v4040_v1  ;;  %vm4062_vm3 = vweird.f32 %v5609_v37 }
 0xef0   :  { %10293 = vst [vmem:[#allocation5_spill] sm:$0xff] %v9262_v60  ;;  %v4046_v53 = vmul.f32 %v5611_v33, %v9251_v20  ;;  %vm4052_vm11 = vweird.f32 %v5611_v33  ;;  %vm4063_vm4 = vmor %vm4061_vm10, %vm4062_vm3 }
 0xef1   :  { %v4057_v15 = vmul.f32 %v5609_v37, %v4056_v42  ;;  %5612 = vrsqrt.f32 %v9260_v26  ;;  %vm4053_vm1 = vmor %vm4051_vm13, %vm4052_vm11  ;;  %vm4071_vm9 = vweird.f32 %v9260_v26 }
 0xef2   :  { %v4047_v51 = vmul.f32 %v5611_v33, %v4046_v53  ;;  %v4019_v53 = vand.u32 2147483647, %v9199_v19 }
 0xef3   :  { %v4058_v21 = vmul.f32 0.5, %v4057_v15 }
 0xef4   :  { %v4048_v28 = vmul.f32 0.5, %v4047_v51  ;;  %v3900_v48 = vpop.xlane.xlu0 %3899 }
 0xef5   :  { %v3991_v16 = vadd.f32 %v3975_v56, %v3900_v48  ;;  %v4059_v44 = vsub.f32 1.5, %v4058_v21  ;;  %v4195_v56 = vmul.f32 %v4044_v47, %v4019_v53  ;;  %v4020_v48 = vand.u32 2147483647, %v9207_v54  ;;  %v10294_v47 = vld [vmem:[#allocation73_spill] sm:$0xff]  ;;  %v3730_v54 = vpop.xlane.xlu1 %3729 }
 0xef6   :  { %v4049_v40 = vsub.f32 1.5, %v4048_v28 }
 0xef7   :  { %v5613_v42 = vpop.eup %5612  ;;  %v9272_v13 = vadd.f32 1.024e-07, %v3991_v16  ;;  %v3902_v43 = vpop.xlane.xlu2 %3901  ;;  %v4060_v1 = vmul.f32 %v5609_v37, %v4059_v44  ;;  %v4227_v16 = vperm.slane %v4195_v56, %v10276_v12  ;;  %v4022_v56 = vand.u32 2147483647, %v3730_v54 }
 0xef8   :  { %v4050_v15 = vmul.f32 %v5611_v33, %v4049_v40  ;;  %v4066_v51 = vmul.f32 %v5613_v42, %v9260_v26  ;;  %v3992_v32 = vadd.f32 %v3976_v36, %v3902_v43  ;;  %vm4072_vm15 = vweird.f32 %v5613_v42 }
 0xef9   :  { %5614 = vrsqrt.f32 %v9272_v13  ;;  %v4064_v63 = vsel %vm4063_vm4, %v5609_v37, %v4060_v1  ;;  %vm4073_vm8 = vmor %vm4071_vm9, %vm4072_vm15  ;;  %vm4081_vm13 = vweird.f32 %v9272_v13 }
 0xefa   :  { %v4054_v62 = vsel %vm4053_vm1, %v5611_v33, %v4050_v15  ;;  %v4067_v21 = vmul.f32 %v5613_v42, %v4066_v51  ;;  %v9278_v28 = vadd.f32 1.024e-07, %v3992_v32  ;;  %v4021_v33 = vand.u32 2147483647, %v9215_v34 }
 0xefb   :  { %v4196_v19 = vmul.f32 %v4054_v62, %v4020_v48 }
 0xefc   :  { %v4068_v40 = vmul.f32 0.5, %v4067_v21  ;;  %5616 = vrsqrt.f32 %v9278_v28  ;;  %v4197_v48 = vmul.f32 %v4064_v63, %v4021_v33  ;;  %vm4091_vm10 = vweird.f32 %v9278_v28 }
 0xefd   :  { %v4228_v53 = vperm.slane %v4196_v19, %v10294_v47  ;;  %v3733_v59 = vpop.xlane.xlu1 %3732 }
 0xefe   :  { %v4069_v36 = vsub.f32 1.5, %v4068_v40  ;;  %v4230_v40 = vperm.slane %v4197_v48, %v10276_v12  ;;  %v4024_v48 = vand.u32 2147483647, %v9234_v18  ;;  %v3978_v18 = vmul.f32 2e-05, %v9225_v61 }
 0xeff   :  { %v5615_v44 = vpop.eup %5614  ;;  %v4229_v43 = vsel %vm1234_vm5, %v4228_v53, %v4227_v16  ;;  %v3980_v61 = vmul.f32 2e-05, %v9139_v4 }
 0xf00   :  { %v4070_v15 = vmul.f32 %v5613_v42, %v4069_v36  ;;  %v4076_v51 = vmul.f32 %v5615_v44, %v9272_v13  ;;  %vm4082_vm11 = vweird.f32 %v5615_v44 }
 0xf01   :  { %vm4083_vm1 = vmor %vm4081_vm13, %vm4082_vm11 }
 0xf02   :  { %v4074_v32 = vsel %vm4073_vm8, %v5613_v42, %v4070_v15  ;;  %v4077_v62 = vmul.f32 %v5615_v44, %v4076_v51  ;;  %v5617_v21 = vpop.eup %5616  ;;  %v4023_v51 = vand.u32 2147483647, %v3733_v59 }
 0xf03   :  { %v4198_v19 = vmul.f32 %v4074_v32, %v4022_v56  ;;  %v4086_v1 = vmul.f32 %v5617_v21, %v9278_v28  ;;  %vm4092_vm3 = vweird.f32 %v5617_v21 }
 0xf04   :  { %v4078_v37 = vmul.f32 0.5, %v4077_v62  ;;  %vm4093_vm4 = vmor %vm4091_vm10, %vm4092_vm3 }
 0xf05   :  { %v4231_v34 = vperm.slane %v4198_v19, %v10294_v47  ;;  %v4087_v53 = vmul.f32 %v5617_v21, %v4086_v1 }
 0xf06   :  { %v4079_v16 = vsub.f32 1.5, %v4078_v37 }
 0xf07   :  { %v4232_v36 = vsel %vm1234_vm5, %v4231_v34, %v4230_v40  ;;  %v4088_v63 = vmul.f32 0.5, %v4087_v53  ;;  %v3904_v40 = vpop.xlane.xlu2 %3903 }
 0xf08   :  { %v4080_v54 = vmul.f32 %v5615_v44, %v4079_v16  ;;  %v4251_v42 = vsel %vm1257_vm6, %v4232_v36, %v4229_v43  ;;  %v3977_v43 = vmul.f32 2e-05, %v9179_v50  ;;  %v3906_v16 = vpop.xlane.xlu1 %3905 }
 0xf09   :  { %v4089_v15 = vsub.f32 1.5, %v4088_v63 }
 0xf0a   :  { %v4084_v33 = vsel %vm4083_vm1, %v5615_v44, %v4080_v54  ;;  %v3993_v34 = vadd.f32 %v3977_v43, %v3904_v40  ;;  %v3982_v43 = vmul.f32 2e-05, %v9182_v58 }
 0xf0b   :  { %v4090_v56 = vmul.f32 %v5617_v21, %v4089_v15  ;;  %v4199_v32 = vmul.f32 %v4084_v33, %v4023_v51  ;;  %v3979_v51 = vmul.f32 2e-05, %v9242_v52 }
 0xf0c   :  { %v9304_v53 = vadd.f32 1.024e-07, %v3993_v34 }
 0xf0d   :  { %v4094_v62 = vsel %vm4093_vm4, %v5617_v21, %v4090_v56  ;;  %v4233_v37 = vperm.slane %v4199_v32, %v10276_v12  ;;  %v3994_v21 = vadd.f32 %v3978_v18, %v3906_v16  ;;  %v3983_v16 = vmul.f32 2e-05, %v9185_v2 }
 0xf0e   :  { %v4200_v19 = vmul.f32 %v4094_v62, %v4024_v48  ;;  %5618 = vrsqrt.f32 %v9304_v53  ;;  %vm4101_vm9 = vweird.f32 %v9304_v53 }
 0xf0f   :  { %v9307_v36 = vadd.f32 1.024e-07, %v3994_v21 }
 0xf10   :  { %v4234_v1 = vperm.slane %v4200_v19, %v10294_v47 }
 0xf11   :  { %5620 = vrsqrt.f32 %v9307_v36  ;;  %vm4111_vm13 = vweird.f32 %v9307_v36 }
 0xf12   :  { %v4235_v44 = vsel %vm1234_vm5, %v4234_v1, %v4233_v37  ;;  %v3981_v37 = vmul.f32 2e-05, %v9153_v6 }
 0xf13   :  { %v9301_v59 = vsel %vm1259_vm7, %v4235_v44, %v4251_v42  ;;  %v3910_v50 = vpop.xlane.xlu0 %3909  ;;  %v3908_v42 = vpop.xlane.xlu1 %3907 }
 0xf14   :  { %v5619_v54 = vpop.eup %5618  ;;  %v3995_v32 = vadd.f32 %v3979_v51, %v3908_v42  ;;  %v3996_v62 = vadd.f32 %v3980_v61, %v3910_v50  ;;  %v3984_v50 = vmul.f32 2e-05, %v9257_v49 }
 0xf15   :  { %v4096_v33 = vmul.f32 %v5619_v54, %v9304_v53  ;;  %vm4102_vm15 = vweird.f32 %v5619_v54 }
 0xf16   :  { %v9316_v44 = vadd.f32 1.024e-07, %v3995_v32  ;;  %v9319_v52 = vadd.f32 1.024e-07, %v3996_v62  ;;  %vm4103_vm8 = vmor %vm4101_vm9, %vm4102_vm15 }
 0xf17   :  { %v5621_v15 = vpop.eup %5620  ;;  %v4097_v56 = vmul.f32 %v5619_v54, %v4096_v33 }
 0xf18   :  { %v4106_v48 = vmul.f32 %v5621_v15, %v9307_v36  ;;  %5622 = vrsqrt.f32 %v9316_v44  ;;  %vm4112_vm11 = vweird.f32 %v5621_v15  ;;  %vm4121_vm4 = vweird.f32 %v9316_v44 }
 0xf19   :  { %v4098_v1 = vmul.f32 0.5, %v4097_v56  ;;  %5624 = vrsqrt.f32 %v9319_v52  ;;  %vm4113_vm1 = vmor %vm4111_vm13, %vm4112_vm11 }
 0xf1a   :  { %v4107_v40 = vmul.f32 %v5621_v15, %v4106_v48 }
 0xf1b   :  { %v3912_v19 = vpop.xlane.xlu0 %3911  ;;  %v4099_v21 = vsub.f32 1.5, %v4098_v1  ;;  %v4025_v1 = vand.u32 2147483647, %v9229_v45 }
 0xf1c   :  { %v3997_v4 = vadd.f32 %v3981_v37, %v3912_v19  ;;  %v4108_v42 = vmul.f32 0.5, %v4107_v40  ;;  %v3985_v37 = vmul.f32 2e-05, %v9268_v35 }
 0xf1d   :  { %v4100_v2 = vmul.f32 %v5619_v54, %v4099_v21 }
 0xf1e   :  { %v9324_v6 = vadd.f32 1.024e-07, %v3997_v4  ;;  %v9334_v48 = vpop.eup %5622 }
 0xf1f   :  { %v9337_v32 = vpop.eup %5624  ;;  %v4104_v62 = vsel %vm4103_vm8, %v5619_v54, %v4100_v2  ;;  %v4116_v40 = vmul.f32 %v9334_v48, %v9316_v44  ;;  %vm4122_vm3 = vweird.f32 %v9334_v48  ;;  %vm4131_vm8 = vweird.f32 %v9319_v52 }
 0xf20   :  { %5626 = vrsqrt.f32 %v9324_v6  ;;  %v4126_v54 = vmul.f32 %v9337_v32, %v9319_v52  ;;  %vm4132_vm10 = vweird.f32 %v9337_v32  ;;  %vm4141_vm15 = vweird.f32 %v9324_v6  ;;  %vm9399_vm9 = vmor %vm4121_vm4, %vm4122_vm3 }
 0xf21   :  { %vm9409_vm11 = vmor %vm4131_vm8, %vm4132_vm10 }
 0xf23   :  { %v3914_v63 = vpop.xlane.xlu2 %3913 }
 0xf24   :  { %v3998_v18 = vadd.f32 %v3982_v43, %v3914_v63  ;;  %v4109_v63 = vsub.f32 1.5, %v4108_v42 }
 0xf26   :  { %v9326_v51 = vadd.f32 1.024e-07, %v3998_v18  ;;  %v4110_v19 = vmul.f32 %v5621_v15, %v4109_v63  ;;  %v9348_v21 = vpop.eup %5626  ;;  %v4127_v63 = vmul.f32 %v9337_v32, %v4126_v54 }
 0xf27   :  { %vm4142_vm13 = vweird.f32 %v9348_v21 }
 0xf28   :  { %5628 = vrsqrt.f32 %v9326_v51  ;;  %v4114_v35 = vsel %vm4113_vm1, %v5621_v15, %v4110_v19  ;;  %v3986_v19 = vmul.f32 2e-05, %v9159_v41  ;;  %v4128_v41 = vmul.f32 0.5, %v4127_v63  ;;  %vm9426_vm4 = vmor %vm4141_vm15, %vm4142_vm13 }
 0xf29   :  { %vm4151_vm1 = vweird.f32 %v9326_v51 }
 0xf2b   :  { %v3916_v34 = vpop.xlane.xlu2 %3915 }
 0xf2c   :  { %v3999_v33 = vadd.f32 %v3983_v16, %v3916_v34  ;;  %v4201_v16 = vmul.f32 %v4104_v62, %v4025_v1 }
 0xf2e   :  { %v9328_v56 = vadd.f32 1.024e-07, %v3999_v33  ;;  %v9350_v45 = vpop.eup %5628 }
 0xf2f   :  { %v4146_v15 = vmul.f32 %v9350_v45, %v9326_v51  ;;  %vm4152_vm3 = vweird.f32 %v9350_v45 }
 0xf30   :  { %5630 = vrsqrt.f32 %v9328_v56  ;;  %vm4153_vm15 = vmor %vm4151_vm1, %vm4152_vm3 }
 0xf33   :  { %v3918_v58 = vpop.xlane.xlu1 %3917 }
 0xf34   :  { %v4000_v61 = vadd.f32 %v3984_v50, %v3918_v58  ;;  %v4117_v58 = vmul.f32 %v9334_v48, %v4116_v40 }
 0xf36   :  { %v9332_v49 = vadd.f32 1.024e-07, %v4000_v61  ;;  %v9354_v50 = vpop.eup %5630  ;;  %v4236_v61 = vperm.slane %v4201_v16, %v10276_v12  ;;  %v4118_v16 = vmul.f32 0.5, %v4117_v58 }
 0xf37   :  { %v4156_v1 = vmul.f32 %v9354_v50, %v9328_v56  ;;  %vm4162_vm10 = vweird.f32 %v9354_v50 }
 0xf38   :  { %5632 = vrsqrt.f32 %v9332_v49  ;;  %v4119_v58 = vsub.f32 1.5, %v4118_v16  ;;  %vm4171_vm13 = vweird.f32 %v9332_v49 }
 0xf3b   :  { %v3742_v43 = vpop.xlane.xlu1 %3741  ;;  %v3920_v34 = vpop.xlane.xlu0 %3919 }
 0xf3c   :  { %v4026_v4 = vand.u32 2147483647, %v3742_v43  ;;  %v4001_v18 = vadd.f32 %v3985_v37, %v3920_v34  ;;  %v4136_v37 = vmul.f32 %v9348_v21, %v9324_v6 }
 0xf3e   :  { %v4202_v33 = vmul.f32 %v4114_v35, %v4026_v4  ;;  %v9352_v42 = vadd.f32 1.024e-07, %v4001_v18  ;;  %v9361_v62 = vpop.eup %5632  ;;  %v4147_v35 = vmul.f32 %v9350_v45, %v4146_v15 }
 0xf3f   :  { %v4166_v54 = vmul.f32 %v9361_v62, %v9332_v49  ;;  %vm4172_vm8 = vweird.f32 %v9361_v62 }
 0xf40   :  { %v4237_v2 = vperm.slane %v4202_v33, %v10294_v47  ;;  %5634 = vrsqrt.f32 %v9352_v42  ;;  %v4148_v15 = vmul.f32 0.5, %v4147_v35  ;;  %vm4173_vm1 = vmor %vm4171_vm13, %vm4172_vm8  ;;  %vm10302_vm13 = vcmp.lt.s32.totalorder %v10276_v12, 9 }
 0xf41   :  { %v4167_v63 = vmul.f32 %v9361_v62, %v4166_v54 }
 0xf42   :  { %v4238_v40 = vsel %vm1234_vm5, %v4237_v2, %v4236_v61  ;;  %v4137_v61 = vmul.f32 %v9348_v21, %v4136_v37  ;;  %v4157_v2 = vmul.f32 %v9354_v50, %v4156_v1 }
 0xf43   :  { %v9373_v43 = vsel %vm1261_vm12, %v4238_v40, %v9301_v59  ;;  %v3922_v34 = vpop.xlane.xlu2 %3921  ;;  %v9387_v40 = vpop.xlane.xlu1 %3750  ;;  %v4168_v16 = vmul.f32 0.5, %v4167_v63 }
 0xf44   :  { %v4002_v4 = vadd.f32 %v3986_v19, %v3922_v34  ;;  %v3745_v18 = vpop.xlane.xlu0 %3744  ;;  %v4129_v19 = vsub.f32 1.5, %v4128_v41  ;;  %v4138_v34 = vmul.f32 0.5, %v4137_v61  ;;  %v4158_v0 = vmul.f32 0.5, %v4157_v2 }
 0xf45   :  { %v4149_v41 = vsub.f32 1.5, %v4148_v15  ;;  %v4027_v55 = vand.u32 2147483647, %v3745_v18 }
 0xf46   :  { %v9378_v33 = vpop.eup %5634  ;;  %v9380_v5 = vadd.f32 1.024e-07, %v4002_v4  ;;  %v4120_v4 = vmul.f32 %v9334_v48, %v4119_v58  ;;  %v4130_v11 = vmul.f32 %v9337_v32, %v4129_v19  ;;  %v4139_v35 = vsub.f32 1.5, %v4138_v34 }
 0xf47   :  { %v4176_v59 = vmul.f32 %v9378_v33, %v9352_v42  ;;  %v4159_v2 = vsub.f32 1.5, %v4158_v0  ;;  %v4169_v0 = vsub.f32 1.5, %v4168_v16  ;;  %v4150_v46 = vmul.f32 %v9350_v45, %v4149_v41 }
 0xf48   :  { %5636 = vrsqrt.f32 %v9380_v5  ;;  %v4124_v58 = vsel %vm9399_vm9, %v9334_v48, %v4120_v4  ;;  %v4134_v34 = vsel %vm9409_vm11, %v9337_v32, %v4130_v11  ;;  %v4140_v4 = vmul.f32 %v9348_v21, %v4139_v35 }
 0xf49   :  { %v4177_v1 = vmul.f32 %v9378_v33, %v4176_v59  ;;  %v4160_v61 = vmul.f32 %v9354_v50, %v4159_v2  ;;  %vm4161_vm9 = vweird.f32 %v9328_v56  ;;  %v4029_v35 = vand.u32 2147483647, %v9387_v40 }
 0xf4a   :  { %vm4163_vm11 = vmor %vm4161_vm9, %vm4162_vm10  ;;  %v4144_v40 = vsel %vm9426_vm4, %v9348_v21, %v4140_v4  ;;  %vm4182_vm3 = vweird.f32 %v9378_v33  ;;  %vm4181_vm10 = vweird.f32 %v9352_v42  ;;  %vm4191_vm8 = vweird.f32 %v9380_v5 }
 0xf4b   :  { %v3748_v37 = vpop.xlane.xlu2 %3747  ;;  %v4178_v15 = vmul.f32 0.5, %v4177_v1  ;;  %vm4183_vm9 = vmor %vm4181_vm10, %vm4182_vm3 }
 0xf4c   :  { %v3754_v60 = vpop.xlane.xlu0 %3753  ;;  %v4028_v19 = vand.u32 2147483647, %v3748_v37  ;;  %v3760_v37 = vpop.xlane.xlu1 %3759 }
 0xf4d   :  { %v4030_v1 = vand.u32 2147483647, %v3754_v60  ;;  %v4179_v16 = vsub.f32 1.5, %v4178_v15  ;;  %v4170_v60 = vmul.f32 %v9361_v62, %v4169_v0  ;;  %v4032_v63 = vand.u32 2147483647, %v3760_v37 }
 0xf4e   :  { %v9396_v54 = vpop.eup %5636  ;;  %v4204_v32 = vmul.f32 %v4134_v34, %v4028_v19  ;;  %v4154_v19 = vsel %vm4153_vm15, %v9350_v45, %v4150_v46  ;;  %v4205_v45 = vmul.f32 %v4144_v40, %v4029_v35 }
 0xf4f   :  { %v4186_v59 = vmul.f32 %v9396_v54, %v9380_v5  ;;  %v4206_v0 = vmul.f32 %v4154_v19, %v4030_v1  ;;  %v4180_v46 = vmul.f32 %v9378_v33, %v4179_v16  ;;  %vm4192_vm4 = vweird.f32 %v9396_v54 }
 0xf50   :  { %v4242_v16 = vperm.slane %v4205_v45, %v10276_v12  ;;  %vm4193_vm15 = vmor %vm4191_vm8, %vm4192_vm4 }
 0xf51   :  { %v4187_v48 = vmul.f32 %v9396_v54, %v4186_v59  ;;  %v4203_v59 = vmul.f32 %v4124_v58, %v4027_v55  ;;  %v4174_v58 = vsel %vm4173_vm1, %v9361_v62, %v4170_v60  ;;  %vm10303_vm1 = vcmask 130048  }
 0xf52   :  { %v4208_v4 = vmul.f32 %v4174_v58, %v4032_v63  ;;  %vm10304_vm10 = vmmov %vm10303_vm1 }
 0xf53   :  { %v3757_v18 = vpop.xlane.xlu2 %3756  ;;  %v4188_v41 = vmul.f32 0.5, %v4187_v48  ;;  %v4164_v48 = vsel %vm4163_vm11, %v9354_v50, %v4160_v61  ;;  %v4239_v21 = vperm.slane %v4203_v59, %v10276_v12  ;;  %v4243_v50 = vperm.slane %v4206_v0, %v10294_v47  ;;  %vm10308_vm8 = vmmov %vm10303_vm1 }
 0xf54   :  { %v4031_v2 = vand.u32 2147483647, %v3757_v18  ;;  %v3763_v15 = vpop.xlane.xlu0 %3762  ;;  %v4240_v18 = vperm.slane %v4204_v32, %v10294_v47  ;;  %v4184_v32 = vsel %vm4183_vm9, %v9378_v33, %v4180_v46  ;;  %v4246_v60 = vperm.slane %v4208_v4, %v10294_v47 }
 0xf55   :  { %v4189_v34 = vsub.f32 1.5, %v4188_v41  ;;  %v4033_v37 = vand.u32 2147483647, %v3763_v15  ;;  %v4244_v63 = vsel %vm1234_vm5, %v4243_v50, %v4242_v16  ;;  %vm10301_vm11 = vcmask 1047559  }
 0xf56   :  { %v4207_v55 = vmul.f32 %v4164_v48, %v4031_v2  ;;  %v4241_v61 = vsel %vm1234_vm5, %v4240_v18, %v4239_v21 }
 0xf57   :  { %v4190_v1 = vmul.f32 %v9396_v54, %v4189_v34  ;;  %v4209_v41 = vmul.f32 %v4184_v32, %v4033_v37  ;;  %v4254_v59 = vsel %vm1263_vm14, %v4241_v61, %v9373_v43 }
 0xf58   :  { %v4245_v11 = vperm.slane %v4207_v55, %v10276_v12  ;;  %v4255_v40 = vsel %vm1265_vm0, %v4244_v63, %v4254_v59 }
 0xf59   :  { %v4194_v2 = vsel %vm4193_vm15, %v9396_v54, %v4190_v1  ;;  %v4248_v15 = vperm.slane %v4209_v41, %v10276_v12 }
 0xf5a   :  { %v4247_v33 = vsel %vm1234_vm5, %v4246_v60, %v4245_v11 }
 0xf5b   :  { %v3766_v62 = vpop.xlane.xlu2 %3765  ;;  %v4256_v48 = vsel %vm1267_vm2, %v4247_v33, %v4255_v40  ;;  %v10305_v40 = vld [vmem:[#allocation75_spill] sm:$0xff] }
 0xf5c   :  { %v4034_v35 = vand.u32 2147483647, %v3766_v62 }
 0xf5e   :  { %v4210_v19 = vmul.f32 %v4194_v2, %v4034_v35 }
 0xf60   :  { %v4249_v34 = vperm.slane %v4210_v19, %v10294_v47 }
 0xf62   :  { %v4250_v0 = vsel %vm1234_vm5, %v4249_v34, %v4248_v15 }
 0xf63   :  { %v4257_v54 = vsel %vm10301_vm11, %v4250_v0, %v4256_v48 }
 0xf64   :  { %v9474_v43 = vsel %vm10302_vm13, %v4257_v54, 1e+30  ;;  %v10306_v54 = vld [vmem:[#allocation74_spill] sm:$0xff] }
 0xf65   :  { %v4260_v18 = vsel %vm10303_vm1, %v9474_v43, inf }
 0xf66   :  { %4261 = vmin.xlane.f32.xlu1 %v4260_v18 }
 0xfd9   :  { %v4262_v55 = vpop.xlane.xlu1 %4261 }
 0xfda   :  { %vm4263_vm3 = vcmp.le.f32.partialorder %v9474_v43, %v4262_v55 }
 0xfdb   :  { %v4264_v46 = vsel %vm4263_vm3, %v10276_v12, 16 }
 0xfdc   :  { %v4265_v45 = vsel %vm10304_vm10, %v4264_v46, 2147483647 }
 0xfdd   :  { %v4267_v58 = vshra.s32 %v4265_v45, 16  ;;  %v4266_v21 = vand.u32 65535, %v4265_v45 }
 0xfdf   :  { %v4269_v37 = vcvt.s32.f32 %v4267_v58  ;;  %v4268_v1 = vcvt.s32.f32 %v4266_v21 }
 0xfe1   :  { %4270 = vmin.xlane.f32.xlu0 %v4269_v37 }
0x1054   :  { %v4271_v4 = vpop.xlane.xlu0 %4270 }
0x1055   :  { %vm4272_vm4 = vcmp.eq.f32.partialorder %v4269_v37, %v4271_v4  ;;  %v4277_v61 = vcvt.f32.s32 %v4271_v4  ;;  %v10307_v37 = vmov 0  }
0x1056   :  { %v4273_v50 = vsel %vm4272_vm4, %v4268_v1, inf }
0x1057   :  { %4274 = vmin.xlane.f32.xlu2 %v4273_v50  ;;  %v4278_v32 = vshll.u32 %v4277_v61, 16 }
0x10ca   :  { %v4275_v11 = vpop.xlane.xlu2 %4274 }
0x10cb   :  { %v4276_v62 = vcvt.f32.s32 %v4275_v11 }
0x10cd   :  { %v4279_v16 = vadd.s32 %v4278_v32, %v4276_v62 }
0x10cf   :  { %vm4280_vm9 = vcmp.eq.s32.totalorder %v10276_v12, %v4279_v16 }
0x10d0   :  { %v5192_v41 = vsel %vm4280_vm9, 1.0, %v10269_v9 }
0x10d1   :  { %v4314_v35 = vperm.slane %v5192_v41, 2  ;;  %v4327_v60 = vperm.slane %v5192_v41, 3  ;;  %v4288_v2 = vperm.slane %v5192_v41, 0  ;;  %v4301_v59 = vperm.slane %v5192_v41, 1 }
0x10d2   :  { %v4340_v33 = vperm.slane %v5192_v41, 4  ;;  %v4353_v15 = vperm.slane %v5192_v41, 5  ;;  %v4366_v18 = vperm.slane %v5192_v41, 6  ;;  %v4379_v55 = vperm.slane %v5192_v41, 7 }
0x10d3   :  { %v5461_v63 = vpack.i.bf16 %v4327_v60, %v4314_v35  ;;  %v5455_v19 = vpack.i.bf16 %v4301_v59, %v4288_v2  ;;  %v5487_v48 = vpack.i.bf16 %v4314_v35, %v4301_v59  ;;  %v4283_v50 = vmul.f32 %v5192_v41, %v9474_v43 }
0x10d4   :  { %v5471_v34 = vpack.i.bf16 %v4353_v15, %v4340_v33  ;;  %v5476_v0 = vpack.i.bf16 %v4288_v2, %v4340_v33  ;;  %v5499_v46 = vpack.i.bf16 %v4340_v33, %v4327_v60  ;;  %v5515_v45 = vpack.i.bf16 %v4379_v55, %v4366_v18 }
0x10d5   :  { %5462 = vperm.xlu1 %5460, %v5461_v63   ;;  %5456 = vperm.xlu2 %5454, %v5455_v19   ;;  %v5509_v58 = vpack.i.bf16 %v4366_v18, %v4353_v15  ;;  %v4284_v11 = vsel %vm10308_vm8, %v4283_v50, 0.0 }
0x10d6   :  { %5450 = vperm.xlu0 %5448, %v5455_v19  }
0x10dd   :  { %5472 = vperm.xlu1 %5460, %v5471_v34   ;;  %5467 = vperm.xlu2 %5454, %v5461_v63  }
0x10de   :  { %5486 = vset.pattern.permute.xlu0 %v10305_v40 }
0x10e5   :  { %5482 = vperm.xlu1 %5460, %v5455_v19   ;;  %5477 = vperm.xlu2 %5454, %v5476_v0  }
0x10e6   :  { %5488 = vperm.xlu0 %5486, %v5487_v48  }
0x10ed   :  { %5498 = vset.pattern.permute.xlu1 %v10305_v40  ;;  %5492 = vset.pattern.permute.xlu2 %v10306_v54 }
0x10ee   :  { %5514 = vset.pattern.permute.xlu0 %v10306_v54 }
0x10f5   :  { %5500 = vperm.xlu1 %5498, %v5499_v46   ;;  %5494 = vperm.xlu2 %5492, %v5461_v63  }
0x10f6   :  { %5516 = vperm.xlu0 %5514, %v5515_v45  }
0x10fd   :  { %5510 = vperm.xlu1 %5498, %v5509_v58   ;;  %5505 = vperm.xlu2 %5492, %v5471_v34  }
0x10fe   :  { %5532 = vset.pattern.permute.xlu0 %v10307_v37 }
0x1105   :  { %5522 = vperm.xlu1 %5498, %v5509_v58   ;;  %5520 = vset.pattern.permute.xlu2 %v10305_v40 }
0x110d   :  { %4390 = vperm.xlu1 %5498, %v4379_v55   ;;  %4625 = vperm.xlu2 %5520, %v4379_v55  }
0x1115   :  { %5526 = vset.pattern.permute.xlu2 %v10306_v54  ;;  %5534 = vset.pattern.permute.xlu1 %v10307_v37 }
0x111d   :  { %5528 = vperm.xlu2 %5526, %v5515_v45  }
0x1125   :  { %5533 = vset.pattern.permute.xlu2 %v10307_v37 }
0x112f   :  { %v5457_v21 = vpop.permute.xlu2 %5456 }
0x1130   :  { %v5458_v4 = vunpack.i.l.bf16 %v5457_v21  ;;  %v5459_v61 = vunpack.i.h.bf16 %v5457_v21 }
0x1132   :  { %v4409_v1 = vmul.f32 %v5458_v4, %v9251_v20  ;;  %v4411_v32 = vmul.f32 %v5459_v61, %v9260_v26 }
0x1134   :  { %4444 = vperm.xlu2 %5533, %v4409_v1  }
0x1137   :  { %4285 = vadd.xlane.f32.xlu1 %v4284_v11  ;;  %v5468_v62 = vpop.permute.xlu2 %5467 }
0x1138   :  { %v5469_v33 = vunpack.i.l.bf16 %v5468_v62  ;;  %v5470_v37 = vunpack.i.h.bf16 %v5468_v62 }
0x113a   :  { %v4413_v40 = vmul.f32 %v5469_v33, %v9278_v28  ;;  %v4415_v62 = vmul.f32 %v5470_v37, %v9307_v36 }
0x113c   :  { %4450 = vperm.xlu2 %5533, %v4411_v32  }
0x113f   :  { %v5478_v19 = vpop.permute.xlu2 %5477 }
0x1140   :  { %v5479_v43 = vunpack.i.l.bf16 %v5478_v19 }
0x1142   :  { %v4417_v26 = vmul.f32 %v5479_v43, %v9319_v52 }
0x1147   :  { %v5463_v16 = vpop.permute.xlu1 %5462 }
0x1148   :  { %v5465_v35 = vunpack.i.h.bf16 %v5463_v16  ;;  %v5451_v60 = vpop.permute.xlu0 %5450  ;;  %v5464_v34 = vunpack.i.l.bf16 %v5463_v16 }
0x1149   :  { %v5452_v2 = vunpack.i.l.bf16 %v5451_v60  ;;  %v5453_v63 = vunpack.i.h.bf16 %v5451_v60 }
0x114a   :  { %v4414_v59 = vmul.f32 %v5465_v35, %v9304_v53  ;;  %v5480_v53 = vunpack.i.h.bf16 %v5478_v19  ;;  %v4412_v48 = vmul.f32 %v5464_v34, %v9272_v13 }
0x114b   :  { %v4408_v20 = vmul.f32 %v5452_v2, %v9221_v7  ;;  %v4410_v41 = vmul.f32 %v5453_v63, %v9249_v31 }
0x114c   :  { %4459 = vperm.xlu2 %5533, %v4414_v59   ;;  %v4628_v52 = vmul.f32 %v5480_v53, %v8962_v30 }
0x114d   :  { %4441 = vperm.xlu0 %5532, %v4408_v20  }
0x114f   :  { %v5473_v15 = vpop.permute.xlu1 %5472  ;;  %v5495_v0 = vpop.permute.xlu2 %5494 }
0x1150   :  { %4447 = vperm.xlu1 %5534, %v4410_v41   ;;  %v5474_v7 = vunpack.i.l.bf16 %v5473_v15  ;;  %v5496_v54 = vunpack.i.l.bf16 %v5495_v0 }
0x1152   :  { %v4416_v4 = vmul.f32 %v5474_v7, %v9316_v44  ;;  %v4631_v13 = vmul.f32 %v5496_v54, %v9017_v8  ;;  %v5475_v44 = vunpack.i.h.bf16 %v5473_v15 }
0x1154   :  { %4468 = vperm.xlu2 %5533, %v4417_v26  }
0x1155   :  { %4456 = vperm.xlu0 %5532, %v4413_v40  }
0x1157   :  { %v5483_v18 = vpop.permute.xlu1 %5482  ;;  %v5506_v35 = vpop.permute.xlu2 %5505 }
0x1158   :  { %v5485_v55 = vunpack.i.h.bf16 %v5483_v18  ;;  %v5484_v46 = vunpack.i.l.bf16 %v5483_v18  ;;  %v5489_v31 = vpop.permute.xlu0 %5488  ;;  %4453 = vperm.xlu1 %5534, %v4412_v48   ;;  %v5507_v63 = vunpack.i.l.bf16 %v5506_v35 }
0x1159   :  { %v5491_v45 = vunpack.i.h.bf16 %v5489_v31  ;;  %v5490_v58 = vunpack.i.l.bf16 %v5489_v31 }
0x115a   :  { %v4629_v28 = vmul.f32 %v5485_v55, %v8991_v27  ;;  %v4627_v21 = vmul.f32 %v5484_v46, %v8957_v38  ;;  %v4635_v15 = vmul.f32 %v5507_v63, %v8998_v22 }
0x115b   :  { %v4632_v1 = vmul.f32 %v5491_v45, %v9012_v24  ;;  %v4630_v50 = vmul.f32 %v5490_v58, %v8986_v39  ;;  %v4418_v24 = vmul.f32 %v5475_v44, %v9324_v6  ;;  %v5497_v39 = vunpack.i.h.bf16 %v5495_v0 }
0x115c   :  { %v4643_v61 = vadd.f32 %v4628_v52, %v4627_v21 }
0x115d   :  { %v4657_v11 = vadd.f32 %v4632_v1, %v4631_v13  ;;  %v4650_v32 = vadd.f32 %v4630_v50, %v4629_v28  ;;  %4465 = vperm.xlu0 %5532, %v4416_v4   ;;  %v4633_v53 = vmul.f32 %v5497_v39, %v9042_v25  ;;  %v5508_v25 = vunpack.i.h.bf16 %v5506_v35 }
0x115e   :  { %v4644_v16 = vrot.slane %v4643_v61, 4 }
0x115f   :  { %v4651_v30 = vrot.slane %v4650_v32, 4  ;;  %v4658_v27 = vrot.slane %v4657_v11, 4 }
0x1160   :  { %4462 = vperm.xlu1 %5534, %v4415_v62   ;;  %v4645_v38 = vadd.f32 %v4644_v16, %v4643_v61  ;;  %v3545_v62 = vcvt.f32.s32 %v9163_v17  ;;  %v10309_v16 = vld [vmem:[#allocation90_spill] sm:$0xff]  ;;  %v10311_v17 = vld [vmem:[#allocation5_spill] sm:$0xff] }
0x1161   :  { %v4652_v60 = vadd.f32 %v4651_v30, %v4650_v32  ;;  %v4659_v2 = vadd.f32 %v4658_v27, %v4657_v11  ;;  %v4637_v30 = vmul.f32 %v5508_v25, %v10309_v16  ;;  %v10310_v27 = vld [vmem:[#allocation4_spill] sm:$0xff] }
0x1162   :  { %v4646_v8 = vrot.slane %v4645_v38, 2 }
0x1163   :  { %v4653_v59 = vrot.slane %v4652_v60, 2  ;;  %v4660_v20 = vrot.slane %v4659_v2, 2 }
0x1164   :  { %v4647_v26 = vadd.f32 %v4646_v8, %v4645_v38 }
0x1165   :  { %v4654_v34 = vadd.f32 %v4653_v59, %v4652_v60  ;;  %v4661_v54 = vadd.f32 %v4660_v20, %v4659_v2 }
0x1166   :  { %v4648_v46 = vrot.slane %v4647_v26, 1 }
0x1167   :  { %v5501_v19 = vpop.permute.xlu1 %5500  ;;  %v4626_v36 = vpop.permute.xlu2 %4625  ;;  %v4655_v31 = vrot.slane %v4654_v34, 1  ;;  %v4662_v21 = vrot.slane %v4661_v54, 1 }
0x1168   :  { %v5503_v43 = vunpack.i.h.bf16 %v5501_v19  ;;  %v5502_v41 = vunpack.i.l.bf16 %v5501_v19  ;;  %v5517_v33 = vpop.permute.xlu0 %5516  ;;  %4471 = vperm.xlu1 %5534, %v4418_v24   ;;  %v4642_v0 = vmul.f32 %v4626_v36, %v9077_v10  ;;  %v4649_v13 = vadd.f32 %v4648_v46, %v4647_v26 }
0x1169   :  { %v5519_v40 = vunpack.i.h.bf16 %v5517_v33  ;;  %v5518_v52 = vunpack.i.l.bf16 %v5517_v33  ;;  %v4656_v10 = vadd.f32 %v4655_v31, %v4654_v34  ;;  %v4663_v59 = vadd.f32 %v4662_v21, %v4661_v54 }
0x116a   :  { %v4636_v48 = vmul.f32 %v5503_v43, %v9037_v29  ;;  %v4634_v6 = vmul.f32 %v5502_v41, %v8978_v3  ;;  %v4699_v8 = vpack.c.bf16 %v4649_v13, %v4649_v13  ;;  %v3544_v36 = vcvt.f32.s32 %v10311_v17  ;;  %v10320_v17 = vld [vmem:[#allocation48_spill] sm:$0xff] }
0x116b   :  { %v4641_v7 = vmul.f32 %v5519_v40, %v9049_v14  ;;  %v4639_v11 = vmul.f32 %v5518_v52, %v9082_v57  ;;  %v4700_v39 = vpack.c.bf16 %v4656_v10, %v4656_v10  ;;  %v3546_v57 = vshll.u32 %v3545_v62, 16 }
0x116c   :  { %v4664_v18 = vadd.f32 %v4634_v6, %v4633_v53  ;;  %v4671_v55 = vadd.f32 %v4636_v48, %v4635_v15  ;;  %v4715_v40 = vunpack.c.l.b16 %v4699_v8  ;;  %v4701_v53 = vpack.c.bf16 %v4663_v59, %v4663_v59  ;;  %v10312_v59 = vld [vmem:[#allocation87_spill] sm:$0xff] }
0x116d   :  { %v4692_v45 = vadd.f32 %v4642_v0, %v4641_v7  ;;  %v4716_v0 = vunpack.c.l.b16 %v4700_v39  ;;  %v3547_v52 = vadd.s32 %v3546_v57, %v3544_v36  ;;  %v10315_v57 = vld [vmem:[#allocation37_spill] sm:$0xff] }
0x116e   :  { %v4665_v58 = vrot.slane %v4664_v18, 4  ;;  %v4672_v37 = vrot.slane %v4671_v55, 4  ;;  %v4717_v25 = vunpack.c.l.b16 %v4701_v53  ;;  %v10321_v36 = vld [vmem:[#allocation49_spill] sm:$0xff]  ;;  %v10326_v53 = vld [vmem:[#allocation60_spill] sm:$0xff] }
0x116f   :  { %v4693_v28 = vrot.slane %v4692_v45, 4  ;;  %v5511_v22 = vpop.permute.xlu1 %5510 }
0x1170   :  { %v4666_v29 = vadd.f32 %v4665_v58, %v4664_v18  ;;  %v4673_v4 = vadd.f32 %v4672_v37, %v4671_v55  ;;  %v5513_v3 = vunpack.i.h.bf16 %v5511_v22  ;;  %v5512_v14 = vunpack.i.l.bf16 %v5511_v22 }
0x1171   :  { %v4694_v1 = vadd.f32 %v4693_v28, %v4692_v45  ;;  %v4723_v22 = vsel %vm1257_vm6, %v4716_v0, %v4715_v40  ;;  %v10325_v40 = vld [vmem:[#allocation57_spill] sm:$0xff] }
0x1172   :  { %v4667_v50 = vrot.slane %v4666_v29, 2  ;;  %v4674_v61 = vrot.slane %v4673_v4, 2  ;;  %v4640_v32 = vmul.f32 %v5513_v3, %v9023_v23  ;;  %v4638_v38 = vmul.f32 %v5512_v14, %v10310_v27  ;;  %v5774_v14 = vld [vmem:[%s9633_s9] sm:$0xff] }
0x1173   :  { %v4695_v35 = vrot.slane %v4694_v1, 2  ;;  %vm3548_vm15 = vcmp.ne.s32.totalorder %v3547_v52, %v5774_v14 }
0x1174   :  { %v4668_v60 = vadd.f32 %v4667_v50, %v4666_v29  ;;  %v4675_v44 = vadd.f32 %v4674_v61, %v4673_v4  ;;  %v4685_v2 = vadd.f32 %v4640_v32, %v4639_v11  ;;  %v4678_v24 = vadd.f32 %v4638_v38, %v4637_v30 }
0x1175   :  { %v4696_v43 = vadd.f32 %v4695_v35, %v4694_v1  ;;  %v4724_v50 = vsel %vm1259_vm7, %v4717_v25, %v4723_v22  ;;  %v5190_v27 = vsel %vm3548_vm15, 1.0, %v10269_v9  ;;  %v10314_v9 = vld [vmem:[#allocation36_spill] sm:$0xff] }
0x1176   :  { %v4669_v63 = vrot.slane %v4668_v60, 1  ;;  %v4676_v19 = vrot.slane %v4675_v44, 1  ;;  %v4686_v20 = vrot.slane %v4685_v2, 4  ;;  %v4679_v23 = vrot.slane %v4678_v24, 4 }
0x1177   :  { %v5523_v41 = vpop.permute.xlu1 %5522  ;;  %v5529_v6 = vpop.permute.xlu2 %5528  ;;  %v4697_v46 = vrot.slane %v4696_v43, 1 }
0x1178   :  { %v4670_v33 = vadd.f32 %v4669_v63, %v4668_v60  ;;  %v4687_v26 = vadd.f32 %v4686_v20, %v4685_v2  ;;  %v5525_v34 = vunpack.i.h.bf16 %v5523_v41  ;;  %v4680_v15 = vadd.f32 %v4679_v23, %v4678_v24  ;;  %v10318_v23 = vld [vmem:[#allocation44_spill] sm:$0xff] }
0x1179   :  { %v5524_v48 = vunpack.i.l.bf16 %v5523_v41  ;;  %v4677_v7 = vadd.f32 %v4676_v19, %v4675_v44  ;;  %v5530_v37 = vunpack.i.l.bf16 %v5529_v6  ;;  %v5531_v10 = vunpack.i.h.bf16 %v5529_v6  ;;  %v10319_v41 = vld [vmem:[#allocation45_spill] sm:$0xff] }
0x117a   :  { %v4688_v54 = vrot.slane %v4687_v26, 2  ;;  %v4421_v18 = vmul.f32 %v5525_v34, %v9332_v49  ;;  %v4702_v55 = vpack.c.bf16 %v4670_v33, %v4670_v33  ;;  %v4681_v31 = vrot.slane %v4680_v15, 2  ;;  %v10322_v33 = vld [vmem:[#allocation52_spill] sm:$0xff]  ;;  %v10329_v6 = vld [vmem:[#allocation65_spill] sm:$0xff] }
0x117b   :  { %v4419_v45 = vmul.f32 %v5524_v48, %v9326_v51  ;;  %v4703_v21 = vpack.c.bf16 %v4677_v7, %v4677_v7  ;;  %v4420_v4 = vmul.f32 %v5530_v37, %v9328_v56  ;;  %v4698_v49 = vadd.f32 %v4697_v46, %v4696_v43  ;;  %v10317_v43 = vld [vmem:[#allocation41_spill] sm:$0xff]  ;;  %v10324_v34 = vld [vmem:[#allocation56_spill] sm:$0xff] }
0x117c   :  { %v4689_v58 = vadd.f32 %v4688_v54, %v4687_v26  ;;  %4480 = vperm.xlu1 %5534, %v4421_v18   ;;  %v4682_v28 = vadd.f32 %v4681_v31, %v4680_v15  ;;  %v4718_v3 = vunpack.c.l.b16 %v4702_v55  ;;  %v4422_v16 = vmul.f32 %v5531_v10, %v9352_v42  ;;  %v10323_v26 = vld [vmem:[#allocation53_spill] sm:$0xff]  ;;  %v10328_v48 = vld [vmem:[#allocation64_spill] sm:$0xff] }
0x117d   :  { %4474 = vperm.xlu0 %5532, %v4419_v45   ;;  %4477 = vperm.xlu2 %5533, %v4420_v4   ;;  %v4719_v61 = vunpack.c.l.b16 %v4703_v21  ;;  %v4706_v62 = vpack.c.bf16 %v4698_v49, %v4698_v49  ;;  %v10313_v24 = vmax.f32 %v10312_v59, 0.0  ;;  %v10327_v15 = vld [vmem:[#allocation61_spill] sm:$0xff] }
0x117e   :  { %v4690_v29 = vrot.slane %v4689_v58, 1  ;;  %v4683_v13 = vrot.slane %v4682_v28, 1  ;;  %v4725_v32 = vsel %vm1261_vm12, %v4718_v3, %v4724_v50 }
0x117f   :  { %v4391_v30 = vpop.permute.xlu1 %4390  ;;  %v4726_v60 = vsel %vm1263_vm14, %v4719_v61, %v4725_v32  ;;  %v4722_v2 = vunpack.c.l.b16 %v4706_v62  ;;  %v3551_v39 = vmax.f32 %v10313_v24, %v5190_v27 }
0x1180   :  { %v4691_v1 = vadd.f32 %v4690_v29, %v4689_v58  ;;  %v4684_v51 = vadd.f32 %v4683_v13, %v4682_v28  ;;  %v4423_v44 = vmul.f32 %v4391_v30, %v9380_v5  ;;  %v10316_v5 = vld [vmem:[#allocation40_spill] sm:$0xff] }
0x1181   :  { %v4855_v20 = vsub.f32 1.0, %v3551_v39 }
0x1182   :  { %v4705_v11 = vpack.c.bf16 %v4691_v1, %v4691_v1  ;;  %v4704_v56 = vpack.c.bf16 %v4684_v51, %v4684_v51 }
0x1184   :  { %v4721_v35 = vunpack.c.l.b16 %v4705_v11  ;;  %v4720_v38 = vunpack.c.l.b16 %v4704_v56 }
0x1185   :  { %4483 = vperm.xlu0 %5532, %v4422_v16   ;;  %4486 = vperm.xlu2 %5533, %v4423_v44  }
0x1186   :  { %v4727_v8 = vsel %vm1265_vm0, %v4720_v38, %v4726_v60 }
0x1187   :  { %v4728_v63 = vsel %vm1267_vm2, %v4721_v35, %v4727_v8 }
0x1188   :  { %v4729_v42 = vsel %vm10301_vm11, %v4722_v2, %v4728_v63 }
0x1189   :  { %v4730_v19 = vpack.c.b16 %v4729_v42, %v4729_v42 }
0x118b   :  { %4740 = vmatmul.bf16.vlgmr.msrb.gmra.mxu0 %v4730_v19  ;;  %4753 = vmatmul.bf16.vlgmr.msrb.gmra.mxu1 %v4730_v19 }
0x118c   :  { %4766 = vmatmul.bf16.vlgmr.msra.gmra.mxu2 %v4730_v19  ;;  %4810 = vmatpush.bf16.msrb.mxu0 %v10314_v9 }
0x118d   :  { %4823 = vmatpush.bf16.msrb.mxu1 %v10315_v57  ;;  %4858 = vperm.xlu0 %5532, %v4855_v20  }
0x118e   :  { %v4445_v7 = vpop.permute.xlu2 %4444 }
0x118f   :  { %v4489_v13 = vperm.slane %v4445_v7, %v10294_v47 }
0x1190   :  { %4811 = vmatpush.bf16.msrb.mxu0 %v10316_v5 }
0x1191   :  { %4824 = vmatpush.bf16.msrb.mxu1 %v10317_v43 }
0x1194   :  { %4812 = vmatpush.bf16.msrb.mxu0 %v10318_v23 }
0x1195   :  { %4825 = vmatpush.bf16.msrb.mxu1 %v10319_v41 }
0x1196   :  { %v4451_v18 = vpop.permute.xlu2 %4450 }
0x1197   :  { %v4492_v29 = vperm.slane %v4451_v18, %v10294_v47 }
0x1198   :  { %4813 = vmatpush.bf16.msrb.mxu0 %v10320_v17 }
0x1199   :  { %4826 = vmatpush.bf16.msrb.mxu1 %v10321_v36 }
0x119b   :  { %4779 = vmatmul.bf16.vlgmr.msra.gmra.mxu0 %v4730_v19  ;;  %4792 = vmatmul.bf16.vlgmr.msra.gmra.mxu1 %v4730_v19 }
0x119c   :  { %4805 = vmatmul.bf16.vlgmr.msrb.gmra.mxu2 %v4730_v19  ;;  %4814 = vmatpush.bf16.msrb.mxu0 %v10322_v33 }
0x119d   :  { %4827 = vmatpush.bf16.msrb.mxu1 %v10323_v26 }
0x11a0   :  { %4815 = vmatpush.bf16.msrb.mxu0 %v10324_v34 }
0x11a1   :  { %4828 = vmatpush.bf16.msrb.mxu1 %v10325_v40 }
0x11a4   :  { %4816 = vmatpush.bf16.msrb.mxu0 %v10326_v53 }
0x11a5   :  { %4829 = vmatpush.bf16.msrb.mxu1 %v10327_v15 }
0x11a6   :  { %v4460_v31 = vpop.permute.xlu2 %4459 }
0x11a7   :  { %v4497_v10 = vperm.slane %v4460_v31, %v10276_v12 }
0x11a8   :  { %4817 = vmatpush.bf16.msrb.mxu0 %v10328_v48 }
0x11a9   :  { %4830 = vmatpush.bf16.msrb.mxu1 %v10329_v6 }
0x11aa   :  { %v9557_v0 = vpop.xlane.xlu1 %4285 }
0x11ab   :  { %4818 = vmatmul.bf16.vlgmr.msrb.gmra.mxu0 %v4730_v19 }
0x11ac   :  { %4831 = vmatmul.bf16.vlgmr.msrb.gmra.mxu1 %v4730_v19 }
0x11ae   :  { %v4469_v37 = vpop.permute.xlu2 %4468 }
0x11af   :  { %v4501_v35 = vperm.slane %v4469_v37, %v10294_v47 }
0x11bf   :  { %v4442_v55 = vpop.permute.xlu0 %4441 }
0x11c0   :  { %v4488_v4 = vperm.slane %v4442_v55, %v10276_v12 }
0x11c2   :  { %v4448_v54 = vpop.permute.xlu1 %4447  ;;  %v4490_v50 = vsel %vm1234_vm5, %v4489_v13, %v4488_v4 }
0x11c3   :  { %v4491_v28 = vperm.slane %v4448_v54, %v10276_v12 }
0x11c5   :  { %v4493_v1 = vsel %vm1234_vm5, %v4492_v29, %v4491_v28 }
0x11c6   :  { %v4512_v62 = vsel %vm1257_vm6, %v4493_v1, %v4490_v50  ;;  %vm10330_vm6 = vmmov %vm10301_vm11 }
0x11c7   :  { %v4457_v45 = vpop.permute.xlu0 %4456 }
0x11c8   :  { %v4495_v49 = vperm.slane %v4457_v45, %v10294_v47 }
0x11ca   :  { %v4454_v46 = vpop.permute.xlu1 %4453 }
0x11cb   :  { %v4494_v22 = vperm.slane %v4454_v46, %v10276_v12 }
0x11cd   :  { %v4496_v51 = vsel %vm1234_vm5, %v4495_v49, %v4494_v22 }
0x11ce   :  { %v4513_v16 = vsel %vm1259_vm7, %v4496_v51, %v4512_v62  ;;  %vm10331_vm7 = vmmov %vm10303_vm1  ;;  %v10332_v62 = vld [vmem:[#allocation88_spill] sm:$0xff] }
0x11cf   :  { %v4466_v52 = vpop.permute.xlu0 %4465 }
0x11d0   :  { %v4500_v56 = vperm.slane %v4466_v52, %v10276_v12 }
0x11d2   :  { %v4463_v58 = vpop.permute.xlu1 %4462  ;;  %v4502_v44 = vsel %vm1234_vm5, %v4501_v35, %v4500_v56 }
0x11d3   :  { %v4498_v3 = vperm.slane %v4463_v58, %v10294_v47 }
0x11d5   :  { %v4499_v61 = vsel %vm1234_vm5, %v4498_v3, %v4497_v10 }
0x11d6   :  { %v4514_v27 = vsel %vm1261_vm12, %v4499_v61, %v4513_v16 }
0x11d7   :  { %v4478_v21 = vpop.permute.xlu2 %4477  ;;  %v4515_v59 = vsel %vm1263_vm14, %v4502_v44, %v4514_v27  ;;  %v10335_v27 = vld [vmem:[#allocation6_spill] sm:$0xff] }
0x11d8   :  { %v4506_v2 = vperm.slane %v4478_v21, %v10276_v12 }
0x11da   :  { %v4472_v25 = vpop.permute.xlu1 %4471 }
0x11db   :  { %v4503_v30 = vperm.slane %v4472_v25, %v10276_v12 }
0x11df   :  { %v4487_v8 = vpop.permute.xlu2 %4486 }
0x11e0   :  { %v4510_v42 = vperm.slane %v4487_v8, %v10294_v47 }
0x11ee   :  { %v4481_v32 = vpop.permute.xlu1 %4480 }
0x11ef   :  { %v4475_v14 = vpop.permute.xlu0 %4474  ;;  %v4507_v38 = vperm.slane %v4481_v32, %v10294_v47 }
0x11f0   :  { %v4504_v11 = vperm.slane %v4475_v14, %v10294_v47 }
0x11f1   :  { %v4508_v24 = vsel %vm1234_vm5, %v4507_v38, %v4506_v2  ;;  %v10337_v2 = vld [vmem:[#allocation10_spill] sm:$0xff] }
0x11f2   :  { %v4505_v60 = vsel %vm1234_vm5, %v4504_v11, %v4503_v30  ;;  %v10334_v30 = vld [vmem:[#allocation2_spill] sm:$0xff] }
0x11f3   :  { %v4516_v63 = vsel %vm1265_vm0, %v4505_v60, %v4515_v59  ;;  %v10336_v60 = vld [vmem:[#allocation89_spill] sm:$0xff]  ;;  %v10338_v59 = vld [vmem:[#allocation91_spill] sm:$0xff] }
0x11f4   :  { %v4517_v9 = vsel %vm1267_vm2, %v4508_v24, %v4516_v63 }
0x11f7   :  { %v4484_v39 = vpop.permute.xlu0 %4483 }
0x11f8   :  { %v4509_v19 = vperm.slane %v4484_v39, %v10276_v12 }
0x11fa   :  { %v4511_v20 = vsel %vm1234_vm5, %v4510_v42, %v4509_v19  ;;  %v10339_v19 = vld [vmem:[#allocation14_spill] sm:$0xff] }
0x11fb   :  { %v4518_v57 = vsel %vm10330_vm6, %v4511_v20, %v4517_v9 }
0x11fc   :  { %v4520_v5 = vsel %vm10331_vm7, %v4518_v57, 0.0 }
0x11fd   :  { %4521 = vadd.xlane.f32.xlu1 %v4520_v5 }
0x11ff   :  { %v4859_v29 = vpop.permute.xlu0 %4858 }
0x1208   :  { %v4741_v43 = vpop.f32.mrf.mxu0  ;;  %v4754_v23 = vpop.f32.mrf.mxu1 }
0x120f   :  { %v4767_v41 = vpop.f32.mrf.mxu2 }
0x1210   :  { %v4743_v17 = vpop.f32.mrf.mxu0  ;;  %v4756_v36 = vpop.f32.mrf.mxu1 }
0x1217   :  { %v4769_v33 = vpop.f32.mrf.mxu2 }
0x1218   :  { %v4780_v26 = vpop.f32.mrf.mxu0  ;;  %v4793_v34 = vpop.f32.mrf.mxu1 }
0x121f   :  { %v4806_v47 = vpop.f32.mrf.mxu2 }
0x1220   :  { %v4782_v40 = vpop.f32.mrf.mxu0  ;;  %v4795_v12 = vpop.f32.mrf.mxu1 }
0x1227   :  { %v4808_v53 = vpop.f32.mrf.mxu2 }
0x1228   :  { %v4819_v15 = vpop.f32.mrf.mxu0 }
0x1229   :  { %v4832_v48 = vpop.f32.mrf.mxu1 }
0x1230   :  { %v4821_v6 = vpop.f32.mrf.mxu0 }
0x1231   :  { %v4834_v7 = vpop.f32.mrf.mxu1 }
0x1270   :  { %v4522_v54 = vpop.xlane.xlu1 %4521 }
0x1271   :  { %5638 = vrsqrt.f32 %v4522_v54  ;;  %vm4842_vm12 = vweird.f32 %v4522_v54 }
0x1277   :  { %v5639_v18 = vpop.eup %5638 }
0x1278   :  { %v4837_v55 = vmul.f32 %v5639_v18, %v4522_v54  ;;  %vm4843_vm5 = vweird.f32 %v5639_v18 }
0x1279   :  { %vm4844_vm14 = vmor %vm4842_vm12, %vm4843_vm5 }
0x127a   :  { %v4838_v46 = vmul.f32 %v5639_v18, %v4837_v55 }
0x127c   :  { %v4839_v31 = vmul.f32 0.5, %v4838_v46 }
0x127e   :  { %v4840_v45 = vsub.f32 1.5, %v4839_v31 }
0x1280   :  { %v4841_v58 = vmul.f32 %v5639_v18, %v4840_v45 }
0x1282   :  { %v4845_v37 = vsel %vm4844_vm14, %v5639_v18, %v4841_v58 }
0x1283   :  { %v4846_v52 = vmul.f32 %v4845_v37, %v9557_v0  ;;  %v10333_v0 = vld [vmem:[#allocation86_spill] sm:$0xff] }
0x1285   :  { %v4847_v25 = vmul.f32 %v4846_v52, %v4741_v43  ;;  %v4848_v28 = vmul.f32 %v4846_v52, %v4754_v23  ;;  %v4849_v22 = vmul.f32 %v4846_v52, %v4767_v41  ;;  %v4850_v21 = vmul.f32 %v4846_v52, %v4780_v26 }
0x1286   :  { %v4851_v4 = vmul.f32 %v4846_v52, %v4793_v34  ;;  %v4852_v3 = vmul.f32 %v4846_v52, %v4806_v47  ;;  %v4853_v49 = vmul.f32 %v4846_v52, %v4819_v15  ;;  %v4854_v13 = vmul.f32 %v4846_v52, %v4832_v48 }
0x1287   :  { %v4861_v10 = vmul.f32 %v4859_v29, %v4847_v25  ;;  %v4862_v1 = vmul.f32 %v4859_v29, %v4848_v28  ;;  %v4863_v51 = vmul.f32 %v4859_v29, %v4849_v22  ;;  %v4864_v14 = vmul.f32 %v4859_v29, %v4850_v21 }
0x1288   :  { %v4865_v50 = vmul.f32 %v4859_v29, %v4851_v4  ;;  %v4866_v61 = vmul.f32 %v4859_v29, %v4852_v3  ;;  %v4867_v11 = vmul.f32 %v4859_v29, %v4853_v49  ;;  %v4868_v32 = vmul.f32 %v4859_v29, %v4854_v13 }
0x1289   :  { %v4869_v56 = vadd.f32 %v4861_v10, %v10332_v62  ;;  %v4870_v16 = vadd.f32 %v4862_v1, %v10333_v0  ;;  %v4871_v35 = vadd.f32 %v4863_v51, %v10334_v30  ;;  %v4872_v38 = vadd.f32 %v4864_v14, %v10335_v27 }
0x128a   :  { %v4873_v44 = vadd.f32 %v4865_v50, %v10336_v60  ;;  %v4874_v8 = vadd.f32 %v4866_v61, %v10337_v2  ;;  %v4875_v24 = vadd.f32 %v4867_v11, %v10338_v59  ;;  %v4876_v20 = vadd.f32 %v4868_v32, %v10339_v19 }
0x128b   :  { %v4877_v39 = vmul.f32 1.02, %v4869_v56  ;;  %v4878_v63 = vmul.f32 1.02, %v4870_v16  ;;  %v4879_v42 = vmul.f32 1.02, %v4871_v35 }
0x128c   :  { %v4880_v9 = vmul.f32 1.02, %v4872_v38  ;;  %v4881_v57 = vmul.f32 1.02, %v4873_v44  ;;  %v4882_v5 = vmul.f32 1.02, %v4874_v8 }
0x128d   :  { %4885 = vst [vmem:[%s9634_s10] sm:$0xff] %v4877_v39  ;;  %v4883_v43 = vmul.f32 1.02, %v4875_v24  ;;  %v4884_v23 = vmul.f32 1.02, %v4876_v20 }
0x128e   :  { %4886 = vst [vmem:[%s9634_s10 + $0x8] sm:$0xff] %v4878_v63 }
0x128f   :  { %4887 = vst [vmem:[%s9634_s10 + $0x10] sm:$0xff] %v4879_v42 }
0x1290   :  { %4888 = vst [vmem:[%s9634_s10 + $0x18] sm:$0xff] %v4880_v9 }
0x1291   :  { %4889 = vst [vmem:[%s9634_s10 + $0x20] sm:$0xff] %v4881_v57 }
0x1292   :  { %4890 = vst [vmem:[%s9634_s10 + $0x28] sm:$0xff] %v4882_v5 }
0x1293   :  { %4891 = vst [vmem:[%s9634_s10 + $0x30] sm:$0xff] %v4883_v43 }
0x1294   :  { %4892 = vst [vmem:[%s9634_s10 + $0x38] sm:$0xff] %v4884_v23 }

</bundles_post_ra>
